<compile_context>
chip_gen: v7x
topology: tpu7x:2x2x1
jax: 0.10.0
libtpu: 0.0.40
codegen_flags: <defaults>
</compile_context>

<pallas_src>
import functools
import itertools
import math

import numpy as np
import jax
import jax.numpy as jnp
from jax.experimental import pallas as pl
from jax.experimental.pallas import tpu as pltpu


# -----------------------------------------------------------------------------
# Static configuration (the "opt" of the PyTorch module), small shapes.
# -----------------------------------------------------------------------------
class Cfg:
    seq_size = 8
    ratio_split_num = 3          # seq_ind = 2,4,6  (all <= seq_size)
    num_frames = 3               # scales = [3,2,1]
    K_clusters = 2
    state_dim = 32
    num_bottleneck = 64
    num_class = 10
    subsample_num = 3
    belta = 0.01
    n_objects = 4                # init_input.size(1)
    batch = 2


CFG = Cfg()
SCALES = list(range(CFG.num_frames, 0, -1))          # [3, 2, 1]
MAXS = CFG.num_frames                                # max relation length
FEAT = (CFG.K_clusters + 1) * CFG.state_dim          # new_input feature dim = 96
FEAT_PAD = 128                                       # lane-padded per-frame feature
SF_PAD = MAXS * FEAT_PAD                             # padded fused feature dim = 384
NB = CFG.num_bottleneck                              # 64
NB_PAD = 128                                         # lane-padded bottleneck
C = CFG.num_class                                    # 10
C_PAD = 128                                          # lane-padded class dim


# -----------------------------------------------------------------------------
# Static (host side) relation bookkeeping — identical to the PyTorch __init__.
# -----------------------------------------------------------------------------
def return_relationset(num_frames, num_frames_relation):
    return list(itertools.combinations(range(num_frames), num_frames_relation))


def select_idx(relations_scales, scale, num_frames):
    def is_ap(arr, distance):
        d = np.diff(arr)
        return bool((d == distance).all())

    division = math.floor(num_frames / scale)
    return [i for i, rel in enumerate(relations_scales) if is_ap(rel, division)]


def adjust_scale_train(observe_ratio, scale_max, scales):
    if observe_ratio < scale_max:
        return scales[-min(5, observe_ratio):]
    return scales[: min(5, observe_ratio) + 1]


def adjust_scale_test(num_frames, scale_max, scales):
    if num_frames < scale_max:
        return scales[-num_frames:]
    return scales[: min(5, num_frames) + 1]


RELATIONS_SCALES = []
SUBSAMPLE_SCALES = []
for ratio in range(1, CFG.ratio_split_num + 1):
    seq = int(ratio * 2)
    rs_tmp, ss_tmp = [], []
    for scale in SCALES:
        rel = return_relationset(seq, min(scale, seq))
        rs_tmp.append(rel)
        ss_tmp.append(min(CFG.subsample_num, len(rel)))
    RELATIONS_SCALES.append(rs_tmp)
    SUBSAMPLE_SCALES.append(ss_tmp)


# -----------------------------------------------------------------------------
# Parameter init (deterministic, mimics torch.nn.Linear uniform(-1/sqrt(in), +)).
# fc_fusion_scales[i] = ReLU -> Linear(scale*FEAT, nb) -> ReLU -> Linear(nb, nb)
#                       -> ReLU -> Linear(nb, num_class)
# (The LSTM / classifier / attention sub-modules are never used in forward().)
# -----------------------------------------------------------------------------
def _linear_params(key, fan_in, fan_out):
    kw, kb = jax.random.split(key)
    bound = 1.0 / math.sqrt(fan_in)
    w = jax.random.uniform(kw, (fan_in, fan_out), jnp.float32, -bound, bound)
    b = jax.random.uniform(kb, (1, fan_out), jnp.float32, -bound, bound)
    return w, b


def init_fc_fusion_params(key):
    params = []
    for i, scale in enumerate(SCALES):
        k1, k2, k3, key = jax.random.split(key, 4)
        w1, b1 = _linear_params(k1, scale * FEAT, NB)
        w2, b2 = _linear_params(k2, NB, NB)
        w3, b3 = _linear_params(k3, NB, C)
        params.append(dict(w1=w1, b1=b1, w2=w2, b2=b2, w3=w3, b3=b3))
    return params


def pack_fusion_params(params):
    """Pad/stack the per-scale fc_fusion weights ONCE into lane-aligned slabs.

    w1 rows of frame f are placed at [f*FEAT_PAD : f*FEAT_PAD + FEAT] so they
    match the per-frame 128-lane padded gather.  All padded rows/cols/biases
    are zero, so padded input content and padded lanes contribute exactly 0.
    """
    ns = len(SCALES)
    W1 = np.zeros((ns, SF_PAD, NB_PAD), np.float32)
    B1 = np.zeros((ns, 1, NB_PAD), np.float32)
    W2 = np.zeros((ns, NB_PAD, NB_PAD), np.float32)
    B2 = np.zeros((ns, 1, NB_PAD), np.float32)
    W3 = np.zeros((ns, NB_PAD, C_PAD), np.float32)
    B3 = np.zeros((ns, 1, C_PAD), np.float32)
    for i, scale in enumerate(SCALES):
        w1 = np.asarray(params[i]["w1"])           # (scale*FEAT, NB)
        for f in range(scale):
            W1[i, f * FEAT_PAD:f * FEAT_PAD + FEAT, :NB] = w1[f * FEAT:(f + 1) * FEAT, :]
        B1[i, 0, :NB] = np.asarray(params[i]["b1"])[0]
        W2[i, :NB, :NB] = np.asarray(params[i]["w2"])
        B2[i, 0, :NB] = np.asarray(params[i]["b2"])[0]
        W3[i, :NB, :C] = np.asarray(params[i]["w3"])
        B3[i, 0, :C] = np.asarray(params[i]["b3"])[0]
    return dict(W1=jnp.asarray(W1), B1=jnp.asarray(B1),
                W2=jnp.asarray(W2), B2=jnp.asarray(B2),
                W3=jnp.asarray(W3), B3=jnp.asarray(B3))


# -----------------------------------------------------------------------------
# Static work plan: enumerate every (ratio, scale, relation) work item, group
# them by scale (each group shares one weight set), assign each (item, batch)
# pair a row in one padded activation slab, and build the selection matrix that
# accumulates rows back into (batch*ratio_split) output rows.
# -----------------------------------------------------------------------------
def build_plan(is_test, batch):
    items_by_scale = [[] for _ in SCALES]        # scale_index -> [(ratio_idx, frames)]
    for ratio in range(1, CFG.ratio_split_num + 1):
        seq_ind = int(ratio * 2)
        if is_test:
            new_scales = adjust_scale_test(seq_ind, CFG.num_frames, SCALES)
        else:
            new_scales = adjust_scale_train(seq_ind, CFG.num_frames, SCALES)
        for scale in new_scales:
            si = SCALES.index(scale)
            rels = RELATIONS_SCALES[ratio - 1][si]
            for idx in select_idx(rels, scale, seq_ind):
                # pad relation to MAXS frames; padded frame slots hit zero w1
                # rows so their gathered content is irrelevant.
                frames = list(rels[idx]) + [0] * (MAXS - scale)
                items_by_scale[si].append((ratio - 1, frames))

    group_slices = []
    row_frames, row_batch, sel_entries = [], [], []
    off = 0
    for items in items_by_scale:
        n_real = len(items) * batch
        n_rows = ((n_real + 7) // 8) * 8 if n_real else 0   # sublane-aligned group
        group_slices.append((off, n_rows))
        for li, (ridx, frames) in enumerate(items):
            for b in range(batch):
                sel_entries.append((b * CFG.ratio_split_num + ridx,
                                    off + li * batch + b))
                row_frames.append(frames)
                row_batch.append(b)
        for _ in range(n_rows - n_real):                    # padding rows
            row_frames.append([0] * MAXS)
            row_batch.append(0)
        off += n_rows

    rows_total = off
    out_rows = batch * CFG.ratio_split_num
    out_pad = ((out_rows + 7) // 8) * 8
    sel = np.zeros((out_pad, rows_total), np.float32)
    for r, c in sel_entries:                                # pad rows stay 0
        sel[r, c] = 1.0
    return dict(group_slices=tuple(group_slices),
                row_frames=np.asarray(row_frames, np.int32),
                row_batch=np.asarray(row_batch, np.int32),
                sel=sel, rows_total=rows_total,
                out_rows=out_rows, out_pad=out_pad)


# -----------------------------------------------------------------------------
# Pallas kernel: all fc_fusion work for the whole forward in ONE grid step.
# Per scale group: ReLU -> x@W1+b1 -> ReLU -> @W2+b2 -> ReLU -> @W3+b3 into a
# VMEM scratch; then one selection matmul accumulates relation rows into the
# lane-dense (out_pad, 128) output.
# -----------------------------------------------------------------------------
def _make_fusion_kernel(group_slices):
    def kernel(x_ref, w1_ref, b1_ref, w2_ref, b2_ref, w3_ref, b3_ref,
               sel_ref, o_ref, y_scr):
        for g, (off, rows) in enumerate(group_slices):      # static unroll (<=3)
            if rows == 0:
                continue
            x = jnp.maximum(x_ref[off:off + rows, :], 0.0)               # ReLU(inplace)
            h = jnp.dot(x, w1_ref[g], preferred_element_type=jnp.float32) + b1_ref[g]
            h = jnp.maximum(h, 0.0)
            h = jnp.dot(h, w2_ref[g], preferred_element_type=jnp.float32) + b2_ref[g]
            h = jnp.maximum(h, 0.0)
            y_scr[off:off + rows, :] = (
                jnp.dot(h, w3_ref[g], preferred_element_type=jnp.float32) + b3_ref[g])
        # Accumulate relations per (batch, ratio) row in one small matmul.
        o_ref[...] = jnp.dot(sel_ref[...], y_scr[...],
                             preferred_element_type=jnp.float32)
    return kernel


def fused_fc_fusion(x_slab, sel, packed, group_slices):
    rows_total, sf_pad = x_slab.shape
    out_pad = sel.shape[0]
    ns = len(SCALES)
    kernel = _make_fusion_kernel(group_slices)
    return pl.pallas_call(
        kernel,
        out_shape=jax.ShapeDtypeStruct((out_pad, C_PAD), jnp.float32),
        grid=(1,),
        in_specs=[
            pl.BlockSpec((rows_total, sf_pad), lambda i: (0, 0)),
            pl.BlockSpec((ns, SF_PAD, NB_PAD), lambda i: (0, 0, 0)),
            pl.BlockSpec((ns, 1, NB_PAD), lambda i: (0, 0, 0)),
            pl.BlockSpec((ns, NB_PAD, NB_PAD), lambda i: (0, 0, 0)),
            pl.BlockSpec((ns, 1, NB_PAD), lambda i: (0, 0, 0)),
            pl.BlockSpec((ns, NB_PAD, C_PAD), lambda i: (0, 0, 0)),
            pl.BlockSpec((ns, 1, C_PAD), lambda i: (0, 0, 0)),
            pl.BlockSpec((out_pad, rows_total), lambda i: (0, 0)),
        ],
        out_specs=pl.BlockSpec((out_pad, C_PAD), lambda i: (0, 0)),
        scratch_shapes=[pltpu.VMEM((rows_total, C_PAD), jnp.float32)],
        compiler_params=pltpu.CompilerParams(
            dimension_semantics=("arbitrary",)),
    )(x_slab, packed["W1"], packed["B1"], packed["W2"], packed["B2"],
      packed["W3"], packed["B3"], sel)


# -----------------------------------------------------------------------------
# temporal_variation (glue).  The PyTorch code runs pyclustering k-means++ on
# CPU numpy per-batch; that has no Pallas equivalent, so we use a deterministic
# Lloyd's k-means in plain JAX with first-K-points init, then reproduce the
# soft-assignment (np.linalg.norm(ord=2) == matrix SPECTRAL norm, matching the
# reference) and weighted-variation math exactly.
# TODO(synk): pyclustering kmeans_plusplus_initializer + kmeans replaced by a
#             deterministic Lloyd's k-means (no clean/deterministic Pallas form).
# -----------------------------------------------------------------------------
def _kmeans(X, K, iters=10):
    centers0 = X[:K]

    def step(c, _):
        d = jnp.sum((X[:, None, :] - c[None, :, :]) ** 2, axis=-1)   # (M, K)
        assign = jnp.argmin(d, axis=1)
        onehot = jax.nn.one_hot(assign, K, dtype=X.dtype)            # (M, K)
        counts = onehot.sum(axis=0)                                  # (K,)
        sums = onehot.T @ X                                          # (K, D)
        new_c = jnp.where(counts[:, None] > 0,
                          sums / jnp.maximum(counts[:, None], 1.0), c)
        return new_c, None

    centers, _ = jax.lax.scan(step, centers0, None, length=iters)
    return centers


def temporal_variation(init_input):
    """init_input: (batch*seq_size, n_objects, state_dim) -> (batch, seq, K, state_dim)."""
    seq, K, belta = CFG.seq_size, CFG.K_clusters, CFG.belta
    N, D = init_input.shape[1], init_input.shape[2]
    B = init_input.shape[0] // seq
    X = init_input.reshape(B, seq * N, D)

    def per_batch(x):
        c = _kmeans(x, K)                                            # (K, D)
        # ex[:, i] = -belta * ||X - tile(c_i)||_2^2  (2-D spectral norm, one
        # scalar per cluster, broadcast to every row — same as the reference).
        ex_scalar = jax.vmap(
            lambda ci: -belta * jnp.linalg.norm(x - ci[None, :], ord=2) ** 2)(c)  # (K,)
        w_row = jax.nn.softmax(ex_scalar)
        w = jnp.broadcast_to(w_row[None, :], (seq * N, K)).reshape(seq, N, K)
        xr = x.reshape(seq, N, D)
        # S[s,k,d] = sum_n w[s,n,k] * (x[s,n,d] - c[k,d])
        S = jnp.einsum("snk,snd->skd", w, xr) - jnp.einsum("snk,kd->skd", w, c)
        return S                                                     # (seq, K, D)

    return jax.vmap(per_batch)(X)                                    # (B, seq, K, D)


# -----------------------------------------------------------------------------
# Forward pass (mirrors TemporalRelationGraph.forward).
# -----------------------------------------------------------------------------
def forward(graph_out, init_input, packed_params, is_test=True):
    B = graph_out.shape[0]
    plan = build_plan(is_test, B)                                    # static (trace time)

    bv = temporal_variation(init_input)                              # (B, seq, K, D)
    bv = bv.reshape(B, CFG.seq_size, -1)
    new_input = jnp.concatenate([bv, graph_out], axis=2)             # (B, seq, FEAT)

    # Pad features ONCE to a full 128-lane frame (weights are packed to match).
    new_input_p = jnp.pad(new_input, ((0, 0), (0, 0), (0, FEAT_PAD - FEAT)))

    # One static gather builds the whole activation slab:
    # row -> (batch b, relation frame tuple); padded frame slots and padded
    # rows multiply zero weights / zero selection entries, so they are inert.
    rb = jnp.asarray(plan["row_batch"])                              # (rows_total,)
    rf = jnp.asarray(plan["row_frames"])                             # (rows_total, MAXS)
    gathered = new_input_p[rb[:, None], rf, :]                       # (rows_total, MAXS, 128)
    x_slab = gathered.reshape(plan["rows_total"], MAXS * FEAT_PAD)   # (rows_total, 384)

    out = fused_fc_fusion(x_slab, jnp.asarray(plan["sel"]),
                          packed_params, plan["group_slices"])       # (out_pad, 128)

    # Rows are ordered (b * ratio_split + r), matching result.view(B*ratio, C).
    return out[:plan["out_rows"], :CFG.num_class]


# -----------------------------------------------------------------------------
# Driver
# -----------------------------------------------------------------------------
if __name__ == "__main__":
    key = jax.random.PRNGKey(0)
    k_go, k_ii, _ = jax.random.split(key, 3)

    graph_out = jax.random.normal(
        k_go, (CFG.batch, CFG.seq_size, CFG.state_dim), jnp.float32)
    init_input = jax.random.normal(
        k_ii, (CFG.batch * CFG.seq_size, CFG.n_objects, CFG.state_dim), jnp.float32)

    params = init_fc_fusion_params(jax.random.PRNGKey(42))
    packed = pack_fusion_params(params)                              # pad/stack once

    fwd = jax.jit(functools.partial(forward, packed_params=packed, is_test=True))
    out = fwd(graph_out, init_input)
    out = jax.block_until_ready(out)

    assert out.shape == (CFG.batch * CFG.ratio_split_num, CFG.num_class)
    assert bool(jnp.all(jnp.isfinite(out)))
    print("KERNEL_OK")
</pallas_src>

<mosaic_0001>
module attributes {stable_mosaic.version = 11 : i64} {
  func.func @kernel(%arg0: i32, %arg1: memref<48x384xf32, #tpu.memory_space<vmem>>, %arg2: memref<3x384x128xf32, #tpu.memory_space<vmem>>, %arg3: memref<3x1x128xf32, #tpu.memory_space<vmem>>, %arg4: memref<3x128x128xf32, #tpu.memory_space<vmem>>, %arg5: memref<3x1x128xf32, #tpu.memory_space<vmem>>, %arg6: memref<3x128x128xf32, #tpu.memory_space<vmem>>, %arg7: memref<3x1x128xf32, #tpu.memory_space<vmem>>, %arg8: memref<8x48xf32, #tpu.memory_space<vmem>>, %arg9: memref<8x128xf32, #tpu.memory_space<vmem>>, %arg10: memref<48x128xf32, #tpu.memory_space<vmem>>) attributes {dimension_semantics = [#tpu.dimension_semantics<arbitrary>], iteration_bounds = array<i64: 1>, scalar_prefetch = 0 : i64, scratch_operands = 1 : i64, tpu.core_type = #tpu.core_type<tc>, window_params = [{pipeline_mode = #tpu.pipeline_mode<synchronous>, transform_indices = @transform_0, window_bounds = array<i64: 48, 384>}, {pipeline_mode = #tpu.pipeline_mode<synchronous>, transform_indices = @transform_1, window_bounds = array<i64: 3, 384, 128>}, {pipeline_mode = #tpu.pipeline_mode<synchronous>, transform_indices = @transform_2, window_bounds = array<i64: 3, 1, 128>}, {pipeline_mode = #tpu.pipeline_mode<synchronous>, transform_indices = @transform_3, window_bounds = array<i64: 3, 128, 128>}, {pipeline_mode = #tpu.pipeline_mode<synchronous>, transform_indices = @transform_4, window_bounds = array<i64: 3, 1, 128>}, {pipeline_mode = #tpu.pipeline_mode<synchronous>, transform_indices = @transform_5, window_bounds = array<i64: 3, 128, 128>}, {pipeline_mode = #tpu.pipeline_mode<synchronous>, transform_indices = @transform_6, window_bounds = array<i64: 3, 1, 128>}, {pipeline_mode = #tpu.pipeline_mode<synchronous>, transform_indices = @transform_7, window_bounds = array<i64: 8, 48>}, {pipeline_mode = #tpu.pipeline_mode<synchronous>, transform_indices = @transform_8, window_bounds = array<i64: 8, 128>}]} {
    %c0 = arith.constant 0 : index
    %c0_0 = arith.constant 0 : index
    %0 = vector.load %arg1[%c0, %c0_0] : memref<48x384xf32, #tpu.memory_space<vmem>>, vector<8x384xf32>
    %cst = arith.constant 0.000000e+00 : f32
    %1 = vector.broadcast %cst : f32 to vector<8x384xf32>
    %2 = arith.maximumf %0, %1 : vector<8x384xf32>
    %c0_1 = arith.constant 0 : index
    %c0_2 = arith.constant 0 : index
    %c0_3 = arith.constant 0 : index
    %3 = vector.load %arg2[%c0_1, %c0_2, %c0_3] : memref<3x384x128xf32, #tpu.memory_space<vmem>>, vector<1x384x128xf32>
    %4 = vector.shape_cast %3 : vector<1x384x128xf32> to vector<384x128xf32>
    %cst_4 = arith.constant dense<0.000000e+00> : vector<8x128xf32>
    %5 = tpu.matmul %2, %4, %cst_4 {dimension_numbers = #tpu.dot_dimension_numbers<[1], [0], [0], [1], [0, 0, 1, 1], [], []>} : vector<8x384xf32>, vector<384x128xf32>, vector<8x128xf32> -> vector<8x128xf32>
    %c0_5 = arith.constant 0 : index
    %c0_6 = arith.constant 0 : index
    %c0_7 = arith.constant 0 : index
    %6 = vector.load %arg3[%c0_5, %c0_6, %c0_7] : memref<3x1x128xf32, #tpu.memory_space<vmem>>, vector<1x1x128xf32>
    %7 = vector.shape_cast %6 : vector<1x1x128xf32> to vector<1x128xf32>
    %8 = vector.broadcast %7 : vector<1x128xf32> to vector<8x128xf32>
    %9 = arith.addf %5, %8 : vector<8x128xf32>
    %cst_8 = arith.constant 0.000000e+00 : f32
    %10 = vector.broadcast %cst_8 : f32 to vector<8x128xf32>
    %11 = arith.maximumf %9, %10 : vector<8x128xf32>
    %c0_9 = arith.constant 0 : index
    %c0_10 = arith.constant 0 : index
    %c0_11 = arith.constant 0 : index
    %12 = vector.load %arg4[%c0_9, %c0_10, %c0_11] : memref<3x128x128xf32, #tpu.memory_space<vmem>>, vector<1x128x128xf32>
    %13 = vector.shape_cast %12 : vector<1x128x128xf32> to vector<128x128xf32>
    %cst_12 = arith.constant dense<0.000000e+00> : vector<8x128xf32>
    %14 = tpu.matmul %11, %13, %cst_12 {dimension_numbers = #tpu.dot_dimension_numbers<[1], [0], [0], [1], [0, 0, 1, 1], [], []>} : vector<8x128xf32>, vector<128x128xf32>, vector<8x128xf32> -> vector<8x128xf32>
    %c0_13 = arith.constant 0 : index
    %c0_14 = arith.constant 0 : index
    %c0_15 = arith.constant 0 : index
    %15 = vector.load %arg5[%c0_13, %c0_14, %c0_15] : memref<3x1x128xf32, #tpu.memory_space<vmem>>, vector<1x1x128xf32>
    %16 = vector.shape_cast %15 : vector<1x1x128xf32> to vector<1x128xf32>
    %17 = vector.broadcast %16 : vector<1x128xf32> to vector<8x128xf32>
    %18 = arith.addf %14, %17 : vector<8x128xf32>
    %cst_16 = arith.constant 0.000000e+00 : f32
    %19 = vector.broadcast %cst_16 : f32 to vector<8x128xf32>
    %20 = arith.maximumf %18, %19 : vector<8x128xf32>
    %c0_17 = arith.constant 0 : index
    %c0_18 = arith.constant 0 : index
    %c0_19 = arith.constant 0 : index
    %21 = vector.load %arg6[%c0_17, %c0_18, %c0_19] : memref<3x128x128xf32, #tpu.memory_space<vmem>>, vector<1x128x128xf32>
    %22 = vector.shape_cast %21 : vector<1x128x128xf32> to vector<128x128xf32>
    %cst_20 = arith.constant dense<0.000000e+00> : vector<8x128xf32>
    %23 = tpu.matmul %20, %22, %cst_20 {dimension_numbers = #tpu.dot_dimension_numbers<[1], [0], [0], [1], [0, 0, 1, 1], [], []>} : vector<8x128xf32>, vector<128x128xf32>, vector<8x128xf32> -> vector<8x128xf32>
    %c0_21 = arith.constant 0 : index
    %c0_22 = arith.constant 0 : index
    %c0_23 = arith.constant 0 : index
    %24 = vector.load %arg7[%c0_21, %c0_22, %c0_23] : memref<3x1x128xf32, #tpu.memory_space<vmem>>, vector<1x1x128xf32>
    %25 = vector.shape_cast %24 : vector<1x1x128xf32> to vector<1x128xf32>
    %26 = vector.broadcast %25 : vector<1x128xf32> to vector<8x128xf32>
    %27 = arith.addf %23, %26 : vector<8x128xf32>
    %c0_24 = arith.constant 0 : index
    %c0_25 = arith.constant 0 : index
    %28 = vector.load %arg10[%c0_24, %c0_25] : memref<48x128xf32, #tpu.memory_space<vmem>>, vector<8x128xf32>
    tpu.vector_store %arg10[%c0_24, %c0_25], %27 {strides = array<i32>} : memref<48x128xf32, #tpu.memory_space<vmem>>, vector<8x128xf32>,
    %c8 = arith.constant 8 : index
    %c0_26 = arith.constant 0 : index
    %29 = vector.load %arg1[%c8, %c0_26] : memref<48x384xf32, #tpu.memory_space<vmem>>, vector<16x384xf32>
    %cst_27 = arith.constant 0.000000e+00 : f32
    %30 = vector.broadcast %cst_27 : f32 to vector<16x384xf32>
    %31 = arith.maximumf %29, %30 : vector<16x384xf32>
    %c1 = arith.constant 1 : index
    %c0_28 = arith.constant 0 : index
    %c0_29 = arith.constant 0 : index
    %32 = vector.load %arg2[%c1, %c0_28, %c0_29] : memref<3x384x128xf32, #tpu.memory_space<vmem>>, vector<1x384x128xf32>
    %33 = vector.shape_cast %32 : vector<1x384x128xf32> to vector<384x128xf32>
    %cst_30 = arith.constant dense<0.000000e+00> : vector<16x128xf32>
    %34 = tpu.matmul %31, %33, %cst_30 {dimension_numbers = #tpu.dot_dimension_numbers<[1], [0], [0], [1], [0, 0, 1, 1], [], []>} : vector<16x384xf32>, vector<384x128xf32>, vector<16x128xf32> -> vector<16x128xf32>
    %c1_31 = arith.constant 1 : index
    %c0_32 = arith.constant 0 : index
    %c0_33 = arith.constant 0 : index
    %35 = vector.load %arg3[%c1_31, %c0_32, %c0_33] : memref<3x1x128xf32, #tpu.memory_space<vmem>>, vector<1x1x128xf32>
    %36 = vector.shape_cast %35 : vector<1x1x128xf32> to vector<1x128xf32>
    %37 = vector.broadcast %36 : vector<1x128xf32> to vector<16x128xf32>
    %38 = arith.addf %34, %37 : vector<16x128xf32>
    %cst_34 = arith.constant 0.000000e+00 : f32
    %39 = vector.broadcast %cst_34 : f32 to vector<16x128xf32>
    %40 = arith.maximumf %38, %39 : vector<16x128xf32>
    %c1_35 = arith.constant 1 : index
    %c0_36 = arith.constant 0 : index
    %c0_37 = arith.constant 0 : index
    %41 = vector.load %arg4[%c1_35, %c0_36, %c0_37] : memref<3x128x128xf32, #tpu.memory_space<vmem>>, vector<1x128x128xf32>
    %42 = vector.shape_cast %41 : vector<1x128x128xf32> to vector<128x128xf32>
    %cst_38 = arith.constant dense<0.000000e+00> : vector<16x128xf32>
    %43 = tpu.matmul %40, %42, %cst_38 {dimension_numbers = #tpu.dot_dimension_numbers<[1], [0], [0], [1], [0, 0, 1, 1], [], []>} : vector<16x128xf32>, vector<128x128xf32>, vector<16x128xf32> -> vector<16x128xf32>
    %c1_39 = arith.constant 1 : index
    %c0_40 = arith.constant 0 : index
    %c0_41 = arith.constant 0 : index
    %44 = vector.load %arg5[%c1_39, %c0_40, %c0_41] : memref<3x1x128xf32, #tpu.memory_space<vmem>>, vector<1x1x128xf32>
    %45 = vector.shape_cast %44 : vector<1x1x128xf32> to vector<1x128xf32>
    %46 = vector.broadcast %45 : vector<1x128xf32> to vector<16x128xf32>
    %47 = arith.addf %43, %46 : vector<16x128xf32>
    %cst_42 = arith.constant 0.000000e+00 : f32
    %48 = vector.broadcast %cst_42 : f32 to vector<16x128xf32>
    %49 = arith.maximumf %47, %48 : vector<16x128xf32>
    %c1_43 = arith.constant 1 : index
    %c0_44 = arith.constant 0 : index
    %c0_45 = arith.constant 0 : index
    %50 = vector.load %arg6[%c1_43, %c0_44, %c0_45] : memref<3x128x128xf32, #tpu.memory_space<vmem>>, vector<1x128x128xf32>
    %51 = vector.shape_cast %50 : vector<1x128x128xf32> to vector<128x128xf32>
    %cst_46 = arith.constant dense<0.000000e+00> : vector<16x128xf32>
    %52 = tpu.matmul %49, %51, %cst_46 {dimension_numbers = #tpu.dot_dimension_numbers<[1], [0], [0], [1], [0, 0, 1, 1], [], []>} : vector<16x128xf32>, vector<128x128xf32>, vector<16x128xf32> -> vector<16x128xf32>
    %c1_47 = arith.constant 1 : index
    %c0_48 = arith.constant 0 : index
    %c0_49 = arith.constant 0 : index
    %53 = vector.load %arg7[%c1_47, %c0_48, %c0_49] : memref<3x1x128xf32, #tpu.memory_space<vmem>>, vector<1x1x128xf32>
    %54 = vector.shape_cast %53 : vector<1x1x128xf32> to vector<1x128xf32>
    %55 = vector.broadcast %54 : vector<1x128xf32> to vector<16x128xf32>
    %56 = arith.addf %52, %55 : vector<16x128xf32>
    %c8_50 = arith.constant 8 : index
    %c0_51 = arith.constant 0 : index
    %57 = vector.load %arg10[%c8_50, %c0_51] : memref<48x128xf32, #tpu.memory_space<vmem>>, vector<16x128xf32>
    tpu.vector_store %arg10[%c8_50, %c0_51], %56 {strides = array<i32>} : memref<48x128xf32, #tpu.memory_space<vmem>>, vector<16x128xf32>,
    %c24 = arith.constant 24 : index
    %c0_52 = arith.constant 0 : index
    %58 = vector.load %arg1[%c24, %c0_52] : memref<48x384xf32, #tpu.memory_space<vmem>>, vector<24x384xf32>
    %cst_53 = arith.constant 0.000000e+00 : f32
    %59 = vector.broadcast %cst_53 : f32 to vector<24x384xf32>
    %60 = arith.maximumf %58, %59 : vector<24x384xf32>
    %c2 = arith.constant 2 : index
    %c0_54 = arith.constant 0 : index
    %c0_55 = arith.constant 0 : index
    %61 = vector.load %arg2[%c2, %c0_54, %c0_55] : memref<3x384x128xf32, #tpu.memory_space<vmem>>, vector<1x384x128xf32>
    %62 = vector.shape_cast %61 : vector<1x384x128xf32> to vector<384x128xf32>
    %cst_56 = arith.constant dense<0.000000e+00> : vector<24x128xf32>
    %63 = tpu.matmul %60, %62, %cst_56 {dimension_numbers = #tpu.dot_dimension_numbers<[1], [0], [0], [1], [0, 0, 1, 1], [], []>} : vector<24x384xf32>, vector<384x128xf32>, vector<24x128xf32> -> vector<24x128xf32>
    %c2_57 = arith.constant 2 : index
    %c0_58 = arith.constant 0 : index
    %c0_59 = arith.constant 0 : index
    %64 = vector.load %arg3[%c2_57, %c0_58, %c0_59] : memref<3x1x128xf32, #tpu.memory_space<vmem>>, vector<1x1x128xf32>
    %65 = vector.shape_cast %64 : vector<1x1x128xf32> to vector<1x128xf32>
    %66 = vector.broadcast %65 : vector<1x128xf32> to vector<24x128xf32>
    %67 = arith.addf %63, %66 : vector<24x128xf32>
    %cst_60 = arith.constant 0.000000e+00 : f32
    %68 = vector.broadcast %cst_60 : f32 to vector<24x128xf32>
    %69 = arith.maximumf %67, %68 : vector<24x128xf32>
    %c2_61 = arith.constant 2 : index
    %c0_62 = arith.constant 0 : index
    %c0_63 = arith.constant 0 : index
    %70 = vector.load %arg4[%c2_61, %c0_62, %c0_63] : memref<3x128x128xf32, #tpu.memory_space<vmem>>, vector<1x128x128xf32>
    %71 = vector.shape_cast %70 : vector<1x128x128xf32> to vector<128x128xf32>
    %cst_64 = arith.constant dense<0.000000e+00> : vector<24x128xf32>
    %72 = tpu.matmul %69, %71, %cst_64 {dimension_numbers = #tpu.dot_dimension_numbers<[1], [0], [0], [1], [0, 0, 1, 1], [], []>} : vector<24x128xf32>, vector<128x128xf32>, vector<24x128xf32> -> vector<24x128xf32>
    %c2_65 = arith.constant 2 : index
    %c0_66 = arith.constant 0 : index
    %c0_67 = arith.constant 0 : index
    %73 = vector.load %arg5[%c2_65, %c0_66, %c0_67] : memref<3x1x128xf32, #tpu.memory_space<vmem>>, vector<1x1x128xf32>
    %74 = vector.shape_cast %73 : vector<1x1x128xf32> to vector<1x128xf32>
    %75 = vector.broadcast %74 : vector<1x128xf32> to vector<24x128xf32>
    %76 = arith.addf %72, %75 : vector<24x128xf32>
    %cst_68 = arith.constant 0.000000e+00 : f32
    %77 = vector.broadcast %cst_68 : f32 to vector<24x128xf32>
    %78 = arith.maximumf %76, %77 : vector<24x128xf32>
    %c2_69 = arith.constant 2 : index
    %c0_70 = arith.constant 0 : index
    %c0_71 = arith.constant 0 : index
    %79 = vector.load %arg6[%c2_69, %c0_70, %c0_71] : memref<3x128x128xf32, #tpu.memory_space<vmem>>, vector<1x128x128xf32>
    %80 = vector.shape_cast %79 : vector<1x128x128xf32> to vector<128x128xf32>
    %cst_72 = arith.constant dense<0.000000e+00> : vector<24x128xf32>
    %81 = tpu.matmul %78, %80, %cst_72 {dimension_numbers = #tpu.dot_dimension_numbers<[1], [0], [0], [1], [0, 0, 1, 1], [], []>} : vector<24x128xf32>, vector<128x128xf32>, vector<24x128xf32> -> vector<24x128xf32>
    %c2_73 = arith.constant 2 : index
    %c0_74 = arith.constant 0 : index
    %c0_75 = arith.constant 0 : index
    %82 = vector.load %arg7[%c2_73, %c0_74, %c0_75] : memref<3x1x128xf32, #tpu.memory_space<vmem>>, vector<1x1x128xf32>
    %83 = vector.shape_cast %82 : vector<1x1x128xf32> to vector<1x128xf32>
    %84 = vector.broadcast %83 : vector<1x128xf32> to vector<24x128xf32>
    %85 = arith.addf %81, %84 : vector<24x128xf32>
    %c24_76 = arith.constant 24 : index
    %c0_77 = arith.constant 0 : index
    %86 = vector.load %arg10[%c24_76, %c0_77] : memref<48x128xf32, #tpu.memory_space<vmem>>, vector<24x128xf32>
    tpu.vector_store %arg10[%c24_76, %c0_77], %85 {strides = array<i32>} : memref<48x128xf32, #tpu.memory_space<vmem>>, vector<24x128xf32>,
    %c0_78 = arith.constant 0 : index
    %c0_79 = arith.constant 0 : index
    %87 = vector.load %arg8[%c0_78, %c0_79] : memref<8x48xf32, #tpu.memory_space<vmem>>, vector<8x48xf32>
    %c0_80 = arith.constant 0 : index
    %c0_81 = arith.constant 0 : index
    %88 = vector.load %arg10[%c0_80, %c0_81] : memref<48x128xf32, #tpu.memory_space<vmem>>, vector<48x128xf32>
    %cst_82 = arith.constant dense<0.000000e+00> : vector<8x128xf32>
    %89 = tpu.matmul %87, %88, %cst_82 {dimension_numbers = #tpu.dot_dimension_numbers<[1], [0], [0], [1], [0, 0, 1, 1], [], []>} : vector<8x48xf32>, vector<48x128xf32>, vector<8x128xf32> -> vector<8x128xf32>
    %c0_83 = arith.constant 0 : index
    %c0_84 = arith.constant 0 : index
    %90 = vector.load %arg9[%c0_83, %c0_84] : memref<8x128xf32, #tpu.memory_space<vmem>>, vector<8x128xf32>
    tpu.vector_store %arg9[%c0_83, %c0_84], %89 {strides = array<i32>} : memref<8x128xf32, #tpu.memory_space<vmem>>, vector<8x128xf32>,
    return
  }
  func.func @transform_0(%arg0: i32) -> (i32, i32) {
    %c0_i32 = arith.constant 0 : i32
    %c0_i32_0 = arith.constant 0 : i32
    %c0_i32_1 = arith.constant 0 : i32
    return %c0_i32, %c0_i32_0 : i32, i32
  }
  func.func @transform_1(%arg0: i32) -> (i32, i32, i32) {
    %c0_i32 = arith.constant 0 : i32
    %c0_i32_0 = arith.constant 0 : i32
    %c0_i32_1 = arith.constant 0 : i32
    %c0_i32_2 = arith.constant 0 : i32
    return %c0_i32, %c0_i32_0, %c0_i32_1 : i32, i32, i32
  }
  func.func @transform_2(%arg0: i32) -> (i32, i32, i32) {
    %c0_i32 = arith.constant 0 : i32
    %c0_i32_0 = arith.constant 0 : i32
    %c0_i32_1 = arith.constant 0 : i32
    %c0_i32_2 = arith.constant 0 : i32
    return %c0_i32, %c0_i32_0, %c0_i32_1 : i32, i32, i32
  }
  func.func @transform_3(%arg0: i32) -> (i32, i32, i32) {
    %c0_i32 = arith.constant 0 : i32
    %c0_i32_0 = arith.constant 0 : i32
    %c0_i32_1 = arith.constant 0 : i32
    %c0_i32_2 = arith.constant 0 : i32
    return %c0_i32, %c0_i32_0, %c0_i32_1 : i32, i32, i32
  }
  func.func @transform_4(%arg0: i32) -> (i32, i32, i32) {
    %c0_i32 = arith.constant 0 : i32
    %c0_i32_0 = arith.constant 0 : i32
    %c0_i32_1 = arith.constant 0 : i32
    %c0_i32_2 = arith.constant 0 : i32
    return %c0_i32, %c0_i32_0, %c0_i32_1 : i32, i32, i32
  }
  func.func @transform_5(%arg0: i32) -> (i32, i32, i32) {
    %c0_i32 = arith.constant 0 : i32
    %c0_i32_0 = arith.constant 0 : i32
    %c0_i32_1 = arith.constant 0 : i32
    %c0_i32_2 = arith.constant 0 : i32
    return %c0_i32, %c0_i32_0, %c0_i32_1 : i32, i32, i32
  }
  func.func @transform_6(%arg0: i32) -> (i32, i32, i32) {
    %c0_i32 = arith.constant 0 : i32
    %c0_i32_0 = arith.constant 0 : i32
    %c0_i32_1 = arith.constant 0 : i32
    %c0_i32_2 = arith.constant 0 : i32
    return %c0_i32, %c0_i32_0, %c0_i32_1 : i32, i32, i32
  }
  func.func @transform_7(%arg0: i32) -> (i32, i32) {
    %c0_i32 = arith.constant 0 : i32
    %c0_i32_0 = arith.constant 0 : i32
    %c0_i32_1 = arith.constant 0 : i32
    return %c0_i32, %c0_i32_0 : i32, i32
  }
  func.func @transform_8(%arg0: i32) -> (i32, i32) {
    %c0_i32 = arith.constant 0 : i32
    %c0_i32_0 = arith.constant 0 : i32
    %c0_i32_1 = arith.constant 0 : i32
    return %c0_i32, %c0_i32_0 : i32, i32
  }
}

</mosaic_0001>

<bundles_post_ra>
// kernel: custom-call.50
= control target key start
LH: loop header
LB: loop body
LE: loop exit
PB: predicated region body
PF: predicated region fallthrough
CT: control target
= control target key end

     0   :  { %s1255_s9 = smov 0   ;;  %s1257_s10 = smov 0   ;;  %s1701_s0 = inlined_call_operand.vmem [shape: f32[2,2,64,32], index: 0, kind: input, shape index: {}]   ;;  %s1702_s1 = inlined_call_operand.vmem [shape: f32[2,2,64,32], index: 1, kind: output, shape index: {0}]   ;;  %s1703_s2 = inlined_call_operand.vmem [shape: f32[2,2,32], index: 2, kind: output, shape index: {1}]  }
   0x1   :  { %s1259_s11 = smov 0   ;;  %s1261_s12 = smov 0  }
   0x2   :  { %s1263_s13 = smov 0   ;;  %s1265_s14 = smov 0  }
   0x3   :  { %s1267_s15 = smov 0  }
   0x4 LB: > { %s31_s16 = sadd.s32 1, %s1224_s13  ;;  %s35_s17 = sadd.s32 1, %s1228_s14  ;;  %s1232_s15 = sphi %s1267_s15, %s9_s15   ;;  %s1228_s14 = sphi %s1265_s14, %s1732_s14   ;;  %s1224_s13 = sphi %s1263_s13, %s1731_s13   ;;  %s1220_s12 = sphi %s1261_s12, %s1730_s12   ;;  %s1216_s11 = sphi %s1259_s11, %s1729_s11   ;;  %s1212_s10 = sphi %s1257_s10, %s1728_s10   ;;  %s1208_s9 = sphi %s1255_s9, %s1727_s9  }
   0x5   : > { %p33_p0 = scmp.ge.s32.totalorder %s31_s16, 2  ;;  %s40_s18 = ssub.s32 0, %s1224_s13 }
   0x6   : > { %s1013_s19 = smin.u32 %s1224_s13, %s40_s18  ;;  %s1011_s22 = sadd.s32 4294967295, %s1232_s15  }
   0x7   : > { %s1734_s16 = smov (%p33_p0, %s31_s16), 0  ;;  %s1736_s17 = smov (!%p33_p0, %s35_s17), %s1228_s14 }
   0x8   : > { %p37_p1 = scmp.ge.s32.totalorder %s1736_s17, 2  ;;  %s42_s20 = sshrl.u32 %s1013_s19, 3 }
   0x9   : > { %s46_s21 = ssub.s32 0, %s1734_s16  ;;  %p66_p2 = scmp.ne.s32.totalorder %s1212_s10, %s1208_s9 }
   0xa   : > { %s1738_s17 = smov (%p37_p1, %s1736_s17), 0  ;;  %s1014_s23 = smin.u32 %s46_s21, %s1734_s16 }
   0xb   : > { %s48_s24 = sshrl.u32 %s1014_s23, 3  ;;  %s51_s25 = ssub.s32 %s1228_s14, %s1738_s17 }
   0xc   : > { %p67_p3 = scmp.eq.s32.totalorder %s1011_s22, 3  ;;  %s52_s26 = ssub.s32 %s42_s20, %s48_s24 }
   0xd   : > { %s56_s27 = sadd.s32 1, %s1212_s10  ;;  %s53_s28 = sor.u32 %s52_s26, %s51_s25 }
   0xe   : > { %p1309_p4 = por %p67_p3, %p66_p2  ;;  %p54_p5 = scmp.eq.s32.totalorder %s53_s28, 0 }
   0xf   : > { %p1016_p6 = scmp.ge.s32.totalorder %s1232_s15, 4 }
  0x10   : > { %s1314_s30 = scalar_select %p54_p5, %s1212_s10, %s56_s27  }
  0x11   : > { %89 = sbr.rel (%p1016_p6) target bundleno = 28 (0x1c), region = 16  ;;  %s91_s3 = sand.u32 (!%p1016_p6), 1, %s1232_s15  }
  0x12   : > { %s1018_s4 = sshll.u32 (!%p1016_p6), %s1224_s13, 3  ;;  %s1017_s5 = sshll.u32 (!%p1016_p6), %s91_s3, 6 }
  0x13   : > { %s1019_s6 = sshll.u32 (!%p1016_p6), %s1228_s14, 4  ;;  %s93_s21 = scalar_lea.vmem (!%p1016_p6), [#allocation0], %s1017_s5 }
  0x14   : > { %s99_s7 = sadd.s32 (!%p1016_p6), %s1019_s6, %s1018_s4 }
  0x15   : > { %s1020_s8 = sshll.u32 (!%p1016_p6), %s99_s7, 3 }
  0x16   : > { %s101_s20 = scalar_lea.vmem (!%p1016_p6), %s1701_s0, %s1020_s8 }
  0x17   : > { %v143_v0 = vld [vmem:[%s101_s20] sm:$0xff] (!%p1016_p6)  ;;  %v145_v1 = vld [vmem:[%s101_s20 + $0x8] sm:$0xff] (!%p1016_p6)  ;;  %v147_v2 = vld [vmem:[%s101_s20 + $0x10] sm:$0xff] (!%p1016_p6) }
  0x18   : > { %144 = vst [vmem:[%s93_s21] sm:$0xff] %v143_v0  ;;  %146 = vst [vmem:[%s93_s21 + $0x8] sm:$0xff] %v145_v1  ;;  %v149_v3 = vld [vmem:[%s101_s20 + $0x18] sm:$0xff]  ;;  %v151_v4 = vld [vmem:[%s101_s20 + $0x20] sm:$0xff] }
  0x19   : > { %148 = vst [vmem:[%s93_s21 + $0x10] sm:$0xff] %v147_v2  ;;  %v153_v5 = vld [vmem:[%s101_s20 + $0x28] sm:$0xff]  ;;  %150 = vst [vmem:[%s93_s21 + $0x18] sm:$0xff] %v149_v3  ;;  %v155_v6 = vld [vmem:[%s101_s20 + $0x30] sm:$0xff] }
  0x1a   : > { %152 = vst [vmem:[%s93_s21 + $0x20] sm:$0xff] %v151_v4  ;;  %154 = vst [vmem:[%s93_s21 + $0x28] sm:$0xff] %v153_v5  ;;  %v157_v7 = vld [vmem:[%s101_s20 + $0x38] sm:$0xff] }
  0x1b   : > { %156 = vst [vmem:[%s93_s21 + $0x30] sm:$0xff] %v155_v6  ;;  %158 = vst [vmem:[%s93_s21 + $0x38] sm:$0xff] %v157_v7 }
  0x1c PF: > { %p1021_p7 = scmp.ge.s32.totalorder %s1232_s15, 1  ;;  %p163_p8 = scmp.lt.s32.totalorder %s1232_s15, 5 }
  0x1e   : > { %p164_p9 = pnand %p1021_p7, %p163_p8 }
  0x20   : > { %167 = sbr.rel (%p164_p9) target bundleno = 390 (0x186), region = 54 }
  0x27   : > { %s170_s23 = sand.u32 1, %s1011_s22   ;;  %s184_s24 = sand.u32 1, %s1208_s9   ;;  %v1238_v16 = vmov 0.0  }
  0x28   : > { %s1022_s25 = sshll.u32 %s170_s23, 6  ;;  %s1328_s26 = sshll.u32 %s184_s24, 1 }
  0x29   : > { %s195_s27 = sand.u32 7, %s1216_s11   ;;  %s172_s28 = scalar_lea.vmem [#allocation0], %s1022_s25 }
  0x2a   : > { %v197_v8 = vld [vmem:[%s172_s28] sm:$0xff]  ;;  %v1025_v9 = vld [vmem:[%s172_s28 + $0x8] sm:$0xff]  ;;  %v1027_v10 = vld [vmem:[%s172_s28 + $0x10] sm:$0xff]  ;;  %s1331_s3 = scalar_lea.vmem [#allocation1], %s1022_s25  ;;  %s1339_s9 = scalar_lea.vmem [#allocation2], %s195_s27 }
  0x2b   : > { %198 = vst [vmem:[%s1331_s3] sm:$0xff] %v197_v8  ;;  %1026 = vst [vmem:[%s1331_s3 + $0x8] sm:$0xff] %v1025_v9  ;;  %v1029_v11 = vld [vmem:[%s172_s28 + $0x18] sm:$0xff]  ;;  %v1031_v12 = vld [vmem:[%s172_s28 + $0x20] sm:$0xff]  ;;  %s186_s22 = scalar_lea.vmem [#allocation3], %s1328_s26  ;;  %s1345_s4 = smov 0  }
  0x2c   : > { %1028 = vst [vmem:[%s1331_s3 + $0x10] sm:$0xff] %v1027_v10  ;;  %v1033_v13 = vld [vmem:[%s172_s28 + $0x28] sm:$0xff]  ;;  %1030 = vst [vmem:[%s1331_s3 + $0x18] sm:$0xff] %v1029_v11  ;;  %v1035_v14 = vld [vmem:[%s172_s28 + $0x30] sm:$0xff] }
  0x2d   : > { %1032 = vst [vmem:[%s1331_s3 + $0x20] sm:$0xff] %v1031_v12  ;;  %1034 = vst [vmem:[%s1331_s3 + $0x28] sm:$0xff] %v1033_v13  ;;  %v1037_v15 = vld [vmem:[%s172_s28 + $0x38] sm:$0xff] }
  0x2e   : > { %227 = vst [vmem:[%s1339_s9] sm:$0x1] %v1238_v16  ;;  %1036 = vst [vmem:[%s1331_s3 + $0x30] sm:$0xff] %v1035_v14 }
  0x2f   : > { %1038 = vst [vmem:[%s1331_s3 + $0x38] sm:$0xff] %v1037_v15 }
  0x30 LB: >> { %v235_v17 = vlaneseq  ;;  %v1355_v20 = vstv %s1236_s4  ;;  %s332_s5 = scalar_lea.vmem %s1331_s3, %s1236_s4 [#allocation1]  ;;  %s516_s6 = scalar_lea.vmem [#allocation4], %s1236_s4  ;;  %s1236_s4 = sphi %s1345_s4, %s233_s4  }
  0x31   : >> { %s1493_s7 = smov [#allocation4] }
  0x32   : >> { %v234_v18 = vld [vmem:[%s1331_s3] sm:$0xff]  ;;  %v1352_v19 = vshrl.u32 %v235_v17, 7  ;;  %v1039_v21 = vld [vmem:[%s1331_s3 + $0x8] sm:$0xff] }
  0x33   : >> { %v1040_v23 = vld [vmem:[%s1331_s3 + $0x10] sm:$0xff]  ;;  %v1041_v25 = vld [vmem:[%s1331_s3 + $0x18] sm:$0xff] }
  0x34   : >> { %vm239_vm0 = vcmp.gt.s32.totalorder %v1352_v19, %v1355_v20  ;;  %v246_v22 = vadd.s32 8, %v1352_v19  ;;  %v256_v24 = vadd.s32 16, %v1352_v19  ;;  %v266_v26 = vadd.s32 24, %v1352_v19  ;;  %v1042_v32 = vld [vmem:[%s1331_s3 + $0x20] sm:$0xff]  ;;  %v1043_v38 = vld [vmem:[%s1331_s3 + $0x28] sm:$0xff] }
  0x35   : >> { %v240_v27 = vsel %vm239_vm0, %v234_v18, 0.0  ;;  %v276_v28 = vadd.s32 32, %v1352_v19  ;;  %v286_v29 = vadd.s32 40, %v1352_v19  ;;  %v296_v30 = vadd.s32 48, %v1352_v19  ;;  %v1044_v43 = vld [vmem:[%s1331_s3 + $0x30] sm:$0xff] }
  0x36   : >> { %v241_v31 = vmul.f32 %v240_v27, %v240_v27  ;;  %vm248_vm1 = vcmp.gt.s32.totalorder %v246_v22, %v1355_v20  ;;  %vm258_vm2 = vcmp.gt.s32.totalorder %v256_v24, %v1355_v20  ;;  %vm268_vm3 = vcmp.gt.s32.totalorder %v266_v26, %v1355_v20  ;;  %v1045_v47 = vld [vmem:[%s1331_s3 + $0x38] sm:$0xff]  ;;  %v1385_v0 = vld [vmem:[%s332_s5] ss:$0 sm:$0xff]  ;;  %s1408_s3 = smov %s1331_s3 }
  0x37   : >> { %v249_v33 = vsel %vm248_vm1, %v1039_v21, 0.0  ;;  %v259_v34 = vsel %vm258_vm2, %v1040_v23, 0.0  ;;  %v269_v35 = vsel %vm268_vm3, %v1041_v25, 0.0  ;;  %vm278_vm4 = vcmp.gt.s32.totalorder %v276_v28, %v1355_v20 }
  0x38   : >> { %v250_v36 = vmul.f32 %v249_v33, %v249_v33  ;;  %v260_v37 = vmul.f32 %v259_v34, %v259_v34  ;;  %v279_v39 = vsel %vm278_vm4, %v1042_v32, 0.0  ;;  %vm288_vm5 = vcmp.gt.s32.totalorder %v286_v29, %v1355_v20 }
  0x39   : >> { %v306_v40 = vadd.s32 56, %v1352_v19  ;;  %v270_v42 = vmul.f32 %v269_v35, %v269_v35  ;;  %vm298_vm6 = vcmp.gt.s32.totalorder %v296_v30, %v1355_v20  ;;  %v289_v44 = vsel %vm288_vm5, %v1043_v38, 0.0  ;;  %v1048_v38 = vld [vmem:[%s1408_s3 + $0x10] sm:$0xff] }
  0x3a   : >> { %v251_v41 = vadd.f32 %v250_v36, %v241_v31  ;;  %v280_v46 = vmul.f32 %v279_v39, %v279_v39  ;;  %v299_v48 = vsel %vm298_vm6, %v1044_v43, 0.0  ;;  %v290_v50 = vmul.f32 %v289_v44, %v289_v44  ;;  %v372_v39 = vld [vmem:[%s1408_s3] sm:$0xff]  ;;  %v1051_v44 = vld [vmem:[%s1408_s3 + $0x28] sm:$0xff] }
  0x3b   : >> { %vm308_vm7 = vcmp.gt.s32.totalorder %v306_v40, %v1355_v20  ;;  %v300_v53 = vmul.f32 %v299_v48, %v299_v48  ;;  %v334_v1 = vand.u32 2147483647, %v1385_v0  ;;  %vm359_vm13 = vcmp.lt.f32.partialorder %v1385_v0, 0.0  ;;  %v1049_v40 = vld [vmem:[%s1408_s3 + $0x18] sm:$0xff] }
  0x3c   : >> { %v261_v45 = vadd.f32 %v260_v37, %v251_v41  ;;  %v311_v51 = vsel %vm308_vm7, %v1045_v47, 0.0  ;;  %v371_v19 = vmov %v1352_v19  ;;  %v1419_v43 = vand.u32 127, %v235_v17 }
  0x3d   : >> { %v312_v55 = vmul.f32 %v311_v51, %v311_v51  ;;  %v335_v6 = vmax.f32 %v334_v1, 0.0  ;;  %v408_v33 = vadd.s32 16, %v371_v19  ;;  %v426_v34 = vadd.s32 24, %v371_v19 }
  0x3e   : >> { %v271_v49 = vadd.f32 %v270_v42, %v261_v45  ;;  %v390_v35 = vadd.s32 8, %v371_v19  ;;  %v462_v36 = vadd.s32 40, %v371_v19  ;;  %v444_v37 = vadd.s32 32, %v371_v19  ;;  %v1047_v42 = vld [vmem:[%s1408_s3 + $0x8] sm:$0xff]  ;;  %v1050_v45 = vld [vmem:[%s1408_s3 + $0x20] sm:$0xff] }
  0x3f   : >> { %vm410_vm14 = vcmp.gt.s32.totalorder %v408_v33, %v1355_v20  ;;  %vm375_vm15 = vcmp.gt.s32.totalorder %v371_v19, %v1355_v20  ;;  %vm428_vm0 = vcmp.gt.s32.totalorder %v426_v34, %v1355_v20  ;;  %v498_v41 = vadd.s32 56, %v371_v19 }
  0x40   : >> { %v281_v52 = vadd.f32 %v280_v46, %v271_v49  ;;  %vm392_vm1 = vcmp.gt.s32.totalorder %v390_v35, %v1355_v20  ;;  %vm464_vm2 = vcmp.gt.s32.totalorder %v462_v36, %v1355_v20  ;;  %vm446_vm3 = vcmp.gt.s32.totalorder %v444_v37, %v1355_v20  ;;  %v529_v37 = vld [vmem:[%s1339_s9] ss:$0 sm:$0xff] }
  0x41   : >> { %v480_v46 = vadd.s32 48, %v371_v19  ;;  %v411_v47 = vsel %vm410_vm14, %v1048_v38, 0.0  ;;  %v376_v48 = vsel %vm375_vm15, %v372_v39, 0.0  ;;  %v429_v49 = vsel %vm428_vm0, %v1049_v40, 0.0 }
  0x42   : >> { %v291_v54 = vadd.f32 %v290_v50, %v281_v52  ;;  %v393_v50 = vsel %vm392_vm1, %v1047_v42, 0.0  ;;  %vm500_vm4 = vcmp.gt.s32.totalorder %v498_v41, %v1355_v20  ;;  %vm501_vm5 = vcmp.lt.s32.totalorder %v498_v41, 64 }
  0x43   : >> { %v465_v17 = vsel %vm464_vm2, %v1051_v44, 0.0  ;;  %v447_v51 = vsel %vm446_vm3, %v1050_v45, 0.0  ;;  %vm1429_vm6 = vcmp.eq.s32.totalorder %v1419_v43, %v1355_v20  ;;  %vm482_vm7 = vcmp.gt.s32.totalorder %v480_v46, %v1355_v20 }
  0x44   : >> { %v301_v56 = vadd.f32 %v300_v53, %v291_v54  ;;  %v1239_v36 = vmov 1.0   ;;  %v536_v19 = vmov %v1352_v19  ;;  %vm1564_vm3 = vcmp.gt.s32.totalorder %v1419_v43, %v1355_v20 }
  0x46   : >> { %v313_v57 = vadd.f32 %v312_v55, %v301_v56 }
  0x48   : >> { %v314_v58 = vrot.slane %v313_v57, 4 }
  0x4a   : >> { %v315_v59 = vadd.f32 %v314_v58, %v313_v57  ;;  %v1053_v58 = vld [vmem:[%s1408_s3 + $0x38] sm:$0xff] }
  0x4c   : >> { %v316_v60 = vrot.slane %v315_v59, 2 }
  0x4e   : >> { %v317_v61 = vadd.f32 %v316_v60, %v315_v59  ;;  %v1052_v60 = vld [vmem:[%s1408_s3 + $0x30] sm:$0xff]  ;;  %s1490_s3 = smov %s1331_s3 }
  0x4f   : >> { %v539_v40 = vld [vmem:[%s1490_s3] sm:$0xff]  ;;  %v1055_v41 = vld [vmem:[%s1490_s3 + $0x8] sm:$0xff] }
  0x50   : >> { %v318_v62 = vrot.slane %v317_v61, 1 }
  0x52   : >> { %v1380_v63 = vadd.f32 %v318_v62, %v317_v61 }
  0x54   : >> { %1164 = vrsqrt.f32 %v1380_v63  ;;  %vm322_vm8 = vcmp.eq.f32.partialorder %v1380_v63, inf  ;;  %v325_v3 = vand.u32 2147483648, %v1380_v63  ;;  %vm324_vm9 = vcmp.eq.f32.partialorder %v1380_v63, 0.0 }
  0x5e   : >> { %v1165_v2 = vpop.eup %1164 }
  0x5f   : >> { %v321_v4 = vmul.f32 %v1165_v2, %v1380_v63 }
  0x61   : >> { %v323_v5 = vsel %vm322_vm8, %v1380_v63, %v321_v4  ;;  %vm1435_vm8 = vmand %vm500_vm4, %vm501_vm5 }
  0x62   : >> { %v326_v7 = vsel %vm324_vm9, %v325_v3, %v323_v5 }
  0x63   : >> { %v336_v8 = vand.u32 2147483647, %v326_v7  ;;  %v503_v7 = vsel %vm1435_vm8, %v1053_v58, 0.0  ;;  %v1063_v58 = vld [vmem:[%s1490_s3 + $0x28] sm:$0xff] }
  0x65   : >> { %v337_v9 = vmax.f32 %v335_v6, %v336_v8 }
  0x67   : >> { %1166 = vrcp.f32 %v337_v9  ;;  %vm349_vm12 = vcmp.eq.f32.partialorder %v337_v9, 0.0 }
  0x71   : >> { %v1167_v10 = vpop.eup %1166 }
  0x72   : >> { %v339_v11 = vmul.f32 %v1167_v10, %v334_v1  ;;  %v342_v12 = vmul.f32 0.0, %v1167_v10  ;;  %v346_v13 = vmul.f32 %v1167_v10, %v336_v8  ;;  %v483_v8 = vsel %vm482_vm7, %v1052_v60, 0.0 }
  0x74   : >> { %v340_v14 = vmul.f32 %v339_v11, %v339_v11  ;;  %v343_v15 = vmul.f32 %v342_v12, %v342_v12  ;;  %v347_v16 = vmul.f32 %v346_v13, %v346_v13 }
  0x76   : >> { %v344_v18 = vadd.f32 %v343_v15, %v340_v14 }
  0x78   : >> { %v348_v21 = vadd.f32 %v347_v16, %v344_v18 }
  0x7a   : >> { %1168 = vrsqrt.f32 %v348_v21  ;;  %vm352_vm10 = vcmp.eq.f32.partialorder %v348_v21, inf  ;;  %v355_v23 = vand.u32 2147483648, %v348_v21  ;;  %vm354_vm11 = vcmp.eq.f32.partialorder %v348_v21, 0.0 }
  0x84   : >> { %v1169_v22 = vpop.eup %1168 }
  0x85   : >> { %v351_v24 = vmul.f32 %v1169_v22, %v348_v21 }
  0x87   : >> { %v353_v25 = vsel %vm352_vm10, %v348_v21, %v351_v24 }
  0x88   : >> { %v356_v26 = vsel %vm354_vm11, %v355_v23, %v353_v25 }
  0x89   : >> { %v357_v27 = vmul.f32 %v356_v26, %v337_v9 }
  0x8b   : >> { %v358_v28 = vsel %vm349_vm12, 0.0, %v357_v27 }
  0x8c   : >> { %v360_v29 = vxor.u32 2147483648, %v358_v28 }
  0x8e   : >> { %v1396_v30 = vsel %vm359_vm13, %v358_v28, %v360_v29 }
  0x8f   : >> { %v1402_v31 = vsel %vm324_vm9, %v1385_v0, %v1396_v30  ;;  %v362_v11 = vsub.f32 %v1396_v30, %v1385_v0 }
  0x90   : >> { %v367_v32 = vsub.f32 %v1385_v0, %v1402_v31 }
  0x92   : >> { %1170 = vrcp.f32 %v367_v32 }
  0x93   : >> { %1172 = vrcp.f32 %v1396_v30 }
  0x9c   : >> { %v1171_v52 = vpop.eup %1170 }
  0x9d   : >> { %v413_v54 = vmul.f32 %v1171_v52, %v411_v47  ;;  %v378_v55 = vmul.f32 %v1171_v52, %v376_v48  ;;  %v431_v56 = vmul.f32 %v1171_v52, %v429_v49  ;;  %v395_v57 = vmul.f32 %v1171_v52, %v393_v50  ;;  %v1173_v16 = vpop.eup %1172  ;;  %v1057_v47 = vld [vmem:[%s1490_s3 + $0x10] sm:$0xff]  ;;  %v1059_v50 = vld [vmem:[%s1490_s3 + $0x18] sm:$0xff] }
  0x9e   : >> { %v467_v61 = vmul.f32 %v1171_v52, %v465_v17  ;;  %v449_v62 = vmul.f32 %v1171_v52, %v447_v51  ;;  %v505_v14 = vmul.f32 %v1171_v52, %v503_v7  ;;  %v485_v15 = vmul.f32 %v1171_v52, %v483_v8 }
  0x9f   : >> { %v414_v1 = vsel %vm324_vm9, 0.0, %v413_v54  ;;  %v379_v2 = vsel %vm324_vm9, 0.0, %v378_v55  ;;  %v432_v3 = vsel %vm324_vm9, 0.0, %v431_v56  ;;  %v396_v4 = vsel %vm324_vm9, 0.0, %v395_v57  ;;  %v1061_v54 = vld [vmem:[%s1490_s3 + $0x20] sm:$0xff] }
  0xa0   : >> { %v419_v5 = vsel %vm1429_vm6, %v414_v1, 0.0  ;;  %v384_v6 = vsel %vm1429_vm6, %v379_v2, 0.0  ;;  %v437_v9 = vsel %vm1429_vm6, %v432_v3, 0.0  ;;  %v401_v10 = vsel %vm1429_vm6, %v396_v4, 0.0  ;;  %v1067_v1 = vld [vmem:[%s1490_s3 + $0x38] sm:$0xff]  ;;  %v1065_v3 = vld [vmem:[%s1490_s3 + $0x30] sm:$0xff]  ;;  %s1516_s3 = smov %s1490_s3 }
  0xa1   : >> { %420 = vadd.xlane.f32.xlu1 %v419_v5  ;;  %385 = vadd.xlane.f32.xlu0 %v384_v6  ;;  %v468_v12 = vsel %vm324_vm9, 0.0, %v467_v61  ;;  %v450_v13 = vsel %vm324_vm9, 0.0, %v449_v62  ;;  %v506_v0 = vsel %vm324_vm9, 0.0, %v505_v14  ;;  %v486_v22 = vsel %vm324_vm9, 0.0, %v485_v15  ;;  %s770_s8 = scalar_lea.vmem %s1516_s3, %s1236_s4  ;;  %s233_s4 = sadd.s32 1, %s1236_s4  }
  0xa2   : >> { %v473_v18 = vsel %vm1429_vm6, %v468_v12, 0.0  ;;  %v455_v21 = vsel %vm1429_vm6, %v450_v13, 0.0  ;;  %v364_v23 = vmul.f32 %v1173_v16, %v362_v11  ;;  %v511_v24 = vsel %vm1429_vm6, %v506_v0, 0.0  ;;  %p230_p10 = scmp.ge.s32.totalorder %s233_s4, 32  }
  0xa3   : >> { %v491_v25 = vsel %vm1429_vm6, %v486_v22, 0.0  ;;  %v583_v61 = vadd.s32 56, %v536_v19  ;;  %v602_v19 = vmov %v1352_v19  ;;  %s1091_s18 = sshll.u32 (%p230_p10), %s1216_s11, 3  ;;  %s1092_s19 = sshll.u32 (%p230_p10), %s1220_s12, 4 }
  0xa4   : >> { %v366_v26 = vsel %vm324_vm9, 0.0, %v364_v23  ;;  %v623_v14 = vadd.s32 8, %v602_v19  ;;  %v644_v16 = vadd.s32 16, %v602_v19  ;;  %vm619_vm10 = vcmp.ge.s32.totalorder %v602_v19, %v1355_v20  ;;  %s797_s20 = sadd.s32 (%p230_p10), %s1092_s19, %s1091_s18 }
  0xa5   : >> { %438 = vadd.xlane.f32.xlu1 %v437_v9  ;;  %402 = vadd.xlane.f32.xlu0 %v401_v10  ;;  %v522_v27 = vsel %vm1429_vm6, %v366_v26, 0.0  ;;  %vm589_vm9 = vcmp.lt.s32.totalorder %v583_v61, 64  ;;  %v686_v22 = vadd.s32 32, %v602_v19  ;;  %vm1524_vm13 = vmand %vm1429_vm6, %vm619_vm10  ;;  %v749_v26 = vadd.s32 56, %v602_v19  ;;  %s1093_s21 = sshll.u32 (%p230_p10), %s797_s20, 3 }
  0xa6   : >> { %vm640_vm11 = vcmp.ge.s32.totalorder %v623_v14, %v1355_v20  ;;  %vm661_vm12 = vcmp.ge.s32.totalorder %v644_v16, %v1355_v20  ;;  %s799_s25 = scalar_lea.vmem (%p230_p10), %s1702_s1, %s1093_s21 }
  0xa7   : >> { %vm1531_vm15 = vmand %vm1429_vm6, %vm640_vm11  ;;  %vm703_vm2 = vcmp.ge.s32.totalorder %v686_v22, %v1355_v20  ;;  %vm766_vm7 = vcmp.ge.s32.totalorder %v749_v26, %v1355_v20 }
  0xa8   : >> { %vm1540_vm0 = vmand %vm1429_vm6, %vm661_vm12 }
  0xa9   : >> { %474 = vadd.xlane.f32.xlu1 %v473_v18  ;;  %456 = vadd.xlane.f32.xlu0 %v455_v21  ;;  %v665_v18 = vadd.s32 24, %v602_v19  ;;  %vm1578_vm8 = vmand %vm1429_vm6, %vm703_vm2 }
  0xaa   : >> { %vm1602_vm11 = vmand %vm1429_vm6, %vm766_vm7 }
  0xab   : >> { %vm682_vm14 = vcmp.ge.s32.totalorder %v665_v18, %v1355_v20 }
  0xac   : >> { %vm1549_vm1 = vmand %vm1429_vm6, %vm682_vm14 }
  0xad   : >> { %512 = vadd.xlane.f32.xlu1 %v511_v24  ;;  %492 = vadd.xlane.f32.xlu0 %v491_v25  ;;  %v707_v24 = vadd.s32 40, %v602_v19  ;;  %v728_v25 = vadd.s32 48, %v602_v19  ;;  %v1075_v19 = vld [vmem:[%s1516_s3 + $0x18] sm:$0xff] }
  0xaf   : >> { %vm724_vm4 = vcmp.ge.s32.totalorder %v707_v24, %v1355_v20  ;;  %vm745_vm5 = vcmp.ge.s32.totalorder %v728_v25, %v1355_v20 }
  0xb0   : >> { %vm1594_vm10 = vmand %vm1429_vm6, %vm745_vm5 }
  0xb1   : >> { %523 = vadd.xlane.f32.xlu0 %v522_v27 }
 0x12e   : >> { %v421_v28 = vpop.xlane.xlu1 %420  ;;  %v386_v29 = vpop.xlane.xlu0 %385 }
 0x12f   : >> { %423 = vst [vmem:[#allocation4 + $0x10] sm:$0xff] %v421_v28  ;;  %387 = vst [vmem:[#allocation4] sm:$0xff] %v386_v29  ;;  %v609_v29 = vld [vmem:[%s1516_s3] sm:$0xff] }
 0x132   : >> { %v439_v30 = vpop.xlane.xlu1 %438  ;;  %v403_v32 = vpop.xlane.xlu0 %402 }
 0x133   : >> { %441 = vst [vmem:[#allocation4 + $0x18] sm:$0xff] %v439_v30  ;;  %405 = vst [vmem:[#allocation4 + $0x8] sm:$0xff] %v403_v32  ;;  %v1069_v30 = vld [vmem:[%s1516_s3 + $0x8] sm:$0xff]  ;;  %v1072_v32 = vld [vmem:[%s1516_s3 + $0x10] sm:$0xff] }
 0x136   : >> { %v475_v63 = vpop.xlane.xlu1 %474  ;;  %v457_v33 = vpop.xlane.xlu0 %456 }
 0x137   : >> { %477 = vst [vmem:[#allocation4 + $0x28] sm:$0xff] %v475_v63  ;;  %459 = vst [vmem:[#allocation4 + $0x20] sm:$0xff] %v457_v33 }
 0x13a   : >> { %v513_v34 = vpop.xlane.xlu1 %512  ;;  %v493_v35 = vpop.xlane.xlu0 %492 }
 0x13b   : >> { %515 = vst [vmem:[#allocation4 + $0x38] sm:$0xff] %v513_v34  ;;  %495 = vst [vmem:[#allocation4 + $0x30] sm:$0xff] %v493_v35 }
 0x13c   : >> { %517 = vst [vmem:[%s516_s6] sm:$0x1] %v1239_v36  ;;  %v1078_v36 = vld [vmem:[%s1516_s3 + $0x20] sm:$0xff] }
 0x13e   : >> { %v1484_v38 = vpop.xlane.xlu0 %523 }
 0x13f   : >> { %v530_v39 = vsel %vm1429_vm6, %v1484_v38, %v529_v37  ;;  %v1081_v37 = vld [vmem:[%s1516_s3 + $0x28] sm:$0xff] }
 0x140   : >> { %531 = vst [vmem:[%s1339_s9] sm:$0x1] %v530_v39  ;;  %v1084_v39 = vld [vmem:[%s1516_s3 + $0x30] sm:$0xff] }
 0x143   : >> { %v538_v42 = vld [vmem:[%s1493_s7] sm:$0xff]  ;;  %v1054_v45 = vld [vmem:[%s1493_s7 + $0x8] sm:$0xff]  ;;  %v1056_v46 = vld [vmem:[%s1493_s7 + $0x10] sm:$0xff] }
 0x144   : >> { %v540_v44 = vmul.f32 %v539_v40, %v538_v42  ;;  %v546_v48 = vmul.f32 %v1055_v41, %v1054_v45  ;;  %v1058_v49 = vld [vmem:[%s1493_s7 + $0x18] sm:$0xff]  ;;  %v553_v51 = vmul.f32 %v1057_v47, %v1056_v46  ;;  %v1060_v52 = vld [vmem:[%s1493_s7 + $0x20] sm:$0xff]  ;;  %v1062_v57 = vld [vmem:[%s1493_s7 + $0x28] sm:$0xff] }
 0x145   : >> { %v560_v56 = vmul.f32 %v1059_v50, %v1058_v49  ;;  %v567_v60 = vmul.f32 %v1061_v54, %v1060_v52  ;;  %v1066_v62 = vld [vmem:[%s1493_s7 + $0x38] sm:$0xff]  ;;  %v1064_v2 = vld [vmem:[%s1493_s7 + $0x30] sm:$0xff]  ;;  %v574_v5 = vmul.f32 %v1063_v58, %v1062_v57  ;;  %s1520_s7 = smov %s1493_s7 }
 0x146   : >> { %v547_v17 = vadd.f32 %v546_v48, %v540_v44  ;;  %v588_v6 = vmul.f32 %v1067_v1, %v1066_v62  ;;  %v581_v8 = vmul.f32 %v1065_v3, %v1064_v2  ;;  %v607_v33 = vld [vmem:[%s1520_s7] sm:$0xff]  ;;  %v1068_v34 = vld [vmem:[%s1520_s7 + $0x8] sm:$0xff]  ;;  %v1087_v40 = vld [vmem:[%s1516_s3 + $0x38] sm:$0xff] }
 0x147   : >> { %v1071_v42 = vld [vmem:[%s1520_s7 + $0x10] sm:$0xff]  ;;  %v1074_v44 = vld [vmem:[%s1520_s7 + $0x18] sm:$0xff]  ;;  %v1077_v45 = vld [vmem:[%s1520_s7 + $0x20] sm:$0xff] }
 0x148   : >> { %v554_v55 = vadd.f32 %v553_v51, %v547_v17  ;;  %v590_v10 = vsel %vm589_vm9, %v588_v6, 0.0  ;;  %v1080_v47 = vld [vmem:[%s1520_s7 + $0x28] sm:$0xff]  ;;  %v1083_v48 = vld [vmem:[%s1520_s7 + $0x30] sm:$0xff]  ;;  %v1086_v49 = vld [vmem:[%s1520_s7 + $0x38] sm:$0xff] }
 0x149   : >> { %vm1586_vm9 = vmand %vm1429_vm6, %vm724_vm4  ;;  %v781_v25 = vld [vmem:[#allocation2] sm:$0x3] (%p230_p10) }
 0x14a   : >> { %v561_v59 = vadd.f32 %v560_v56, %v554_v55  ;;  %783 = vst [vmem:[%s186_s22] sm:$0x3] (%p230_p10), %v781_v25 }
 0x14c   : >> { %v568_v4 = vadd.f32 %v567_v60, %v561_v59 }
 0x14e   : >> { %v575_v7 = vadd.f32 %v574_v5, %v568_v4 }
 0x150   : >> { %v582_v9 = vadd.f32 %v581_v8, %v575_v7 }
 0x152   : >> { %v591_v11 = vadd.f32 %v590_v10, %v582_v9 }
 0x154   : >> { %v592_v12 = vrot.slane %v591_v11, 4 }
 0x156   : >> { %v593_v13 = vadd.f32 %v592_v12, %v591_v11 }
 0x158   : >> { %v594_v15 = vrot.slane %v593_v13, 2 }
 0x15a   : >> { %v595_v21 = vadd.f32 %v594_v15, %v593_v13 }
 0x15c   : >> { %v596_v0 = vrot.slane %v595_v21, 1 }
 0x15e   : >> { %v597_v27 = vadd.f32 %v596_v0, %v595_v21 }
 0x160   : >> { %v603_v41 = vmul.f32 %v597_v27, %v1484_v38 }
 0x162   : >> { %v608_v50 = vmul.f32 %v607_v33, %v603_v41  ;;  %v628_v38 = vmul.f32 %v1068_v34, %v603_v41  ;;  %v649_v17 = vmul.f32 %v1071_v42, %v603_v41  ;;  %v670_v51 = vmul.f32 %v1074_v44, %v603_v41 }
 0x163   : >> { %v691_v52 = vmul.f32 %v1077_v45, %v603_v41  ;;  %v712_v54 = vmul.f32 %v1080_v47, %v603_v41  ;;  %v733_v55 = vmul.f32 %v1083_v48, %v603_v41  ;;  %v754_v56 = vmul.f32 %v1086_v49, %v603_v41 }
 0x164   : >> { %v612_v58 = vsub.f32 %v609_v29, %v608_v50  ;;  %v633_v59 = vsub.f32 %v1069_v30, %v628_v38  ;;  %v654_v60 = vsub.f32 %v1072_v32, %v649_v17  ;;  %v675_v61 = vsub.f32 %v1075_v19, %v670_v51 }
 0x165   : >> { %v696_v1 = vsub.f32 %v1078_v36, %v691_v52  ;;  %v717_v2 = vsub.f32 %v1081_v37, %v712_v54  ;;  %v738_v3 = vsub.f32 %v1084_v39, %v733_v55  ;;  %v759_v4 = vsub.f32 %v1087_v40, %v754_v56 }
 0x166   : >> { %v613_v6 = vsel %vm1564_vm3, %v612_v58, %v609_v29  ;;  %v634_v7 = vsel %vm1564_vm3, %v633_v59, %v1069_v30  ;;  %v655_v8 = vsel %vm1564_vm3, %v654_v60, %v1072_v32  ;;  %v676_v9 = vsel %vm1564_vm3, %v675_v61, %v1075_v19 }
 0x167   : >> { %v621_v20 = vsel %vm1524_vm13, %v607_v33, %v613_v6  ;;  %v642_v10 = vsel %vm1531_vm15, %v1068_v34, %v634_v7  ;;  %v663_v11 = vsel %vm1540_vm0, %v1071_v42, %v655_v8  ;;  %v684_v12 = vsel %vm1549_vm1, %v1074_v44, %v676_v9 }
 0x168   : >> { %622 = vst [vmem:[%s1516_s3] sm:$0xff] %v621_v20  ;;  %1070 = vst [vmem:[%s1516_s3 + $0x8] sm:$0xff] %v642_v10  ;;  %v697_v13 = vsel %vm1564_vm3, %v696_v1, %v1078_v36  ;;  %v718_v14 = vsel %vm1564_vm3, %v717_v2, %v1081_v37  ;;  %v739_v15 = vsel %vm1564_vm3, %v738_v3, %v1084_v39 }
 0x169   : >> { %1073 = vst [vmem:[%s1516_s3 + $0x10] sm:$0xff] %v663_v11  ;;  %1076 = vst [vmem:[%s1516_s3 + $0x18] sm:$0xff] %v684_v12  ;;  %v760_v16 = vsel %vm1564_vm3, %v759_v4, %v1087_v40  ;;  %v705_v18 = vsel %vm1578_vm8, %v1077_v45, %v697_v13  ;;  %v726_v21 = vsel %vm1586_vm9, %v1080_v47, %v718_v14 }
 0x16a   : >> { %v747_v0 = vsel %vm1594_vm10, %v1083_v48, %v739_v15  ;;  %v768_v22 = vsel %vm1602_vm11, %v1086_v49, %v760_v16  ;;  %1079 = vst [vmem:[%s1516_s3 + $0x20] sm:$0xff] %v705_v18  ;;  %1082 = vst [vmem:[%s1516_s3 + $0x28] sm:$0xff] %v726_v21 }
 0x16b   : >> { %1085 = vst [vmem:[%s1516_s3 + $0x30] sm:$0xff] %v747_v0  ;;  %1088 = vst [vmem:[%s1516_s3 + $0x38] sm:$0xff] %v768_v22 }
 0x16e   : > { %232 = sbr.rel (!%p230_p10) target bundleno = 48 (0x30), region = 238 }
 0x172   : >> { %v771_v23 = vld [vmem:[%s770_s8] ss:$0 sm:$0xff] }
 0x173   : >> { %v776_v24 = vsel %vm1429_vm6, %v1402_v31, %v771_v23 }
 0x174   : >> { %777 = vst [vmem:[%s770_s8] sm:$0x1] %v776_v24 }
 0x175   : > { %p863_p11 = scmp.lt.s32.totalorder (%p1309_p4), %s1216_s11, 0  ;;  %s864_s27 = ssub.s32 (%p1309_p4), 0, %s1216_s11  ;;  %v887_v63 = vld [vmem:[%s186_s22] sm:$0x3] (%p1309_p4) }
 0x176   : > { %s1094_s28 = smin.u32 (%p1309_p4), %s1216_s11, %s864_s27 }
 0x17a   : > { %862 = sbr.rel (!%p1309_p4) target bundleno = 390 (0x186), region = 99 }
 0x17b   : > { %v841_v31 = vld [vmem:[%s1331_s3] sm:$0xff]  ;;  %v843_v53 = vld [vmem:[%s1331_s3 + $0x8] sm:$0xff]  ;;  %v845_v26 = vld [vmem:[%s1331_s3 + $0x10] sm:$0xff] }
 0x17c   : > { %v847_v27 = vld [vmem:[%s1331_s3 + $0x18] sm:$0xff]  ;;  %v849_v28 = vld [vmem:[%s1331_s3 + $0x20] sm:$0xff]  ;;  %v851_v29 = vld [vmem:[%s1331_s3 + $0x28] sm:$0xff]  ;;  %842 = vst [vmem:[%s799_s25] sm:$0xff] %v841_v31 }
 0x17d   : > { %v853_v30 = vld [vmem:[%s1331_s3 + $0x30] sm:$0xff]  ;;  %v855_v32 = vld [vmem:[%s1331_s3 + $0x38] sm:$0xff]  ;;  %844 = vst [vmem:[%s799_s25 + $0x8] sm:$0xff] %v843_v53  ;;  %846 = vst [vmem:[%s799_s25 + $0x10] sm:$0xff] %v845_v26  ;;  %s866_s3 = sshrl.u32 (%p1309_p4), %s1094_s28, 3 }
 0x17e   : > { %848 = vst [vmem:[%s799_s25 + $0x18] sm:$0xff] %v847_v27  ;;  %850 = vst [vmem:[%s799_s25 + $0x20] sm:$0xff] %v849_v28  ;;  %s867_s9 = ssub.s32 (%p1309_p4), 0, %s866_s3 }
 0x17f   : > { %852 = vst [vmem:[%s799_s25 + $0x28] sm:$0xff] %v851_v29  ;;  %854 = vst [vmem:[%s799_s25 + $0x30] sm:$0xff] %v853_v30 }
 0x180   : > { %856 = vst [vmem:[%s799_s25 + $0x38] sm:$0xff] %v855_v32 }
 0x181   : > { %s1740_s9 = smov (!%p863_p11, %s867_s9), %s866_s3 }
 0x182   : > { %s869_s4 = sadd.s32 %s1220_s12, %s1740_s9 }
 0x183   : > { %s1095_s5 = sshll.u32 %s869_s4, 1 }
 0x184   : > { %s871_s29 = scalar_lea.vmem %s1703_s2, %s1095_s5 }
 0x185   : > { %888 = vst [vmem:[%s871_s29] sm:$0x3] %v887_v63 }
 0x186 PF: > { %s9_s15 = sadd.s32 1, %s1232_s15   ;;  %s1727_s9 = smov %s1212_s10 }
 0x187   : > { %p6_p12 = scmp.ge.s32.totalorder %s9_s15, 6   ;;  %s1728_s10 = smov %s1314_s30 }
 0x188   : > { %s1729_s11 = smov %s1224_s13  ;;  %s1730_s12 = smov %s1228_s14 }
 0x189   : > { %s1731_s13 = smov %s1734_s16  ;;  %s1732_s14 = smov %s1738_s17 }
 0x18a   :  { %8 = sbr.rel (!%p6_p12) target bundleno = 4 (0x4), region = 249 }

// kernel: custom-call.51
= control target key start
LH: loop header
LB: loop body
LE: loop exit
PB: predicated region body
PF: predicated region fallthrough
CT: control target
= control target key end

     0   :  { %s882_s6 = smov 0   ;;  %s884_s7 = smov 0   ;;  %s1118_s0 = inlined_call_operand.vmem [shape: f32[2,2,32,32], index: 0, kind: input, shape index: {}]   ;;  %s1119_s1 = inlined_call_operand.vmem [shape: f32[2,2,32,32], index: 1, kind: output, shape index: {}]  }
   0x1   :  { %s886_s8 = smov 0   ;;  %s888_s9 = smov 0  }
   0x2   :  { %s890_s10 = smov 0  }
   0x3 LB: > { %s742_s11 = sadd.s32 4294967295, %s869_s10   ;;  %s16_s12 = sadd.s32 1, %s861_s8  ;;  %s869_s10 = sphi %s890_s10, %s7_s10   ;;  %s865_s9 = sphi %s888_s9, %s1123_s9   ;;  %s861_s8 = sphi %s886_s8, %s1122_s8   ;;  %s857_s7 = sphi %s884_s7, %s1121_s7   ;;  %s853_s6 = sphi %s882_s6, %s1120_s6  }
   0x4   : > { %p17_p0 = scmp.ge.s32.totalorder %s16_s12, 2  ;;  %s19_s13 = sadd.s32 1, %s865_s9 }
   0x5   : > { %p744_p2 = scmp.ge.s32.totalorder %s869_s10, 4 }
   0x6   : > { %s1125_s12 = smov (%p17_p0, %s16_s12), 0  ;;  %s1127_s13 = smov (!%p17_p0, %s19_s13), %s865_s9 }
   0x7   : > { %p21_p1 = scmp.ge.s32.totalorder %s1127_s13, 2  ;;  %33 = sbr.rel (%p744_p2) target bundleno = 16 (0x10), region = 16 }
   0x8   : > { %s35_s14 = sand.u32 (!%p744_p2), 1, %s869_s10   ;;  %s746_s15 = sshll.u32 (!%p744_p2), %s865_s9, 1 }
   0x9   : > { %s1129_s13 = smov (%p21_p1, %s1127_s13), 0  ;;  %s745_s16 = sshll.u32 (!%p744_p2), %s35_s14, 5 }
   0xa   : > { %s39_s17 = sadd.s32 (!%p744_p2), %s861_s8, %s746_s15  ;;  %s37_s22 = scalar_lea.vmem (!%p744_p2), [#allocation0], %s745_s16 }
   0xb   : > { %s747_s18 = sshll.u32 (!%p744_p2), %s39_s17, 5 }
   0xc   : > { %s41_s21 = scalar_lea.vmem (!%p744_p2), %s1118_s0, %s747_s18 }
   0xd   : > { %v54_v0 = vld [vmem:[%s41_s21] sm:$0xff] (!%p744_p2)  ;;  %v56_v1 = vld [vmem:[%s41_s21 + $0x8] sm:$0xff] (!%p744_p2)  ;;  %v58_v2 = vld [vmem:[%s41_s21 + $0x10] sm:$0xff] (!%p744_p2) }
   0xe   : > { %55 = vst [vmem:[%s37_s22] sm:$0xff] %v54_v0  ;;  %57 = vst [vmem:[%s37_s22 + $0x8] sm:$0xff] %v56_v1  ;;  %v60_v3 = vld [vmem:[%s41_s21 + $0x18] sm:$0xff] }
   0xf   : > { %59 = vst [vmem:[%s37_s22 + $0x10] sm:$0xff] %v58_v2  ;;  %61 = vst [vmem:[%s37_s22 + $0x18] sm:$0xff] %v60_v3 }
  0x10 PF: > { %p748_p3 = scmp.ge.s32.totalorder %s869_s10, 1  ;;  %p66_p4 = scmp.lt.s32.totalorder %s869_s10, 5 }
  0x12   : > { %p67_p5 = pnand %p748_p3, %p66_p4 }
  0x13   : > { %s73_s23 = sand.u32 (!%p67_p5), 1, %s742_s11   ;;  %v84_v4 = vlaneseq (!%p67_p5)  ;;  %vm119_vm0 = vcmask (!%p67_p5), 261120   ;;  %v871_v44 = vmov (!%p67_p5), 0.0   ;;  %s786_s26 = sshll.u32 (!%p67_p5), %s857_s7, 1 }
  0x14   : > { %70 = sbr.rel (%p67_p5) target bundleno = 4526 (0x11ae), region = 39  ;;  %s749_s24 = sshll.u32 (!%p67_p5), %s73_s23, 5 }
  0x15   : > { %v924_v5 = vand.u32 (!%p67_p5), 127, %v84_v4  ;;  %v926_v6 = vshrl.u32 (!%p67_p5), %v84_v4, 7  ;;  %s928_s25 = scalar_lea.vmem (!%p67_p5), [#allocation0], %s749_s24  ;;  %s662_s27 = sadd.s32 (!%p67_p5), %s853_s6, %s786_s26 }
  0x16   : > { %v90_v7 = vld [vmem:[%s928_s25] sm:$0xff] (!%p67_p5)  ;;  %v758_v40 = vld [vmem:[%s928_s25 + $0x8] ss:$0 sm:$0xff] (!%p67_p5)  ;;  %v759_v50 = vld [vmem:[%s928_s25 + $0x9] ss:$0 sm:$0xff] (!%p67_p5)  ;;  %s787_s28 = sshll.u32 (!%p67_p5), %s662_s27, 5 }
  0x17   : > { %v751_v8 = vld [vmem:[%s928_s25 + $0x1] ss:$0 sm:$0xff] (!%p67_p5)  ;;  %vm89_vm1 = vcmp.eq.s32.totalorder (!%p67_p5), %v924_v5, %v926_v6  ;;  %vm93_vm2 = vcmp.eq.s32.totalorder (!%p67_p5), %v924_v5, 0  ;;  %v752_v13 = vld [vmem:[%s928_s25 + $0x2] ss:$0 sm:$0xff] (!%p67_p5)  ;;  %vm123_vm3 = vcmp.eq.s32.totalorder (!%p67_p5), %v924_v5, 1  ;;  %s664_s2 = scalar_lea.vmem (!%p67_p5), %s1119_s1, %s787_s28 }
  0x18   : > { %v120_v9 = vsel (!%p67_p5), %vm119_vm0, %v751_v8, 0.0  ;;  %v94_v10 = vsel (!%p67_p5), %vm93_vm2, %v90_v7, 1.0  ;;  %v131_v14 = vsel (!%p67_p5), %vm119_vm0, %v752_v13, 0.0  ;;  %v753_v18 = vld [vmem:[%s928_s25 + $0x3] ss:$0 sm:$0xff] (!%p67_p5)  ;;  %vm134_vm4 = vcmp.eq.s32.totalorder (!%p67_p5), %v924_v5, 2 }
  0x19   : > { %v95_v11 = vsel (!%p67_p5), %vm89_vm1, %v94_v10, 0.0  ;;  %v142_v19 = vsel (!%p67_p5), %vm119_vm0, %v753_v18, 0.0  ;;  %v754_v23 = vld [vmem:[%s928_s25 + $0x4] ss:$0 sm:$0xff] (!%p67_p5)  ;;  %vm145_vm5 = vcmp.eq.s32.totalorder (!%p67_p5), %v924_v5, 3  ;;  %vm156_vm6 = vcmp.eq.s32.totalorder (!%p67_p5), %v924_v5, 4 }
  0x1a   : > { %v124_v12 = vmul.f32 (!%p67_p5), %v120_v9, %v95_v11  ;;  %v153_v24 = vsel (!%p67_p5), %vm119_vm0, %v754_v23, 0.0  ;;  %v755_v28 = vld [vmem:[%s928_s25 + $0x5] ss:$0 sm:$0xff] (!%p67_p5)  ;;  %v756_v33 = vld [vmem:[%s928_s25 + $0x6] ss:$0 sm:$0xff] (!%p67_p5)  ;;  %vm167_vm7 = vcmp.eq.s32.totalorder (!%p67_p5), %v924_v5, 5 }
  0x1b   : > { %v164_v29 = vsel %vm119_vm0, %v755_v28, 0.0  ;;  %v175_v34 = vsel %vm119_vm0, %v756_v33, 0.0  ;;  %v100_v38 = vadd.s32 8, %v926_v6  ;;  %v757_v39 = vld [vmem:[%s928_s25 + $0x7] ss:$0 sm:$0xff]  ;;  %vm178_vm8 = vcmp.eq.s32.totalorder %v924_v5, 6 }
  0x1c   : > { %125 = vadd.xlane.f32.xlu0 %v124_v12  ;;  %v186_v41 = vsel %vm119_vm0, %v757_v39, 0.0  ;;  %v197_v46 = vsel %vm119_vm0, %v758_v40, 0.0  ;;  %vm189_vm10 = vcmp.eq.s32.totalorder %v924_v5, 7  ;;  %vm200_vm11 = vcmp.eq.s32.totalorder %v924_v5, 8  ;;  %v760_v58 = vld [vmem:[%s928_s25 + $0xa] ss:$0 sm:$0xff] }
  0x1d   : > { %vm101_vm9 = vcmp.eq.s32.totalorder %v924_v5, %v100_v38  ;;  %v212_v53 = vsel %vm119_vm0, %v759_v50, 0.0  ;;  %vm215_vm12 = vcmp.eq.s32.totalorder %v924_v5, 9  ;;  %v227_v61 = vsel %vm119_vm0, %v760_v58, 0.0  ;;  %v761_v2 = vld [vmem:[%s928_s25 + $0xb] ss:$0 sm:$0xff] }
  0x1e   : > { %v102_v45 = vsel %vm101_vm9, 1.0, %v871_v44  ;;  %vm230_vm13 = vcmp.eq.s32.totalorder %v924_v5, 10  ;;  %v242_v7 = vsel %vm119_vm0, %v761_v2, 0.0  ;;  %v762_v12 = vld [vmem:[%s928_s25 + $0xc] ss:$0 sm:$0xff]  ;;  %vm245_vm14 = vcmp.eq.s32.totalorder %v924_v5, 11 }
  0x1f   : > { %v205_v48 = vmul.f32 %v197_v46, %v102_v45  ;;  %vm260_vm15 = vcmp.eq.s32.totalorder %v924_v5, 12  ;;  %v764_v28 = vld [vmem:[%s928_s25 + $0xe] ss:$0 sm:$0xff]  ;;  %vm275_vm1 = vcmp.eq.s32.totalorder %v924_v5, 13  ;;  %vm290_vm2 = vcmp.eq.s32.totalorder %v924_v5, 14 }
  0x20   : > { %vm396_vm9 = vcmp.eq.s32.totalorder %v924_v5, 20 }
  0xa9   : > { %v126_v15 = vpop.xlane.xlu0 %125 }
  0xaa   : > { %v127_v16 = vsel %vm123_vm3, %v126_v15, %v95_v11  ;;  %v257_v15 = vsel %vm119_vm0, %v762_v12, 0.0  ;;  %vm305_vm3 = vcmp.eq.s32.totalorder %v924_v5, 15 }
  0xab   : > { %v135_v17 = vmul.f32 %v131_v14, %v127_v16 }
  0xad   : > { %136 = vadd.xlane.f32.xlu0 %v135_v17 }
 0x13a   : > { %v137_v20 = vpop.xlane.xlu0 %136 }
 0x13b   : > { %v138_v21 = vsel %vm134_vm4, %v137_v20, %v127_v16  ;;  %v763_v20 = vld [vmem:[%s928_s25 + $0xd] ss:$0 sm:$0xff] }
 0x13c   : > { %v146_v22 = vmul.f32 %v142_v19, %v138_v21  ;;  %v272_v23 = vsel %vm119_vm0, %v763_v20, 0.0 }
 0x13e   : > { %147 = vadd.xlane.f32.xlu1 %v146_v22 }
 0x1cb   : > { %v148_v25 = vpop.xlane.xlu1 %147 }
 0x1cc   : > { %v149_v26 = vsel %vm145_vm5, %v148_v25, %v138_v21  ;;  %vm320_vm5 = vcmp.eq.s32.totalorder %v924_v5, 16 }
 0x1cd   : > { %v157_v27 = vmul.f32 %v153_v24, %v149_v26 }
 0x1cf   : > { %158 = vadd.xlane.f32.xlu1 %v157_v27 }
 0x25c   : > { %v159_v30 = vpop.xlane.xlu1 %158 }
 0x25d   : > { %v160_v31 = vsel %vm156_vm6, %v159_v30, %v149_v26  ;;  %vm339_vm6 = vcmp.eq.s32.totalorder %v924_v5, 17 }
 0x25e   : > { %v168_v32 = vmul.f32 %v164_v29, %v160_v31 }
 0x260   : > { %169 = vadd.xlane.f32.xlu0 %v168_v32 }
 0x2ed   : > { %v170_v35 = vpop.xlane.xlu0 %169 }
 0x2ee   : > { %v171_v36 = vsel %vm167_vm7, %v170_v35, %v160_v31  ;;  %v287_v31 = vsel %vm119_vm0, %v764_v28, 0.0  ;;  %vm358_vm7 = vcmp.eq.s32.totalorder %v924_v5, 18 }
 0x2ef   : > { %v179_v37 = vmul.f32 %v175_v34, %v171_v36 }
 0x2f1   : > { %180 = vadd.xlane.f32.xlu1 %v179_v37 }
 0x37e   : > { %v181_v42 = vpop.xlane.xlu1 %180 }
 0x37f   : > { %v182_v43 = vsel %vm178_vm8, %v181_v42, %v171_v36  ;;  %v765_v36 = vld [vmem:[%s928_s25 + $0xf] ss:$0 sm:$0xff]  ;;  %vm377_vm8 = vcmp.eq.s32.totalorder %v924_v5, 19 }
 0x380   : > { %v190_v47 = vmul.f32 %v186_v41, %v182_v43  ;;  %v302_v39 = vsel %vm119_vm0, %v765_v36, 0.0 }
 0x382   : > { %191 = vadd.xlane.f32.xlu0 %v190_v47 }
 0x386   : > { %206 = vadd.xlane.f32.xlu0 %v205_v48 }
 0x40f   : > { %v192_v49 = vpop.xlane.xlu0 %191 }
 0x410   : > { %v193_v51 = vsel %vm189_vm10, %v192_v49, %v182_v43  ;;  %vm415_vm10 = vcmp.eq.s32.totalorder %v924_v5, 21 }
 0x411   : > { %v201_v52 = vmul.f32 %v197_v46, %v193_v51 }
 0x413   : > { %202 = vadd.xlane.f32.xlu1 %v201_v52  ;;  %v207_v54 = vpop.xlane.xlu0 %206  ;;  %v107_v52 = vadd.s32 16, %v926_v6 }
 0x414   : > { %v208_v55 = vsel %vm200_vm11, %v207_v54, %v102_v45  ;;  %v766_v45 = vld [vmem:[%s928_s25 + $0x10] ss:$0 sm:$0xff] }
 0x415   : > { %v220_v56 = vmul.f32 %v212_v53, %v208_v55  ;;  %v317_v48 = vsel %vm119_vm0, %v766_v45, 0.0  ;;  %vm108_vm4 = vcmp.eq.s32.totalorder %v924_v5, %v107_v52 }
 0x417   : > { %221 = vadd.xlane.f32.xlu0 %v220_v56 }
 0x4a0   : > { %v203_v57 = vpop.xlane.xlu1 %202 }
 0x4a1   : > { %v204_v59 = vsel %vm200_vm11, %v203_v57, %v193_v51  ;;  %vm434_vm11 = vcmp.eq.s32.totalorder %v924_v5, 22 }
 0x4a2   : > { %v216_v60 = vmul.f32 %v212_v53, %v204_v59 }
 0x4a4   : > { %217 = vadd.xlane.f32.xlu1 %v216_v60  ;;  %v222_v62 = vpop.xlane.xlu0 %221 }
 0x4a5   : > { %v223_v63 = vsel %vm215_vm12, %v222_v62, %v208_v55  ;;  %v109_v55 = vsel %vm108_vm4, 1.0, %v871_v44  ;;  %vm587_vm4 = vcmp.eq.s32.totalorder %v924_v5, 29 }
 0x4a6   : > { %v235_v0 = vmul.f32 %v227_v61, %v223_v63  ;;  %v329_v58 = vmul.f32 %v317_v48, %v109_v55 }
 0x4a8   : > { %236 = vadd.xlane.f32.xlu0 %v235_v0 }
 0x531   : > { %v218_v1 = vpop.xlane.xlu1 %217 }
 0x532   : > { %v219_v3 = vsel %vm215_vm12, %v218_v1, %v204_v59  ;;  %v767_v59 = vld [vmem:[%s928_s25 + $0x11] ss:$0 sm:$0xff]  ;;  %vm453_vm12 = vcmp.eq.s32.totalorder %v924_v5, 23 }
 0x533   : > { %v231_v4 = vmul.f32 %v227_v61, %v219_v3  ;;  %v336_v61 = vsel %vm119_vm0, %v767_v59, 0.0 }
 0x535   : > { %232 = vadd.xlane.f32.xlu1 %v231_v4  ;;  %v237_v8 = vpop.xlane.xlu0 %236 }
 0x536   : > { %v238_v9 = vsel %vm230_vm13, %v237_v8, %v223_v63 }
 0x537   : > { %v250_v10 = vmul.f32 %v242_v7, %v238_v9 }
 0x539   : > { %251 = vadd.xlane.f32.xlu0 %v250_v10 }
 0x5c2   : > { %v233_v11 = vpop.xlane.xlu1 %232 }
 0x5c3   : > { %v234_v13 = vsel %vm230_vm13, %v233_v11, %v219_v3  ;;  %v768_v3 = vld [vmem:[%s928_s25 + $0x12] ss:$0 sm:$0xff] }
 0x5c4   : > { %v246_v14 = vmul.f32 %v242_v7, %v234_v13  ;;  %v355_v8 = vsel %vm119_vm0, %v768_v3, 0.0 }
 0x5c6   : > { %247 = vadd.xlane.f32.xlu1 %v246_v14  ;;  %v252_v16 = vpop.xlane.xlu0 %251 }
 0x5c7   : > { %v253_v17 = vsel %vm245_vm14, %v252_v16, %v238_v9  ;;  %v769_v16 = vld [vmem:[%s928_s25 + $0x13] ss:$0 sm:$0xff] }
 0x5c8   : > { %v265_v18 = vmul.f32 %v257_v15, %v253_v17 }
 0x5ca   : > { %266 = vadd.xlane.f32.xlu0 %v265_v18 }
 0x653   : > { %v248_v19 = vpop.xlane.xlu1 %247 }
 0x654   : > { %v249_v21 = vsel %vm245_vm14, %v248_v19, %v234_v13  ;;  %v374_v19 = vsel %vm119_vm0, %v769_v16, 0.0  ;;  %vm472_vm14 = vcmp.eq.s32.totalorder %v924_v5, 24 }
 0x655   : > { %v261_v22 = vmul.f32 %v257_v15, %v249_v21 }
 0x657   : > { %262 = vadd.xlane.f32.xlu1 %v261_v22  ;;  %v267_v24 = vpop.xlane.xlu0 %266 }
 0x658   : > { %v268_v25 = vsel %vm260_vm15, %v267_v24, %v253_v17 }
 0x659   : > { %v280_v26 = vmul.f32 %v272_v23, %v268_v25 }
 0x65b   : > { %281 = vadd.xlane.f32.xlu0 %v280_v26 }
 0x6e4   : > { %v263_v27 = vpop.xlane.xlu1 %262 }
 0x6e5   : > { %v264_v29 = vsel %vm260_vm15, %v263_v27, %v249_v21  ;;  %v770_v27 = vld [vmem:[%s928_s25 + $0x14] ss:$0 sm:$0xff]  ;;  %vm495_vm15 = vcmp.eq.s32.totalorder %v924_v5, 25 }
 0x6e6   : > { %v276_v30 = vmul.f32 %v272_v23, %v264_v29 }
 0x6e8   : > { %277 = vadd.xlane.f32.xlu1 %v276_v30  ;;  %v282_v32 = vpop.xlane.xlu0 %281  ;;  %v393_v30 = vsel %vm119_vm0, %v770_v27, 0.0 }
 0x6e9   : > { %v283_v33 = vsel %vm275_vm1, %v282_v32, %v268_v25 }
 0x6ea   : > { %v295_v34 = vmul.f32 %v287_v31, %v283_v33 }
 0x6ec   : > { %296 = vadd.xlane.f32.xlu0 %v295_v34 }
 0x775   : > { %v278_v35 = vpop.xlane.xlu1 %277 }
 0x776   : > { %v279_v37 = vsel %vm275_vm1, %v278_v35, %v264_v29  ;;  %vm518_vm1 = vcmp.eq.s32.totalorder %v924_v5, 26 }
 0x777   : > { %v291_v38 = vmul.f32 %v287_v31, %v279_v37 }
 0x779   : > { %292 = vadd.xlane.f32.xlu1 %v291_v38  ;;  %v297_v40 = vpop.xlane.xlu0 %296  ;;  %v771_v38 = vld [vmem:[%s928_s25 + $0x15] ss:$0 sm:$0xff] }
 0x77a   : > { %v298_v41 = vsel %vm290_vm2, %v297_v40, %v283_v33 }
 0x77b   : > { %v310_v42 = vmul.f32 %v302_v39, %v298_v41 }
 0x77d   : > { %311 = vadd.xlane.f32.xlu0 %v310_v42 }
 0x806   : > { %v293_v43 = vpop.xlane.xlu1 %292 }
 0x807   : > { %v294_v46 = vsel %vm290_vm2, %v293_v43, %v279_v37  ;;  %vm541_vm2 = vcmp.eq.s32.totalorder %v924_v5, 27 }
 0x808   : > { %v306_v47 = vmul.f32 %v302_v39, %v294_v46 }
 0x80a   : > { %307 = vadd.xlane.f32.xlu1 %v306_v47  ;;  %v312_v49 = vpop.xlane.xlu0 %311 }
 0x80b   : > { %v313_v50 = vsel %vm305_vm3, %v312_v49, %v298_v41  ;;  %v412_v41 = vsel %vm119_vm0, %v771_v38, 0.0 }
 0x80c   : > { %v325_v51 = vmul.f32 %v317_v48, %v313_v50 }
 0x80e   : > { %326 = vadd.xlane.f32.xlu0 %v325_v51 }
 0x897   : > { %v308_v53 = vpop.xlane.xlu1 %307 }
 0x898   : > { %v309_v54 = vsel %vm305_vm3, %v308_v53, %v294_v46  ;;  %vm564_vm3 = vcmp.eq.s32.totalorder %v924_v5, 28 }
 0x899   : > { %v321_v56 = vmul.f32 %v317_v48, %v309_v54 }
 0x89b   : > { %322 = vadd.xlane.f32.xlu1 %v321_v56  ;;  %v327_v57 = vpop.xlane.xlu0 %326 }
 0x89c   : > { %v328_v60 = vsel %vm320_vm5, %v327_v57, %v313_v50  ;;  %v772_v50 = vld [vmem:[%s928_s25 + $0x16] ss:$0 sm:$0xff] }
 0x89d   : > { %v344_v62 = vmul.f32 %v336_v61, %v328_v60  ;;  %v431_v53 = vsel %vm119_vm0, %v772_v50, 0.0 }
 0x89f   : > { %330 = vadd.xlane.f32.xlu1 %v329_v58 }
 0x8a3   : > { %345 = vadd.xlane.f32.xlu1 %v344_v62 }
 0x928   : > { %v323_v63 = vpop.xlane.xlu1 %322 }
 0x929   : > { %v324_v0 = vsel %vm320_vm5, %v323_v63, %v309_v54 }
 0x92a   : > { %v340_v1 = vmul.f32 %v336_v61, %v324_v0 }
 0x92c   : > { %v331_v2 = vpop.xlane.xlu1 %330  ;;  %341 = vadd.xlane.f32.xlu0 %v340_v1 }
 0x92d   : > { %v332_v4 = vsel %vm320_vm5, %v331_v2, %v109_v55  ;;  %vm610_vm5 = vcmp.eq.s32.totalorder %v924_v5, 30 }
 0x92e   : > { %v348_v7 = vmul.f32 %v336_v61, %v332_v4  ;;  %v773_v61 = vld [vmem:[%s928_s25 + $0x17] ss:$0 sm:$0xff] }
 0x930   : > { %349 = vadd.xlane.f32.xlu0 %v348_v7  ;;  %v346_v9 = vpop.xlane.xlu1 %345 }
 0x931   : > { %v347_v10 = vsel %vm339_vm6, %v346_v9, %v328_v60  ;;  %v114_v9 = vadd.s32 24, %v926_v6 }
 0x932   : > { %v363_v11 = vmul.f32 %v355_v8, %v347_v10 }
 0x933   : > { %vm115_vm13 = vcmp.eq.s32.totalorder %v924_v5, %v114_v9 }
 0x934   : > { %364 = vadd.xlane.f32.xlu0 %v363_v11  ;;  %v774_v11 = vld [vmem:[%s928_s25 + $0x18] ss:$0 sm:$0xff] }
 0x9b9   : > { %v342_v12 = vpop.xlane.xlu0 %341 }
 0x9ba   : > { %v343_v13 = vsel %vm339_vm6, %v342_v12, %v324_v0  ;;  %v450_v0 = vsel %vm119_vm0, %v773_v61, 0.0 }
 0x9bb   : > { %v359_v14 = vmul.f32 %v355_v8, %v343_v13 }
 0x9bd   : > { %360 = vadd.xlane.f32.xlu1 %v359_v14  ;;  %v350_v15 = vpop.xlane.xlu0 %349  ;;  %v469_v14 = vsel %vm119_vm0, %v774_v11, 0.0 }
 0x9be   : > { %v351_v17 = vsel %vm339_vm6, %v350_v15, %v332_v4 }
 0x9bf   : > { %v367_v18 = vmul.f32 %v355_v8, %v351_v17 }
 0x9c1   : > { %368 = vadd.xlane.f32.xlu1 %v367_v18  ;;  %v365_v20 = vpop.xlane.xlu0 %364 }
 0x9c2   : > { %v366_v21 = vsel %vm358_vm7, %v365_v20, %v347_v10 }
 0x9c3   : > { %v382_v22 = vmul.f32 %v374_v19, %v366_v21 }
 0x9c5   : > { %383 = vadd.xlane.f32.xlu1 %v382_v22 }
 0xa4a   : > { %v361_v23 = vpop.xlane.xlu1 %360 }
 0xa4b   : > { %v362_v24 = vsel %vm358_vm7, %v361_v23, %v343_v13  ;;  %v775_v23 = vld [vmem:[%s928_s25 + $0x19] ss:$0 sm:$0xff] }
 0xa4c   : > { %v378_v25 = vmul.f32 %v374_v19, %v362_v24 }
 0xa4e   : > { %379 = vadd.xlane.f32.xlu0 %v378_v25  ;;  %v369_v26 = vpop.xlane.xlu1 %368 }
 0xa4f   : > { %v370_v28 = vsel %vm358_vm7, %v369_v26, %v351_v17  ;;  %v116_v17 = vsel %vm115_vm13, 1.0, %v871_v44  ;;  %v492_v44 = vsel %vm119_vm0, %v775_v23, 0.0 }
 0xa50   : > { %v386_v29 = vmul.f32 %v374_v19, %v370_v28  ;;  %v485_v18 = vmul.f32 %v469_v14, %v116_v17 }
 0xa52   : > { %387 = vadd.xlane.f32.xlu0 %v386_v29  ;;  %v384_v31 = vpop.xlane.xlu1 %383 }
 0xa53   : > { %v385_v32 = vsel %vm377_vm8, %v384_v31, %v366_v21 }
 0xa54   : > { %v401_v33 = vmul.f32 %v393_v30, %v385_v32 }
 0xa56   : > { %402 = vadd.xlane.f32.xlu0 %v401_v33 }
 0xadb   : > { %v380_v34 = vpop.xlane.xlu0 %379 }
 0xadc   : > { %v381_v35 = vsel %vm377_vm8, %v380_v34, %v362_v24 }
 0xadd   : > { %v397_v36 = vmul.f32 %v393_v30, %v381_v35 }
 0xadf   : > { %398 = vadd.xlane.f32.xlu1 %v397_v36  ;;  %v388_v37 = vpop.xlane.xlu0 %387  ;;  %v776_v36 = vld [vmem:[%s928_s25 + $0x1a] ss:$0 sm:$0xff] }
 0xae0   : > { %v389_v39 = vsel %vm377_vm8, %v388_v37, %v370_v28 }
 0xae1   : > { %v405_v40 = vmul.f32 %v393_v30, %v389_v39 }
 0xae3   : > { %406 = vadd.xlane.f32.xlu1 %v405_v40  ;;  %v403_v42 = vpop.xlane.xlu0 %402 }
 0xae4   : > { %v404_v43 = vsel %vm396_vm9, %v403_v42, %v385_v32 }
 0xae5   : > { %v420_v45 = vmul.f32 %v412_v41, %v404_v43 }
 0xae7   : > { %421 = vadd.xlane.f32.xlu1 %v420_v45 }
 0xb6c   : > { %v399_v46 = vpop.xlane.xlu1 %398 }
 0xb6d   : > { %v400_v47 = vsel %vm396_vm9, %v399_v46, %v381_v35 }
 0xb6e   : > { %v416_v48 = vmul.f32 %v412_v41, %v400_v47 }
 0xb70   : > { %417 = vadd.xlane.f32.xlu0 %v416_v48  ;;  %v407_v49 = vpop.xlane.xlu1 %406 }
 0xb71   : > { %v408_v51 = vsel %vm396_vm9, %v407_v49, %v389_v39  ;;  %v515_v39 = vsel %vm119_vm0, %v776_v36, 0.0 }
 0xb72   : > { %v424_v52 = vmul.f32 %v412_v41, %v408_v51 }
 0xb74   : > { %425 = vadd.xlane.f32.xlu0 %v424_v52  ;;  %v422_v54 = vpop.xlane.xlu1 %421 }
 0xb75   : > { %v423_v55 = vsel %vm415_vm10, %v422_v54, %v404_v43 }
 0xb76   : > { %v439_v56 = vmul.f32 %v431_v53, %v423_v55 }
 0xb78   : > { %440 = vadd.xlane.f32.xlu0 %v439_v56 }
 0xbfd   : > { %v418_v57 = vpop.xlane.xlu0 %417 }
 0xbfe   : > { %v419_v58 = vsel %vm415_vm10, %v418_v57, %v400_v47 }
 0xbff   : > { %v435_v59 = vmul.f32 %v431_v53, %v419_v58 }
 0xc01   : > { %436 = vadd.xlane.f32.xlu1 %v435_v59  ;;  %v426_v60 = vpop.xlane.xlu0 %425 }
 0xc02   : > { %v427_v62 = vsel %vm415_vm10, %v426_v60, %v408_v51  ;;  %v777_v51 = vld [vmem:[%s928_s25 + $0x1b] ss:$0 sm:$0xff] }
 0xc03   : > { %v443_v63 = vmul.f32 %v431_v53, %v427_v62  ;;  %v538_v54 = vsel %vm119_vm0, %v777_v51, 0.0 }
 0xc05   : > { %444 = vadd.xlane.f32.xlu1 %v443_v63  ;;  %v441_v1 = vpop.xlane.xlu0 %440 }
 0xc06   : > { %v442_v2 = vsel %vm434_vm11, %v441_v1, %v423_v55  ;;  %v778_v1 = vld [vmem:[%s928_s25 + $0x1c] ss:$0 sm:$0xff] }
 0xc07   : > { %v458_v3 = vmul.f32 %v450_v0, %v442_v2 }
 0xc09   : > { %459 = vadd.xlane.f32.xlu1 %v458_v3 }
 0xc8e   : > { %v437_v4 = vpop.xlane.xlu1 %436 }
 0xc8f   : > { %v438_v7 = vsel %vm434_vm11, %v437_v4, %v419_v58  ;;  %v561_v4 = vsel %vm119_vm0, %v778_v1, 0.0 }
 0xc90   : > { %v454_v8 = vmul.f32 %v450_v0, %v438_v7 }
 0xc92   : > { %455 = vadd.xlane.f32.xlu0 %v454_v8  ;;  %v445_v10 = vpop.xlane.xlu1 %444 }
 0xc93   : > { %v446_v12 = vsel %vm434_vm11, %v445_v10, %v427_v62 }
 0xc94   : > { %v462_v13 = vmul.f32 %v450_v0, %v446_v12 }
 0xc96   : > { %463 = vadd.xlane.f32.xlu0 %v462_v13  ;;  %v460_v15 = vpop.xlane.xlu1 %459 }
 0xc97   : > { %v461_v16 = vsel %vm453_vm12, %v460_v15, %v442_v2 }
 0xc98   : > { %v477_v6 = vmul.f32 %v469_v14, %v461_v16 }
 0xc9a   : > { %478 = vadd.xlane.f32.xlu0 %v477_v6 }
 0xc9e   : > { %486 = vadd.xlane.f32.xlu0 %v485_v18 }
 0xd1f   : > { %v456_v19 = vpop.xlane.xlu0 %455 }
 0xd20   : > { %v457_v20 = vsel %vm453_vm12, %v456_v19, %v438_v7 }
 0xd21   : > { %v473_v21 = vmul.f32 %v469_v14, %v457_v20 }
 0xd23   : > { %474 = vadd.xlane.f32.xlu1 %v473_v21  ;;  %v464_v22 = vpop.xlane.xlu0 %463 }
 0xd24   : > { %v465_v24 = vsel %vm453_vm12, %v464_v22, %v446_v12 }
 0xd25   : > { %v481_v25 = vmul.f32 %v469_v14, %v465_v24 }
 0xd27   : > { %482 = vadd.xlane.f32.xlu1 %v481_v25  ;;  %v479_v26 = vpop.xlane.xlu0 %478 }
 0xd28   : > { %v480_v27 = vsel %vm472_vm14, %v479_v26, %v461_v16 }
 0xd29   : > { %v500_v28 = vmul.f32 %v492_v44, %v480_v27 }
 0xd2b   : > { %501 = vadd.xlane.f32.xlu0 %v500_v28  ;;  %v487_v29 = vpop.xlane.xlu0 %486 }
 0xd2c   : > { %v488_v30 = vsel %vm472_vm14, %v487_v29, %v116_v17  ;;  %v779_v17 = vld [vmem:[%s928_s25 + $0x1d] ss:$0 sm:$0xff]  ;;  %v780_v29 = vld [vmem:[%s928_s25 + $0x1e] ss:$0 sm:$0xff] }
 0xd2d   : > { %v508_v31 = vmul.f32 %v492_v44, %v488_v30  ;;  %v584_v19 = vsel %vm119_vm0, %v779_v17, 0.0 }
 0xd2f   : > { %509 = vadd.xlane.f32.xlu0 %v508_v31 }
 0xdb0   : > { %v475_v32 = vpop.xlane.xlu1 %474 }
 0xdb1   : > { %v476_v33 = vsel %vm472_vm14, %v475_v32, %v457_v20  ;;  %v607_v32 = vsel %vm119_vm0, %v780_v29, 0.0 }
 0xdb2   : > { %v496_v34 = vmul.f32 %v492_v44, %v476_v33 }
 0xdb4   : > { %497 = vadd.xlane.f32.xlu1 %v496_v34  ;;  %v483_v35 = vpop.xlane.xlu1 %482 }
 0xdb5   : > { %v484_v37 = vsel %vm472_vm14, %v483_v35, %v465_v24 }
 0xdb6   : > { %v504_v38 = vmul.f32 %v492_v44, %v484_v37 }
 0xdb8   : > { %505 = vadd.xlane.f32.xlu1 %v504_v38  ;;  %v502_v40 = vpop.xlane.xlu0 %501 }
 0xdb9   : > { %v503_v41 = vsel %vm495_vm15, %v502_v40, %v480_v27 }
 0xdba   : > { %v523_v42 = vmul.f32 %v515_v39, %v503_v41 }
 0xdbc   : > { %524 = vadd.xlane.f32.xlu0 %v523_v42  ;;  %v510_v43 = vpop.xlane.xlu0 %509 }
 0xdbd   : > { %v511_v45 = vsel %vm495_vm15, %v510_v43, %v488_v30  ;;  %v781_v43 = vld [vmem:[%s928_s25 + $0x1f] ss:$0 sm:$0xff] }
 0xdbe   : > { %v531_v46 = vmul.f32 %v515_v39, %v511_v45 }
 0xdc0   : > { %532 = vadd.xlane.f32.xlu0 %v531_v46 }
 0xe41   : > { %v498_v47 = vpop.xlane.xlu1 %497 }
 0xe42   : > { %v499_v48 = vsel %vm495_vm15, %v498_v47, %v476_v33  ;;  %v630_v47 = vsel %vm119_vm0, %v781_v43, 0.0  ;;  %vm633_vm0 = vcmp.eq.s32.totalorder %v924_v5, 31 }
 0xe43   : > { %v519_v49 = vmul.f32 %v515_v39, %v499_v48 }
 0xe45   : > { %520 = vadd.xlane.f32.xlu1 %v519_v49  ;;  %v506_v50 = vpop.xlane.xlu1 %505 }
 0xe46   : > { %v507_v52 = vsel %vm495_vm15, %v506_v50, %v484_v37 }
 0xe47   : > { %v527_v53 = vmul.f32 %v515_v39, %v507_v52 }
 0xe49   : > { %528 = vadd.xlane.f32.xlu1 %v527_v53  ;;  %v525_v55 = vpop.xlane.xlu0 %524 }
 0xe4a   : > { %v526_v56 = vsel %vm518_vm1, %v525_v55, %v503_v41 }
 0xe4b   : > { %v546_v57 = vmul.f32 %v538_v54, %v526_v56 }
 0xe4d   : > { %547 = vadd.xlane.f32.xlu0 %v546_v57  ;;  %v533_v58 = vpop.xlane.xlu0 %532 }
 0xe4e   : > { %v534_v59 = vsel %vm518_vm1, %v533_v58, %v511_v45 }
 0xe4f   : > { %v554_v60 = vmul.f32 %v538_v54, %v534_v59 }
 0xe51   : > { %555 = vadd.xlane.f32.xlu0 %v554_v60 }
 0xed2   : > { %v521_v61 = vpop.xlane.xlu1 %520 }
 0xed3   : > { %v522_v62 = vsel %vm518_vm1, %v521_v61, %v499_v48 }
 0xed4   : > { %v542_v63 = vmul.f32 %v538_v54, %v522_v62 }
 0xed6   : > { %543 = vadd.xlane.f32.xlu1 %v542_v63  ;;  %v529_v0 = vpop.xlane.xlu1 %528 }
 0xed7   : > { %v530_v2 = vsel %vm518_vm1, %v529_v0, %v507_v52 }
 0xed8   : > { %v550_v3 = vmul.f32 %v538_v54, %v530_v2 }
 0xeda   : > { %551 = vadd.xlane.f32.xlu1 %v550_v3  ;;  %v548_v7 = vpop.xlane.xlu0 %547 }
 0xedb   : > { %v549_v8 = vsel %vm541_vm2, %v548_v7, %v526_v56 }
 0xedc   : > { %v569_v9 = vmul.f32 %v561_v4, %v549_v8 }
 0xede   : > { %570 = vadd.xlane.f32.xlu0 %v569_v9  ;;  %v556_v10 = vpop.xlane.xlu0 %555 }
 0xedf   : > { %v557_v11 = vsel %vm541_vm2, %v556_v10, %v534_v59 }
 0xee0   : > { %v577_v12 = vmul.f32 %v561_v4, %v557_v11 }
 0xee2   : > { %578 = vadd.xlane.f32.xlu0 %v577_v12 }
 0xf63   : > { %v544_v13 = vpop.xlane.xlu1 %543 }
 0xf64   : > { %v545_v14 = vsel %vm541_vm2, %v544_v13, %v522_v62 }
 0xf65   : > { %v565_v15 = vmul.f32 %v561_v4, %v545_v14 }
 0xf67   : > { %566 = vadd.xlane.f32.xlu1 %v565_v15  ;;  %v552_v16 = vpop.xlane.xlu1 %551 }
 0xf68   : > { %v553_v6 = vsel %vm541_vm2, %v552_v16, %v530_v2 }
 0xf69   : > { %v573_v18 = vmul.f32 %v561_v4, %v553_v6 }
 0xf6b   : > { %574 = vadd.xlane.f32.xlu1 %v573_v18  ;;  %v571_v20 = vpop.xlane.xlu0 %570 }
 0xf6c   : > { %v572_v21 = vsel %vm564_vm3, %v571_v20, %v549_v8 }
 0xf6d   : > { %v592_v22 = vmul.f32 %v584_v19, %v572_v21 }
 0xf6f   : > { %593 = vadd.xlane.f32.xlu0 %v592_v22  ;;  %v579_v23 = vpop.xlane.xlu0 %578 }
 0xf70   : > { %v580_v24 = vsel %vm564_vm3, %v579_v23, %v557_v11 }
 0xf71   : > { %v600_v25 = vmul.f32 %v584_v19, %v580_v24 }
 0xf73   : > { %601 = vadd.xlane.f32.xlu0 %v600_v25 }
 0xff4   : > { %v567_v44 = vpop.xlane.xlu1 %566 }
 0xff5   : > { %v568_v26 = vsel %vm564_vm3, %v567_v44, %v545_v14 }
 0xff6   : > { %v588_v27 = vmul.f32 %v584_v19, %v568_v26 }
 0xff8   : > { %589 = vadd.xlane.f32.xlu1 %v588_v27  ;;  %v575_v28 = vpop.xlane.xlu1 %574 }
 0xff9   : > { %v576_v30 = vsel %vm564_vm3, %v575_v28, %v553_v6 }
 0xffa   : > { %v596_v31 = vmul.f32 %v584_v19, %v576_v30 }
 0xffc   : > { %597 = vadd.xlane.f32.xlu1 %v596_v31  ;;  %v594_v33 = vpop.xlane.xlu0 %593 }
 0xffd   : > { %v595_v34 = vsel %vm587_vm4, %v594_v33, %v572_v21 }
 0xffe   : > { %v615_v35 = vmul.f32 %v607_v32, %v595_v34 }
0x1000   : > { %616 = vadd.xlane.f32.xlu0 %v615_v35  ;;  %v602_v36 = vpop.xlane.xlu0 %601 }
0x1001   : > { %v603_v37 = vsel %vm587_vm4, %v602_v36, %v580_v24 }
0x1002   : > { %v623_v38 = vmul.f32 %v607_v32, %v603_v37 }
0x1004   : > { %624 = vadd.xlane.f32.xlu0 %v623_v38 }
0x1085   : > { %v590_v39 = vpop.xlane.xlu1 %589 }
0x1086   : > { %v591_v40 = vsel %vm587_vm4, %v590_v39, %v568_v26 }
0x1087   : > { %v611_v41 = vmul.f32 %v607_v32, %v591_v40 }
0x1089   : > { %612 = vadd.xlane.f32.xlu1 %v611_v41  ;;  %v598_v42 = vpop.xlane.xlu1 %597 }
0x108a   : > { %v599_v45 = vsel %vm587_vm4, %v598_v42, %v576_v30 }
0x108b   : > { %v619_v46 = vmul.f32 %v607_v32, %v599_v45 }
0x108d   : > { %620 = vadd.xlane.f32.xlu1 %v619_v46  ;;  %v617_v48 = vpop.xlane.xlu0 %616 }
0x108e   : > { %v618_v49 = vsel %vm610_vm5, %v617_v48, %v595_v34 }
0x108f   : > { %v638_v50 = vmul.f32 %v630_v47, %v618_v49 }
0x1091   : > { %639 = vadd.xlane.f32.xlu0 %v638_v50  ;;  %v625_v51 = vpop.xlane.xlu0 %624 }
0x1092   : > { %v626_v52 = vsel %vm610_vm5, %v625_v51, %v603_v37 }
0x1093   : > { %v646_v53 = vmul.f32 %v630_v47, %v626_v52 }
0x1095   : > { %647 = vadd.xlane.f32.xlu0 %v646_v53 }
0x1116   : > { %v613_v54 = vpop.xlane.xlu1 %612 }
0x1117   : > { %v614_v55 = vsel %vm610_vm5, %v613_v54, %v591_v40 }
0x1118   : > { %v634_v56 = vmul.f32 %v630_v47, %v614_v55 }
0x111a   : > { %635 = vadd.xlane.f32.xlu1 %v634_v56  ;;  %v621_v57 = vpop.xlane.xlu1 %620 }
0x111b   : > { %v622_v58 = vsel %vm610_vm5, %v621_v57, %v599_v45 }
0x111c   : > { %v642_v59 = vmul.f32 %v630_v47, %v622_v58 }
0x111e   : > { %643 = vadd.xlane.f32.xlu1 %v642_v59  ;;  %v640_v60 = vpop.xlane.xlu0 %639 }
0x111f   : > { %v641_v61 = vsel %vm633_vm0, %v640_v60, %v618_v49 }
0x1120   : > { %680 = vst [vmem:[%s664_s2 + $0x8] sm:$0xff] %v641_v61 }
0x1122   : > { %v648_v62 = vpop.xlane.xlu0 %647 }
0x1123   : > { %v649_v63 = vsel %vm633_vm0, %v648_v62, %v626_v52 }
0x1124   : > { %684 = vst [vmem:[%s664_s2 + $0x18] sm:$0xff] %v649_v63 }
0x11a7   : > { %v636_v0 = vpop.xlane.xlu1 %635 }
0x11a8   : > { %v637_v1 = vsel %vm633_vm0, %v636_v0, %v614_v55 }
0x11a9   : > { %678 = vst [vmem:[%s664_s2] sm:$0xff] %v637_v1 }
0x11ab   : > { %v644_v2 = vpop.xlane.xlu1 %643 }
0x11ac   : > { %v645_v3 = vsel %vm633_vm0, %v644_v2, %v622_v58 }
0x11ad   : > { %682 = vst [vmem:[%s664_s2 + $0x10] sm:$0xff] %v645_v3 }
0x11ae PF: > { %s7_s10 = sadd.s32 1, %s869_s10   ;;  %s1120_s6 = smov %s861_s8 }
0x11af   : > { %p4_p6 = scmp.ge.s32.totalorder %s7_s10, 6   ;;  %s1121_s7 = smov %s865_s9 }
0x11b0   : > { %s1122_s8 = smov %s1125_s12  ;;  %s1123_s9 = smov %s1129_s13 }
0x11b1   :  { %6 = sbr.rel (!%p4_p6) target bundleno = 3 (0x3), region = 122 }

// kernel: custom-call.43
= control target key start
LH: loop header
LB: loop body
LE: loop exit
PB: predicated region body
PF: predicated region fallthrough
CT: control target
= control target key end

     0   :  { %s6_s0 = inlined_call_operand.hbm [shape: pred[2,2], index: 0, kind: output, shape index: {}]  }

// kernel: custom-call.48
= control target key start
LH: loop header
LB: loop body
LE: loop exit
PB: predicated region body
PF: predicated region fallthrough
CT: control target
= control target key end

     0   :  { %s2094_s6 = smov 0   ;;  %s2096_s7 = smov 0   ;;  %s2579_s0 = inlined_call_operand.vmem [shape: f32[2,2,32,32], index: 0, kind: input, shape index: {}]   ;;  %s2580_s1 = inlined_call_operand.vmem [shape: f32[2,2,32,32], index: 1, kind: output, shape index: {}]  }
   0x1   :  { %s2098_s8 = smov 0   ;;  %s2100_s9 = smov 0  }
   0x2   :  { %s2102_s10 = smov 0  }
   0x3 LB: > { %s1640_s11 = sadd.s32 4294967295, %s2081_s10   ;;  %s29_s12 = sadd.s32 1, %s2073_s8  ;;  %s2081_s10 = sphi %s2102_s10, %s7_s10   ;;  %s2077_s9 = sphi %s2100_s9, %s2584_s9   ;;  %s2073_s8 = sphi %s2098_s8, %s2583_s8   ;;  %s2069_s7 = sphi %s2096_s7, %s2582_s7   ;;  %s2065_s6 = sphi %s2094_s6, %s2581_s6  }
   0x4   : > { %p31_p0 = scmp.ge.s32.totalorder %s29_s12, 2  ;;  %s33_s13 = sadd.s32 1, %s2077_s9 }
   0x5   : > { %p1642_p2 = scmp.ge.s32.totalorder %s2081_s10, 4 }
   0x6   : > { %s2586_s12 = smov (%p31_p0, %s29_s12), 0  ;;  %s2588_s13 = smov (!%p31_p0, %s33_s13), %s2077_s9 }
   0x7   : > { %p35_p1 = scmp.ge.s32.totalorder %s2588_s13, 2  ;;  %47 = sbr.rel (%p1642_p2) target bundleno = 17 (0x11), region = 16 }
   0x8   : > { %s49_s14 = sand.u32 (!%p1642_p2), 1, %s2081_s10   ;;  %s1644_s15 = sshll.u32 (!%p1642_p2), %s2073_s8, 2 }
   0x9   : > { %s2590_s13 = smov (%p35_p1, %s2588_s13), 0  ;;  %s1643_s16 = sshll.u32 (!%p1642_p2), %s49_s14, 5 }
   0xa   : > { %s1645_s17 = sshll.u32 (!%p1642_p2), %s2077_s9, 3  ;;  %s51_s23 = scalar_lea.vmem (!%p1642_p2), [#allocation0], %s1643_s16 }
   0xb   : > { %s56_s18 = sadd.s32 (!%p1642_p2), %s1645_s17, %s1644_s15 }
   0xc   : > { %s1646_s19 = sshll.u32 (!%p1642_p2), %s56_s18, 3 }
   0xd   : > { %s58_s22 = scalar_lea.vmem (!%p1642_p2), %s2579_s0, %s1646_s19 }
   0xe   : > { %v92_v0 = vld [vmem:[%s58_s22] sm:$0xff]  ;;  %v94_v1 = vld [vmem:[%s58_s22 + $0x8] sm:$0xff]  ;;  %v96_v2 = vld [vmem:[%s58_s22 + $0x10] sm:$0xff] }
   0xf   : > { %93 = vst [vmem:[%s51_s23] sm:$0xff] %v92_v0  ;;  %95 = vst [vmem:[%s51_s23 + $0x8] sm:$0xff] %v94_v1  ;;  %v98_v3 = vld [vmem:[%s58_s22 + $0x18] sm:$0xff] }
  0x10   : > { %97 = vst [vmem:[%s51_s23 + $0x10] sm:$0xff] %v96_v2  ;;  %99 = vst [vmem:[%s51_s23 + $0x18] sm:$0xff] %v98_v3 }
  0x11 PF: > { %p1647_p3 = scmp.ge.s32.totalorder %s2081_s10, 1  ;;  %p104_p4 = scmp.lt.s32.totalorder %s2081_s10, 5 }
  0x13   : > { %p105_p5 = pnand %p1647_p3, %p104_p4 }
  0x14   : > { %s111_s24 = sand.u32 (!%p105_p5), 1, %s1640_s11   ;;  %v2083_v4 = vmov (!%p105_p5), 0.0   ;;  %vm129_vm0 = vcmask (!%p105_p5), 7168   ;;  %vm186_vm1 = vcmask (!%p105_p5), 15368   ;;  %vm203_vm2 = vcmask (!%p105_p5), 1047553   ;;  %s1932_s28 = sshll.u32 (!%p105_p5), %s2065_s6, 2 }
  0x15   : > { %108 = sbr.rel (%p105_p5) target bundleno = 5462 (0x1556), region = 54  ;;  %s1648_s25 = sshll.u32 (!%p105_p5), %s111_s24, 5  ;;  %vm204_vm3 = vmand (!%p105_p5), %vm186_vm1, %vm203_vm2  ;;  %vm247_vm4 = vcmask (!%p105_p5), 23568   ;;  %vm264_vm5 = vcmask (!%p105_p5), 1047554   ;;  %vm308_vm7 = vcmask (!%p105_p5), 31768   ;;  %vm325_vm8 = vcmask (!%p105_p5), 1047555  }
  0x16   : > { %s2138_s26 = scalar_lea.vmem (!%p105_p5), [#allocation1], %s1648_s25  ;;  %s2142_s27 = scalar_lea.vmem (!%p105_p5), [#allocation0], %s1648_s25  ;;  %vm265_vm6 = vmand (!%p105_p5), %vm247_vm4, %vm264_vm5  ;;  %vm369_vm10 = vcmask (!%p105_p5), 39968   ;;  %vm386_vm11 = vcmask (!%p105_p5), 1047556   ;;  %vm430_vm13 = vcmask (!%p105_p5), 48168   ;;  %vm447_vm14 = vcmask (!%p105_p5), 1047557  }
  0x17   : > { %122 = vst [vmem:[%s2138_s26] sm:$0xff] (!%p105_p5), %v2083_v4  ;;  %v131_v8 = vld [vmem:[%s2142_s27] ss:$0 sm:$0xff] (!%p105_p5)  ;;  %v2153_v17 = vld [vmem:[%s2142_s27 + $0x8] sm:$0xff] (!%p105_p5)  ;;  %v1663_v26 = vld [vmem:[%s2142_s27 + $0x1] ss:$0 sm:$0xff] (!%p105_p5)  ;;  %s1933_s29 = sshll.u32 (!%p105_p5), %s2069_s7, 3 }
  0x18   : > { %v2146_v12 = vld [vmem:[%s2142_s27] sm:$0xff] (!%p105_p5)  ;;  %v2174_v32 = vld [vmem:[%s2142_s27 + $0x10] sm:$0xff] (!%p105_p5)  ;;  %v2197_v57 = vld [vmem:[%s2142_s27 + $0x18] sm:$0xff] (!%p105_p5)  ;;  %s1527_s30 = sadd.s32 (!%p105_p5), %s1933_s29, %s1932_s28 }
  0x19   : > { %v1674_v50 = vld [vmem:[%s2142_s27 + $0x2] ss:$0 sm:$0xff] (!%p105_p5)  ;;  %vm326_vm9 = vmand (!%p105_p5), %vm308_vm7, %vm325_vm8  ;;  %s1934_s2 = sshll.u32 (!%p105_p5), %s1527_s30, 3 }
  0x1a   : > { %vm387_vm12 = vmand (!%p105_p5), %vm369_vm10, %vm386_vm11  ;;  %s2535_s5 = scalar_lea.vmem (!%p105_p5), %s2580_s1, %s1934_s2 }
  0x1b   : > { %vm448_vm15 = vmand (!%p105_p5), %vm430_vm13, %vm447_vm14 }
  0x1e   : > { %v130_v5 = vld [vmem:[%s2138_s26] ss:$0 sm:$0xff] }
  0x1f   : > { %v132_v6 = vmul.f32 %v130_v5, %v130_v5  ;;  %v151_v7 = vmul.f32 0.0, %v130_v5 }
  0x21   : > { %133 = vadd.xlane.f32.xlu0 %v132_v6  ;;  %152 = vadd.xlane.f32.xlu1 %v151_v7 }
  0x25   : > { %140 = vadd.xlane.f32.xlu0 %v151_v7 }
  0xae   : > { %v134_v9 = vpop.xlane.xlu0 %133  ;;  %v153_v16 = vpop.xlane.xlu1 %152 }
  0xaf   : > { %v135_v10 = vsub.f32 %v131_v8, %v134_v9  ;;  %v154_v19 = vsub.f32 %v2153_v17, %v153_v16 }
  0xb1   : > { %1978 = vrsqrt.f32 %v135_v10 }
  0xb2   : > { %v141_v11 = vpop.xlane.xlu0 %140 }
  0xb3   : > { %v142_v13 = vsub.f32 %v2146_v12, %v141_v11 }
  0xbb   : > { %v2149_v14 = vpop.eup %1978 }
  0xbc   : > { %v143_v15 = vmul.f32 %v2149_v14, %v142_v13  ;;  %v155_v20 = vmul.f32 %v2149_v14, %v154_v19 }
  0xbe   : > { %v144_v18 = vsel %vm129_vm0, %v143_v15, 0.0  ;;  %v156_v21 = vsel %vm129_vm0, %v155_v20, 0.0 }
  0xbf   : > { %146 = vst [vmem:[%s2138_s26] sm:$0xff] %v144_v18 }
  0xc6   : > { %v2161_v22 = vld [vmem:[%s2138_s26 + $0x1] ss:$0 sm:$0xff] }
  0xc7   : > { %v198_v23 = vmul.f32 %v2161_v22, %v144_v18  ;;  %v191_v24 = vmul.f32 %v2161_v22, %v2161_v22  ;;  %v212_v25 = vmul.f32 %v2161_v22, %v156_v21 }
  0xc9   : > { %199 = vadd.xlane.f32.xlu0 %v198_v23  ;;  %192 = vadd.xlane.f32.xlu1 %v191_v24 }
  0xcd   : > { %213 = vadd.xlane.f32.xlu0 %v212_v25  ;;  %165 = vadd.xlane.f32.xlu1 %v151_v7 }
 0x156   : > { %v193_v27 = vpop.xlane.xlu1 %192  ;;  %v200_v29 = vpop.xlane.xlu0 %199 }
 0x157   : > { %v194_v28 = vsub.f32 %v1663_v26, %v193_v27  ;;  %v201_v30 = vsub.f32 %v2146_v12, %v200_v29 }
 0x159   : > { %1980 = vrsqrt.f32 %v194_v28 }
 0x15a   : > { %v166_v33 = vpop.xlane.xlu1 %165  ;;  %v214_v39 = vpop.xlane.xlu0 %213 }
 0x15b   : > { %v167_v36 = vsub.f32 %v2174_v32, %v166_v33  ;;  %v215_v40 = vsub.f32 %v2153_v17, %v214_v39 }
 0x15d   : > { %v168_v38 = vmul.f32 %v2149_v14, %v167_v36 }
 0x15f   : > { %v169_v41 = vsel %vm129_vm0, %v168_v38, 0.0 }
 0x160   : > { %v225_v47 = vmul.f32 %v2161_v22, %v169_v41 }
 0x163   : > { %v2169_v31 = vpop.eup %1980 }
 0x164   : > { %v202_v34 = vmul.f32 %v2169_v31, %v201_v30  ;;  %v216_v42 = vmul.f32 %v2169_v31, %v215_v40 }
 0x166   : > { %v205_v35 = vsel %vm204_vm3, %v202_v34, 0.0  ;;  %v217_v46 = vsel %vm186_vm1, %v216_v42, 0.0 }
 0x167   : > { %v206_v37 = vadd.f32 %v205_v35, %v144_v18  ;;  %v218_v48 = vadd.f32 %v217_v46, %v156_v21  ;;  %v1685_v18 = vld [vmem:[%s2142_s27 + $0x3] ss:$0 sm:$0xff] }
 0x169   : > { %207 = vst [vmem:[%s2138_s26] sm:$0xff] %v206_v37 }
 0x170   : > { %v2184_v43 = vld [vmem:[%s2138_s26 + $0x2] ss:$0 sm:$0xff] }
 0x171   : > { %v259_v44 = vmul.f32 %v2184_v43, %v206_v37  ;;  %v252_v45 = vmul.f32 %v2184_v43, %v2184_v43  ;;  %v273_v49 = vmul.f32 %v2184_v43, %v218_v48 }
 0x173   : > { %260 = vadd.xlane.f32.xlu0 %v259_v44  ;;  %253 = vadd.xlane.f32.xlu1 %v252_v45 }
 0x177   : > { %178 = vadd.xlane.f32.xlu1 %v151_v7  ;;  %226 = vadd.xlane.f32.xlu0 %v225_v47 }
 0x17b   : > { %274 = vadd.xlane.f32.xlu1 %v273_v49 }
 0x200   : > { %v254_v51 = vpop.xlane.xlu1 %253  ;;  %v261_v53 = vpop.xlane.xlu0 %260 }
 0x201   : > { %v255_v52 = vsub.f32 %v1674_v50, %v254_v51  ;;  %v262_v54 = vsub.f32 %v2146_v12, %v261_v53  ;;  %v1696_v50 = vld [vmem:[%s2142_s27 + $0x4] ss:$0 sm:$0xff] }
 0x203   : > { %1982 = vrsqrt.f32 %v255_v52 }
 0x204   : > { %v227_v56 = vpop.xlane.xlu0 %226  ;;  %v179_v58 = vpop.xlane.xlu1 %178 }
 0x205   : > { %v228_v60 = vsub.f32 %v2174_v32, %v227_v56  ;;  %v180_v61 = vsub.f32 %v2197_v57, %v179_v58 }
 0x207   : > { %v229_v0 = vmul.f32 %v2169_v31, %v228_v60  ;;  %v181_v1 = vmul.f32 %v2149_v14, %v180_v61 }
 0x208   : > { %v275_v2 = vpop.xlane.xlu1 %274 }
 0x209   : > { %v230_v3 = vsel %vm186_vm1, %v229_v0, 0.0  ;;  %v182_v4 = vsel %vm129_vm0, %v181_v1, 0.0  ;;  %v276_v5 = vsub.f32 %v2153_v17, %v275_v2  ;;  %vm491_vm0 = vcmask 56368  }
 0x20a   : > { %v231_v8 = vadd.f32 %v230_v3, %v169_v41  ;;  %v238_v14 = vmul.f32 %v2161_v22, %v182_v4 }
 0x20c   : > { %v286_v13 = vmul.f32 %v2184_v43, %v231_v8 }
 0x20d   : > { %v2194_v55 = vpop.eup %1982 }
 0x20e   : > { %v263_v59 = vmul.f32 %v2194_v55, %v262_v54  ;;  %v277_v6 = vmul.f32 %v2194_v55, %v276_v5 }
 0x210   : > { %v266_v62 = vsel %vm265_vm6, %v263_v59, 0.0  ;;  %v278_v11 = vsel %vm247_vm4, %v277_v6, 0.0  ;;  %vm613_vm6 = vcmask 72768  }
 0x211   : > { %v267_v63 = vadd.f32 %v266_v62, %v206_v37  ;;  %v279_v15 = vadd.f32 %v278_v11, %v218_v48 }
 0x213   : > { %268 = vst [vmem:[%s2138_s26] sm:$0xff] %v267_v63 }
 0x21a   : > { %v2212_v7 = vld [vmem:[%s2138_s26 + $0x3] ss:$0 sm:$0xff] }
 0x21b   : > { %v320_v9 = vmul.f32 %v2212_v7, %v267_v63  ;;  %v313_v10 = vmul.f32 %v2212_v7, %v2212_v7  ;;  %v334_v16 = vmul.f32 %v2212_v7, %v279_v15 }
 0x21d   : > { %321 = vadd.xlane.f32.xlu1 %v320_v9  ;;  %314 = vadd.xlane.f32.xlu0 %v313_v10 }
 0x221   : > { %287 = vadd.xlane.f32.xlu1 %v286_v13  ;;  %239 = vadd.xlane.f32.xlu0 %v238_v14 }
 0x225   : > { %335 = vadd.xlane.f32.xlu0 %v334_v16 }
 0x2aa   : > { %v315_v19 = vpop.xlane.xlu0 %314  ;;  %v322_v21 = vpop.xlane.xlu1 %321 }
 0x2ab   : > { %v316_v20 = vsub.f32 %v1685_v18, %v315_v19  ;;  %v323_v23 = vsub.f32 %v2146_v12, %v322_v21  ;;  %v1707_v19 = vld [vmem:[%s2142_s27 + $0x5] ss:$0 sm:$0xff] }
 0x2ad   : > { %1984 = vrsqrt.f32 %v316_v20 }
 0x2ae   : > { %v240_v22 = vpop.xlane.xlu0 %239  ;;  %v288_v25 = vpop.xlane.xlu1 %287 }
 0x2af   : > { %v241_v28 = vsub.f32 %v2197_v57, %v240_v22  ;;  %v289_v29 = vsub.f32 %v2174_v32, %v288_v25 }
 0x2b1   : > { %v242_v33 = vmul.f32 %v2169_v31, %v241_v28  ;;  %v290_v34 = vmul.f32 %v2194_v55, %v289_v29 }
 0x2b2   : > { %v336_v35 = vpop.xlane.xlu0 %335 }
 0x2b3   : > { %v243_v36 = vsel %vm186_vm1, %v242_v33, 0.0  ;;  %v291_v37 = vsel %vm247_vm4, %v290_v34, 0.0  ;;  %v337_v38 = vsub.f32 %v2153_v17, %v336_v35  ;;  %vm508_vm1 = vcmask 1047558  }
 0x2b4   : > { %v244_v41 = vadd.f32 %v243_v36, %v182_v4  ;;  %v292_v42 = vadd.f32 %v291_v37, %v231_v8  ;;  %vm509_vm3 = vmand %vm491_vm0, %vm508_vm1 }
 0x2b6   : > { %v299_v46 = vmul.f32 %v2184_v43, %v244_v41  ;;  %v347_v47 = vmul.f32 %v2212_v7, %v292_v42 }
 0x2b7   : > { %v2223_v24 = vpop.eup %1984 }
 0x2b8   : > { %v324_v26 = vmul.f32 %v2223_v24, %v323_v23  ;;  %v338_v39 = vmul.f32 %v2223_v24, %v337_v38 }
 0x2ba   : > { %v327_v27 = vsel %vm326_vm9, %v324_v26, 0.0  ;;  %v339_v45 = vsel %vm308_vm7, %v338_v39, 0.0 }
 0x2bb   : > { %v328_v30 = vadd.f32 %v327_v27, %v267_v63  ;;  %v340_v48 = vadd.f32 %v339_v45, %v279_v15 }
 0x2bd   : > { %329 = vst [vmem:[%s2138_s26] sm:$0xff] %v328_v30 }
 0x2c4   : > { %v2238_v40 = vld [vmem:[%s2138_s26 + $0x4] ss:$0 sm:$0xff] }
 0x2c5   : > { %v381_v44 = vmul.f32 %v2238_v40, %v328_v30  ;;  %v374_v31 = vmul.f32 %v2238_v40, %v2238_v40  ;;  %v395_v49 = vmul.f32 %v2238_v40, %v340_v48 }
 0x2c7   : > { %382 = vadd.xlane.f32.xlu0 %v381_v44  ;;  %375 = vadd.xlane.f32.xlu1 %v374_v31 }
 0x2cb   : > { %300 = vadd.xlane.f32.xlu1 %v299_v46  ;;  %348 = vadd.xlane.f32.xlu0 %v347_v47 }
 0x2cf   : > { %396 = vadd.xlane.f32.xlu1 %v395_v49 }
 0x354   : > { %v376_v51 = vpop.xlane.xlu1 %375  ;;  %v383_v53 = vpop.xlane.xlu0 %382 }
 0x355   : > { %v377_v52 = vsub.f32 %v1696_v50, %v376_v51  ;;  %v384_v54 = vsub.f32 %v2146_v12, %v383_v53  ;;  %v1718_v51 = vld [vmem:[%s2142_s27 + $0x6] ss:$0 sm:$0xff] }
 0x357   : > { %1986 = vrsqrt.f32 %v377_v52 }
 0x358   : > { %v349_v43 = vpop.xlane.xlu0 %348  ;;  %v301_v58 = vpop.xlane.xlu1 %300 }
 0x359   : > { %v350_v60 = vsub.f32 %v2174_v32, %v349_v43  ;;  %v302_v61 = vsub.f32 %v2197_v57, %v301_v58 }
 0x35b   : > { %v351_v0 = vmul.f32 %v2223_v24, %v350_v60  ;;  %v303_v1 = vmul.f32 %v2194_v55, %v302_v61 }
 0x35c   : > { %v397_v2 = vpop.xlane.xlu1 %396 }
 0x35d   : > { %v352_v3 = vsel %vm308_vm7, %v351_v0, 0.0  ;;  %v304_v4 = vsel %vm247_vm4, %v303_v1, 0.0  ;;  %v398_v5 = vsub.f32 %v2153_v17, %v397_v2  ;;  %vm552_vm4 = vcmask 64568  }
 0x35e   : > { %v353_v9 = vadd.f32 %v352_v3, %v292_v42  ;;  %v305_v10 = vadd.f32 %v304_v4, %v244_v41 }
 0x360   : > { %v408_v14 = vmul.f32 %v2238_v40, %v353_v9  ;;  %v360_v15 = vmul.f32 %v2212_v7, %v305_v10 }
 0x361   : > { %v2249_v56 = vpop.eup %1986 }
 0x362   : > { %v385_v59 = vmul.f32 %v2249_v56, %v384_v54  ;;  %v399_v6 = vmul.f32 %v2249_v56, %v398_v5 }
 0x364   : > { %v388_v62 = vsel %vm387_vm12, %v385_v59, 0.0  ;;  %v400_v55 = vsel %vm369_vm10, %v399_v6, 0.0 }
 0x365   : > { %v389_v63 = vadd.f32 %v388_v62, %v328_v30  ;;  %v401_v16 = vadd.f32 %v400_v55, %v340_v48 }
 0x367   : > { %390 = vst [vmem:[%s2138_s26] sm:$0xff] %v389_v63 }
 0x36e   : > { %v2264_v8 = vld [vmem:[%s2138_s26 + $0x5] ss:$0 sm:$0xff] }
 0x36f   : > { %v442_v11 = vmul.f32 %v2264_v8, %v389_v63  ;;  %v435_v13 = vmul.f32 %v2264_v8, %v2264_v8  ;;  %v456_v18 = vmul.f32 %v2264_v8, %v401_v16 }
 0x371   : > { %443 = vadd.xlane.f32.xlu1 %v442_v11  ;;  %436 = vadd.xlane.f32.xlu0 %v435_v13 }
 0x375   : > { %409 = vadd.xlane.f32.xlu1 %v408_v14  ;;  %361 = vadd.xlane.f32.xlu0 %v360_v15 }
 0x379   : > { %457 = vadd.xlane.f32.xlu0 %v456_v18 }
 0x3fe   : > { %v437_v20 = vpop.xlane.xlu0 %436  ;;  %v444_v23 = vpop.xlane.xlu1 %443 }
 0x3ff   : > { %v438_v21 = vsub.f32 %v1707_v19, %v437_v20  ;;  %v445_v22 = vsub.f32 %v2146_v12, %v444_v23 }
 0x401   : > { %1988 = vrsqrt.f32 %v438_v21 }
 0x402   : > { %v362_v7 = vpop.xlane.xlu0 %361  ;;  %v410_v26 = vpop.xlane.xlu1 %409 }
 0x403   : > { %v363_v29 = vsub.f32 %v2197_v57, %v362_v7  ;;  %v411_v30 = vsub.f32 %v2174_v32, %v410_v26 }
 0x405   : > { %v364_v34 = vmul.f32 %v2223_v24, %v363_v29  ;;  %v412_v35 = vmul.f32 %v2249_v56, %v411_v30 }
 0x406   : > { %v458_v36 = vpop.xlane.xlu0 %457 }
 0x407   : > { %v365_v37 = vsel %vm308_vm7, %v364_v34, 0.0  ;;  %v413_v38 = vsel %vm369_vm10, %v412_v35, 0.0  ;;  %v459_v39 = vsub.f32 %v2153_v17, %v458_v36  ;;  %vm662_vm7 = vcmask 80968  }
 0x408   : > { %v366_v44 = vadd.f32 %v365_v37, %v305_v10  ;;  %v414_v31 = vadd.f32 %v413_v38, %v353_v9  ;;  %vm682_vm9 = vmand %vm662_vm7, %vm203_vm2 }
 0x40a   : > { %v421_v47 = vmul.f32 %v2238_v40, %v366_v44  ;;  %v469_v48 = vmul.f32 %v2264_v8, %v414_v31 }
 0x40b   : > { %v2275_v25 = vpop.eup %1988 }
 0x40c   : > { %v446_v27 = vmul.f32 %v2275_v25, %v445_v22  ;;  %v460_v41 = vmul.f32 %v2275_v25, %v459_v39  ;;  %v1729_v22 = vld [vmem:[%s2142_s27 + $0x7] ss:$0 sm:$0xff] }
 0x40e   : > { %v449_v28 = vsel %vm448_vm15, %v446_v27, 0.0  ;;  %v461_v24 = vsel %vm430_vm13, %v460_v41, 0.0 }
 0x40f   : > { %v450_v33 = vadd.f32 %v449_v28, %v389_v63  ;;  %v462_v49 = vadd.f32 %v461_v24, %v401_v16 }
 0x411   : > { %451 = vst [vmem:[%s2138_s26] sm:$0xff] %v450_v33 }
 0x418   : > { %v1717_v42 = vld [vmem:[%s2138_s26 + $0x6] ss:$0 sm:$0xff] }
 0x419   : > { %v503_v45 = vmul.f32 %v1717_v42, %v450_v33  ;;  %v496_v46 = vmul.f32 %v1717_v42, %v1717_v42  ;;  %v517_v50 = vmul.f32 %v1717_v42, %v462_v49 }
 0x41b   : > { %504 = vadd.xlane.f32.xlu0 %v503_v45  ;;  %497 = vadd.xlane.f32.xlu1 %v496_v46 }
 0x41f   : > { %422 = vadd.xlane.f32.xlu1 %v421_v47  ;;  %470 = vadd.xlane.f32.xlu0 %v469_v48 }
 0x423   : > { %518 = vadd.xlane.f32.xlu1 %v517_v50 }
 0x4a8   : > { %v498_v52 = vpop.xlane.xlu1 %497  ;;  %v505_v58 = vpop.xlane.xlu0 %504 }
 0x4a9   : > { %v499_v53 = vsub.f32 %v1718_v51, %v498_v52  ;;  %v506_v61 = vsub.f32 %v2146_v12, %v505_v58 }
 0x4ab   : > { %1990 = vrsqrt.f32 %v499_v53 }
 0x4ac   : > { %v423_v54 = vpop.xlane.xlu1 %422  ;;  %v471_v0 = vpop.xlane.xlu0 %470 }
 0x4ad   : > { %v424_v43 = vsub.f32 %v2197_v57, %v423_v54 }
 0x4af   : > { %v425_v59 = vmul.f32 %v2249_v56, %v424_v43  ;;  %v472_v56 = vsub.f32 %v2174_v32, %v471_v0  ;;  %v1740_v43 = vld [vmem:[%s2142_s27 + $0x8] ss:$0 sm:$0xff] }
 0x4b0   : > { %v519_v1 = vpop.xlane.xlu1 %518 }
 0x4b1   : > { %v426_v60 = vsel %vm369_vm10, %v425_v59, 0.0  ;;  %v520_v4 = vsub.f32 %v2153_v17, %v519_v1  ;;  %v473_v12 = vmul.f32 %v2275_v25, %v472_v56  ;;  %vm713_vm10 = vcmask 89168  }
 0x4b2   : > { %v427_v40 = vadd.f32 %v426_v60, %v366_v44  ;;  %vm733_vm12 = vmand %vm713_vm10, %vm264_vm5 }
 0x4b3   : > { %v474_v9 = vsel %vm430_vm13, %v473_v12, 0.0 }
 0x4b4   : > { %v482_v62 = vmul.f32 %v2264_v8, %v427_v40  ;;  %v475_v13 = vadd.f32 %v474_v9, %v414_v31 }
 0x4b5   : > { %v1991_v63 = vpop.eup %1990 }
 0x4b6   : > { %v507_v2 = vmul.f32 %v1991_v63, %v506_v61  ;;  %483 = vadd.xlane.f32.xlu1 %v482_v62  ;;  %v521_v6 = vmul.f32 %v1991_v63, %v520_v4  ;;  %v530_v15 = vmul.f32 %v1717_v42, %v475_v13 }
 0x4b8   : > { %v510_v3 = vsel %vm509_vm3, %v507_v2, 0.0  ;;  %v522_v8 = vsel %vm491_vm0, %v521_v6, 0.0 }
 0x4b9   : > { %v511_v5 = vadd.f32 %v510_v3, %v450_v33  ;;  %v523_v10 = vadd.f32 %v522_v8, %v462_v49 }
 0x4bb   : > { %512 = vst [vmem:[%s2138_s26] sm:$0xff] %v511_v5 }
 0x4c2   : > { %v1728_v11 = vld [vmem:[%s2138_s26 + $0x7] ss:$0 sm:$0xff] }
 0x4c3   : > { %v557_v55 = vmul.f32 %v1728_v11, %v1728_v11  ;;  %v578_v14 = vmul.f32 %v1728_v11, %v523_v10 }
 0x4c5   : > { %558 = vadd.xlane.f32.xlu0 %v557_v55  ;;  %579 = vadd.xlane.f32.xlu1 %v578_v14 }
 0x4c9   : > { %531 = vadd.xlane.f32.xlu0 %v530_v15  ;;  %v1751_v15 = vld [vmem:[%s2142_s27 + $0x9] ss:$0 sm:$0xff] }
 0x543   : > { %v484_v16 = vpop.xlane.xlu1 %483 }
 0x544   : > { %v485_v18 = vsub.f32 %v2197_v57, %v484_v16 }
 0x546   : > { %v486_v19 = vmul.f32 %v2275_v25, %v485_v18 }
 0x548   : > { %v487_v20 = vsel %vm430_vm13, %v486_v19, 0.0  ;;  %vm764_vm13 = vcmask 97368  }
 0x549   : > { %v488_v21 = vadd.f32 %v487_v20, %v427_v40  ;;  %vm784_vm15 = vmand %vm764_vm13, %vm325_vm8 }
 0x54b   : > { %v543_v23 = vmul.f32 %v1717_v42, %v488_v21 }
 0x54d   : > { %544 = vadd.xlane.f32.xlu0 %v543_v23 }
 0x552   : > { %v559_v7 = vpop.xlane.xlu0 %558  ;;  %v580_v30 = vpop.xlane.xlu1 %579 }
 0x553   : > { %v560_v26 = vsub.f32 %v1729_v22, %v559_v7  ;;  %v581_v25 = vsub.f32 %v2153_v17, %v580_v30 }
 0x555   : > { %1992 = vrsqrt.f32 %v560_v26 }
 0x556   : > { %v532_v27 = vpop.xlane.xlu0 %531 }
 0x557   : > { %v533_v28 = vsub.f32 %v2174_v32, %v532_v27 }
 0x559   : > { %v534_v29 = vmul.f32 %v1991_v63, %v533_v28 }
 0x55b   : > { %v535_v33 = vsel %vm491_vm0, %v534_v29, 0.0 }
 0x55c   : > { %v536_v34 = vadd.f32 %v535_v33, %v475_v13 }
 0x55e   : > { %v591_v35 = vmul.f32 %v1728_v11, %v536_v34 }
 0x55f   : > { %v2315_v36 = vpop.eup %1992 }
 0x560   : > { %v582_v37 = vmul.f32 %v2315_v36, %v581_v25  ;;  %592 = vadd.xlane.f32.xlu1 %v591_v35 }
 0x562   : > { %v583_v38 = vsel %vm552_vm4, %v582_v37, 0.0 }
 0x563   : > { %v584_v39 = vadd.f32 %v583_v38, %v523_v10 }
 0x565   : > { %1732 = vst [vmem:[%s2138_s26 + $0x8] sm:$0xff] %v584_v39 }
 0x56c   : > { %v1739_v41 = vld [vmem:[%s2138_s26 + $0x8] ss:$0 sm:$0xff] }
 0x56d   : > { %v627_v42 = vmul.f32 %v1739_v41, %v584_v39  ;;  %v618_v44 = vmul.f32 %v1739_v41, %v1739_v41 }
 0x56f   : > { %628 = vadd.xlane.f32.xlu1 %v627_v42  ;;  %619 = vadd.xlane.f32.xlu0 %v618_v44 }
 0x5da   : > { %v545_v31 = vpop.xlane.xlu0 %544 }
 0x5db   : > { %v546_v45 = vsub.f32 %v2197_v57, %v545_v31  ;;  %v1762_v31 = vld [vmem:[%s2142_s27 + $0xa] ss:$0 sm:$0xff] }
 0x5dd   : > { %v547_v46 = vmul.f32 %v1991_v63, %v546_v45 }
 0x5df   : > { %v548_v24 = vsel %vm491_vm0, %v547_v46, 0.0  ;;  %vm815_vm0 = vcmask 105568  }
 0x5e0   : > { %v549_v47 = vadd.f32 %v548_v24, %v488_v21  ;;  %vm835_vm3 = vmand %vm815_vm0, %vm386_vm11 }
 0x5e2   : > { %v604_v48 = vmul.f32 %v1728_v11, %v549_v47 }
 0x5e4   : > { %605 = vadd.xlane.f32.xlu0 %v604_v48 }
 0x5ed   : > { %v593_v49 = vpop.xlane.xlu1 %592 }
 0x5ee   : > { %v594_v50 = vsub.f32 %v2174_v32, %v593_v49 }
 0x5f0   : > { %v595_v51 = vmul.f32 %v2315_v36, %v594_v50 }
 0x5f2   : > { %v596_v52 = vsel %vm552_vm4, %v595_v51, 0.0 }
 0x5f3   : > { %v597_v53 = vadd.f32 %v596_v52, %v536_v34 }
 0x5f5   : > { %v640_v54 = vmul.f32 %v1739_v41, %v597_v53 }
 0x5f7   : > { %641 = vadd.xlane.f32.xlu1 %v640_v54 }
 0x5fc   : > { %v620_v58 = vpop.xlane.xlu0 %619  ;;  %v629_v60 = vpop.xlane.xlu1 %628 }
 0x5fd   : > { %v621_v59 = vsub.f32 %v1740_v43, %v620_v58  ;;  %v630_v40 = vsub.f32 %v2153_v17, %v629_v60 }
 0x5ff   : > { %1994 = vrsqrt.f32 %v621_v59 }
 0x609   : > { %v1995_v61 = vpop.eup %1994 }
 0x60a   : > { %v631_v62 = vmul.f32 %v1995_v61, %v630_v40 }
 0x60c   : > { %v632_v63 = vsel %vm613_vm6, %v631_v62, 0.0 }
 0x60d   : > { %v633_v0 = vadd.f32 %v632_v63, %v584_v39 }
 0x60f   : > { %1743 = vst [vmem:[%s2138_s26 + $0x8] sm:$0xff] %v633_v0 }
 0x616   : > { %v1750_v1 = vld [vmem:[%s2138_s26 + $0x9] ss:$0 sm:$0xff] }
 0x617   : > { %v676_v2 = vmul.f32 %v1750_v1, %v633_v0  ;;  %v667_v56 = vmul.f32 %v1750_v1, %v1750_v1 }
 0x619   : > { %677 = vadd.xlane.f32.xlu1 %v676_v2  ;;  %668 = vadd.xlane.f32.xlu0 %v667_v56 }
 0x671   : > { %v606_v3 = vpop.xlane.xlu0 %605 }
 0x672   : > { %v607_v4 = vsub.f32 %v2197_v57, %v606_v3  ;;  %v1773_v3 = vld [vmem:[%s2142_s27 + $0xb] ss:$0 sm:$0xff] }
 0x674   : > { %v608_v5 = vmul.f32 %v2315_v36, %v607_v4 }
 0x676   : > { %v609_v6 = vsel %vm552_vm4, %v608_v5, 0.0 }
 0x677   : > { %v610_v12 = vadd.f32 %v609_v6, %v549_v47 }
 0x679   : > { %v653_v8 = vmul.f32 %v1739_v41, %v610_v12 }
 0x67b   : > { %654 = vadd.xlane.f32.xlu0 %v653_v8 }
 0x684   : > { %v642_v9 = vpop.xlane.xlu1 %641 }
 0x685   : > { %v643_v10 = vsub.f32 %v2174_v32, %v642_v9 }
 0x687   : > { %v644_v11 = vmul.f32 %v1995_v61, %v643_v10 }
 0x689   : > { %v645_v13 = vsel %vm613_vm6, %v644_v11, 0.0 }
 0x68a   : > { %v646_v55 = vadd.f32 %v645_v13, %v597_v53 }
 0x68c   : > { %v691_v14 = vmul.f32 %v1750_v1, %v646_v55 }
 0x68e   : > { %692 = vadd.xlane.f32.xlu1 %v691_v14 }
 0x6a6   : > { %v669_v16 = vpop.xlane.xlu0 %668  ;;  %v678_v19 = vpop.xlane.xlu1 %677 }
 0x6a7   : > { %v670_v18 = vsub.f32 %v1751_v15, %v669_v16  ;;  %v679_v20 = vsub.f32 %v2153_v17, %v678_v19 }
 0x6a9   : > { %1996 = vrsqrt.f32 %v670_v18 }
 0x6b3   : > { %v1997_v21 = vpop.eup %1996 }
 0x6b4   : > { %v680_v23 = vmul.f32 %v1997_v21, %v679_v20 }
 0x6b6   : > { %v683_v22 = vsel %vm682_vm9, %v680_v23, 0.0  ;;  %vm917_vm9 = vcmask 121968  }
 0x6b7   : > { %v684_v7 = vadd.f32 %v683_v22, %v633_v0 }
 0x6b9   : > { %1754 = vst [vmem:[%s2138_s26 + $0x8] sm:$0xff] %v684_v7 }
 0x6c0   : > { %v1761_v26 = vld [vmem:[%s2138_s26 + $0xa] ss:$0 sm:$0xff] }
 0x6c1   : > { %v727_v27 = vmul.f32 %v1761_v26, %v684_v7  ;;  %v718_v28 = vmul.f32 %v1761_v26, %v1761_v26 }
 0x6c3   : > { %728 = vadd.xlane.f32.xlu1 %v727_v27  ;;  %719 = vadd.xlane.f32.xlu0 %v718_v28  ;;  %v1784_v28 = vld [vmem:[%s2142_s27 + $0xc] ss:$0 sm:$0xff] }
 0x708   : > { %v655_v29 = vpop.xlane.xlu0 %654 }
 0x709   : > { %v656_v30 = vsub.f32 %v2197_v57, %v655_v29 }
 0x70b   : > { %v657_v33 = vmul.f32 %v1995_v61, %v656_v30 }
 0x70d   : > { %v658_v34 = vsel %vm613_vm6, %v657_v33, 0.0  ;;  %v2368_v33 = vld [vmem:[%s2142_s27 + $0x8] sm:$0xff]  ;;  %vm866_vm6 = vcmask 113768  }
 0x70e   : > { %v659_v25 = vadd.f32 %v658_v34, %v610_v12 }
 0x710   : > { %v704_v35 = vmul.f32 %v1750_v1, %v659_v25 }
 0x712   : > { %705 = vadd.xlane.f32.xlu0 %v704_v35 }
 0x71b   : > { %v693_v37 = vpop.xlane.xlu1 %692 }
 0x71c   : > { %v694_v38 = vsub.f32 %v2174_v32, %v693_v37 }
 0x71e   : > { %v695_v39 = vmul.f32 %v1997_v21, %v694_v38 }
 0x720   : > { %v696_v41 = vsel %vm662_vm7, %v695_v39, 0.0 }
 0x721   : > { %v697_v42 = vadd.f32 %v696_v41, %v646_v55 }
 0x723   : > { %v742_v44 = vmul.f32 %v1761_v26, %v697_v42 }
 0x725   : > { %743 = vadd.xlane.f32.xlu1 %v742_v44 }
 0x750   : > { %v720_v45 = vpop.xlane.xlu0 %719  ;;  %v729_v24 = vpop.xlane.xlu1 %728 }
 0x751   : > { %v721_v46 = vsub.f32 %v1762_v31, %v720_v45  ;;  %v730_v47 = vsub.f32 %v2153_v17, %v729_v24 }
 0x753   : > { %1998 = vrsqrt.f32 %v721_v46 }
 0x75d   : > { %v1999_v48 = vpop.eup %1998 }
 0x75e   : > { %v731_v49 = vmul.f32 %v1999_v48, %v730_v47 }
 0x760   : > { %v734_v50 = vsel %vm733_vm12, %v731_v49, 0.0  ;;  %vm968_vm12 = vcmask 130168  }
 0x761   : > { %v735_v51 = vadd.f32 %v734_v50, %v684_v7 }
 0x763   : > { %1765 = vst [vmem:[%s2138_s26 + $0x8] sm:$0xff] %v735_v51 }
 0x76a   : > { %v1772_v52 = vld [vmem:[%s2138_s26 + $0xb] ss:$0 sm:$0xff] }
 0x76b   : > { %v778_v53 = vmul.f32 %v1772_v52, %v735_v51  ;;  %v769_v54 = vmul.f32 %v1772_v52, %v1772_v52 }
 0x76d   : > { %779 = vadd.xlane.f32.xlu1 %v778_v53  ;;  %770 = vadd.xlane.f32.xlu0 %v769_v54 }
 0x79f   : > { %v706_v43 = vpop.xlane.xlu0 %705 }
 0x7a0   : > { %v707_v58 = vsub.f32 %v2197_v57, %v706_v43  ;;  %v1795_v43 = vld [vmem:[%s2142_s27 + $0xd] ss:$0 sm:$0xff] }
 0x7a2   : > { %v708_v59 = vmul.f32 %v1997_v21, %v707_v58 }
 0x7a4   : > { %v709_v60 = vsel %vm662_vm7, %v708_v59, 0.0  ;;  %vm886_vm7 = vmand %vm866_vm6, %vm447_vm14 }
 0x7a5   : > { %v710_v40 = vadd.f32 %v709_v60, %v659_v25 }
 0x7a7   : > { %v755_v61 = vmul.f32 %v1761_v26, %v710_v40 }
 0x7a9   : > { %756 = vadd.xlane.f32.xlu0 %v755_v61 }
 0x7b2   : > { %v744_v62 = vpop.xlane.xlu1 %743 }
 0x7b3   : > { %v745_v63 = vsub.f32 %v2174_v32, %v744_v62 }
 0x7b5   : > { %v746_v0 = vmul.f32 %v1999_v48, %v745_v63 }
 0x7b7   : > { %v747_v1 = vsel %vm713_vm10, %v746_v0, 0.0 }
 0x7b8   : > { %v748_v2 = vadd.f32 %v747_v1, %v697_v42 }
 0x7ba   : > { %v793_v56 = vmul.f32 %v1772_v52, %v748_v2 }
 0x7bc   : > { %794 = vadd.xlane.f32.xlu1 %v793_v56 }
 0x7fa   : > { %v771_v4 = vpop.xlane.xlu0 %770  ;;  %v780_v6 = vpop.xlane.xlu1 %779 }
 0x7fb   : > { %v772_v5 = vsub.f32 %v1773_v3, %v771_v4  ;;  %v781_v12 = vsub.f32 %v2153_v17, %v780_v6 }
 0x7fd   : > { %2000 = vrsqrt.f32 %v772_v5 }
 0x807   : > { %v2001_v8 = vpop.eup %2000 }
 0x808   : > { %v782_v9 = vmul.f32 %v2001_v8, %v781_v12 }
 0x80a   : > { %v785_v10 = vsel %vm784_vm15, %v782_v9, 0.0  ;;  %vm1055_vm15 = vcmask 146568  }
 0x80b   : > { %v786_v11 = vadd.f32 %v785_v10, %v735_v51 }
 0x80d   : > { %1776 = vst [vmem:[%s2138_s26 + $0x8] sm:$0xff] %v786_v11 }
 0x814   : > { %v1783_v13 = vld [vmem:[%s2138_s26 + $0xc] ss:$0 sm:$0xff] }
 0x815   : > { %v829_v55 = vmul.f32 %v1783_v13, %v786_v11  ;;  %v820_v14 = vmul.f32 %v1783_v13, %v1783_v13 }
 0x817   : > { %830 = vadd.xlane.f32.xlu1 %v829_v55  ;;  %821 = vadd.xlane.f32.xlu0 %v820_v14  ;;  %v1806_v14 = vld [vmem:[%s2142_s27 + $0xe] ss:$0 sm:$0xff] }
 0x836   : > { %v757_v15 = vpop.xlane.xlu0 %756 }
 0x837   : > { %v758_v16 = vsub.f32 %v2197_v57, %v757_v15 }
 0x839   : > { %v759_v18 = vmul.f32 %v1999_v48, %v758_v16  ;;  %v2378_v48 = vld [vmem:[%s2142_s27 + $0x10] sm:$0xff] }
 0x83b   : > { %v760_v17 = vsel %vm713_vm10, %v759_v18, 0.0  ;;  %v2394_v18 = vld [vmem:[%s2142_s27 + $0x18] sm:$0xff]  ;;  %vm937_vm10 = vmand %vm917_vm9, %vm508_vm1 }
 0x83c   : > { %v761_v19 = vadd.f32 %v760_v17, %v710_v40 }
 0x83e   : > { %v806_v20 = vmul.f32 %v1772_v52, %v761_v19 }
 0x840   : > { %807 = vadd.xlane.f32.xlu0 %v806_v20 }
 0x849   : > { %v795_v21 = vpop.xlane.xlu1 %794 }
 0x84a   : > { %v796_v23 = vsub.f32 %v2174_v32, %v795_v21 }
 0x84c   : > { %v797_v22 = vmul.f32 %v2001_v8, %v796_v23 }
 0x84e   : > { %v798_v7 = vsel %vm764_vm13, %v797_v22, 0.0 }
 0x84f   : > { %v799_v26 = vadd.f32 %v798_v7, %v748_v2 }
 0x851   : > { %v844_v27 = vmul.f32 %v1783_v13, %v799_v26 }
 0x853   : > { %845 = vadd.xlane.f32.xlu1 %v844_v27 }
 0x8a4   : > { %v822_v29 = vpop.xlane.xlu0 %821  ;;  %v831_v34 = vpop.xlane.xlu1 %830 }
 0x8a5   : > { %v823_v30 = vsub.f32 %v1784_v28, %v822_v29  ;;  %v832_v25 = vsub.f32 %v2368_v33, %v831_v34 }
 0x8a7   : > { %2002 = vrsqrt.f32 %v823_v30 }
 0x8b1   : > { %v2003_v35 = vpop.eup %2002 }
 0x8b2   : > { %v833_v32 = vmul.f32 %v2003_v35, %v832_v25 }
 0x8b4   : > { %v836_v37 = vsel %vm835_vm3, %v833_v32, 0.0  ;;  %vm1093_vm3 = vcmask 154768  }
 0x8b5   : > { %v837_v38 = vadd.f32 %v836_v37, %v786_v11 }
 0x8b7   : > { %1787 = vst [vmem:[%s2138_s26 + $0x8] sm:$0xff] %v837_v38 }
 0x8be   : > { %v1794_v39 = vld [vmem:[%s2138_s26 + $0xd] ss:$0 sm:$0xff] }
 0x8bf   : > { %v880_v41 = vmul.f32 %v1794_v39, %v837_v38  ;;  %v871_v42 = vmul.f32 %v1794_v39, %v1794_v39 }
 0x8c1   : > { %881 = vadd.xlane.f32.xlu1 %v880_v41  ;;  %872 = vadd.xlane.f32.xlu0 %v871_v42 }
 0x8cd   : > { %v808_v44 = vpop.xlane.xlu0 %807 }
 0x8ce   : > { %v809_v31 = vsub.f32 %v2197_v57, %v808_v44 }
 0x8d0   : > { %v810_v45 = vmul.f32 %v2001_v8, %v809_v31 }
 0x8d2   : > { %v811_v46 = vsel %vm764_vm13, %v810_v45, 0.0  ;;  %vm1019_vm13 = vcmask 138368  }
 0x8d3   : > { %v812_v24 = vadd.f32 %v811_v46, %v761_v19 }
 0x8d5   : > { %v857_v47 = vmul.f32 %v1783_v13, %v812_v24 }
 0x8d7   : > { %858 = vadd.xlane.f32.xlu0 %v857_v47 }
 0x8e0   : > { %v846_v49 = vpop.xlane.xlu1 %845 }
 0x8e1   : > { %v847_v50 = vsub.f32 %v2378_v48, %v846_v49 }
 0x8e3   : > { %v848_v51 = vmul.f32 %v2003_v35, %v847_v50 }
 0x8e5   : > { %v849_v52 = vsel %vm815_vm0, %v848_v51, 0.0 }
 0x8e6   : > { %v850_v53 = vadd.f32 %v849_v52, %v799_v26 }
 0x8e8   : > { %v895_v54 = vmul.f32 %v1794_v39, %v850_v53 }
 0x8ea   : > { %896 = vadd.xlane.f32.xlu1 %v895_v54 }
 0x94e   : > { %v873_v58 = vpop.xlane.xlu0 %872  ;;  %v882_v60 = vpop.xlane.xlu1 %881 }
 0x94f   : > { %v874_v59 = vsub.f32 %v1795_v43, %v873_v58  ;;  %v883_v40 = vsub.f32 %v2368_v33, %v882_v60 }
 0x951   : > { %2004 = vrsqrt.f32 %v874_v59 }
 0x95b   : > { %v2005_v61 = vpop.eup %2004 }
 0x95c   : > { %v884_v62 = vmul.f32 %v2005_v61, %v883_v40 }
 0x95e   : > { %v887_v63 = vsel %vm886_vm7, %v884_v62, 0.0  ;;  %vm1131_vm7 = vcmask 162968  }
 0x95f   : > { %v888_v0 = vadd.f32 %v887_v63, %v837_v38 }
 0x961   : > { %1798 = vst [vmem:[%s2138_s26 + $0x8] sm:$0xff] %v888_v0 }
 0x964   : > { %v859_v1 = vpop.xlane.xlu0 %858 }
 0x965   : > { %v860_v2 = vsub.f32 %v2197_v57, %v859_v1 }
 0x967   : > { %v861_v56 = vmul.f32 %v2003_v35, %v860_v2  ;;  %v1828_v2 = vld [vmem:[%s2142_s27 + $0x10] ss:$0 sm:$0xff] }
 0x968   : > { %v1805_v3 = vld [vmem:[%s2138_s26 + $0xe] ss:$0 sm:$0xff] }
 0x969   : > { %v931_v4 = vmul.f32 %v1805_v3, %v888_v0  ;;  %v922_v5 = vmul.f32 %v1805_v3, %v1805_v3  ;;  %v862_v6 = vsel %vm815_vm0, %v861_v56, 0.0  ;;  %vm1075_vm0 = vmand %vm1055_vm15, %vm203_vm2 }
 0x96a   : > { %v863_v12 = vadd.f32 %v862_v6, %v812_v24  ;;  %v1817_v24 = vld [vmem:[%s2142_s27 + $0xf] ss:$0 sm:$0xff] }
 0x96b   : > { %932 = vadd.xlane.f32.xlu1 %v931_v4  ;;  %923 = vadd.xlane.f32.xlu0 %v922_v5 }
 0x96c   : > { %v908_v8 = vmul.f32 %v1794_v39, %v863_v12 }
 0x96f   : > { %909 = vadd.xlane.f32.xlu0 %v908_v8 }
 0x977   : > { %v897_v9 = vpop.xlane.xlu1 %896 }
 0x978   : > { %v898_v10 = vsub.f32 %v2378_v48, %v897_v9 }
 0x97a   : > { %v899_v11 = vmul.f32 %v2005_v61, %v898_v10 }
 0x97c   : > { %v900_v13 = vsel %vm866_vm6, %v899_v11, 0.0 }
 0x97d   : > { %v901_v57 = vadd.f32 %v900_v13, %v850_v53 }
 0x97f   : > { %v946_v55 = vmul.f32 %v1805_v3, %v901_v57 }
 0x981   : > { %947 = vadd.xlane.f32.xlu1 %v946_v55 }
 0x9f8   : > { %v924_v15 = vpop.xlane.xlu0 %923  ;;  %v933_v21 = vpop.xlane.xlu1 %932 }
 0x9f9   : > { %v925_v16 = vsub.f32 %v1806_v14, %v924_v15  ;;  %v934_v7 = vsub.f32 %v2368_v33, %v933_v21 }
 0x9fb   : > { %2006 = vrsqrt.f32 %v925_v16 }
 0x9fc   : > { %v910_v17 = vpop.xlane.xlu0 %909 }
 0x9fd   : > { %v911_v19 = vsub.f32 %v2394_v18, %v910_v17 }
 0x9ff   : > { %v912_v20 = vmul.f32 %v2005_v61, %v911_v19  ;;  %v1836_v19 = vld [vmem:[%s2142_s27 + $0x11] ss:$0 sm:$0xff] }
 0xa01   : > { %v913_v23 = vsel %vm866_vm6, %v912_v20, 0.0  ;;  %vm1113_vm6 = vmand %vm1093_vm3, %vm264_vm5 }
 0xa02   : > { %v914_v22 = vadd.f32 %v913_v23, %v863_v12 }
 0xa04   : > { %v959_v26 = vmul.f32 %v1805_v3, %v914_v22 }
 0xa05   : > { %v2007_v27 = vpop.eup %2006 }
 0xa06   : > { %v935_v28 = vmul.f32 %v2007_v27, %v934_v7  ;;  %960 = vadd.xlane.f32.xlu1 %v959_v26 }
 0xa08   : > { %v938_v29 = vsel %vm937_vm10, %v935_v28, 0.0  ;;  %vm1169_vm10 = vcmask 171168  }
 0xa09   : > { %v2401_v30 = vadd.f32 %v938_v29, %v888_v0 }
 0xa0b   : > { %1809 = vst [vmem:[%s2138_s26 + $0x8] sm:$0xff] %v2401_v30 }
 0xa0e   : > { %v948_v34 = vpop.xlane.xlu1 %947 }
 0xa0f   : > { %v949_v25 = vsub.f32 %v2378_v48, %v948_v34 }
 0xa11   : > { %v950_v35 = vmul.f32 %v2007_v27, %v949_v25 }
 0xa12   : > { %v2407_v32 = vld [vmem:[%s2138_s26 + $0xf] ss:$0 sm:$0xff] }
 0xa13   : > { %v973_v33 = vmul.f32 %v2407_v32, %v2407_v32  ;;  %v951_v37 = vsel %vm917_vm9, %v950_v35, 0.0 }
 0xa14   : > { %v952_v38 = vadd.f32 %v951_v37, %v901_v57 }
 0xa15   : > { %974 = vadd.xlane.f32.xlu0 %v973_v33 }
 0xa16   : > { %v997_v39 = vmul.f32 %v2407_v32, %v952_v38 }
 0xa19   : > { %998 = vadd.xlane.f32.xlu0 %v997_v39 }
 0xa93   : > { %v961_v41 = vpop.xlane.xlu1 %960 }
 0xa94   : > { %v962_v42 = vsub.f32 %v2394_v18, %v961_v41 }
 0xa96   : > { %v963_v44 = vmul.f32 %v2007_v27, %v962_v42  ;;  %v1844_v42 = vld [vmem:[%s2142_s27 + $0x12] ss:$0 sm:$0xff] }
 0xa98   : > { %v964_v31 = vsel %vm917_vm9, %v963_v44, 0.0  ;;  %vm1151_vm9 = vmand %vm1131_vm7, %vm325_vm8 }
 0xa99   : > { %v965_v45 = vadd.f32 %v964_v31, %v914_v22 }
 0xa9b   : > { %v1010_v46 = vmul.f32 %v2407_v32, %v965_v45 }
 0xa9d   : > { %1011 = vadd.xlane.f32.xlu1 %v1010_v46 }
 0xaa2   : > { %v975_v47 = vpop.xlane.xlu0 %974 }
 0xaa3   : > { %v976_v49 = vsub.f32 %v1817_v24, %v975_v47 }
 0xaa5   : > { %2008 = vrsqrt.f32 %v976_v49 }
 0xaa6   : > { %v999_v50 = vpop.xlane.xlu0 %998 }
 0xaa7   : > { %v1000_v51 = vsub.f32 %v2378_v48, %v999_v50 }
 0xaaf   : > { %v2418_v52 = vpop.eup %2008 }
 0xab0   : > { %v1001_v53 = vmul.f32 %v2418_v52, %v1000_v51 }
 0xab2   : > { %v1002_v54 = vsel %vm968_vm12, %v1001_v53, 0.0 }
 0xab3   : > { %v1003_v43 = vadd.f32 %v1002_v54, %v952_v38 }
 0xab5   : > { %1823 = vst [vmem:[%s2138_s26 + $0x10] sm:$0xff] %v1003_v43 }
 0xabc   : > { %v1827_v58 = vld [vmem:[%s2138_s26 + $0x10] ss:$0 sm:$0xff] }
 0xabd   : > { %v1024_v59 = vmul.f32 %v1827_v58, %v1827_v58  ;;  %v1033_v60 = vmul.f32 %v1827_v58, %v1003_v43 }
 0xabf   : > { %1025 = vadd.xlane.f32.xlu0 %v1024_v59  ;;  %1034 = vadd.xlane.f32.xlu1 %v1033_v60 }
 0xb2a   : > { %v1012_v40 = vpop.xlane.xlu1 %1011 }
 0xb2b   : > { %v1013_v61 = vsub.f32 %v2394_v18, %v1012_v40 }
 0xb2d   : > { %v1014_v62 = vmul.f32 %v2418_v52, %v1013_v61 }
 0xb2f   : > { %v1015_v63 = vsel %vm968_vm12, %v1014_v62, 0.0  ;;  %v1852_v62 = vld [vmem:[%s2142_s27 + $0x13] ss:$0 sm:$0xff] }
 0xb30   : > { %v1016_v0 = vadd.f32 %v1015_v63, %v965_v45 }
 0xb32   : > { %v1046_v1 = vmul.f32 %v1827_v58, %v1016_v0 }
 0xb34   : > { %1047 = vadd.xlane.f32.xlu0 %v1046_v1 }
 0xb4c   : > { %v1026_v56 = vpop.xlane.xlu0 %1025  ;;  %v1035_v4 = vpop.xlane.xlu1 %1034 }
 0xb4d   : > { %v1027_v3 = vsub.f32 %v1828_v2, %v1026_v56  ;;  %v1036_v5 = vsub.f32 %v2378_v48, %v1035_v4 }
 0xb4f   : > { %2010 = vrsqrt.f32 %v1027_v3 }
 0xb59   : > { %v2011_v6 = vpop.eup %2010 }
 0xb5a   : > { %v1037_v12 = vmul.f32 %v2011_v6, %v1036_v5 }
 0xb5c   : > { %v1038_v8 = vsel %vm1019_vm13, %v1037_v12, 0.0 }
 0xb5d   : > { %v1039_v9 = vadd.f32 %v1038_v8, %v1003_v43 }
 0xb5f   : > { %1831 = vst [vmem:[%s2138_s26 + $0x10] sm:$0xff] %v1039_v9 }
 0xb66   : > { %v1835_v10 = vld [vmem:[%s2138_s26 + $0x11] ss:$0 sm:$0xff] }
 0xb67   : > { %v1069_v11 = vmul.f32 %v1835_v10, %v1039_v9  ;;  %v1060_v13 = vmul.f32 %v1835_v10, %v1835_v10 }
 0xb69   : > { %1070 = vadd.xlane.f32.xlu0 %v1069_v11  ;;  %1061 = vadd.xlane.f32.xlu1 %v1060_v13 }
 0xbc1   : > { %v1048_v57 = vpop.xlane.xlu0 %1047 }
 0xbc2   : > { %v1049_v55 = vsub.f32 %v2394_v18, %v1048_v57 }
 0xbc4   : > { %v1050_v14 = vmul.f32 %v2011_v6, %v1049_v55 }
 0xbc6   : > { %v1051_v15 = vsel %vm1019_vm13, %v1050_v14, 0.0  ;;  %v1860_v14 = vld [vmem:[%s2142_s27 + $0x14] ss:$0 sm:$0xff]  ;;  %vm1189_vm13 = vmand %vm1169_vm10, %vm386_vm11 }
 0xbc7   : > { %v1052_v16 = vadd.f32 %v1051_v15, %v1016_v0 }
 0xbc9   : > { %v1084_v17 = vmul.f32 %v1835_v10, %v1052_v16 }
 0xbcb   : > { %1085 = vadd.xlane.f32.xlu1 %v1084_v17 }
 0xbf6   : > { %v1062_v20 = vpop.xlane.xlu1 %1061  ;;  %v1071_v23 = vpop.xlane.xlu0 %1070 }
 0xbf7   : > { %v1063_v21 = vsub.f32 %v1836_v19, %v1062_v20  ;;  %v1072_v22 = vsub.f32 %v2378_v48, %v1071_v23 }
 0xbf9   : > { %2012 = vrsqrt.f32 %v1063_v21 }
 0xc03   : > { %v2013_v7 = vpop.eup %2012 }
 0xc04   : > { %v1073_v26 = vmul.f32 %v2013_v7, %v1072_v22 }
 0xc06   : > { %v1076_v27 = vsel %vm1075_vm0, %v1073_v26, 0.0 }
 0xc07   : > { %v1077_v28 = vadd.f32 %v1076_v27, %v1039_v9 }
 0xc09   : > { %1839 = vst [vmem:[%s2138_s26 + $0x10] sm:$0xff] %v1077_v28 }
 0xc10   : > { %v1843_v29 = vld [vmem:[%s2138_s26 + $0x12] ss:$0 sm:$0xff] }
 0xc11   : > { %v1107_v34 = vmul.f32 %v1843_v29, %v1077_v28  ;;  %v1098_v25 = vmul.f32 %v1843_v29, %v1843_v29 }
 0xc13   : > { %1108 = vadd.xlane.f32.xlu1 %v1107_v34  ;;  %1099 = vadd.xlane.f32.xlu0 %v1098_v25 }
 0xc58   : > { %v1086_v35 = vpop.xlane.xlu1 %1085 }
 0xc59   : > { %v1087_v33 = vsub.f32 %v2394_v18, %v1086_v35 }
 0xc5b   : > { %v1088_v37 = vmul.f32 %v2013_v7, %v1087_v33 }
 0xc5d   : > { %v1089_v38 = vsel %vm1055_vm15, %v1088_v37, 0.0  ;;  %v1868_v37 = vld [vmem:[%s2142_s27 + $0x15] ss:$0 sm:$0xff]  ;;  %vm1207_vm15 = vcmask 179368  }
 0xc5e   : > { %v1090_v39 = vadd.f32 %v1089_v38, %v1052_v16  ;;  %vm1227_vm0 = vmand %vm1207_vm15, %vm447_vm14 }
 0xc60   : > { %v1122_v41 = vmul.f32 %v1843_v29, %v1090_v39 }
 0xc62   : > { %1123 = vadd.xlane.f32.xlu0 %v1122_v41 }
 0xca0   : > { %v1100_v44 = vpop.xlane.xlu0 %1099  ;;  %v1109_v45 = vpop.xlane.xlu1 %1108 }
 0xca1   : > { %v1101_v31 = vsub.f32 %v1844_v42, %v1100_v44  ;;  %v1110_v46 = vsub.f32 %v2378_v48, %v1109_v45 }
 0xca3   : > { %2014 = vrsqrt.f32 %v1101_v31 }
 0xcad   : > { %v2015_v24 = vpop.eup %2014 }
 0xcae   : > { %v1111_v47 = vmul.f32 %v2015_v24, %v1110_v46 }
 0xcb0   : > { %v1114_v49 = vsel %vm1113_vm6, %v1111_v47, 0.0 }
 0xcb1   : > { %v1115_v50 = vadd.f32 %v1114_v49, %v1077_v28 }
 0xcb3   : > { %1847 = vst [vmem:[%s2138_s26 + $0x10] sm:$0xff] %v1115_v50 }
 0xcba   : > { %v1851_v51 = vld [vmem:[%s2138_s26 + $0x13] ss:$0 sm:$0xff] }
 0xcbb   : > { %v1145_v53 = vmul.f32 %v1851_v51, %v1115_v50  ;;  %v1136_v54 = vmul.f32 %v1851_v51, %v1851_v51 }
 0xcbd   : > { %1146 = vadd.xlane.f32.xlu0 %v1145_v53  ;;  %1137 = vadd.xlane.f32.xlu1 %v1136_v54 }
 0xcef   : > { %v1124_v43 = vpop.xlane.xlu0 %1123 }
 0xcf0   : > { %v1125_v58 = vsub.f32 %v2394_v18, %v1124_v43 }
 0xcf2   : > { %v1126_v59 = vmul.f32 %v2015_v24, %v1125_v58 }
 0xcf4   : > { %v1127_v60 = vsel %vm1093_vm3, %v1126_v59, 0.0  ;;  %v1876_v59 = vld [vmem:[%s2142_s27 + $0x16] ss:$0 sm:$0xff]  ;;  %vm1245_vm3 = vcmask 187568  }
 0xcf5   : > { %v1128_v40 = vadd.f32 %v1127_v60, %v1090_v39  ;;  %vm1265_vm6 = vmand %vm1245_vm3, %vm508_vm1 }
 0xcf7   : > { %v1160_v61 = vmul.f32 %v1851_v51, %v1128_v40 }
 0xcf9   : > { %1161 = vadd.xlane.f32.xlu1 %v1160_v61 }
 0xd4a   : > { %v1138_v63 = vpop.xlane.xlu1 %1137  ;;  %v1147_v1 = vpop.xlane.xlu0 %1146 }
 0xd4b   : > { %v1139_v0 = vsub.f32 %v1852_v62, %v1138_v63  ;;  %v1148_v2 = vsub.f32 %v2378_v48, %v1147_v1 }
 0xd4d   : > { %2016 = vrsqrt.f32 %v1139_v0 }
 0xd57   : > { %v2017_v56 = vpop.eup %2016 }
 0xd58   : > { %v1149_v3 = vmul.f32 %v2017_v56, %v1148_v2 }
 0xd5a   : > { %v1152_v4 = vsel %vm1151_vm9, %v1149_v3, 0.0  ;;  %vm1321_vm9 = vcmask 203968  }
 0xd5b   : > { %v1153_v5 = vadd.f32 %v1152_v4, %v1115_v50 }
 0xd5d   : > { %1855 = vst [vmem:[%s2138_s26 + $0x10] sm:$0xff] %v1153_v5 }
 0xd64   : > { %v1859_v6 = vld [vmem:[%s2138_s26 + $0x14] ss:$0 sm:$0xff] }
 0xd65   : > { %v1183_v12 = vmul.f32 %v1859_v6, %v1153_v5  ;;  %v1174_v8 = vmul.f32 %v1859_v6, %v1859_v6 }
 0xd67   : > { %1184 = vadd.xlane.f32.xlu1 %v1183_v12  ;;  %1175 = vadd.xlane.f32.xlu0 %v1174_v8 }
 0xd86   : > { %v1162_v9 = vpop.xlane.xlu1 %1161 }
 0xd87   : > { %v1163_v10 = vsub.f32 %v2394_v18, %v1162_v9 }
 0xd89   : > { %v1164_v11 = vmul.f32 %v2017_v56, %v1163_v10  ;;  %v1884_v10 = vld [vmem:[%s2142_s27 + $0x17] ss:$0 sm:$0xff] }
 0xd8b   : > { %v1165_v13 = vsel %vm1131_vm7, %v1164_v11, 0.0  ;;  %vm1283_vm7 = vcmask 195768  }
 0xd8c   : > { %v1166_v57 = vadd.f32 %v1165_v13, %v1128_v40 }
 0xd8e   : > { %v1198_v55 = vmul.f32 %v1859_v6, %v1166_v57 }
 0xd90   : > { %1199 = vadd.xlane.f32.xlu0 %v1198_v55 }
 0xdf4   : > { %v1176_v15 = vpop.xlane.xlu0 %1175  ;;  %v1185_v17 = vpop.xlane.xlu1 %1184 }
 0xdf5   : > { %v1177_v16 = vsub.f32 %v1860_v14, %v1176_v15  ;;  %v1186_v19 = vsub.f32 %v2378_v48, %v1185_v17 }
 0xdf7   : > { %2018 = vrsqrt.f32 %v1177_v16 }
 0xe01   : > { %v2019_v20 = vpop.eup %2018 }
 0xe02   : > { %v1187_v21 = vmul.f32 %v2019_v20, %v1186_v19 }
 0xe04   : > { %v1190_v23 = vsel %vm1189_vm13, %v1187_v21, 0.0 }
 0xe05   : > { %v1191_v22 = vadd.f32 %v1190_v23, %v1153_v5  ;;  %v1892_v23 = vld [vmem:[%s2142_s27 + $0x18] ss:$0 sm:$0xff] }
 0xe07   : > { %1863 = vst [vmem:[%s2138_s26 + $0x10] sm:$0xff] %v1191_v22 }
 0xe0e   : > { %v1867_v7 = vld [vmem:[%s2138_s26 + $0x15] ss:$0 sm:$0xff] }
 0xe0f   : > { %v1221_v26 = vmul.f32 %v1867_v7, %v1191_v22  ;;  %v1212_v27 = vmul.f32 %v1867_v7, %v1867_v7 }
 0xe11   : > { %1222 = vadd.xlane.f32.xlu0 %v1221_v26  ;;  %1213 = vadd.xlane.f32.xlu1 %v1212_v27 }
 0xe1d   : > { %v1200_v28 = vpop.xlane.xlu0 %1199 }
 0xe1e   : > { %v1201_v29 = vsub.f32 %v2394_v18, %v1200_v28 }
 0xe20   : > { %v1202_v34 = vmul.f32 %v2019_v20, %v1201_v29 }
 0xe22   : > { %v1203_v25 = vsel %vm1169_vm10, %v1202_v34, 0.0  ;;  %vm1344_vm10 = vcmask 212168  }
 0xe23   : > { %v1204_v35 = vadd.f32 %v1203_v25, %v1166_v57  ;;  %vm1364_vm13 = vmand %vm1344_vm10, %vm203_vm2  ;;  %vm1469_vm10 = vcmask 253168  }
 0xe25   : > { %v1236_v33 = vmul.f32 %v1867_v7, %v1204_v35 }
 0xe27   : > { %1237 = vadd.xlane.f32.xlu1 %v1236_v33 }
 0xe9e   : > { %v1214_v38 = vpop.xlane.xlu1 %1213  ;;  %v1223_v41 = vpop.xlane.xlu0 %1222 }
 0xe9f   : > { %v1215_v39 = vsub.f32 %v1868_v37, %v1214_v38  ;;  %v1224_v42 = vsub.f32 %v2378_v48, %v1223_v41  ;;  %v1897_v38 = vld [vmem:[%s2142_s27 + $0x19] ss:$0 sm:$0xff] }
 0xea1   : > { %2020 = vrsqrt.f32 %v1215_v39 }
 0xeab   : > { %v2021_v44 = vpop.eup %2020 }
 0xeac   : > { %v1225_v31 = vmul.f32 %v2021_v44, %v1224_v42 }
 0xeae   : > { %v1228_v45 = vsel %vm1227_vm0, %v1225_v31, 0.0  ;;  %vm1394_vm0 = vcmask 228568  }
 0xeaf   : > { %v1229_v46 = vadd.f32 %v1228_v45, %v1191_v22 }
 0xeb1   : > { %1871 = vst [vmem:[%s2138_s26 + $0x10] sm:$0xff] %v1229_v46 }
 0xeb4   : > { %v1238_v24 = vpop.xlane.xlu1 %1237 }
 0xeb5   : > { %v1239_v47 = vsub.f32 %v2394_v18, %v1238_v24 }
 0xeb7   : > { %v1240_v49 = vmul.f32 %v2021_v44, %v1239_v47 }
 0xeb8   : > { %v1875_v50 = vld [vmem:[%s2138_s26 + $0x16] ss:$0 sm:$0xff] }
 0xeb9   : > { %v1259_v51 = vmul.f32 %v1875_v50, %v1229_v46  ;;  %v1250_v53 = vmul.f32 %v1875_v50, %v1875_v50  ;;  %v1241_v54 = vsel %vm1207_vm15, %v1240_v49, 0.0  ;;  %vm1369_vm15 = vcmask 220368  }
 0xeba   : > { %v1242_v43 = vadd.f32 %v1241_v54, %v1204_v35  ;;  %vm1389_vm2 = vmand %vm1369_vm15, %vm264_vm5 }
 0xebb   : > { %1260 = vadd.xlane.f32.xlu1 %v1259_v51  ;;  %1251 = vadd.xlane.f32.xlu0 %v1250_v53  ;;  %v1902_v51 = vld [vmem:[%s2142_s27 + $0x1a] ss:$0 sm:$0xff]  ;;  %vm1414_vm5 = vmand %vm1394_vm0, %vm325_vm8 }
 0xebc   : > { %v1274_v58 = vmul.f32 %v1875_v50, %v1242_v43 }
 0xebf   : > { %1275 = vadd.xlane.f32.xlu0 %v1274_v58 }
 0xf48   : > { %v1252_v60 = vpop.xlane.xlu0 %1251  ;;  %v1261_v61 = vpop.xlane.xlu1 %1260 }
 0xf49   : > { %v1253_v40 = vsub.f32 %v1876_v59, %v1252_v60  ;;  %v1262_v62 = vsub.f32 %v2378_v48, %v1261_v61 }
 0xf4b   : > { %2022 = vrsqrt.f32 %v1253_v40 }
 0xf4c   : > { %v1276_v0 = vpop.xlane.xlu0 %1275 }
 0xf4d   : > { %v1277_v56 = vsub.f32 %v2394_v18, %v1276_v0 }
 0xf55   : > { %v2023_v63 = vpop.eup %2022 }
 0xf56   : > { %v1263_v1 = vmul.f32 %v2023_v63, %v1262_v62  ;;  %v1278_v4 = vmul.f32 %v2023_v63, %v1277_v56 }
 0xf58   : > { %v1266_v2 = vsel %vm1265_vm6, %v1263_v1, 0.0  ;;  %v1279_v5 = vsel %vm1245_vm3, %v1278_v4, 0.0  ;;  %v1907_v1 = vld [vmem:[%s2142_s27 + $0x1b] ss:$0 sm:$0xff]  ;;  %vm1419_vm3 = vcmask 236768   ;;  %vm1444_vm6 = vcmask 244968  }
 0xf59   : > { %v2474_v3 = vadd.f32 %v1266_v2, %v1229_v46  ;;  %v1280_v6 = vadd.f32 %v1279_v5, %v1242_v43  ;;  %vm1439_vm8 = vmand %vm1419_vm3, %vm386_vm11 }
 0xf5a   : > { %vm1464_vm11 = vmand %vm1444_vm6, %vm447_vm14  ;;  %vm569_vm14 = vcmask 1047559  }
 0xf5b   : > { %1879 = vst [vmem:[%s2138_s26 + $0x10] sm:$0xff] %v2474_v3 }
 0xf62   : > { %v2479_v12 = vld [vmem:[%s2138_s26 + $0x17] ss:$0 sm:$0xff] }
 0xf63   : > { %v1288_v8 = vmul.f32 %v2479_v12, %v2479_v12  ;;  %v1312_v9 = vmul.f32 %v2479_v12, %v1280_v6 }
 0xf65   : > { %1289 = vadd.xlane.f32.xlu1 %v1288_v8  ;;  %1313 = vadd.xlane.f32.xlu0 %v1312_v9 }
 0xff2   : > { %v1290_v11 = vpop.xlane.xlu1 %1289  ;;  %v1314_v57 = vpop.xlane.xlu0 %1313 }
 0xff3   : > { %v1291_v13 = vsub.f32 %v1884_v10, %v1290_v11  ;;  %v1315_v55 = vsub.f32 %v2394_v18, %v1314_v57 }
 0xff5   : > { %2024 = vrsqrt.f32 %v1291_v13 }
 0xfff   : > { %v2486_v14 = vpop.eup %2024 }
0x1000   : > { %v1316_v15 = vmul.f32 %v2486_v14, %v1315_v55  ;;  %v1912_v55 = vld [vmem:[%s2142_s27 + $0x1c] ss:$0 sm:$0xff] }
0x1002   : > { %v1317_v16 = vsel %vm1283_vm7, %v1316_v15, 0.0 }
0x1003   : > { %v1318_v17 = vadd.f32 %v1317_v16, %v1280_v6 }
0x1005   : > { %1890 = vst [vmem:[%s2138_s26 + $0x18] sm:$0xff] %v1318_v17 }
0x100c   : > { %v1891_v19 = vld [vmem:[%s2138_s26 + $0x18] ss:$0 sm:$0xff] }
0x100d   : > { %v1335_v20 = vmul.f32 %v1891_v19, %v1318_v17  ;;  %v1326_v21 = vmul.f32 %v1891_v19, %v1891_v19 }
0x100f   : > { %1336 = vadd.xlane.f32.xlu0 %v1335_v20  ;;  %1327 = vadd.xlane.f32.xlu1 %v1326_v21 }
0x109c   : > { %v1328_v22 = vpop.xlane.xlu1 %1327  ;;  %v1337_v26 = vpop.xlane.xlu0 %1336 }
0x109d   : > { %v1329_v7 = vsub.f32 %v1892_v23, %v1328_v22  ;;  %v1338_v27 = vsub.f32 %v2394_v18, %v1337_v26 }
0x109f   : > { %2026 = vrsqrt.f32 %v1329_v7 }
0x10a9   : > { %v2027_v28 = vpop.eup %2026 }
0x10aa   : > { %v1339_v29 = vmul.f32 %v2027_v28, %v1338_v27  ;;  %v1917_v28 = vld [vmem:[%s2142_s27 + $0x1d] ss:$0 sm:$0xff] }
0x10ac   : > { %v1340_v34 = vsel %vm1321_vm9, %v1339_v29, 0.0  ;;  %vm570_vm9 = vmand %vm552_vm4, %vm569_vm14 }
0x10ad   : > { %v1341_v25 = vadd.f32 %v1340_v34, %v1318_v17  ;;  %vm1303_vm4 = vmand %vm1283_vm7, %vm569_vm14  ;;  %vm1494_vm7 = vcmask 261368  }
0x10ae   : > { %vm1514_vm15 = vmand %vm1494_vm7, %vm569_vm14 }
0x10af   : > { %1895 = vst [vmem:[%s2138_s26 + $0x18] sm:$0xff] %v1341_v25 }
0x10b6   : > { %v1896_v35 = vld [vmem:[%s2138_s26 + $0x19] ss:$0 sm:$0xff] }
0x10b7   : > { %v1358_v33 = vmul.f32 %v1896_v35, %v1341_v25  ;;  %v1349_v37 = vmul.f32 %v1896_v35, %v1896_v35 }
0x10b9   : > { %1359 = vadd.xlane.f32.xlu0 %v1358_v33  ;;  %1350 = vadd.xlane.f32.xlu1 %v1349_v37 }
0x1146   : > { %v1351_v39 = vpop.xlane.xlu1 %1350  ;;  %v1360_v42 = vpop.xlane.xlu0 %1359 }
0x1147   : > { %v1352_v41 = vsub.f32 %v1897_v38, %v1351_v39  ;;  %v1361_v44 = vsub.f32 %v2394_v18, %v1360_v42 }
0x1149   : > { %2028 = vrsqrt.f32 %v1352_v41 }
0x1153   : > { %v2029_v31 = vpop.eup %2028 }
0x1154   : > { %v1362_v45 = vmul.f32 %v2029_v31, %v1361_v44  ;;  %v563_v31 = vld [vmem:[%s2138_s26] sm:$0xff] }
0x1156   : > { %v1365_v46 = vsel %vm1364_vm13, %v1362_v45, 0.0  ;;  %v2042_v45 = vld [vmem:[%s2138_s26 + $0x7] ss:$0 sm:$0xff]  ;;  %vm1489_vm13 = vmand %vm1469_vm10, %vm508_vm1 }
0x1157   : > { %v1366_v24 = vadd.f32 %v1365_v46, %v1341_v25  ;;  %v564_v46 = vmul.f32 %v2042_v45, %v563_v31  ;;  %vm988_vm1 = vmand %vm968_vm12, %vm569_vm14 }
0x1159   : > { %1900 = vst [vmem:[%s2138_s26 + $0x18] sm:$0xff] %v1366_v24 }
0x1160   : > { %v1901_v47 = vld [vmem:[%s2138_s26 + $0x1a] ss:$0 sm:$0xff] }
0x1161   : > { %v1383_v49 = vmul.f32 %v1901_v47, %v1366_v24  ;;  %v1374_v50 = vmul.f32 %v1901_v47, %v1901_v47  ;;  %v1922_v47 = vld [vmem:[%s2142_s27 + $0x1e] ss:$0 sm:$0xff] }
0x1163   : > { %1384 = vadd.xlane.f32.xlu0 %v1383_v49  ;;  %1375 = vadd.xlane.f32.xlu1 %v1374_v50 }
0x11f0   : > { %v1376_v53 = vpop.xlane.xlu1 %1375  ;;  %v1385_v43 = vpop.xlane.xlu0 %1384 }
0x11f1   : > { %v1377_v54 = vsub.f32 %v1902_v51, %v1376_v53  ;;  %v1386_v58 = vsub.f32 %v2394_v18, %v1385_v43  ;;  %v562_v53 = vld [vmem:[%s2142_s27] sm:$0xff] }
0x11f3   : > { %2030 = vrsqrt.f32 %v1377_v54 }
0x11fd   : > { %v2031_v59 = vpop.eup %2030 }
0x11fe   : > { %v1387_v60 = vmul.f32 %v2031_v59, %v1386_v58 }
0x1200   : > { %v1390_v40 = vsel %vm1389_vm2, %v1387_v60, 0.0 }
0x1201   : > { %v1391_v61 = vadd.f32 %v1390_v40, %v1366_v24  ;;  %v1297_v24 = vmul.f32 %v2479_v12, %v2474_v3 }
0x1203   : > { %1905 = vst [vmem:[%s2138_s26 + $0x18] sm:$0xff] %v1391_v61 }
0x120a   : > { %v1906_v62 = vld [vmem:[%s2138_s26 + $0x1b] ss:$0 sm:$0xff] }
0x120b   : > { %v1408_v63 = vmul.f32 %v1906_v62, %v1391_v61  ;;  %v1399_v0 = vmul.f32 %v1906_v62, %v1906_v62 }
0x120d   : > { %1409 = vadd.xlane.f32.xlu0 %v1408_v63  ;;  %1400 = vadd.xlane.f32.xlu1 %v1399_v0 }
0x129a   : > { %v1401_v2 = vpop.xlane.xlu1 %1400  ;;  %v1410_v4 = vpop.xlane.xlu0 %1409 }
0x129b   : > { %v1402_v56 = vsub.f32 %v1907_v1, %v1401_v2  ;;  %v1411_v5 = vsub.f32 %v2394_v18, %v1410_v4  ;;  %v982_v4 = vmul.f32 %v2407_v32, %v2401_v30 }
0x129d   : > { %2032 = vrsqrt.f32 %v1402_v56 }
0x12a7   : > { %v2033_v6 = vpop.eup %2032 }
0x12a8   : > { %v1412_v8 = vmul.f32 %v2033_v6, %v1411_v5  ;;  %v1927_v6 = vld [vmem:[%s2142_s27 + $0x1f] ss:$0 sm:$0xff] }
0x12aa   : > { %v1415_v9 = vsel %vm1414_vm5, %v1412_v8, 0.0 }
0x12ab   : > { %v1416_v10 = vadd.f32 %v1415_v9, %v1391_v61  ;;  %v1818_v9 = vld [vmem:[%s2142_s27 + $0x8] sm:$0xff] }
0x12ad   : > { %1910 = vst [vmem:[%s2138_s26 + $0x18] sm:$0xff] %v1416_v10 }
0x12b4   : > { %v1911_v11 = vld [vmem:[%s2138_s26 + $0x1c] ss:$0 sm:$0xff] }
0x12b5   : > { %v1433_v13 = vmul.f32 %v1911_v11, %v1416_v10  ;;  %v1424_v57 = vmul.f32 %v1911_v11, %v1911_v11 }
0x12b7   : > { %1434 = vadd.xlane.f32.xlu0 %v1433_v13  ;;  %1425 = vadd.xlane.f32.xlu1 %v1424_v57 }
0x1344   : > { %v1426_v15 = vpop.xlane.xlu1 %1425  ;;  %v1435_v17 = vpop.xlane.xlu0 %1434 }
0x1345   : > { %v1427_v16 = vsub.f32 %v1912_v55, %v1426_v15  ;;  %v1436_v19 = vsub.f32 %v2394_v18, %v1435_v17 }
0x1347   : > { %2034 = vrsqrt.f32 %v1427_v16 }
0x1351   : > { %v2035_v20 = vpop.eup %2034 }
0x1352   : > { %v1437_v21 = vmul.f32 %v2035_v20, %v1436_v19 }
0x1354   : > { %v1440_v23 = vsel %vm1439_vm8, %v1437_v21, 0.0 }
0x1355   : > { %v1441_v22 = vadd.f32 %v1440_v23, %v1416_v10 }
0x1357   : > { %1915 = vst [vmem:[%s2138_s26 + $0x18] sm:$0xff] %v1441_v22 }
0x135e   : > { %v1916_v7 = vld [vmem:[%s2138_s26 + $0x1d] ss:$0 sm:$0xff] }
0x135f   : > { %v1458_v26 = vmul.f32 %v1916_v7, %v1441_v22  ;;  %v1449_v27 = vmul.f32 %v1916_v7, %v1916_v7 }
0x1361   : > { %1459 = vadd.xlane.f32.xlu0 %v1458_v26  ;;  %1450 = vadd.xlane.f32.xlu1 %v1449_v27 }
0x13ee   : > { %v1451_v29 = vpop.xlane.xlu1 %1450  ;;  %v1460_v25 = vpop.xlane.xlu0 %1459 }
0x13ef   : > { %v1452_v34 = vsub.f32 %v1917_v28, %v1451_v29  ;;  %v1461_v35 = vsub.f32 %v2394_v18, %v1460_v25 }
0x13f1   : > { %2036 = vrsqrt.f32 %v1452_v34 }
0x13fb   : > { %v2037_v33 = vpop.eup %2036 }
0x13fc   : > { %v1462_v37 = vmul.f32 %v2037_v33, %v1461_v35 }
0x13fe   : > { %v1465_v38 = vsel %vm1464_vm11, %v1462_v37, 0.0 }
0x13ff   : > { %v1466_v39 = vadd.f32 %v1465_v38, %v1441_v22 }
0x1401   : > { %1920 = vst [vmem:[%s2138_s26 + $0x18] sm:$0xff] %v1466_v39 }
0x1408   : > { %v1921_v41 = vld [vmem:[%s2138_s26 + $0x1e] ss:$0 sm:$0xff] }
0x1409   : > { %v1483_v42 = vmul.f32 %v1921_v41, %v1466_v39  ;;  %v1474_v44 = vmul.f32 %v1921_v41, %v1921_v41 }
0x140b   : > { %1484 = vadd.xlane.f32.xlu0 %v1483_v42  ;;  %1475 = vadd.xlane.f32.xlu1 %v1474_v44 }
0x140f   : > { %565 = vadd.xlane.f32.xlu0 %v564_v46 }
0x1413   : > { %1298 = vadd.xlane.f32.xlu0 %v1297_v24 }
0x1498   : > { %v1485_v49 = vpop.xlane.xlu0 %1484  ;;  %v1476_v50 = vpop.xlane.xlu1 %1475 }
0x1499   : > { %v1477_v51 = vsub.f32 %v1922_v47, %v1476_v50  ;;  %v1486_v61 = vsub.f32 %v2394_v18, %v1485_v49 }
0x149b   : > { %2038 = vrsqrt.f32 %v1477_v51 }
0x149c   : > { %v566_v54 = vpop.xlane.xlu0 %565 }
0x149d   : > { %v567_v43 = vsub.f32 %v562_v53, %v566_v54 }
0x149f   : > { %v568_v12 = vmul.f32 %v2315_v36, %v567_v43 }
0x14a0   : > { %v1299_v58 = vpop.xlane.xlu0 %1298 }
0x14a1   : > { %v571_v59 = vsel %vm570_vm9, %v568_v12, 0.0  ;;  %v1300_v60 = vsub.f32 %v2378_v48, %v1299_v58 }
0x14a2   : > { %v572_v40 = vadd.f32 %v571_v59, %v563_v31 }
0x14a3   : > { %v1301_v36 = vmul.f32 %v2486_v14, %v1300_v60 }
0x14a4   : > { %573 = vst [vmem:[%s2138_s26] sm:$0xff] %v572_v40  ;;  %1564 = vst [vmem:[%s2535_s5] sm:$0xff] %v572_v40 }
0x14a5   : > { %v2039_v62 = vpop.eup %2038  ;;  %v1304_v63 = vsel %vm1303_vm4, %v1301_v36, 0.0 }
0x14a6   : > { %v1487_v0 = vmul.f32 %v2039_v62, %v1486_v61  ;;  %v1305_v48 = vadd.f32 %v1304_v63, %v2474_v3 }
0x14a8   : > { %v1490_v1 = vsel %vm1489_vm13, %v1487_v0, 0.0  ;;  %1887 = vst [vmem:[%s2138_s26 + $0x10] sm:$0xff] %v1305_v48  ;;  %1568 = vst [vmem:[%s2535_s5 + $0x10] sm:$0xff] %v1305_v48 }
0x14a9   : > { %v1491_v2 = vadd.f32 %v1490_v1, %v1466_v39 }
0x14ab   : > { %1925 = vst [vmem:[%s2138_s26 + $0x18] sm:$0xff] %v1491_v2 }
0x14b2   : > { %v1926_v56 = vld [vmem:[%s2138_s26 + $0x1f] ss:$0 sm:$0xff] }
0x14b3   : > { %v1499_v14 = vmul.f32 %v1926_v56, %v1926_v56  ;;  %v1508_v5 = vmul.f32 %v1926_v56, %v1491_v2 }
0x14b5   : > { %1500 = vadd.xlane.f32.xlu1 %v1499_v14 }
0x14b9   : > { %983 = vadd.xlane.f32.xlu1 %v982_v4 }
0x14bd   : > { %1509 = vadd.xlane.f32.xlu1 %v1508_v5 }
0x1542   : > { %v1501_v8 = vpop.xlane.xlu1 %1500 }
0x1543   : > { %v1502_v3 = vsub.f32 %v1927_v6, %v1501_v8 }
0x1545   : > { %2040 = vrsqrt.f32 %v1502_v3 }
0x1546   : > { %v984_v10 = vpop.xlane.xlu1 %983 }
0x1547   : > { %v985_v11 = vsub.f32 %v1818_v9, %v984_v10 }
0x1549   : > { %v986_v13 = vmul.f32 %v2418_v52, %v985_v11 }
0x154a   : > { %v1510_v57 = vpop.xlane.xlu1 %1509 }
0x154b   : > { %v989_v32 = vsel %vm988_vm1, %v986_v13, 0.0  ;;  %v1511_v15 = vsub.f32 %v2394_v18, %v1510_v57 }
0x154c   : > { %v990_v55 = vadd.f32 %v989_v32, %v2401_v30 }
0x154e   : > { %1820 = vst [vmem:[%s2138_s26 + $0x8] sm:$0xff] %v990_v55  ;;  %1566 = vst [vmem:[%s2535_s5 + $0x8] sm:$0xff] %v990_v55 }
0x154f   : > { %v2041_v16 = vpop.eup %2040 }
0x1550   : > { %v1512_v17 = vmul.f32 %v2041_v16, %v1511_v15 }
0x1552   : > { %v1515_v19 = vsel %vm1514_vm15, %v1512_v17, 0.0 }
0x1553   : > { %v1516_v20 = vadd.f32 %v1515_v19, %v1491_v2 }
0x1555   : > { %1930 = vst [vmem:[%s2138_s26 + $0x18] sm:$0xff] %v1516_v20  ;;  %1570 = vst [vmem:[%s2535_s5 + $0x18] sm:$0xff] %v1516_v20 }
0x1556 PF: > { %s7_s10 = sadd.s32 1, %s2081_s10   ;;  %s2581_s6 = smov %s2073_s8 }
0x1557   : > { %p4_p6 = scmp.ge.s32.totalorder %s7_s10, 6   ;;  %s2582_s7 = smov %s2077_s9 }
0x1558   : > { %s2583_s8 = smov %s2586_s12  ;;  %s2584_s9 = smov %s2590_s13 }
0x1559   :  { %6 = sbr.rel (!%p4_p6) target bundleno = 3 (0x3), region = 399 }

// kernel: custom-call.49
= control target key start
LH: loop header
LB: loop body
LE: loop exit
PB: predicated region body
PF: predicated region fallthrough
CT: control target
= control target key end

     0   :  { %s1007_s6 = smov 0   ;;  %s1009_s7 = smov 0   ;;  %s1195_s0 = inlined_call_operand.vmem [shape: f32[2,2,1,32,32], index: 0, kind: input, shape index: {}]   ;;  %s1196_s1 = inlined_call_operand.vmem [shape: f32[2,2,1,32,32], index: 1, kind: output, shape index: {}]  }
   0x1   :  { %s1011_s8 = smov 0   ;;  %s1013_s9 = smov 0  }
   0x2   :  { %s1015_s10 = smov 0  }
   0x3 LB: > { %s883_s11 = sadd.s32 4294967295, %s993_s10   ;;  %s36_s12 = sadd.s32 1, %s985_s8  ;;  %s993_s10 = sphi %s1015_s10, %s7_s10   ;;  %s989_s9 = sphi %s1013_s9, %s1200_s9   ;;  %s985_s8 = sphi %s1011_s8, %s1199_s8   ;;  %s981_s7 = sphi %s1009_s7, %s1198_s7   ;;  %s977_s6 = sphi %s1007_s6, %s1197_s6  }
   0x4   : > { %p38_p0 = scmp.ge.s32.totalorder %s36_s12, 2  ;;  %s40_s13 = sadd.s32 1, %s989_s9 }
   0x5   : > { %p885_p2 = scmp.ge.s32.totalorder %s993_s10, 4 }
   0x6   : > { %s1202_s12 = smov (%p38_p0, %s36_s12), 0  ;;  %s1204_s13 = smov (!%p38_p0, %s40_s13), %s989_s9 }
   0x7   : > { %p42_p1 = scmp.ge.s32.totalorder %s1204_s13, 2  ;;  %54 = sbr.rel (%p885_p2) target bundleno = 17 (0x11), region = 16 }
   0x8   : > { %s56_s14 = sand.u32 (!%p885_p2), 1, %s993_s10   ;;  %s887_s15 = sshll.u32 (!%p885_p2), %s985_s8, 2 }
   0x9   : > { %s1206_s13 = smov (%p42_p1, %s1204_s13), 0  ;;  %s886_s16 = sshll.u32 (!%p885_p2), %s56_s14, 5 }
   0xa   : > { %s888_s17 = sshll.u32 (!%p885_p2), %s989_s9, 3  ;;  %s58_s23 = scalar_lea.vmem (!%p885_p2), [#allocation0], %s886_s16 }
   0xb   : > { %s65_s18 = sadd.s32 (!%p885_p2), %s888_s17, %s887_s15 }
   0xc   : > { %s889_s19 = sshll.u32 (!%p885_p2), %s65_s18, 3 }
   0xd   : > { %s67_s22 = scalar_lea.vmem (!%p885_p2), %s1195_s0, %s889_s19 }
   0xe   : > { %v101_v0 = vld [vmem:[%s67_s22] sm:$0xff]  ;;  %v103_v1 = vld [vmem:[%s67_s22 + $0x8] sm:$0xff]  ;;  %v105_v2 = vld [vmem:[%s67_s22 + $0x10] sm:$0xff] }
   0xf   : > { %102 = vst [vmem:[%s58_s23] sm:$0xff] %v101_v0  ;;  %104 = vst [vmem:[%s58_s23 + $0x8] sm:$0xff] %v103_v1  ;;  %v107_v3 = vld [vmem:[%s67_s22 + $0x18] sm:$0xff] }
  0x10   : > { %106 = vst [vmem:[%s58_s23 + $0x10] sm:$0xff] %v105_v2  ;;  %108 = vst [vmem:[%s58_s23 + $0x18] sm:$0xff] %v107_v3 }
  0x11 PF: > { %p890_p3 = scmp.ge.s32.totalorder %s993_s10, 1  ;;  %p113_p4 = scmp.lt.s32.totalorder %s993_s10, 5 }
  0x13   : > { %p114_p5 = pnand %p890_p3, %p113_p4 }
  0x15   : > { %117 = sbr.rel (%p114_p5) target bundleno = 4702 (0x125e), region = 54 }
  0x1c   : > { %s120_s24 = sand.u32 1, %s883_s11   ;;  %v131_v4 = vlaneseq  ;;  %v995_v13 = vmov -1.0   ;;  %v996_v57 = vmov 0.0   ;;  %s900_s27 = sshll.u32 %s977_s6, 2 }
  0x1d   : > { %s891_s25 = sshll.u32 %s120_s24, 5  ;;  %s901_s28 = sshll.u32 %s981_s7, 3 }
  0x1e   : > { %v1051_v5 = vand.u32 127, %v131_v4  ;;  %v1053_v6 = vshrl.u32 %v131_v4, 7  ;;  %s1055_s26 = scalar_lea.vmem [#allocation0], %s891_s25  ;;  %s763_s29 = sadd.s32 %s901_s28, %s900_s27 }
  0x1f   : > { %v138_v7 = vld [vmem:[%s1055_s26] sm:$0xff]  ;;  %v893_v40 = vld [vmem:[%s1055_s26 + $0x8] sm:$0xff]  ;;  %s902_s30 = sshll.u32 %s763_s29, 3 }
  0x20   : > { %vm137_vm0 = vcmp.eq.s32.totalorder %v1053_v6, %v1051_v5  ;;  %vm133_vm1 = vcmp.lt.s32.totalorder %v1051_v5, 32  ;;  %vm142_vm2 = vcmp.ge.s32.totalorder %v1053_v6, %v1051_v5  ;;  %vm204_vm4 = vcmp.eq.s32.totalorder %v1051_v5, 0  ;;  %s765_s4 = scalar_lea.vmem %s1196_s1, %s902_s30 }
  0x21   : > { %v139_v8 = vsel %vm137_vm0, %v138_v7, 0.0  ;;  %vm143_vm3 = vmand %vm142_vm2, %vm133_vm1  ;;  %vm201_vm5 = vcmp.eq.s32.totalorder %v1051_v5, %v1053_v6  ;;  %v205_v14 = vsel %vm204_vm4, 1.0, %v995_v13  ;;  %vm233_vm6 = vcmp.eq.s32.totalorder %v1051_v5, 1 }
  0x22   : > { %140 = vadd.xlane.f32.xlu0 %v139_v8  ;;  %v144_v10 = vsel %vm143_vm3, %v138_v7, 0.0  ;;  %v206_v15 = vsel %vm201_vm5, %v205_v14, 0.0  ;;  %vm243_vm7 = vcmp.eq.s32.totalorder %v1051_v5, 2  ;;  %vm253_vm8 = vcmp.eq.s32.totalorder %v1051_v5, 3 }
  0x23   : > { %vm263_vm9 = vcmp.eq.s32.totalorder %v1051_v5, 4  ;;  %v152_v35 = vadd.s32 8, %v1053_v6  ;;  %vm273_vm11 = vcmp.eq.s32.totalorder %v1051_v5, 5  ;;  %vm283_vm14 = vcmp.eq.s32.totalorder %v1051_v5, 6 }
  0x24   : > { %vm293_vm0 = vcmp.eq.s32.totalorder %v1051_v5, 7  ;;  %vm303_vm2 = vcmp.eq.s32.totalorder %v1051_v5, 8  ;;  %vm317_vm3 = vcmp.eq.s32.totalorder %v1051_v5, 9  ;;  %vm331_vm4 = vcmp.eq.s32.totalorder %v1051_v5, 10 }
  0x25   : > { %vm153_vm10 = vcmp.eq.s32.totalorder %v152_v35, %v1051_v5  ;;  %vm158_vm12 = vcmp.ge.s32.totalorder %v152_v35, %v1051_v5  ;;  %vm212_vm15 = vcmp.eq.s32.totalorder %v1051_v5, %v152_v35  ;;  %vm345_vm5 = vcmp.eq.s32.totalorder %v1051_v5, 11 }
  0x26   : > { %v155_v41 = vsel %vm153_vm10, %v893_v40, 0.0  ;;  %vm159_vm13 = vmand %vm158_vm12, %vm133_vm1  ;;  %v213_v58 = vsel %vm212_vm15, -1.0, %v996_v57  ;;  %vm401_vm12 = vcmp.eq.s32.totalorder %v1051_v5, 15  ;;  %vm433_vm15 = vcmp.eq.s32.totalorder %v1051_v5, 17 }
  0x27   : > { %v160_v48 = vsel %vm159_vm13, %v893_v40, 0.0 }
  0xaf   : > { %v1060_v9 = vpop.xlane.xlu0 %140 }
  0xb0   : > { %947 = vrcp.f32 %v1060_v9 }
  0xba   : > { %v1068_v11 = vpop.eup %947 }
  0xbb   : > { %v146_v12 = vmul.f32 %v1068_v11, %v144_v10 }
  0xbd   : > { %147 = vst [vmem:[#allocation2] sm:$0xff] %v146_v12 }
  0xc4   : > { %v229_v16 = vld [vmem:[#allocation2 + $0x1] ss:$0 sm:$0xff]  ;;  %v239_v19 = vld [vmem:[#allocation2 + $0x2] ss:$0 sm:$0xff]  ;;  %v249_v24 = vld [vmem:[#allocation2 + $0x3] ss:$0 sm:$0xff] }
  0xc5   : > { %v230_v17 = vxor.u32 2147483648, %v229_v16  ;;  %v240_v21 = vxor.u32 2147483648, %v239_v19  ;;  %v250_v26 = vxor.u32 2147483648, %v249_v24  ;;  %v259_v29 = vld [vmem:[#allocation2 + $0x4] ss:$0 sm:$0xff] }
  0xc6   : > { %v260_v31 = vxor.u32 2147483648, %v259_v29  ;;  %v269_v34 = vld [vmem:[#allocation2 + $0x5] ss:$0 sm:$0xff]  ;;  %v279_v42 = vld [vmem:[#allocation2 + $0x6] ss:$0 sm:$0xff] }
  0xc7   : > { %v234_v18 = vmul.f32 %v230_v17, %v206_v15  ;;  %v270_v37 = vxor.u32 2147483648, %v269_v34  ;;  %v280_v44 = vxor.u32 2147483648, %v279_v42  ;;  %v289_v51 = vld [vmem:[#allocation2 + $0x7] ss:$0 sm:$0xff] }
  0xc8   : > { %v290_v54 = vxor.u32 2147483648, %v289_v51  ;;  %v168_v51 = vadd.s32 16, %v1053_v6 }
  0xc9   : > { %235 = vadd.xlane.f32.xlu0 %v234_v18 }
  0xca   : > { %vm174_vm10 = vcmp.ge.s32.totalorder %v168_v51, %v1051_v5  ;;  %vm219_vm13 = vcmp.eq.s32.totalorder %v1051_v5, %v168_v51 }
 0x156   : > { %v236_v20 = vpop.xlane.xlu0 %235 }
 0x157   : > { %v237_v22 = vsel %vm233_vm6, %v236_v20, %v206_v15  ;;  %vm359_vm6 = vcmp.eq.s32.totalorder %v1051_v5, 12 }
 0x158   : > { %v244_v23 = vmul.f32 %v240_v21, %v237_v22 }
 0x15a   : > { %245 = vadd.xlane.f32.xlu1 %v244_v23 }
 0x1e7   : > { %v246_v25 = vpop.xlane.xlu1 %245 }
 0x1e8   : > { %v247_v27 = vsel %vm243_vm7, %v246_v25, %v237_v22  ;;  %vm373_vm7 = vcmp.eq.s32.totalorder %v1051_v5, 13 }
 0x1e9   : > { %v254_v28 = vmul.f32 %v250_v26, %v247_v27 }
 0x1eb   : > { %255 = vadd.xlane.f32.xlu1 %v254_v28 }
 0x278   : > { %v256_v30 = vpop.xlane.xlu1 %255 }
 0x279   : > { %v257_v32 = vsel %vm253_vm8, %v256_v30, %v247_v27  ;;  %vm169_vm8 = vcmp.eq.s32.totalorder %v168_v51, %v1051_v5 }
 0x27a   : > { %v264_v33 = vmul.f32 %v260_v31, %v257_v32 }
 0x27c   : > { %265 = vadd.xlane.f32.xlu0 %v264_v33 }
 0x309   : > { %v266_v36 = vpop.xlane.xlu0 %265 }
 0x30a   : > { %v267_v38 = vsel %vm263_vm9, %v266_v36, %v257_v32  ;;  %vm387_vm9 = vcmp.eq.s32.totalorder %v1051_v5, 14 }
 0x30b   : > { %v274_v39 = vmul.f32 %v270_v37, %v267_v38 }
 0x30d   : > { %275 = vadd.xlane.f32.xlu1 %v274_v39 }
 0x311   : > { %156 = vadd.xlane.f32.xlu1 %v155_v41 }
 0x39a   : > { %v276_v43 = vpop.xlane.xlu1 %275 }
 0x39b   : > { %v277_v45 = vsel %vm273_vm11, %v276_v43, %v267_v38  ;;  %vm175_vm11 = vmand %vm174_vm10, %vm133_vm1  ;;  %vm559_vm10 = vcmp.eq.s32.totalorder %v1051_v5, 24 }
 0x39c   : > { %v284_v46 = vmul.f32 %v280_v44, %v277_v45 }
 0x39e   : > { %285 = vadd.xlane.f32.xlu0 %v284_v46  ;;  %v1082_v47 = vpop.xlane.xlu1 %156 }
 0x39f   : > { %949 = vrcp.f32 %v1082_v47 }
 0x3a9   : > { %v1088_v49 = vpop.eup %949 }
 0x3aa   : > { %v162_v50 = vmul.f32 %v1088_v49, %v160_v48 }
 0x3ac   : > { %163 = vst [vmem:[#allocation2 + $0x8] sm:$0xff] %v162_v50 }
 0x3b3   : > { %v299_v52 = vld [vmem:[#allocation2 + $0x8] ss:$0 sm:$0xff]  ;;  %v313_v63 = vld [vmem:[#allocation2 + $0x9] ss:$0 sm:$0xff]  ;;  %v327_v10 = vld [vmem:[#allocation2 + $0xa] ss:$0 sm:$0xff] }
 0x3b4   : > { %v300_v55 = vxor.u32 2147483648, %v299_v52  ;;  %v314_v2 = vxor.u32 2147483648, %v313_v63  ;;  %v328_v14 = vxor.u32 2147483648, %v327_v10  ;;  %v341_v19 = vld [vmem:[#allocation2 + $0xb] ss:$0 sm:$0xff] }
 0x3b5   : > { %v342_v22 = vxor.u32 2147483648, %v341_v19  ;;  %v355_v27 = vld [vmem:[#allocation2 + $0xc] ss:$0 sm:$0xff]  ;;  %v369_v35 = vld [vmem:[#allocation2 + $0xd] ss:$0 sm:$0xff] }
 0x3b6   : > { %v308_v60 = vmul.f32 %v300_v55, %v213_v58  ;;  %v356_v30 = vxor.u32 2147483648, %v355_v27  ;;  %v370_v38 = vxor.u32 2147483648, %v369_v35  ;;  %v383_v43 = vld [vmem:[#allocation2 + $0xe] ss:$0 sm:$0xff] }
 0x3b7   : > { %v384_v46 = vxor.u32 2147483648, %v383_v43 }
 0x42b   : > { %v286_v53 = vpop.xlane.xlu0 %285 }
 0x42c   : > { %v287_v56 = vsel %vm283_vm14, %v286_v53, %v277_v45  ;;  %vm415_vm14 = vcmp.eq.s32.totalorder %v1051_v5, 16 }
 0x42d   : > { %v294_v59 = vmul.f32 %v290_v54, %v287_v56 }
 0x42f   : > { %295 = vadd.xlane.f32.xlu0 %v294_v59  ;;  %v397_v59 = vld [vmem:[#allocation2 + $0xf] ss:$0 sm:$0xff] }
 0x433   : > { %309 = vadd.xlane.f32.xlu0 %v308_v60 }
 0x4bc   : > { %v296_v61 = vpop.xlane.xlu0 %295 }
 0x4bd   : > { %v297_v62 = vsel %vm293_vm0, %v296_v61, %v287_v56  ;;  %v398_v61 = vxor.u32 2147483648, %v397_v59  ;;  %vm451_vm0 = vcmp.eq.s32.totalorder %v1051_v5, 18 }
 0x4be   : > { %v304_v0 = vmul.f32 %v300_v55, %v297_v62  ;;  %v894_v55 = vld [vmem:[%s1055_s26 + $0x10] sm:$0xff] }
 0x4c0   : > { %v310_v1 = vpop.xlane.xlu0 %309  ;;  %305 = vadd.xlane.f32.xlu1 %v304_v0 }
 0x4c1   : > { %v311_v3 = vsel %vm303_vm2, %v310_v1, %v213_v58  ;;  %v171_v58 = vsel %vm169_vm8, %v894_v55, 0.0 }
 0x4c2   : > { %v322_v4 = vmul.f32 %v314_v2, %v311_v3 }
 0x4c4   : > { %323 = vadd.xlane.f32.xlu0 %v322_v4 }
 0x54d   : > { %v306_v7 = vpop.xlane.xlu1 %305 }
 0x54e   : > { %v307_v8 = vsel %vm303_vm2, %v306_v7, %v297_v62  ;;  %vm469_vm2 = vcmp.eq.s32.totalorder %v1051_v5, 19 }
 0x54f   : > { %v318_v12 = vmul.f32 %v314_v2, %v307_v8 }
 0x551   : > { %v324_v13 = vpop.xlane.xlu0 %323  ;;  %319 = vadd.xlane.f32.xlu1 %v318_v12 }
 0x552   : > { %v325_v15 = vsel %vm317_vm3, %v324_v13, %v311_v3  ;;  %v176_v3 = vsel %vm175_vm11, %v894_v55, 0.0  ;;  %vm581_vm11 = vcmp.eq.s32.totalorder %v1051_v5, 25 }
 0x553   : > { %v336_v16 = vmul.f32 %v328_v14, %v325_v15 }
 0x555   : > { %337 = vadd.xlane.f32.xlu0 %v336_v16 }
 0x5de   : > { %v320_v17 = vpop.xlane.xlu1 %319 }
 0x5df   : > { %v321_v18 = vsel %vm317_vm3, %v320_v17, %v307_v8  ;;  %vm487_vm3 = vcmp.eq.s32.totalorder %v1051_v5, 20 }
 0x5e0   : > { %v332_v20 = vmul.f32 %v328_v14, %v321_v18 }
 0x5e2   : > { %v338_v21 = vpop.xlane.xlu0 %337  ;;  %333 = vadd.xlane.f32.xlu1 %v332_v20 }
 0x5e3   : > { %v339_v23 = vsel %vm331_vm4, %v338_v21, %v325_v15 }
 0x5e4   : > { %v350_v24 = vmul.f32 %v342_v22, %v339_v23 }
 0x5e6   : > { %351 = vadd.xlane.f32.xlu0 %v350_v24 }
 0x66f   : > { %v334_v25 = vpop.xlane.xlu1 %333 }
 0x670   : > { %v335_v26 = vsel %vm331_vm4, %v334_v25, %v321_v18  ;;  %v220_v18 = vsel %vm219_vm13, -1.0, %v996_v57  ;;  %vm505_vm4 = vcmp.eq.s32.totalorder %v1051_v5, 21  ;;  %vm625_vm13 = vcmp.eq.s32.totalorder %v1051_v5, 27 }
 0x671   : > { %v346_v28 = vmul.f32 %v342_v22, %v335_v26 }
 0x673   : > { %v352_v29 = vpop.xlane.xlu0 %351  ;;  %347 = vadd.xlane.f32.xlu1 %v346_v28 }
 0x674   : > { %v353_v31 = vsel %vm345_vm5, %v352_v29, %v339_v23 }
 0x675   : > { %v364_v32 = vmul.f32 %v356_v30, %v353_v31 }
 0x677   : > { %365 = vadd.xlane.f32.xlu0 %v364_v32 }
 0x700   : > { %v348_v33 = vpop.xlane.xlu1 %347 }
 0x701   : > { %v349_v34 = vsel %vm345_vm5, %v348_v33, %v335_v26 }
 0x702   : > { %v360_v36 = vmul.f32 %v356_v30, %v349_v34 }
 0x704   : > { %v366_v37 = vpop.xlane.xlu0 %365  ;;  %361 = vadd.xlane.f32.xlu1 %v360_v36 }
 0x705   : > { %v367_v39 = vsel %vm359_vm6, %v366_v37, %v353_v31 }
 0x706   : > { %v378_v40 = vmul.f32 %v370_v38, %v367_v39 }
 0x708   : > { %379 = vadd.xlane.f32.xlu0 %v378_v40 }
 0x791   : > { %v362_v41 = vpop.xlane.xlu1 %361 }
 0x792   : > { %v363_v42 = vsel %vm359_vm6, %v362_v41, %v349_v34  ;;  %vm523_vm6 = vcmp.eq.s32.totalorder %v1051_v5, 22 }
 0x793   : > { %v374_v44 = vmul.f32 %v370_v38, %v363_v42 }
 0x795   : > { %v380_v45 = vpop.xlane.xlu0 %379  ;;  %375 = vadd.xlane.f32.xlu1 %v374_v44 }
 0x796   : > { %v381_v48 = vsel %vm373_vm7, %v380_v45, %v367_v39 }
 0x797   : > { %v392_v50 = vmul.f32 %v384_v46, %v381_v48 }
 0x799   : > { %393 = vadd.xlane.f32.xlu0 %v392_v50 }
 0x822   : > { %v376_v52 = vpop.xlane.xlu1 %375 }
 0x823   : > { %v377_v53 = vsel %vm373_vm7, %v376_v52, %v363_v42 }
 0x824   : > { %v388_v54 = vmul.f32 %v384_v46, %v377_v53 }
 0x826   : > { %v394_v56 = vpop.xlane.xlu0 %393  ;;  %389 = vadd.xlane.f32.xlu1 %v388_v54 }
 0x827   : > { %v395_v60 = vsel %vm387_vm9, %v394_v56, %v381_v48 }
 0x828   : > { %v406_v62 = vmul.f32 %v398_v61, %v395_v60 }
 0x82a   : > { %172 = vadd.xlane.f32.xlu1 %v171_v58 }
 0x82e   : > { %407 = vadd.xlane.f32.xlu1 %v406_v62 }
 0x8b3   : > { %v390_v63 = vpop.xlane.xlu1 %389 }
 0x8b4   : > { %v391_v0 = vsel %vm387_vm9, %v390_v63, %v377_v53 }
 0x8b5   : > { %v402_v1 = vmul.f32 %v398_v61, %v391_v0 }
 0x8b7   : > { %403 = vadd.xlane.f32.xlu0 %v402_v1  ;;  %v1105_v2 = vpop.xlane.xlu1 %172 }
 0x8b8   : > { %951 = vrcp.f32 %v1105_v2 }
 0x8bb   : > { %v408_v8 = vpop.xlane.xlu1 %407 }
 0x8bc   : > { %v409_v13 = vsel %vm401_vm12, %v408_v8, %v395_v60 }
 0x8c2   : > { %v1111_v4 = vpop.eup %951 }
 0x8c3   : > { %v178_v7 = vmul.f32 %v1111_v4, %v176_v3 }
 0x8c5   : > { %179 = vst [vmem:[#allocation2 + $0x10] sm:$0xff] %v178_v7 }
 0x8cc   : > { %v411_v10 = vld [vmem:[#allocation2 + $0x10] ss:$0 sm:$0xff]  ;;  %v429_v20 = vld [vmem:[#allocation2 + $0x11] ss:$0 sm:$0xff]  ;;  %v447_v31 = vld [vmem:[#allocation2 + $0x12] ss:$0 sm:$0xff] }
 0x8cd   : > { %v412_v12 = vxor.u32 2147483648, %v411_v10  ;;  %v430_v22 = vxor.u32 2147483648, %v429_v20  ;;  %v448_v33 = vxor.u32 2147483648, %v447_v31  ;;  %v465_v42 = vld [vmem:[#allocation2 + $0x13] ss:$0 sm:$0xff] }
 0x8ce   : > { %v466_v44 = vxor.u32 2147483648, %v465_v42  ;;  %v483_v55 = vld [vmem:[#allocation2 + $0x14] ss:$0 sm:$0xff]  ;;  %v501_v7 = vld [vmem:[#allocation2 + $0x15] ss:$0 sm:$0xff] }
 0x8cf   : > { %v420_v14 = vmul.f32 %v412_v12, %v409_v13  ;;  %v424_v19 = vmul.f32 %v412_v12, %v220_v18  ;;  %v484_v58 = vxor.u32 2147483648, %v483_v55  ;;  %v502_v10 = vxor.u32 2147483648, %v501_v7  ;;  %v519_v20 = vld [vmem:[#allocation2 + $0x16] ss:$0 sm:$0xff] }
 0x8d1   : > { %421 = vadd.xlane.f32.xlu1 %v420_v14 }
 0x944   : > { %v404_v15 = vpop.xlane.xlu0 %403 }
 0x945   : > { %v405_v16 = vsel %vm401_vm12, %v404_v15, %v391_v0  ;;  %vm603_vm12 = vcmp.eq.s32.totalorder %v1051_v5, 26 }
 0x946   : > { %v416_v17 = vmul.f32 %v412_v12, %v405_v16 }
 0x948   : > { %417 = vadd.xlane.f32.xlu0 %v416_v17 }
 0x94c   : > { %425 = vadd.xlane.f32.xlu0 %v424_v19 }
 0x95e   : > { %v422_v21 = vpop.xlane.xlu1 %421 }
 0x95f   : > { %v423_v23 = vsel %vm415_vm14, %v422_v21, %v409_v13  ;;  %v184_v21 = vadd.s32 24, %v1053_v6 }
 0x960   : > { %v438_v24 = vmul.f32 %v430_v22, %v423_v23 }
 0x961   : > { %vm185_vm5 = vcmp.eq.s32.totalorder %v184_v21, %v1051_v5  ;;  %vm190_vm7 = vcmp.ge.s32.totalorder %v184_v21, %v1051_v5  ;;  %vm226_vm9 = vcmp.eq.s32.totalorder %v1051_v5, %v184_v21 }
 0x962   : > { %439 = vadd.xlane.f32.xlu0 %v438_v24  ;;  %vm191_vm8 = vmand %vm190_vm7, %vm133_vm1  ;;  %vm541_vm1 = vcmp.eq.s32.totalorder %v1051_v5, 23 }
 0x9d5   : > { %v418_v25 = vpop.xlane.xlu0 %417 }
 0x9d6   : > { %v419_v26 = vsel %vm415_vm14, %v418_v25, %v405_v16 }
 0x9d7   : > { %v434_v27 = vmul.f32 %v430_v22, %v419_v26 }
 0x9d9   : > { %v426_v28 = vpop.xlane.xlu0 %425  ;;  %435 = vadd.xlane.f32.xlu1 %v434_v27 }
 0x9da   : > { %v427_v29 = vsel %vm415_vm14, %v426_v28, %v220_v18  ;;  %vm647_vm14 = vcmp.eq.s32.totalorder %v1051_v5, 28 }
 0x9db   : > { %v442_v30 = vmul.f32 %v430_v22, %v427_v29 }
 0x9dd   : > { %443 = vadd.xlane.f32.xlu1 %v442_v30 }
 0x9ef   : > { %v440_v32 = vpop.xlane.xlu0 %439 }
 0x9f0   : > { %v441_v34 = vsel %vm433_vm15, %v440_v32, %v423_v23  ;;  %v520_v23 = vxor.u32 2147483648, %v519_v20 }
 0x9f1   : > { %v456_v35 = vmul.f32 %v448_v33, %v441_v34 }
 0x9f3   : > { %457 = vadd.xlane.f32.xlu1 %v456_v35 }
 0xa66   : > { %v436_v36 = vpop.xlane.xlu1 %435 }
 0xa67   : > { %v437_v37 = vsel %vm433_vm15, %v436_v36, %v419_v26  ;;  %v895_v26 = vld [vmem:[%s1055_s26 + $0x18] sm:$0xff] }
 0xa68   : > { %v452_v38 = vmul.f32 %v448_v33, %v437_v37  ;;  %v187_v27 = vsel %vm185_vm5, %v895_v26, 0.0  ;;  %vm732_vm5 = vweird.f32 %v1060_v9 }
 0xa6a   : > { %453 = vadd.xlane.f32.xlu0 %v452_v38  ;;  %v444_v39 = vpop.xlane.xlu1 %443 }
 0xa6b   : > { %v445_v40 = vsel %vm433_vm15, %v444_v39, %v427_v29  ;;  %v192_v39 = vsel %vm191_vm8, %v895_v26, 0.0  ;;  %vm669_vm15 = vcmp.eq.s32.totalorder %v1051_v5, 29 }
 0xa6c   : > { %v460_v41 = vmul.f32 %v448_v33, %v445_v40  ;;  %v537_v33 = vld [vmem:[#allocation2 + $0x17] ss:$0 sm:$0xff] }
 0xa6d   : > { %v538_v35 = vxor.u32 2147483648, %v537_v33 }
 0xa6e   : > { %461 = vadd.xlane.f32.xlu0 %v460_v41 }
 0xa80   : > { %v458_v43 = vpop.xlane.xlu1 %457 }
 0xa81   : > { %v459_v45 = vsel %vm451_vm0, %v458_v43, %v441_v34 }
 0xa82   : > { %v474_v46 = vmul.f32 %v466_v44, %v459_v45 }
 0xa84   : > { %475 = vadd.xlane.f32.xlu0 %v474_v46 }
 0xaf7   : > { %v454_v48 = vpop.xlane.xlu0 %453 }
 0xaf8   : > { %v455_v50 = vsel %vm451_vm0, %v454_v48, %v437_v37 }
 0xaf9   : > { %v470_v51 = vmul.f32 %v466_v44, %v455_v50 }
 0xafb   : > { %471 = vadd.xlane.f32.xlu1 %v470_v51  ;;  %v462_v52 = vpop.xlane.xlu0 %461 }
 0xafc   : > { %v463_v53 = vsel %vm451_vm0, %v462_v52, %v445_v40  ;;  %vm691_vm0 = vcmp.eq.s32.totalorder %v1051_v5, 30 }
 0xafd   : > { %v478_v54 = vmul.f32 %v466_v44, %v463_v53 }
 0xaff   : > { %479 = vadd.xlane.f32.xlu1 %v478_v54  ;;  %v227_v54 = vsel %vm226_vm9, -1.0, %v996_v57 }
 0xb11   : > { %v476_v56 = vpop.xlane.xlu0 %475 }
 0xb12   : > { %v477_v59 = vsel %vm469_vm2, %v476_v56, %v459_v45 }
 0xb13   : > { %v492_v60 = vmul.f32 %v484_v58, %v477_v59 }
 0xb15   : > { %493 = vadd.xlane.f32.xlu1 %v492_v60 }
 0xb88   : > { %v472_v61 = vpop.xlane.xlu1 %471 }
 0xb89   : > { %v473_v62 = vsel %vm469_vm2, %v472_v61, %v455_v50 }
 0xb8a   : > { %v488_v63 = vmul.f32 %v484_v58, %v473_v62 }
 0xb8c   : > { %489 = vadd.xlane.f32.xlu0 %v488_v63  ;;  %v480_v0 = vpop.xlane.xlu1 %479 }
 0xb8d   : > { %v481_v1 = vsel %vm469_vm2, %v480_v0, %v463_v53  ;;  %vm713_vm2 = vcmp.eq.s32.totalorder %v1051_v5, 31 }
 0xb8e   : > { %v496_v3 = vmul.f32 %v484_v58, %v481_v1 }
 0xb90   : > { %497 = vadd.xlane.f32.xlu0 %v496_v3 }
 0xba2   : > { %v494_v8 = vpop.xlane.xlu1 %493 }
 0xba3   : > { %v495_v12 = vsel %vm487_vm3, %v494_v8, %v477_v59 }
 0xba4   : > { %v510_v13 = vmul.f32 %v502_v10, %v495_v12 }
 0xba6   : > { %511 = vadd.xlane.f32.xlu0 %v510_v13 }
 0xc19   : > { %v490_v14 = vpop.xlane.xlu0 %489 }
 0xc1a   : > { %v491_v15 = vsel %vm487_vm3, %v490_v14, %v473_v62 }
 0xc1b   : > { %v506_v16 = vmul.f32 %v502_v10, %v491_v15 }
 0xc1d   : > { %507 = vadd.xlane.f32.xlu1 %v506_v16  ;;  %v498_v17 = vpop.xlane.xlu0 %497 }
 0xc1e   : > { %v499_v18 = vsel %vm487_vm3, %v498_v17, %v481_v1  ;;  %vm737_vm3 = vweird.f32 %v1082_v47 }
 0xc1f   : > { %v514_v19 = vmul.f32 %v502_v10, %v499_v18 }
 0xc21   : > { %515 = vadd.xlane.f32.xlu1 %v514_v19 }
 0xc33   : > { %v512_v22 = vpop.xlane.xlu0 %511 }
 0xc34   : > { %v513_v24 = vsel %vm505_vm4, %v512_v22, %v495_v12 }
 0xc35   : > { %v528_v25 = vmul.f32 %v520_v23, %v513_v24 }
 0xc37   : > { %529 = vadd.xlane.f32.xlu1 %v528_v25 }
 0xc3b   : > { %188 = vadd.xlane.f32.xlu1 %v187_v27 }
 0xcaa   : > { %v508_v28 = vpop.xlane.xlu1 %507 }
 0xcab   : > { %v509_v29 = vsel %vm505_vm4, %v508_v28, %v491_v15 }
 0xcac   : > { %v524_v30 = vmul.f32 %v520_v23, %v509_v29 }
 0xcae   : > { %525 = vadd.xlane.f32.xlu0 %v524_v30  ;;  %v516_v31 = vpop.xlane.xlu1 %515 }
 0xcaf   : > { %v517_v6 = vsel %vm505_vm4, %v516_v31, %v499_v18 }
 0xcb0   : > { %v532_v32 = vmul.f32 %v520_v23, %v517_v6 }
 0xcb2   : > { %533 = vadd.xlane.f32.xlu0 %v532_v32 }
 0xcc4   : > { %v530_v34 = vpop.xlane.xlu1 %529 }
 0xcc5   : > { %v531_v36 = vsel %vm523_vm6, %v530_v34, %v513_v24 }
 0xcc6   : > { %v546_v37 = vmul.f32 %v538_v35, %v531_v36 }
 0xcc8   : > { %547 = vadd.xlane.f32.xlu1 %v546_v37  ;;  %v1135_v38 = vpop.xlane.xlu1 %188 }
 0xcc9   : > { %953 = vrcp.f32 %v1135_v38  ;;  %vm749_vm4 = vweird.f32 %v1135_v38 }
 0xcd3   : > { %v1141_v40 = vpop.eup %953 }
 0xcd4   : > { %v194_v41 = vmul.f32 %v1141_v40, %v192_v39 }
 0xcd6   : > { %195 = vst [vmem:[#allocation2 + $0x18] sm:$0xff] %v194_v41 }
 0xcdd   : > { %v555_v50 = vld [vmem:[#allocation2 + $0x18] ss:$0 sm:$0xff]  ;;  %v577_v0 = vld [vmem:[#allocation2 + $0x19] ss:$0 sm:$0xff]  ;;  %v599_v19 = vld [vmem:[#allocation2 + $0x1a] ss:$0 sm:$0xff] }
 0xcde   : > { %v556_v51 = vxor.u32 2147483648, %v555_v50  ;;  %v578_v3 = vxor.u32 2147483648, %v577_v0  ;;  %v600_v21 = vxor.u32 2147483648, %v599_v19  ;;  %v621_v32 = vld [vmem:[#allocation2 + $0x1b] ss:$0 sm:$0xff] }
 0xcdf   : > { %v622_v34 = vxor.u32 2147483648, %v621_v32  ;;  %v643_v50 = vld [vmem:[#allocation2 + $0x1c] ss:$0 sm:$0xff] }
 0xce0   : > { %v572_v56 = vmul.f32 %v556_v51, %v227_v54 }
 0xd3b   : > { %v526_v42 = vpop.xlane.xlu0 %525 }
 0xd3c   : > { %v527_v43 = vsel %vm523_vm6, %v526_v42, %v509_v29 }
 0xd3d   : > { %v542_v44 = vmul.f32 %v538_v35, %v527_v43 }
 0xd3f   : > { %543 = vadd.xlane.f32.xlu0 %v542_v44  ;;  %v534_v45 = vpop.xlane.xlu0 %533 }
 0xd40   : > { %v535_v46 = vsel %vm523_vm6, %v534_v45, %v517_v6  ;;  %vm743_vm6 = vweird.f32 %v1105_v2 }
 0xd41   : > { %v550_v48 = vmul.f32 %v538_v35, %v535_v46 }
 0xd43   : > { %551 = vadd.xlane.f32.xlu0 %v550_v48 }
 0xd55   : > { %v548_v52 = vpop.xlane.xlu1 %547 }
 0xd56   : > { %v549_v53 = vsel %vm541_vm1, %v548_v52, %v531_v36  ;;  %v644_v52 = vxor.u32 2147483648, %v643_v50 }
 0xd57   : > { %v564_v55 = vmul.f32 %v556_v51, %v549_v53 }
 0xd59   : > { %565 = vadd.xlane.f32.xlu0 %v564_v55 }
 0xd5d   : > { %573 = vadd.xlane.f32.xlu0 %v572_v56 }
 0xdcc   : > { %v544_v58 = vpop.xlane.xlu0 %543 }
 0xdcd   : > { %v545_v59 = vsel %vm541_vm1, %v544_v58, %v527_v43 }
 0xdce   : > { %v560_v60 = vmul.f32 %v556_v51, %v545_v59 }
 0xdd0   : > { %v552_v61 = vpop.xlane.xlu0 %551  ;;  %561 = vadd.xlane.f32.xlu1 %v560_v60 }
 0xdd1   : > { %v553_v62 = vsel %vm541_vm1, %v552_v61, %v535_v46 }
 0xdd2   : > { %v568_v63 = vmul.f32 %v556_v51, %v553_v62 }
 0xdd4   : > { %569 = vadd.xlane.f32.xlu1 %v568_v63 }
 0xde6   : > { %v566_v1 = vpop.xlane.xlu0 %565 }
 0xde7   : > { %v567_v7 = vsel %vm559_vm10, %v566_v1, %v549_v53  ;;  %v665_v1 = vld [vmem:[#allocation2 + $0x1d] ss:$0 sm:$0xff] }
 0xde8   : > { %v586_v8 = vmul.f32 %v578_v3, %v567_v7 }
 0xdea   : > { %587 = vadd.xlane.f32.xlu0 %v586_v8  ;;  %v574_v57 = vpop.xlane.xlu0 %573 }
 0xdeb   : > { %v575_v10 = vsel %vm559_vm10, %v574_v57, %v227_v54 }
 0xdec   : > { %v594_v12 = vmul.f32 %v578_v3, %v575_v10 }
 0xdee   : > { %595 = vadd.xlane.f32.xlu0 %v594_v12 }
 0xe5d   : > { %v562_v13 = vpop.xlane.xlu1 %561 }
 0xe5e   : > { %v563_v14 = vsel %vm559_vm10, %v562_v13, %v545_v59 }
 0xe5f   : > { %v582_v15 = vmul.f32 %v578_v3, %v563_v14 }
 0xe61   : > { %583 = vadd.xlane.f32.xlu1 %v582_v15  ;;  %v570_v16 = vpop.xlane.xlu1 %569 }
 0xe62   : > { %v571_v17 = vsel %vm559_vm10, %v570_v16, %v553_v62 }
 0xe63   : > { %v590_v18 = vmul.f32 %v578_v3, %v571_v17 }
 0xe65   : > { %591 = vadd.xlane.f32.xlu1 %v590_v18 }
 0xe77   : > { %v588_v20 = vpop.xlane.xlu0 %587 }
 0xe78   : > { %v589_v22 = vsel %vm581_vm11, %v588_v20, %v567_v7  ;;  %v666_v7 = vxor.u32 2147483648, %v665_v1  ;;  %v687_v20 = vld [vmem:[#allocation2 + $0x1e] ss:$0 sm:$0xff] }
 0xe79   : > { %v608_v23 = vmul.f32 %v600_v21, %v589_v22 }
 0xe7b   : > { %609 = vadd.xlane.f32.xlu0 %v608_v23  ;;  %v596_v24 = vpop.xlane.xlu0 %595 }
 0xe7c   : > { %v597_v25 = vsel %vm581_vm11, %v596_v24, %v575_v10 }
 0xe7d   : > { %v616_v26 = vmul.f32 %v600_v21, %v597_v25 }
 0xe7f   : > { %617 = vadd.xlane.f32.xlu0 %v616_v26 }
 0xeee   : > { %v584_v27 = vpop.xlane.xlu1 %583 }
 0xeef   : > { %v585_v28 = vsel %vm581_vm11, %v584_v27, %v563_v14 }
 0xef0   : > { %v604_v29 = vmul.f32 %v600_v21, %v585_v28 }
 0xef2   : > { %605 = vadd.xlane.f32.xlu1 %v604_v29  ;;  %v592_v30 = vpop.xlane.xlu1 %591 }
 0xef3   : > { %v593_v31 = vsel %vm581_vm11, %v592_v30, %v571_v17 }
 0xef4   : > { %v612_v6 = vmul.f32 %v600_v21, %v593_v31 }
 0xef6   : > { %613 = vadd.xlane.f32.xlu1 %v612_v6 }
 0xf08   : > { %v610_v33 = vpop.xlane.xlu0 %609 }
 0xf09   : > { %v611_v35 = vsel %vm603_vm12, %v610_v33, %v589_v22  ;;  %v688_v22 = vxor.u32 2147483648, %v687_v20  ;;  %v709_v33 = vld [vmem:[#allocation2 + $0x1f] ss:$0 sm:$0xff] }
 0xf0a   : > { %v630_v36 = vmul.f32 %v622_v34, %v611_v35 }
 0xf0c   : > { %631 = vadd.xlane.f32.xlu0 %v630_v36  ;;  %v618_v37 = vpop.xlane.xlu0 %617 }
 0xf0d   : > { %v619_v39 = vsel %vm603_vm12, %v618_v37, %v597_v25 }
 0xf0e   : > { %v638_v41 = vmul.f32 %v622_v34, %v619_v39 }
 0xf10   : > { %639 = vadd.xlane.f32.xlu0 %v638_v41 }
 0xf7f   : > { %v606_v42 = vpop.xlane.xlu1 %605 }
 0xf80   : > { %v607_v43 = vsel %vm603_vm12, %v606_v42, %v585_v28 }
 0xf81   : > { %v626_v44 = vmul.f32 %v622_v34, %v607_v43 }
 0xf83   : > { %627 = vadd.xlane.f32.xlu1 %v626_v44  ;;  %v614_v45 = vpop.xlane.xlu1 %613 }
 0xf84   : > { %v615_v46 = vsel %vm603_vm12, %v614_v45, %v593_v31 }
 0xf85   : > { %v634_v48 = vmul.f32 %v622_v34, %v615_v46 }
 0xf87   : > { %635 = vadd.xlane.f32.xlu1 %v634_v48 }
 0xf99   : > { %v632_v51 = vpop.xlane.xlu0 %631 }
 0xf9a   : > { %v633_v53 = vsel %vm625_vm13, %v632_v51, %v611_v35  ;;  %v710_v35 = vxor.u32 2147483648, %v709_v33 }
 0xf9b   : > { %v652_v54 = vmul.f32 %v644_v52, %v633_v53 }
 0xf9d   : > { %653 = vadd.xlane.f32.xlu0 %v652_v54  ;;  %v640_v55 = vpop.xlane.xlu0 %639 }
 0xf9e   : > { %v641_v56 = vsel %vm625_vm13, %v640_v55, %v619_v39 }
 0xf9f   : > { %v660_v58 = vmul.f32 %v644_v52, %v641_v56 }
 0xfa1   : > { %661 = vadd.xlane.f32.xlu0 %v660_v58 }
0x1010   : > { %v628_v59 = vpop.xlane.xlu1 %627 }
0x1011   : > { %v629_v60 = vsel %vm625_vm13, %v628_v59, %v607_v43 }
0x1012   : > { %v648_v61 = vmul.f32 %v644_v52, %v629_v60 }
0x1014   : > { %649 = vadd.xlane.f32.xlu1 %v648_v61  ;;  %v636_v62 = vpop.xlane.xlu1 %635 }
0x1015   : > { %v637_v63 = vsel %vm625_vm13, %v636_v62, %v615_v46 }
0x1016   : > { %v656_v0 = vmul.f32 %v644_v52, %v637_v63 }
0x1018   : > { %657 = vadd.xlane.f32.xlu1 %v656_v0 }
0x102a   : > { %v654_v3 = vpop.xlane.xlu0 %653 }
0x102b   : > { %v655_v8 = vsel %vm647_vm14, %v654_v3, %v633_v53 }
0x102c   : > { %v674_v57 = vmul.f32 %v666_v7, %v655_v8 }
0x102e   : > { %675 = vadd.xlane.f32.xlu0 %v674_v57  ;;  %v662_v10 = vpop.xlane.xlu0 %661 }
0x102f   : > { %v663_v12 = vsel %vm647_vm14, %v662_v10, %v641_v56 }
0x1030   : > { %v682_v13 = vmul.f32 %v666_v7, %v663_v12 }
0x1032   : > { %683 = vadd.xlane.f32.xlu0 %v682_v13 }
0x10a1   : > { %v650_v14 = vpop.xlane.xlu1 %649 }
0x10a2   : > { %v651_v15 = vsel %vm647_vm14, %v650_v14, %v629_v60 }
0x10a3   : > { %v670_v16 = vmul.f32 %v666_v7, %v651_v15 }
0x10a5   : > { %671 = vadd.xlane.f32.xlu1 %v670_v16  ;;  %v658_v17 = vpop.xlane.xlu1 %657 }
0x10a6   : > { %v659_v18 = vsel %vm647_vm14, %v658_v17, %v637_v63 }
0x10a7   : > { %v678_v19 = vmul.f32 %v666_v7, %v659_v18 }
0x10a9   : > { %679 = vadd.xlane.f32.xlu1 %v678_v19 }
0x10bb   : > { %v676_v21 = vpop.xlane.xlu0 %675 }
0x10bc   : > { %v677_v23 = vsel %vm669_vm15, %v676_v21, %v655_v8 }
0x10bd   : > { %v696_v24 = vmul.f32 %v688_v22, %v677_v23 }
0x10bf   : > { %697 = vadd.xlane.f32.xlu0 %v696_v24  ;;  %v684_v25 = vpop.xlane.xlu0 %683 }
0x10c0   : > { %v685_v26 = vsel %vm669_vm15, %v684_v25, %v663_v12 }
0x10c1   : > { %v704_v27 = vmul.f32 %v688_v22, %v685_v26 }
0x10c3   : > { %705 = vadd.xlane.f32.xlu0 %v704_v27 }
0x1132   : > { %v672_v28 = vpop.xlane.xlu1 %671 }
0x1133   : > { %v673_v29 = vsel %vm669_vm15, %v672_v28, %v651_v15 }
0x1134   : > { %v692_v30 = vmul.f32 %v688_v22, %v673_v29 }
0x1136   : > { %693 = vadd.xlane.f32.xlu1 %v692_v30  ;;  %v680_v31 = vpop.xlane.xlu1 %679 }
0x1137   : > { %v681_v6 = vsel %vm669_vm15, %v680_v31, %v659_v18 }
0x1138   : > { %v700_v32 = vmul.f32 %v688_v22, %v681_v6 }
0x113a   : > { %701 = vadd.xlane.f32.xlu1 %v700_v32 }
0x114c   : > { %v698_v34 = vpop.xlane.xlu0 %697 }
0x114d   : > { %v699_v36 = vsel %vm691_vm0, %v698_v34, %v677_v23 }
0x114e   : > { %v718_v37 = vmul.f32 %v710_v35, %v699_v36 }
0x1150   : > { %719 = vadd.xlane.f32.xlu0 %v718_v37  ;;  %v706_v39 = vpop.xlane.xlu0 %705 }
0x1151   : > { %v707_v41 = vsel %vm691_vm0, %v706_v39, %v685_v26 }
0x1152   : > { %v726_v42 = vmul.f32 %v710_v35, %v707_v41 }
0x1154   : > { %727 = vadd.xlane.f32.xlu0 %v726_v42 }
0x11c3   : > { %v694_v43 = vpop.xlane.xlu1 %693 }
0x11c4   : > { %v695_v44 = vsel %vm691_vm0, %v694_v43, %v673_v29 }
0x11c5   : > { %v714_v45 = vmul.f32 %v710_v35, %v695_v44 }
0x11c7   : > { %715 = vadd.xlane.f32.xlu1 %v714_v45  ;;  %v702_v46 = vpop.xlane.xlu1 %701 }
0x11c8   : > { %v703_v48 = vsel %vm691_vm0, %v702_v46, %v681_v6 }
0x11c9   : > { %v722_v50 = vmul.f32 %v710_v35, %v703_v48 }
0x11cb   : > { %723 = vadd.xlane.f32.xlu1 %v722_v50 }
0x11dd   : > { %v720_v51 = vpop.xlane.xlu0 %719 }
0x11de   : > { %v721_v52 = vsel %vm713_vm2, %v720_v51, %v699_v36 }
0x11df   : > { %v736_v53 = vmul.f32 %v1088_v49, %v721_v52 }
0x11e1   : > { %v738_v54 = vsel %vm737_vm3, %v721_v52, %v736_v53  ;;  %v728_v55 = vpop.xlane.xlu0 %727 }
0x11e2   : > { %802 = vst [vmem:[%s765_s4 + $0x8] sm:$0xff] %v738_v54  ;;  %v729_v56 = vsel %vm713_vm2, %v728_v55, %v707_v41 }
0x11e3   : > { %v748_v58 = vmul.f32 %v1141_v40, %v729_v56 }
0x11e5   : > { %v750_v59 = vsel %vm749_vm4, %v729_v56, %v748_v58 }
0x11e6   : > { %806 = vst [vmem:[%s765_s4 + $0x18] sm:$0xff] %v750_v59 }
0x1254   : > { %v716_v60 = vpop.xlane.xlu1 %715 }
0x1255   : > { %v717_v61 = vsel %vm713_vm2, %v716_v60, %v695_v44 }
0x1256   : > { %v731_v49 = vmul.f32 %v1068_v11, %v717_v61 }
0x1258   : > { %v733_v47 = vsel %vm732_vm5, %v717_v61, %v731_v49  ;;  %v724_v62 = vpop.xlane.xlu1 %723 }
0x1259   : > { %800 = vst [vmem:[%s765_s4] sm:$0xff] %v733_v47  ;;  %v725_v63 = vsel %vm713_vm2, %v724_v62, %v703_v48 }
0x125a   : > { %v742_v40 = vmul.f32 %v1111_v4, %v725_v63 }
0x125c   : > { %v744_v38 = vsel %vm743_vm6, %v725_v63, %v742_v40 }
0x125d   : > { %804 = vst [vmem:[%s765_s4 + $0x10] sm:$0xff] %v744_v38 }
0x125e PF: > { %s7_s10 = sadd.s32 1, %s993_s10   ;;  %s1197_s6 = smov %s985_s8 }
0x125f   : > { %p4_p6 = scmp.ge.s32.totalorder %s7_s10, 6   ;;  %s1198_s7 = smov %s989_s9 }
0x1260   : > { %s1199_s8 = smov %s1202_s12  ;;  %s1200_s9 = smov %s1206_s13 }
0x1261   :  { %6 = sbr.rel (!%p4_p6) target bundleno = 3 (0x3), region = 158 }

// kernel: custom-call.17
= control target key start
LH: loop header
LB: loop body
LE: loop exit
PB: predicated region body
PF: predicated region fallthrough
CT: control target
= control target key end

     0   :  { %s2994_s0 = inlined_call_operand.vmem [shape: f32[2,2,16,16], index: 0, kind: input, shape index: {}]   ;;  %s2995_s1 = inlined_call_operand.vmem [shape: f32[2,2,16,16], index: 1, kind: input, shape index: {}]   ;;  %s2996_s2 = inlined_call_operand.vmem [shape: f32[2,2,16,16], index: 2, kind: input, shape index: {}]   ;;  %s2997_s3 = inlined_call_operand.vmem [shape: f32[2,2,16,16], index: 3, kind: input, shape index: {}]   ;;  %s2998_s4 = inlined_call_operand.vmem [shape: f32[2,2,16], index: 4, kind: output, shape index: {0}]   ;;  %s2999_s5 = inlined_call_operand.vmem [shape: f32[2,2,16], index: 5, kind: output, shape index: {1}]   ;;  %s3000_s6 = inlined_call_operand.hbm [shape: f32[2,2,16,16], index: 6, kind: output, shape index: {2}]   ;;  %s3001_s7 = inlined_call_operand.hbm [shape: f32[2,2,16,16], index: 7, kind: output, shape index: {3}]   ;;  %s3002_s8 = inlined_call_operand.hbm [shape: f32[2,2,16,16], index: 8, kind: output, shape index: {4}]   ;;  %s3003_s9 = inlined_call_operand.hbm [shape: f32[2,2,16,16], index: 9, kind: output, shape index: {5}]  }
   0x1   :  { %3008 = sst [smem:[#allocation35_spill]] %s2994_s0 }
   0x2   :  { %3009 = sst [smem:[#allocation36_spill]] %s2995_s1 }
   0x3   :  { %3010 = sst [smem:[#allocation37_spill]] %s2996_s2 }
   0x4   :  { %11 = vsyncpa [#allocation9], 0 }
   0x5   :  { %13 = vsyncpa [#allocation9 + $0x1], 0 }
   0x6   :  { %14 = vsyncpa [#allocation11], 0 }
   0x7   :  { %16 = vsyncpa [#allocation11 + $0x1], 0 }
   0x8   :  { %17 = vsyncpa [#allocation14], 0 }
   0x9   :  { %19 = vsyncpa [#allocation14 + $0x1], 0  ;;  %s2358_s30 = smov 0   ;;  %s2360_s10 = smov 0  }
   0xa   :  { %s2362_s11 = smov 0   ;;  %s2364_s12 = smov 0  }
   0xb   :  { %s2366_s13 = smov 0   ;;  %s2368_s14 = smov 0  }
   0xc   :  { %s2370_s15 = smov 0  }
   0xd LB: > { %3011 = sst [smem:[#allocation31_spill]] %s2287_s14  ;;  %s3004_s17 = sadd.s32 4294967295, %s2291_s15   ;;  %s2291_s15 = sphi %s2370_s15, %s25_s15   ;;  %s2287_s14 = sphi %s2368_s14, %s3031_s14   ;;  %s2283_s13 = sphi %s2366_s13, %s3035_s13   ;;  %s2279_s12 = sphi %s2364_s12, %s3029_s12   ;;  %s2275_s11 = sphi %s2362_s11, %s3034_s11   ;;  %s2271_s10 = sphi %s2360_s10, %s3033_s10   ;;  %s2267_s30 = sphi %s2358_s30, %s3032_s30  }
   0xe   : > { %s34_s18 = sadd.s32 1, %s2283_s13  ;;  %s37_s19 = sadd.s32 1, %s2287_s14 }
   0xf   : > { %p35_p0 = scmp.ge.s32.totalorder %s34_s18, 2  ;;  %s41_s20 = sshrl.u32 %s2283_s13, 3 }
  0x10   : > { %p58_p1 = scmp.ne.s32.totalorder %s2271_s10, %s2267_s30  ;;  %p59_p2 = scmp.eq.s32.totalorder %s3004_s17, 3 }
  0x11   : > { %s3037_s18 = smov (%p35_p0, %s34_s18), 0  ;;  %s3039_s19 = smov (!%p35_p0, %s37_s19), %s2287_s14 }
  0x12   : > { %3012 = sst [smem:[#allocation32_spill]] %s3037_s18  ;;  %s42_s21 = sshrl.u32 %s3037_s18, 3 }
  0x13   : > { %p39_p3 = scmp.ge.s32.totalorder %s3039_s19, 2  ;;  %s44_s22 = ssub.s32 %s41_s20, %s42_s21 }
  0x14   : > { %p2406_p4 = por %p59_p2, %p58_p1  ;;  %s48_s26 = sadd.s32 1, %s2271_s10 }
  0x15   : > { %s3041_s19 = smov (%p39_p3, %s3039_s19), 0  ;;  %p1864_p6 = scmp.ge.s32.totalorder %s2291_s15, 4 }
  0x16   : > { %3014 = sst [smem:[#allocation33_spill]] %s3041_s19  ;;  %s43_s24 = ssub.s32 %s2287_s14, %s3041_s19 }
  0x17   : > { %s45_s25 = sor.u32 %s44_s22, %s43_s24  ;;  %111 = sbr.rel (%p1864_p6) target bundleno = 39 (0x27), region = 16 }
  0x18   : > { %p46_p5 = scmp.eq.s32.totalorder %s45_s25, 0  ;;  %s113_s28 = sand.u32 (!%p1864_p6), 1, %s2291_s15  }
  0x19   : > { %s1866_s29 = sshll.u32 (!%p1864_p6), %s2287_s14, 1  ;;  %s1865_s20 = sshll.u32 (!%p1864_p6), %s113_s28, 4 }
  0x1a   : > { %s2416_s27 = scalar_select %p46_p5, %s2271_s10, %s48_s26  }
  0x1b   : > { %s117_s21 = sadd.s32 (!%p1864_p6), %s2283_s13, %s1866_s29  ;;  %s3016_s0 = sld [smem:[#allocation35_spill]] (!%p1864_p6) }
  0x1c   : > { %3015 = sst [smem:[#allocation34_spill]] %s2416_s27  ;;  %s1867_s16 = sshll.u32 (!%p1864_p6), %s117_s21, 4 }
  0x1d   : > { %s3017_s1 = sld [smem:[#allocation36_spill]] (!%p1864_p6)  ;;  %s115_s26 = scalar_lea.vmem (!%p1864_p6), [#allocation0], %s1865_s20 }
  0x1e   : > { %s3018_s2 = sld [smem:[#allocation37_spill]]  ;;  %s142_s29 = scalar_lea.vmem [#allocation1], %s1865_s20 }
  0x1f   : > { %s169_s21 = scalar_lea.vmem [#allocation2], %s1865_s20  ;;  %s196_s22 = scalar_lea.vmem [#allocation3], %s1865_s20 }
  0x21   : > { %s119_s19 = scalar_lea.vmem %s3016_s0, %s1867_s16 }
  0x22   : > { %v132_v0 = vld [vmem:[%s119_s19] sm:$0xff]  ;;  %v134_v1 = vld [vmem:[%s119_s19 + $0x8] sm:$0xff]  ;;  %s200_s19 = scalar_lea.vmem %s2997_s3, %s1867_s16 }
  0x23   : > { %s146_s25 = scalar_lea.vmem %s3017_s1, %s1867_s16  ;;  %133 = vst [vmem:[%s115_s26] sm:$0xff] %v132_v0  ;;  %135 = vst [vmem:[%s115_s26 + $0x8] sm:$0xff] %v134_v1  ;;  %v213_v6 = vld [vmem:[%s200_s19] sm:$0xff]  ;;  %v215_v7 = vld [vmem:[%s200_s19 + $0x8] sm:$0xff] }
  0x24   : > { %v159_v2 = vld [vmem:[%s146_s25] sm:$0xff]  ;;  %v161_v3 = vld [vmem:[%s146_s25 + $0x8] sm:$0xff]  ;;  %s173_s28 = scalar_lea.vmem %s3018_s2, %s1867_s16  ;;  %214 = vst [vmem:[%s196_s22] sm:$0xff] %v213_v6  ;;  %216 = vst [vmem:[%s196_s22 + $0x8] sm:$0xff] %v215_v7 }
  0x25   : > { %160 = vst [vmem:[%s142_s29] sm:$0xff] %v159_v2  ;;  %162 = vst [vmem:[%s142_s29 + $0x8] sm:$0xff] %v161_v3  ;;  %v186_v4 = vld [vmem:[%s173_s28] sm:$0xff]  ;;  %v188_v5 = vld [vmem:[%s173_s28 + $0x8] sm:$0xff] }
  0x26   : > { %187 = vst [vmem:[%s169_s21] sm:$0xff] %v186_v4  ;;  %189 = vst [vmem:[%s169_s21 + $0x8] sm:$0xff] %v188_v5 }
  0x27 PF: > { %p1877_p7 = scmp.ge.s32.totalorder %s2291_s15, 1  ;;  %p221_p8 = scmp.lt.s32.totalorder %s2291_s15, 5 }
  0x29   : > { %p222_p9 = pnand %p1877_p7, %p221_p8 }
  0x2b   : > { %225 = sbr.rel (%p222_p9) target bundleno = 1161 (0x489), region = 96 }
  0x32   : > { %s3019_s14 = sadd.s32 4294967295, %s2291_s15   ;;  %s262_s16 = sand.u32 1, %s2267_s30   ;;  %v334_v8 = vlaneseq  ;;  %v2301_v19 = vmov 0.0  }
  0x33   : > { %s2438_s27 = sand.u32 1, %s3019_s14   ;;  %s2444_s20 = sshll.u32 %s262_s16, 1 }
  0x34   : > { %s2442_s24 = sshll.u32 %s2438_s27, 4  ;;  %v2446_v9 = vshrl.u32 %v334_v8, 7  ;;  %v2449_v12 = vand.u32 127, %v334_v8  ;;  %s293_s18 = smov [#allocation15] }
  0x35   : > { %s230_s25 = scalar_lea.vmem [#allocation0], %s2442_s24  ;;  %s234_s30 = scalar_lea.vmem [#allocation1], %s2442_s24 }
  0x36   : > { %v294_v10 = vld [vmem:[%s230_s25] sm:$0xff]  ;;  %v1888_v11 = vld [vmem:[%s230_s25 + $0x8] sm:$0xff]  ;;  %v339_v9 = vmov %v2446_v9  ;;  %s238_s26 = scalar_lea.vmem [#allocation2], %s2442_s24  ;;  %s242_s28 = scalar_lea.vmem [#allocation3], %s2442_s24  ;;  %v336_v12 = vmov %v2449_v12  ;;  %vm1711_vm4 = vcmp.lt.s32.totalorder %v2449_v12, 16 }
  0x37   : > { %v301_v13 = vld [vmem:[%s234_s30] sm:$0xff]  ;;  %v1890_v14 = vld [vmem:[%s234_s30 + $0x8] sm:$0xff]  ;;  %v359_v9 = vmov %v2446_v9  ;;  %s2457_s29 = scalar_lea.vmem [#allocation8], %s2442_s24  ;;  %s2462_s17 = scalar_lea.vmem [#allocation10], %s2442_s24  ;;  %v349_v20 = vadd.s32 8, %v339_v9  ;;  %295 = vst [vmem:[%s293_s18] sm:$0xff] %v294_v10  ;;  %1889 = vst [vmem:[%s293_s18 + $0x8] sm:$0xff] %v1888_v11  ;;  %v356_v12 = vmov %v2449_v12  ;;  %vm343_vm0 = vcmp.eq.s32.totalorder %v339_v9, %v336_v12 }
  0x38   : > { %v308_v15 = vld [vmem:[%s238_s26] sm:$0xff]  ;;  %v1892_v16 = vld [vmem:[%s238_s26 + $0x8] sm:$0xff]  ;;  %321 = vst [vmem:[%s2457_s29] sm:$0xff] %v2301_v19  ;;  %1896 = vst [vmem:[%s2457_s29 + $0x8] sm:$0xff] %v2301_v19  ;;  %s300_s19 = smov [#allocation16]  ;;  %s2467_s21 = scalar_lea.vmem [#allocation12], %s2442_s24  ;;  %v369_v21 = vadd.s32 8, %v359_v9  ;;  %vm363_vm2 = vcmp.eq.s32.totalorder %v359_v9, %v356_v12  ;;  %v1706_v9 = vmov %v2446_v9 }
  0x39   : > { %v315_v17 = vld [vmem:[%s242_s28] sm:$0xff]  ;;  %v1894_v18 = vld [vmem:[%s242_s28 + $0x8] sm:$0xff]  ;;  %324 = vst [vmem:[%s2462_s17] sm:$0xff] %v2301_v19  ;;  %1897 = vst [vmem:[%s2462_s17 + $0x8] sm:$0xff] %v2301_v19  ;;  %s2472_s22 = scalar_lea.vmem [#allocation13], %s2442_s24  ;;  %s307_s14 = smov [#allocation17]  ;;  %vm350_vm1 = vcmp.eq.s32.totalorder %v349_v20, %v336_v12  ;;  %v1722_v38 = vadd.s32 8, %v1706_v9 }
  0x3a   : > { %327 = vst [vmem:[%s2467_s21] sm:$0xff] %v2301_v19  ;;  %1898 = vst [vmem:[%s2467_s21 + $0x8] sm:$0xff] %v2301_v19  ;;  %s314_s16 = smov [#allocation18]  ;;  %s333_s29 = smov %s2457_s29  ;;  %vm370_vm3 = vcmp.eq.s32.totalorder %v369_v21, %v356_v12  ;;  %v1703_v12 = vmov %v2449_v12 }
  0x3b   : > { %330 = vst [vmem:[%s2472_s22] sm:$0xff] %v2301_v19  ;;  %1899 = vst [vmem:[%s2472_s22 + $0x8] sm:$0xff] %v2301_v19  ;;  %s353_s22 = smov %s2472_s22  ;;  %s1707_s30 = smov [#allocation15]  ;;  %vm1716_vm5 = vcmp.eq.s32.totalorder %v1706_v9, %v1703_v12  ;;  %v1729_v12 = vmov %v2449_v12  ;;  %vm1723_vm6 = vcmp.eq.s32.totalorder %v1722_v38, %v1703_v12  ;;  %v1778_v9 = vmov %v2446_v9 }
  0x3c   : > { %302 = vst [vmem:[%s300_s19] sm:$0xff] %v301_v13  ;;  %1891 = vst [vmem:[%s300_s19 + $0x8] sm:$0xff] %v1890_v14  ;;  %s1733_s26 = smov [#allocation16]  ;;  %s1756_s28 = smov [#allocation17]  ;;  %v1732_v9 = vmov %v2446_v9  ;;  %v1752_v12 = vmov %v2449_v12  ;;  %v1796_v60 = vadd.s32 8, %v1778_v9 }
  0x3d   : > { %309 = vst [vmem:[%s307_s14] sm:$0xff] %v308_v15  ;;  %1893 = vst [vmem:[%s307_s14 + $0x8] sm:$0xff] %v1892_v16  ;;  %s1779_s18 = smov [#allocation18]  ;;  %v1775_v12 = vmov %v2449_v12  ;;  %v1755_v9 = vmov %v2446_v9 }
  0x3e   : > { %316 = vst [vmem:[%s314_s16] sm:$0xff] %v315_v17  ;;  %1895 = vst [vmem:[%s314_s16 + $0x8] sm:$0xff] %v1894_v18  ;;  %v1713_v30 = vld [vmem:[%s1707_s30] sm:$0xff]  ;;  %v1904_v31 = vld [vmem:[%s1707_s30 + $0x8] sm:$0xff]  ;;  %vm1788_vm7 = vcmp.eq.s32.totalorder %v1778_v9, %v1775_v12  ;;  %vm1797_vm8 = vcmp.eq.s32.totalorder %v1796_v60, %v1775_v12 }
  0x3f   : > { %v340_v22 = vld [vmem:[%s333_s29] sm:$0xff]  ;;  %v1900_v23 = vld [vmem:[%s333_s29 + $0x8] sm:$0xff]  ;;  %v1714_v33 = vsel %vm1711_vm4, %v1713_v30, 0.0  ;;  %v1720_v34 = vsel %vm1711_vm4, %v1904_v31, 0.0 }
  0x40   : > { %v344_v24 = vsel %vm343_vm0, 1.0, %v340_v22  ;;  %v351_v25 = vsel %vm350_vm1, 1.0, %v1900_v23  ;;  %v1715_v39 = vmul.f32 %v1714_v33, %v1714_v33  ;;  %v1721_v40 = vmul.f32 %v1720_v34, %v1720_v34 }
  0x41   : > { %345 = vst [vmem:[%s333_s29] sm:$0xff] %v344_v24  ;;  %1901 = vst [vmem:[%s333_s29 + $0x8] sm:$0xff] %v351_v25 }
  0x42   : > { %v360_v26 = vld [vmem:[%s353_s22] sm:$0xff]  ;;  %v1902_v27 = vld [vmem:[%s353_s22 + $0x8] sm:$0xff]  ;;  %v1726_v45 = vadd.f32 %v1721_v40, %v1715_v39  ;;  %v1717_v49 = vsel %vm1716_vm5, 0.0, %v1715_v39  ;;  %v1724_v53 = vsel %vm1723_vm6, 0.0, %v1721_v40 }
  0x43   : > { %v364_v28 = vsel %vm363_vm2, 1.0, %v360_v26  ;;  %v371_v29 = vsel %vm370_vm3, 1.0, %v1902_v27  ;;  %v1739_v32 = vld [vmem:[%s1733_s26] sm:$0xff]  ;;  %v1905_v36 = vld [vmem:[%s1733_s26 + $0x8] sm:$0xff]  ;;  %v1725_v55 = vadd.f32 %v1724_v53, %v1717_v49 }
  0x44   : > { %365 = vst [vmem:[%s353_s22] sm:$0xff] %v364_v28  ;;  %1903 = vst [vmem:[%s353_s22 + $0x8] sm:$0xff] %v371_v29  ;;  %v1740_v35 = vsel %vm1711_vm4, %v1739_v32, 0.0  ;;  %v1762_v37 = vld [vmem:[%s1756_s28] sm:$0xff]  ;;  %v1746_v42 = vsel %vm1711_vm4, %v1905_v36, 0.0  ;;  %v1906_v43 = vld [vmem:[%s1756_s28 + $0x8] sm:$0xff] }
  0x45   : > { %v1741_v41 = vmul.f32 %v1740_v35, %v1740_v35  ;;  %v1763_v44 = vsel %vm1711_vm4, %v1762_v37, 0.0  ;;  %v1747_v46 = vmul.f32 %v1746_v42, %v1746_v42  ;;  %v1785_v47 = vld [vmem:[%s1779_s18] sm:$0xff]  ;;  %v1769_v48 = vsel %vm1711_vm4, %v1906_v43, 0.0  ;;  %v1907_v52 = vld [vmem:[%s1779_s18 + $0x8] sm:$0xff] }
  0x46   : > { %v1764_v51 = vmul.f32 %v1763_v44, %v1763_v44  ;;  %v1786_v54 = vsel %vm1711_vm4, %v1785_v47, 0.0  ;;  %v1770_v57 = vmul.f32 %v1769_v48, %v1769_v48  ;;  %v1794_v58 = vsel %vm1711_vm4, %v1907_v52, 0.0 }
  0x47   : > { %v1743_v50 = vadd.f32 %v1741_v41, %v1726_v45  ;;  %v1742_v59 = vadd.f32 %v1741_v41, %v1725_v55  ;;  %v1787_v62 = vmul.f32 %v1786_v54, %v1786_v54  ;;  %v1795_v1 = vmul.f32 %v1794_v58, %v1794_v58 }
  0x49   : > { %v1749_v56 = vadd.f32 %v1747_v46, %v1743_v50  ;;  %v1748_v63 = vadd.f32 %v1747_v46, %v1742_v59  ;;  %v1789_v4 = vsel %vm1788_vm7, 0.0, %v1787_v62  ;;  %v1798_v7 = vsel %vm1797_vm8, 0.0, %v1795_v1 }
  0x4b   : > { %v1766_v61 = vadd.f32 %v1764_v51, %v1749_v56  ;;  %v1765_v2 = vadd.f32 %v1764_v51, %v1748_v63 }
  0x4d   : > { %v1772_v0 = vadd.f32 %v1770_v57, %v1766_v61  ;;  %v1771_v5 = vadd.f32 %v1770_v57, %v1765_v2 }
  0x4f   : > { %v1791_v3 = vadd.f32 %v1787_v62, %v1772_v0  ;;  %v1790_v8 = vadd.f32 %v1789_v4, %v1771_v5 }
  0x51   : > { %v1800_v6 = vadd.f32 %v1795_v1, %v1791_v3  ;;  %v1799_v10 = vadd.f32 %v1798_v7, %v1790_v8 }
  0x53   : > { %1801 = vadd.xlane.f32.xlu0 %v1800_v6 }
  0x57   : > { %1809 = vadd.xlane.f32.xlu0 %v1799_v10 }
  0xe0   : > { %v1802_v11 = vpop.xlane.xlu0 %1801 }
  0xe1   : > { %v1803_v13 = vrot.slane %v1802_v11, 4 }
  0xe3   : > { %v1804_v14 = vadd.f32 %v1803_v13, %v1802_v11 }
  0xe4   : > { %v1810_v15 = vpop.xlane.xlu0 %1809 }
  0xe5   : > { %v1805_v16 = vrot.slane %v1804_v14, 2  ;;  %v1811_v17 = vrot.slane %v1810_v15, 4 }
  0xe7   : > { %v1812_v18 = vadd.f32 %v1811_v17, %v1810_v15  ;;  %v1806_v19 = vadd.f32 %v1805_v16, %v1804_v14 }
  0xe9   : > { %v1813_v20 = vrot.slane %v1812_v18, 2  ;;  %v1807_v22 = vrot.slane %v1806_v19, 1 }
  0xeb   : > { %v1814_v21 = vadd.f32 %v1813_v20, %v1812_v18  ;;  %v1808_v25 = vadd.f32 %v1807_v22, %v1806_v19 }
  0xed   : > { %v1815_v23 = vrot.slane %v1814_v21, 1 }
  0xef   : > { %v1816_v24 = vadd.f32 %v1815_v23, %v1814_v21 }
  0xf1   : > { %2025 = vpush %v1816_v24 }
  0xf2   : > { %2027 = vpush %v1808_v25 }
 0x122   : > { %s2026_s19 = spop %2025 }
 0x123   : > { %s2028_s14 = spop %2027 }
 0x124   : > { %s1819_s16 = smul.f32 1e-10, %s2028_s14 }
 0x126   : > { %p1820_p10 = scmp.le.f32.partialorder %s2026_s19, %s1819_s16 }
 0x127   : > { %s2508_s30 = smov (!%p1820_p10), 0  }
 0x128   : > { %1823 = sbr.rel (%p1820_p10) target bundleno = 1023 (0x3ff), region = 374 }
 0x12f LB: >> { %s2513_s26 = smov 0   ;;  %s2295_s30 = sphi %s2508_s30, %s3020_s30  }
 0x130 LB: >>> { %s509_s28 = smov [#allocation15]  ;;  %v513_v12 = vmov %v2449_v12  ;;  %v516_v9 = vmov %v2446_v9  ;;  %s535_s18 = smov [#allocation16]  ;;  %vm1042_vm8 = vcmp.eq.s32.totalorder %v2446_v9, 0  ;;  %s2299_s26 = sphi %s2513_s26, %s508_s26  }
 0x131   : >>> { %v539_v12 = vmov %v2449_v12  ;;  %v542_v9 = vmov %v2446_v9  ;;  %v517_v26 = vld [vmem:[%s509_s28] sm:$0xff]  ;;  %vm520_vm9 = vcmp.eq.s32.totalorder %v516_v9, %v513_v12  ;;  %v1908_v27 = vld [vmem:[%s509_s28 + $0x8] sm:$0xff]  ;;  %v525_v28 = vadd.s32 8, %v516_v9  ;;  %s561_s19 = smov [#allocation18]  ;;  %s510_s14 = smov [#allocation19] }
 0x132   : >>> { %vm546_vm10 = vcmp.eq.s32.totalorder %v542_v9, %v539_v12  ;;  %v551_v29 = vadd.s32 8, %v542_v9  ;;  %v521_v30 = vsel %vm520_vm9, %v517_v26, 0.0  ;;  %v543_v31 = vld [vmem:[%s535_s18] sm:$0xff]  ;;  %v1909_v32 = vld [vmem:[%s535_s18 + $0x8] sm:$0xff]  ;;  %v565_v12 = vmov %v2449_v12  ;;  %s536_s16 = smov [#allocation20]  ;;  %s562_s28 = smov [#allocation21] }
 0x133   : >>> { %v568_v9 = vmov %v2446_v9  ;;  %vm526_vm11 = vcmp.eq.s32.totalorder %v525_v28, %v513_v12  ;;  %v547_v33 = vsel %vm546_vm10, %v543_v31, 0.0  ;;  %v569_v34 = vld [vmem:[%s561_s19] sm:$0xff]  ;;  %v1910_v38 = vld [vmem:[%s561_s19 + $0x8] sm:$0xff]  ;;  %s591_s18 = smov [#allocation20]  ;;  %s589_s19 = smov [#allocation19]  ;;  %vm1066_vm9 = vcmp.eq.s32.totalorder %v2446_v9, 7 }
 0x134   : >>> { %vm552_vm12 = vcmp.eq.s32.totalorder %v551_v29, %v539_v12  ;;  %vm572_vm13 = vcmp.eq.s32.totalorder %v568_v9, %v565_v12  ;;  %v527_v35 = vsel %vm526_vm11, %v1908_v27, %v521_v30  ;;  %v577_v39 = vadd.s32 8, %v568_v9  ;;  %s593_s25 = smov [#allocation21]  ;;  %s2532_s24 = smov [#allocation15] }
 0x135   : >>> { %v553_v36 = vsel %vm552_vm12, %v1909_v32, %v547_v33  ;;  %v573_v37 = vsel %vm572_vm13, %v569_v34, 0.0  ;;  %v528_v40 = vrot.slane %v527_v35, 4  ;;  %v658_v9 = vmov %v2446_v9  ;;  %s2536_s0 = smov [#allocation17]  ;;  %s2538_s1 = smov [#allocation18] }
 0x136   : >>> { %v554_v41 = vrot.slane %v553_v36, 4  ;;  %vm578_vm14 = vcmp.eq.s32.totalorder %v577_v39, %v565_v12  ;;  %v689_v9 = vmov %v2446_v9  ;;  %v659_v28 = vadd.s32 8, %v658_v9  ;;  %s2541_s29 = smov %s2457_s29  ;;  %s2544_s17 = smov %s2462_s17 }
 0x137   : >>> { %v529_v42 = vadd.f32 %v528_v40, %v527_v35  ;;  %v579_v44 = vsel %vm578_vm14, %v1910_v38, %v573_v37  ;;  %v640_v12 = vmov %v2449_v12  ;;  %v643_v9 = vmov %v2446_v9  ;;  %s2548_s21 = smov %s2467_s21  ;;  %s2551_s22 = smov %s2472_s22 }
 0x138   : >>> { %v555_v43 = vadd.f32 %v554_v41, %v553_v36  ;;  %v580_v45 = vrot.slane %v579_v44, 4  ;;  %v655_v12 = vmov %v2449_v12  ;;  %v690_v29 = vadd.s32 8, %v689_v9  ;;  %s2737_s2 = smov [#allocation18]  ;;  %s508_s26 = sadd.s32 1, %s2299_s26  }
 0x139   : >>> { %v530_v46 = vrot.slane %v529_v42, 2  ;;  %v671_v12 = vmov %v2449_v12  ;;  %v674_v9 = vmov %v2446_v9  ;;  %vm645_vm3 = vcmp.eq.s32.totalorder %v643_v9, %v640_v12  ;;  %p505_p11 = scmp.ge.s32.totalorder %s508_s26, 31  }
 0x13a   : >>> { %v556_v47 = vrot.slane %v555_v43, 2  ;;  %v581_v48 = vadd.f32 %v580_v45, %v579_v44  ;;  %v686_v12 = vmov %v2449_v12  ;;  %vm660_vm5 = vcmp.eq.s32.totalorder %v659_v28, %v655_v12  ;;  %v708_v44 = vld [vmem:[%s2536_s0] sm:$0xff]  ;;  %s456_s26 = smov (%p505_p11), [#allocation18] }
 0x13b   : >>> { %v531_v49 = vadd.f32 %v530_v46, %v529_v42  ;;  %vm676_vm6 = vcmp.eq.s32.totalorder %v674_v9, %v671_v12  ;;  %vm691_vm7 = vcmp.eq.s32.totalorder %v690_v29, %v686_v12  ;;  %v706_v42 = vld [vmem:[%s2532_s24] sm:$0xff]  ;;  %v845_v9 = vmov %v2446_v9 }
 0x13c   : >>> { %v557_v50 = vadd.f32 %v556_v47, %v555_v43  ;;  %v582_v51 = vrot.slane %v581_v48, 2  ;;  %v709_v45 = vld [vmem:[%s2538_s1] sm:$0xff]  ;;  %v823_v9 = vmov %v2446_v9  ;;  %v842_v12 = vmov %v2449_v12 }
 0x13d   : >>> { %v532_v52 = vrot.slane %v531_v49, 1  ;;  %v1130_v46 = vld [vmem:[%s2541_s29] sm:$0xff]  ;;  %v865_v9 = vmov %v2446_v9  ;;  %v820_v12 = vmov %v2449_v12  ;;  %vm849_vm10 = vcmp.eq.s32.totalorder %v845_v9, %v842_v12 }
 0x13e   : >>> { %v558_v53 = vrot.slane %v557_v50, 1  ;;  %v583_v54 = vadd.f32 %v582_v51, %v581_v48  ;;  %v1131_v47 = vld [vmem:[%s2544_s17] sm:$0xff]  ;;  %v886_v9 = vmov %v2446_v9  ;;  %v862_v12 = vmov %v2449_v12 }
 0x13f   : >>> { %v533_v55 = vadd.f32 %v532_v52, %v531_v49  ;;  %v1132_v49 = vld [vmem:[%s2548_s21] sm:$0xff]  ;;  %v883_v12 = vmov %v2449_v12  ;;  %vm828_vm12 = vcmp.eq.s32.totalorder %v823_v9, %v820_v12  ;;  %vm869_vm14 = vcmp.eq.s32.totalorder %v865_v9, %v862_v12 }
 0x140   : >>> { %v559_v56 = vadd.f32 %v558_v53, %v557_v50  ;;  %v584_v57 = vrot.slane %v583_v54, 1  ;;  %v1133_v50 = vld [vmem:[%s2551_s22] sm:$0xff] }
 0x141   : >>> { %534 = vst [vmem:[%s510_s14] sm:$0x1] %v533_v55  ;;  %s630_s14 = smov [#allocation23] }
 0x142   : >>> { %560 = vst [vmem:[%s536_s16] sm:$0x1] %v559_v56  ;;  %v585_v58 = vadd.f32 %v584_v57, %v583_v54  ;;  %s587_s16 = smov [#allocation24] }
 0x143   : >>> { %s632_s16 = smov %s587_s16 }
 0x144   : >>> { %586 = vst [vmem:[%s562_s28] sm:$0x1] %v585_v58  ;;  %s588_s28 = smov [#allocation25] }
 0x145   : >>> { %s634_s28 = smov %s588_s28 }
 0x148   : >>> { %v590_v61 = vld [vmem:[%s589_s19] sm:$0xff]  ;;  %s651_s19 = smov [#allocation24] }
 0x149   : >>> { %v592_v59 = vld [vmem:[%s591_s18] sm:$0xff]  ;;  %v613_v11 = vand.u32 2147483647, %v590_v61  ;;  %s636_s18 = smov [#allocation24] }
 0x14a   : >>> { %v596_v60 = vmul.f32 2.0, %v592_v59  ;;  %v614_v17 = vand.u32 2147483647, %v592_v59 }
 0x14b   : >>> { %v594_v62 = vld [vmem:[%s593_s25] sm:$0xff]  ;;  %s628_s25 = smov [#allocation22] }
 0x14c   : >>> { %2113 = vrcp.f32 %v596_v60  ;;  %v595_v63 = vsub.f32 %v594_v62, %v590_v61  ;;  %v615_v13 = vand.u32 2147483647, %v594_v62 }
 0x14e   : >>> { %v616_v16 = vmin.f32 %v613_v11, %v615_v13 }
 0x150   : >>> { %v617_v18 = vmul.f32 1.1920929e-08, %v616_v16 }
 0x152   : >>> { %vm618_vm2 = vcmp.le.f32.partialorder %v614_v17, %v617_v18 }
 0x156   : >>> { %v2114_v0 = vpop.eup %2113 }
 0x157   : >>> { %v598_v1 = vmul.f32 %v2114_v0, %v595_v63 }
 0x159   : >>> { %v600_v2 = vmul.f32 %v598_v1, %v598_v1  ;;  %vm599_vm1 = vcmp.ge.f32.partialorder %v598_v1, 0.0 }
 0x15b   : >>> { %v601_v3 = vadd.f32 1.0, %v600_v2 }
 0x15d   : >>> { %2115 = vrsqrt.f32 %v601_v3  ;;  %vm604_vm15 = vcmp.eq.f32.partialorder %v601_v3, inf  ;;  %v607_v5 = vand.u32 2147483648, %v601_v3  ;;  %vm606_vm0 = vcmp.eq.f32.partialorder %v601_v3, 0.0 }
 0x167   : >>> { %v2116_v4 = vpop.eup %2115 }
 0x168   : >>> { %v603_v6 = vmul.f32 %v2116_v4, %v601_v3 }
 0x16a   : >>> { %v605_v7 = vsel %vm604_vm15, %v601_v3, %v603_v6 }
 0x16b   : >>> { %v608_v8 = vsel %vm606_vm0, %v607_v5, %v605_v7  ;;  %vm891_vm0 = vcmp.eq.s32.totalorder %v886_v9, %v883_v12 }
 0x16c   : >>> { %v609_v10 = vxor.u32 2147483648, %v608_v8 }
 0x16e   : >>> { %v610_v14 = vsel %vm599_vm1, %v608_v8, %v609_v10 }
 0x16f   : >>> { %v611_v15 = vadd.f32 %v610_v14, %v598_v1 }
 0x171   : >>> { %2117 = vrcp.f32 %v611_v15 }
 0x17b   : >>> { %v2118_v19 = vpop.eup %2117 }
 0x17c   : >>> { %v619_v20 = vsel %vm618_vm2, 0.0, %v2118_v19  ;;  %vm913_vm2 = vcmp.eq.s32.totalorder %v2449_v12, 0 }
 0x17d   : >>> { %v620_v21 = vmul.f32 %v619_v20, %v619_v20  ;;  %v624_v22 = vmul.f32 %v619_v20, %v592_v59 }
 0x17f   : >>> { %v621_v23 = vadd.f32 1.0, %v620_v21  ;;  %v625_v24 = vsub.f32 %v590_v61, %v624_v22  ;;  %v627_v25 = vadd.f32 %v624_v22, %v594_v62 }
 0x181   : >>> { %2119 = vrsqrt.f32 %v621_v23  ;;  %629 = vst [vmem:[%s628_s25] sm:$0xff] %v625_v24  ;;  %631 = vst [vmem:[%s630_s14] sm:$0xff] %v627_v25  ;;  %s667_s25 = smov [#allocation25]  ;;  %s682_s14 = smov [#allocation25] }
 0x18b   : >>> { %v2120_v26 = vpop.eup %2119 }
 0x18c   : >>> { %633 = vst [vmem:[%s632_s16] sm:$0xff] %v2120_v26  ;;  %v623_v27 = vmul.f32 %v2120_v26, %v619_v20  ;;  %s649_s16 = smov [#allocation26] }
 0x18e   : >>> { %635 = vst [vmem:[%s634_s28] sm:$0xff] %v623_v27  ;;  %s664_s28 = smov [#allocation26] }
 0x193   : >>> { %v637_v30 = vld [vmem:[%s636_s18] ss:$0 sm:$0xff]  ;;  %s698_s18 = smov [#allocation26] }
 0x194   : >>> { %v652_v31 = vld [vmem:[%s651_s19] ss:$0 sm:$0xff]  ;;  %v646_v32 = vsel %vm645_vm3, %v637_v30, 0.0  ;;  %s680_s19 = smov [#allocation27]  ;;  %vm917_vm3 = vcmp.eq.s32.totalorder %v2449_v12, 1 }
 0x195   : >>> { %v661_v33 = vsel %vm660_vm5, %v652_v31, 0.0  ;;  %647 = vadd.xlane.f32.xlu0 %v646_v32  ;;  %v668_v34 = vld [vmem:[%s667_s25] ss:$0 sm:$0xff]  ;;  %s695_s25 = smov [#allocation27]  ;;  %vm930_vm5 = vcmp.eq.s32.totalorder %v2449_v12, 15 }
 0x196   : >>> { %662 = vadd.xlane.f32.xlu1 %v661_v33  ;;  %v683_v35 = vld [vmem:[%s682_s14] ss:$0 sm:$0xff]  ;;  %v677_v36 = vsel %vm676_vm6, %v668_v34, 0.0  ;;  %s2534_s14 = smov [#allocation16] }
 0x197   : >>> { %v692_v37 = vsel %vm691_vm7, %v683_v35, 0.0  ;;  %v707_v43 = vld [vmem:[%s2534_s14] sm:$0xff] }
 0x199   : >>> { %678 = vadd.xlane.f32.xlu0 %v677_v36 }
 0x19a   : >>> { %693 = vadd.xlane.f32.xlu1 %v692_v37 }
 0x222   : >>> { %v648_v38 = vpop.xlane.xlu0 %647 }
 0x223   : >>> { %v663_v39 = vpop.xlane.xlu1 %662  ;;  %650 = vst [vmem:[%s649_s16] sm:$0xff] %v648_v38  ;;  %s1122_s16 = smov [#allocation26] }
 0x224   : >>> { %1911 = vst [vmem:[%s664_s28 + $0x8] sm:$0xff] %v663_v39  ;;  %s700_s28 = smov [#allocation27] }
 0x226   : >>> { %v679_v40 = vpop.xlane.xlu0 %678 }
 0x227   : >>> { %v694_v41 = vpop.xlane.xlu1 %693  ;;  %681 = vst [vmem:[%s680_s19] sm:$0xff] %v679_v40  ;;  %s1124_s19 = smov [#allocation27] }
 0x228   : >>> { %1912 = vst [vmem:[%s695_s25 + $0x8] sm:$0xff] %v694_v41  ;;  %s1150_s25 = smov [#allocation26] }
 0x22b   : >>> { %v699_v48 = vld [vmem:[%s698_s18] sm:$0xff]  ;;  %s726_s18 = smov [#allocation26]  ;;  %v1971_v17 = vld [vmem:[%s1150_s25 + $0x8] sm:$0xff]  ;;  %s2610_s25 = smov [#allocation15] }
 0x22c   : >>> { %v1123_v51 = vld [vmem:[%s1122_s16] sm:$0xff]  ;;  %v710_v52 = vmul.f32 %v706_v42, %v699_v48  ;;  %v713_v53 = vmul.f32 %v707_v43, %v699_v48  ;;  %v717_v54 = vmul.f32 %v708_v44, %v699_v48  ;;  %v720_v55 = vmul.f32 %v709_v45, %v699_v48  ;;  %s729_s16 = smov [#allocation27]  ;;  %v1913_v16 = vld [vmem:[%s726_s18 + $0x8] sm:$0xff]  ;;  %s762_s18 = smov [#allocation25] }
 0x22d   : >>> { %v1134_v56 = vmul.f32 %v1130_v46, %v1123_v51  ;;  %v1137_v57 = vmul.f32 %v1131_v47, %v1123_v51  ;;  %v1141_v58 = vmul.f32 %v1132_v49, %v1123_v51  ;;  %v1144_v59 = vmul.f32 %v1133_v50, %v1123_v51 }
 0x22f   : >>> { %v701_v60 = vld [vmem:[%s700_s28] sm:$0xff]  ;;  %s2568_s28 = smov [#allocation15]  ;;  %v1914_v18 = vld [vmem:[%s729_s16 + $0x8] sm:$0xff]  ;;  %s2616_s16 = smov [#allocation16] }
 0x230   : >>> { %v1125_v61 = vld [vmem:[%s1124_s19] sm:$0xff]  ;;  %v711_v62 = vmul.f32 %v708_v44, %v701_v60  ;;  %v714_v63 = vmul.f32 %v709_v45, %v701_v60  ;;  %v716_v0 = vmul.f32 %v706_v42, %v701_v60  ;;  %v719_v1 = vmul.f32 %v707_v43, %v701_v60  ;;  %s2570_s19 = smov [#allocation17] }
 0x231   : >>> { %v1135_v2 = vmul.f32 %v1132_v49, %v1125_v61  ;;  %v1138_v3 = vmul.f32 %v1133_v50, %v1125_v61  ;;  %v1140_v4 = vmul.f32 %v1130_v46, %v1125_v61  ;;  %v1143_v5 = vmul.f32 %v1131_v47, %v1125_v61 }
 0x232   : >>> { %v712_v6 = vsub.f32 %v710_v52, %v711_v62  ;;  %v715_v7 = vsub.f32 %v713_v53, %v714_v63  ;;  %v718_v8 = vadd.f32 %v717_v54, %v716_v0  ;;  %v721_v10 = vadd.f32 %v720_v55, %v719_v1 }
 0x233   : >>> { %v1136_v11 = vsub.f32 %v1134_v56, %v1135_v2  ;;  %v1139_v13 = vsub.f32 %v1137_v57, %v1138_v3  ;;  %v1142_v14 = vadd.f32 %v1141_v58, %v1140_v4  ;;  %v1145_v15 = vadd.f32 %v1144_v59, %v1143_v5  ;;  %v2628_v56 = vld [vmem:[%s762_s18] ss:$0 sm:$0xff]  ;;  %s817_s18 = smov [#allocation22] }
 0x234   : >>> { %722 = vst [vmem:[%s2532_s24] sm:$0xff] %v712_v6  ;;  %724 = vst [vmem:[%s2536_s0] sm:$0xff] %v718_v8  ;;  %s1153_s24 = smov [#allocation27]  ;;  %s2572_s0 = smov [#allocation18] }
 0x235   : >>> { %725 = vst [vmem:[%s2538_s1] sm:$0xff] %v721_v10  ;;  %723 = vst [vmem:[%s2534_s14] sm:$0xff] %v715_v7  ;;  %v1972_v19 = vld [vmem:[%s1153_s24 + $0x8] sm:$0xff]  ;;  %s2586_s1 = smov [#allocation16]  ;;  %s760_s14 = smov [#allocation24] }
 0x236   : >>> { %1146 = vst [vmem:[%s2541_s29] sm:$0xff] %v1136_v11  ;;  %1147 = vst [vmem:[%s2544_s17] sm:$0xff] %v1139_v13  ;;  %s2575_s29 = smov %s2457_s29  ;;  %s2578_s17 = smov %s2462_s17  ;;  %v2626_v55 = vld [vmem:[%s760_s14] ss:$0 sm:$0xff] }
 0x237   : >>> { %1148 = vst [vmem:[%s2548_s21] sm:$0xff] %v1142_v14  ;;  %1149 = vst [vmem:[%s2551_s22] sm:$0xff] %v1145_v15  ;;  %s2581_s21 = smov %s2467_s21  ;;  %s2584_s22 = smov %s2472_s22 }
 0x238   : >>> { %s788_s24 = smov [#allocation15]  ;;  %s794_s14 = smov [#allocation18] }
 0x23b   : >>> { %v1915_v20 = vld [vmem:[%s2568_s28 + $0x8] sm:$0xff] }
 0x23c   : >>> { %v1917_v21 = vld [vmem:[%s2570_s19 + $0x8] sm:$0xff]  ;;  %v744_v23 = vmul.f32 %v1915_v20, %v1913_v16  ;;  %v750_v26 = vmul.f32 %v1915_v20, %v1914_v18 }
 0x23d   : >>> { %v1918_v22 = vld [vmem:[%s2572_s0 + $0x8] sm:$0xff]  ;;  %v745_v24 = vmul.f32 %v1917_v21, %v1914_v18  ;;  %v751_v30 = vmul.f32 %v1917_v21, %v1913_v16 }
 0x23e   : >>> { %v748_v25 = vmul.f32 %v1918_v22, %v1914_v18  ;;  %v1973_v27 = vld [vmem:[%s2575_s29 + $0x8] sm:$0xff]  ;;  %v754_v31 = vmul.f32 %v1918_v22, %v1913_v16 }
 0x23f   : >>> { %v1974_v28 = vld [vmem:[%s2578_s17 + $0x8] sm:$0xff]  ;;  %v1168_v33 = vmul.f32 %v1973_v27, %v1971_v17  ;;  %v746_v36 = vsub.f32 %v744_v23, %v745_v24  ;;  %v1174_v39 = vmul.f32 %v1973_v27, %v1972_v19  ;;  %v752_v40 = vadd.f32 %v751_v30, %v750_v26 }
 0x240   : >>> { %v1975_v29 = vld [vmem:[%s2581_s21 + $0x8] sm:$0xff]  ;;  %v1171_v37 = vmul.f32 %v1974_v28, %v1971_v17  ;;  %v1177_v43 = vmul.f32 %v1974_v28, %v1972_v19 }
 0x241   : >>> { %v1976_v32 = vld [vmem:[%s2584_s22 + $0x8] sm:$0xff]  ;;  %v1169_v34 = vmul.f32 %v1975_v29, %v1972_v19  ;;  %v1175_v42 = vmul.f32 %v1975_v29, %v1971_v17  ;;  %1919 = vst [vmem:[%s2568_s28 + $0x8] sm:$0xff] %v746_v36  ;;  %1921 = vst [vmem:[%s2570_s19 + $0x8] sm:$0xff] %v752_v40  ;;  %s2619_s28 = smov [#allocation17]  ;;  %s2621_s19 = smov [#allocation18] }
 0x242   : >>> { %v1916_v35 = vld [vmem:[%s2586_s1 + $0x8] sm:$0xff]  ;;  %v1172_v38 = vmul.f32 %v1976_v32, %v1972_v19  ;;  %v1178_v45 = vmul.f32 %v1976_v32, %v1971_v17 }
 0x243   : >>> { %v1170_v41 = vsub.f32 %v1168_v33, %v1169_v34  ;;  %v747_v46 = vmul.f32 %v1916_v35, %v1913_v16  ;;  %v753_v47 = vmul.f32 %v1916_v35, %v1914_v18  ;;  %v1176_v48 = vadd.f32 %v1175_v42, %v1174_v39 }
 0x244   : >>> { %v1173_v44 = vsub.f32 %v1171_v37, %v1172_v38  ;;  %v1179_v49 = vadd.f32 %v1178_v45, %v1177_v43 }
 0x245   : >>> { %1977 = vst [vmem:[%s2575_s29 + $0x8] sm:$0xff] %v1170_v41  ;;  %v749_v50 = vsub.f32 %v747_v46, %v748_v25  ;;  %v755_v51 = vadd.f32 %v754_v31, %v753_v47  ;;  %s2601_s29 = smov %s2457_s29  ;;  %1979 = vst [vmem:[%s2581_s21 + $0x8] sm:$0xff] %v1176_v48  ;;  %s2605_s21 = smov %s2467_s21 }
 0x246   : >>> { %1978 = vst [vmem:[%s2578_s17 + $0x8] sm:$0xff] %v1173_v44  ;;  %1980 = vst [vmem:[%s2584_s22 + $0x8] sm:$0xff] %v1179_v49  ;;  %s2614_s17 = smov %s2462_s17  ;;  %s2632_s22 = smov %s2472_s22 }
 0x247   : >>> { %1920 = vst [vmem:[%s2586_s1 + $0x8] sm:$0xff] %v749_v50  ;;  %1922 = vst [vmem:[%s2572_s0 + $0x8] sm:$0xff] %v755_v51  ;;  %s790_s0 = smov [#allocation16]  ;;  %s792_s1 = smov [#allocation17]  ;;  %v855_v50 = vadd.s32 8, %v845_v9  ;;  %v835_v51 = vadd.s32 8, %v823_v9 }
 0x248   : >>> { %v768_v57 = vld [vmem:[%s2610_s25] sm:$0xff] }
 0x249   : >>> { %v772_v17 = vmul.f32 %v768_v57, %v2626_v55  ;;  %v775_v18 = vmul.f32 %v768_v57, %v2628_v56  ;;  %v770_v22 = vld [vmem:[%s2619_s28] sm:$0xff]  ;;  %vm856_vm11 = vcmp.eq.s32.totalorder %v855_v50, %v842_v12  ;;  %vm836_vm13 = vcmp.eq.s32.totalorder %v835_v51, %v820_v12 }
 0x24a   : >>> { %v778_v26 = vmul.f32 %v770_v22, %v2626_v55  ;;  %v781_v28 = vmul.f32 %v770_v22, %v2628_v56 }
 0x24c   : >>> { %v1186_v52 = vld [vmem:[%s2601_s29] ss:$0 sm:$0xff]  ;;  %v1982_v54 = vld [vmem:[%s2601_s29 + $0x7] ss:$0 sm:$0xff]  ;;  %v1983_v59 = vld [vmem:[%s2601_s29 + $0x7] sm:$0xfe] }
 0x24d   : >>> { %v1981_v53 = vld [vmem:[%s2601_s29 - $0x1] sm:$0xfe]  ;;  %v1984_v60 = vld [vmem:[%s2601_s29 + $0xf] ss:$0 sm:$0xff]  ;;  %v1204_v62 = vsel %vm1042_vm8, %v1982_v54, %v1983_v59  ;;  %v1988_v1 = vld [vmem:[%s2605_s21 + $0x8] ss:$0 sm:$0xff] }
 0x24e   : >>> { %v1193_v58 = vsel %vm1042_vm8, %v1186_v52, %v1981_v53  ;;  %v1230_v61 = vld [vmem:[%s2614_s17] ss:$0 sm:$0xff]  ;;  %v1987_v0 = vld [vmem:[%s2605_s21 + $0x9] sm:$0x7f]  ;;  %1985 = vst [vmem:[%s2601_s29 + $0x8] sm:$0xff] %v1204_v62  ;;  %v875_v52 = vadd.s32 8, %v865_v9 }
 0x24f   : >>> { %1196 = vst [vmem:[%s2601_s29] sm:$0xff] %v1193_v58  ;;  %v1208_v63 = vld [vmem:[%s2605_s21] ss:$0 sm:$0xff]  ;;  %v1217_v2 = vsel %vm1066_vm9, %v1984_v60, %v1987_v0  ;;  %v1990_v3 = vld [vmem:[%s2605_s21 + $0x1] sm:$0x7f]  ;;  %v1993_v8 = vld [vmem:[%s2614_s17 + $0x7] sm:$0xfe] }
 0x250   : >>> { %1986 = vst [vmem:[%s2601_s29 + $0x1] sm:$0x1] %v1208_v63  ;;  %v1991_v4 = vld [vmem:[%s2614_s17 - $0x1] sm:$0xfe]  ;;  %v1992_v5 = vld [vmem:[%s2614_s17 + $0x7] ss:$0 sm:$0xff]  ;;  %v1225_v6 = vsel %vm1066_vm9, %v1988_v1, %v1990_v3  ;;  %vm876_vm15 = vcmp.eq.s32.totalorder %v875_v52, %v862_v12 }
 0x251   : >>> { %1989 = vst [vmem:[%s2605_s21 + $0x8] sm:$0xff] %v1217_v2  ;;  %v1237_v7 = vsel %vm1042_vm8, %v1230_v61, %v1991_v4  ;;  %v1994_v10 = vld [vmem:[%s2614_s17 + $0xf] ss:$0 sm:$0xff]  ;;  %v1252_v11 = vld [vmem:[%s2632_s22] ss:$0 sm:$0xff]  ;;  %1227 = vst [vmem:[%s2605_s21] sm:$0xff] %v1225_v6  ;;  %v1248_v13 = vsel %vm1042_vm8, %v1992_v5, %v1993_v8  ;;  %v898_v53 = vadd.s32 8, %v886_v9  ;;  %v380_v9 = vmov (%p505_p11), %v2446_v9 }
 0x252   : >>> { %1240 = vst [vmem:[%s2614_s17] sm:$0xff] %v1237_v7  ;;  %v1997_v14 = vld [vmem:[%s2632_s22 + $0x9] sm:$0x7f]  ;;  %v1998_v15 = vld [vmem:[%s2632_s22 + $0x8] ss:$0 sm:$0xff]  ;;  %v2000_v16 = vld [vmem:[%s2632_s22 + $0x1] sm:$0x7f] }
 0x253   : >>> { %1995 = vst [vmem:[%s2614_s17 + $0x8] sm:$0xff] %v1248_v13  ;;  %1996 = vst [vmem:[%s2614_s17 + $0x1] sm:$0x1] %v1252_v11  ;;  %v1261_v19 = vsel %vm1066_vm9, %v1994_v10, %v1997_v14  ;;  %v1269_v20 = vsel %vm1066_vm9, %v1998_v15, %v2000_v16  ;;  %v769_v21 = vld [vmem:[%s2616_s16] sm:$0xff]  ;;  %vm899_vm1 = vcmp.eq.s32.totalorder %v898_v53, %v883_v12  ;;  %v377_v12 = vmov (%p505_p11), %v2449_v12 }
 0x254   : >>> { %v771_v23 = vld [vmem:[%s2621_s19] sm:$0xff]  ;;  %1999 = vst [vmem:[%s2632_s22 + $0x8] sm:$0xff] %v1261_v19  ;;  %1271 = vst [vmem:[%s2632_s22] sm:$0xff] %v1269_v20  ;;  %v773_v24 = vmul.f32 %v769_v21, %v2628_v56  ;;  %v776_v25 = vmul.f32 %v769_v21, %v2626_v55  ;;  %vm392_vm6 = vcmp.eq.s32.totalorder (%p505_p11), %v380_v9, %v377_v12  ;;  %v406_v12 = vmov (%p505_p11), %v2449_v12 }
 0x255   : >>> { %v779_v27 = vmul.f32 %v771_v23, %v2628_v56  ;;  %v782_v29 = vmul.f32 %v771_v23, %v2626_v55  ;;  %v824_v54 = vld [vmem:[%s817_s18] ss:$0 sm:$0xff]  ;;  %s2723_s18 = smov [#allocation15] }
 0x256   : >>> { %v774_v30 = vsub.f32 %v772_v17, %v773_v24  ;;  %v777_v31 = vadd.f32 %v776_v25, %v775_v18 }
 0x257   : >>> { %v780_v32 = vsub.f32 %v778_v26, %v779_v27  ;;  %v783_v33 = vadd.f32 %v782_v29, %v781_v28 }
 0x258   : >>> { %784 = vst [vmem:[%s2610_s25] sm:$0xff] %v774_v30  ;;  %785 = vst [vmem:[%s2616_s16] sm:$0xff] %v777_v31  ;;  %s880_s25 = smov [#allocation23]  ;;  %s839_s16 = smov [#allocation16] }
 0x259   : >>> { %786 = vst [vmem:[%s2619_s28] sm:$0xff] %v780_v32  ;;  %787 = vst [vmem:[%s2621_s19] sm:$0xff] %v783_v33  ;;  %s2705_s28 = smov [#allocation15]  ;;  %s859_s19 = smov [#allocation17] }
 0x25f   : >>> { %v1923_v34 = vld [vmem:[%s788_s24 + $0x8] sm:$0xff] }
 0x260   : >>> { %v1924_v35 = vld [vmem:[%s790_s0 + $0x8] sm:$0xff]  ;;  %v803_v38 = vmul.f32 %v1923_v34, %v2628_v56  ;;  %v800_v40 = vmul.f32 %v1923_v34, %v2626_v55 }
 0x261   : >>> { %v1925_v36 = vld [vmem:[%s792_s1 + $0x8] sm:$0xff]  ;;  %v801_v37 = vmul.f32 %v1924_v35, %v2628_v56  ;;  %v804_v39 = vmul.f32 %v1924_v35, %v2626_v55 }
 0x262   : >>> { %v1926_v41 = vld [vmem:[%s794_s14 + $0x8] sm:$0xff]  ;;  %v806_v42 = vmul.f32 %v1925_v36, %v2626_v55  ;;  %v809_v44 = vmul.f32 %v1925_v36, %v2628_v56 }
 0x263   : >>> { %v807_v43 = vmul.f32 %v1926_v41, %v2628_v56  ;;  %v810_v45 = vmul.f32 %v1926_v41, %v2626_v55  ;;  %v805_v46 = vadd.f32 %v804_v39, %v803_v38  ;;  %v802_v47 = vsub.f32 %v800_v40, %v801_v37  ;;  %v887_v55 = vld [vmem:[%s880_s25] ss:$0 sm:$0xff]  ;;  %s2726_s25 = smov [#allocation17] }
 0x265   : >>> { %v808_v48 = vsub.f32 %v806_v42, %v807_v43  ;;  %v811_v49 = vadd.f32 %v810_v45, %v809_v44  ;;  %1928 = vst [vmem:[%s790_s0 + $0x8] sm:$0xff] %v805_v46  ;;  %1927 = vst [vmem:[%s788_s24 + $0x8] sm:$0xff] %v802_v47  ;;  %s879_s24 = smov [#allocation18]  ;;  %s2717_s0 = smov [#allocation16] }
 0x267   : >>> { %1929 = vst [vmem:[%s792_s1 + $0x8] sm:$0xff] %v808_v48  ;;  %1930 = vst [vmem:[%s794_s14 + $0x8] sm:$0xff] %v811_v49  ;;  %s2719_s1 = smov [#allocation15]  ;;  %s2302_s14 = smov 1  }
 0x26c   : >>> { %v846_v56 = vld [vmem:[%s839_s16] sm:$0xff]  ;;  %v1933_v57 = vld [vmem:[%s839_s16 + $0x8] sm:$0xff] }
 0x26d   : >>> { %v825_v58 = vld [vmem:[%s2705_s28] sm:$0xff]  ;;  %v850_v59 = vsel %vm849_vm10, 0.0, %v846_v56  ;;  %v857_v60 = vsel %vm856_vm11, 0.0, %v1933_v57  ;;  %v1931_v62 = vld [vmem:[%s2705_s28 + $0x8] sm:$0xff] }
 0x26e   : >>> { %v829_v61 = vsel %vm828_vm12, %v824_v54, %v825_v58  ;;  %v866_v63 = vld [vmem:[%s859_s19] sm:$0xff]  ;;  %v1935_v0 = vld [vmem:[%s859_s19 + $0x8] sm:$0xff]  ;;  %851 = vst [vmem:[%s839_s16] sm:$0xff] %v850_v59  ;;  %1934 = vst [vmem:[%s839_s16 + $0x8] sm:$0xff] %v857_v60  ;;  %v837_v1 = vsel %vm836_vm13, %v824_v54, %v1931_v62  ;;  %s2303_s16 = smov 127  }
 0x26f   : >>> { %830 = vst [vmem:[%s2705_s28] sm:$0xff] %v829_v61  ;;  %v870_v2 = vsel %vm869_vm14, 0.0, %v866_v63  ;;  %v877_v3 = vsel %vm876_vm15, 0.0, %v1935_v0  ;;  %v888_v4 = vld [vmem:[%s879_s24] sm:$0xff]  ;;  %v1937_v5 = vld [vmem:[%s879_s24 + $0x8] sm:$0xff]  ;;  %1932 = vst [vmem:[%s2705_s28 + $0x8] sm:$0xff] %v837_v1  ;;  %s2728_s28 = smov [#allocation18] }
 0x270   : >>> { %871 = vst [vmem:[%s859_s19] sm:$0xff] %v870_v2  ;;  %1936 = vst [vmem:[%s859_s19 + $0x8] sm:$0xff] %v877_v3  ;;  %v892_v6 = vsel %vm891_vm0, %v887_v55, %v888_v4  ;;  %v900_v7 = vsel %vm899_vm1, %v887_v55, %v1937_v5  ;;  %s2732_s19 = smov [#allocation16] }
 0x271   : >>> { %893 = vst [vmem:[%s879_s24] sm:$0xff] %v892_v6  ;;  %1938 = vst [vmem:[%s879_s24 + $0x8] sm:$0xff] %v900_v7  ;;  %s2735_s24 = smov [#allocation17] }
 0x275   : >>> { %v904_v8 = vld [vmem:[%s2717_s0] sm:$0xff]  ;;  %v1939_v15 = vld [vmem:[%s2732_s19 + $0x8] sm:$0xff] }
 0x276   : >>> { %905 = vrot.lane.b32.xlu1 %v904_v8, %s2302_s14  ;;  %v908_v10 = vld [vmem:[%s2719_s1] sm:$0xff]  ;;  %v1941_v11 = vld [vmem:[%s2723_s18 + $0x8] sm:$0xff] }
 0x277   : >>> { %909 = vrot.lane.b32.xlu0 %v908_v10, %s2302_s14  ;;  %v974_v13 = vld [vmem:[%s2726_s25] sm:$0xff]  ;;  %v1947_v16 = vld [vmem:[%s2735_s24 + $0x8] sm:$0xff] }
 0x278   : >>> { %v970_v14 = vld [vmem:[%s2728_s28] sm:$0xff]  ;;  %v1945_v17 = vld [vmem:[%s2737_s2 + $0x8] sm:$0xff] }
 0x27a   : >>> { %941 = vrot.lane.b32.xlu1 %v1941_v11, %s2302_s14 }
 0x27b   : >>> { %926 = vrot.lane.b32.xlu0 %v904_v8, %s2303_s16 }
 0x27e   : >>> { %975 = vrot.lane.b32.xlu1 %v974_v13, %s2302_s14 }
 0x27f   : >>> { %971 = vrot.lane.b32.xlu0 %v970_v14, %s2302_s14 }
 0x282   : >>> { %937 = vrot.lane.b32.xlu1 %v1939_v15, %s2302_s14 }
 0x283   : >>> { %958 = vrot.lane.b32.xlu0 %v1939_v15, %s2303_s16 }
 0x286   : >>> { %1007 = vrot.lane.b32.xlu1 %v1947_v16, %s2302_s14 }
 0x287   : >>> { %1003 = vrot.lane.b32.xlu0 %v1945_v17, %s2302_s14  ;;  %s2784_s14 = smov [#allocation17] }
 0x28a   : >>> { %992 = vrot.lane.b32.xlu1 %v970_v14, %s2303_s16 }
 0x28e   : >>> { %1024 = vrot.lane.b32.xlu1 %v1945_v17, %s2303_s16  ;;  %s410_s16 = smov (%p505_p11), [#allocation16] }
 0x2e8   : >>> { %v906_v18 = vpop.permute.xlu1 %905 }
 0x2e9   : >>> { %v910_v19 = vpop.permute.xlu0 %909 }
 0x2ea   : >>> { %v914_v20 = vsel %vm913_vm2, %v908_v10, %v910_v19 }
 0x2eb   : >>> { %v918_v21 = vsel %vm917_vm3, %v906_v18, %v914_v20 }
 0x2ec   : >>> { %v924_v22 = vsel %vm1711_vm4, %v918_v21, 0.0  ;;  %v942_v23 = vpop.permute.xlu1 %941 }
 0x2ed   : >>> { %v927_v24 = vpop.permute.xlu0 %926  ;;  %964 = vst [vmem:[%s2719_s1] sm:$0xff] %v924_v22  ;;  %v946_v31 = vsel %vm913_vm2, %v1941_v11, %v942_v23  ;;  %s2779_s1 = smov [#allocation16] }
 0x2ee   : >>> { %v931_v25 = vsel %vm930_vm5, %v908_v10, %v927_v24 }
 0x2ef   : >>> { %965 = vst [vmem:[%s2717_s0] sm:$0xff] %v931_v25  ;;  %s2775_s0 = smov [#allocation15] }
 0x2f0   : >>> { %v976_v26 = vpop.permute.xlu1 %975 }
 0x2f1   : >>> { %v980_v27 = vsel %vm913_vm2, %v974_v13, %v976_v26  ;;  %v972_v28 = vpop.permute.xlu0 %971 }
 0x2f2   : >>> { %v984_v29 = vsel %vm917_vm3, %v972_v28, %v980_v27 }
 0x2f3   : >>> { %v990_v30 = vsel %vm1711_vm4, %v984_v29, 0.0 }
 0x2f4   : >>> { %v938_v32 = vpop.permute.xlu1 %937  ;;  %1030 = vst [vmem:[%s2726_s25] sm:$0xff] %v990_v30  ;;  %s381_s25 = smov (%p505_p11), [#allocation15] }
 0x2f5   : >>> { %v950_v33 = vsel %vm917_vm3, %v938_v32, %v946_v31  ;;  %v959_v34 = vpop.permute.xlu0 %958 }
 0x2f6   : >>> { %v956_v35 = vsel %vm1711_vm4, %v950_v33, 0.0  ;;  %v963_v36 = vsel %vm930_vm5, %v1941_v11, %v959_v34 }
 0x2f7   : >>> { %1943 = vst [vmem:[%s2723_s18 + $0x8] sm:$0xff] %v956_v35  ;;  %1944 = vst [vmem:[%s2732_s19 + $0x8] sm:$0xff] %v963_v36  ;;  %s1079_s18 = smov [#allocation18] }
 0x2f8   : >>> { %v1008_v37 = vpop.permute.xlu1 %1007 }
 0x2f9   : >>> { %v1012_v38 = vsel %vm913_vm2, %v1947_v16, %v1008_v37  ;;  %v1004_v39 = vpop.permute.xlu0 %1003 }
 0x2fa   : >>> { %v1016_v40 = vsel %vm917_vm3, %v1004_v39, %v1012_v38 }
 0x2fb   : >>> { %v1022_v41 = vsel %vm1711_vm4, %v1016_v40, 0.0 }
 0x2fc   : >>> { %v993_v42 = vpop.permute.xlu1 %992  ;;  %1949 = vst [vmem:[%s2735_s24 + $0x8] sm:$0xff] %v1022_v41 }
 0x2fd   : >>> { %v997_v43 = vsel %vm930_vm5, %v974_v13, %v993_v42  ;;  %v399_v13 = vadd.s32 (%p505_p11), 8, %v380_v9  ;;  %v409_v9 = vmov (%p505_p11), %v2446_v9 }
 0x2fe   : >>> { %v1036_v44 = vld [vmem:[%s2775_s0] ss:$0 sm:$0xff]  ;;  %v1952_v46 = vld [vmem:[%s2775_s0 + $0x7] ss:$0 sm:$0xff]  ;;  %1031 = vst [vmem:[%s2728_s28] sm:$0xff] %v997_v43  ;;  %v1953_v48 = vld [vmem:[%s2775_s0 + $0x7] sm:$0xfe]  ;;  %v455_v9 = vmov (%p505_p11), %v2446_v9 }
 0x2ff   : >>> { %v1951_v45 = vld [vmem:[%s2775_s0 - $0x1] sm:$0xfe]  ;;  %v1054_v51 = vsel %vm1042_vm8, %v1952_v46, %v1953_v48  ;;  %v1962_v53 = vld [vmem:[%s2779_s1 + $0x7] ss:$0 sm:$0xff]  ;;  %v1963_v54 = vld [vmem:[%s2779_s1 + $0x7] sm:$0xfe]  ;;  %vm400_vm7 = vcmp.eq.s32.totalorder (%p505_p11), %v399_v13, %v377_v12  ;;  %v429_v12 = vmov (%p505_p11), %v2449_v12  ;;  %v432_v9 = vmov (%p505_p11), %v2446_v9 }
 0x300   : >>> { %v1043_v47 = vsel %vm1042_vm8, %v1036_v44, %v1951_v45  ;;  %v1080_v49 = vld [vmem:[%s2779_s1] ss:$0 sm:$0xff]  ;;  %v1964_v55 = vld [vmem:[%s2779_s1 + $0xf] ss:$0 sm:$0xff]  ;;  %v1025_v56 = vpop.permute.xlu1 %1024  ;;  %v1098_v57 = vsel %vm1042_vm8, %v1962_v53, %v1963_v54  ;;  %s433_s28 = smov (%p505_p11), [#allocation17]  ;;  %v452_v12 = vmov (%p505_p11), %v2449_v12  ;;  %v476_v40 = vadd.s32 (%p505_p11), 8, %v455_v9 }
 0x301   : >>> { %v1961_v50 = vld [vmem:[%s2779_s1 - $0x1] sm:$0xfe]  ;;  %1046 = vst [vmem:[%s2775_s0] sm:$0xff] %v1043_v47  ;;  %v1029_v58 = vsel %vm930_vm5, %v1947_v16, %v1025_v56  ;;  %v1954_v59 = vld [vmem:[%s2775_s0 + $0xf] ss:$0 sm:$0xff]  ;;  %1965 = vst [vmem:[%s2779_s1 + $0x8] sm:$0xff] %v1098_v57 }
 0x302   : >>> { %v1087_v52 = vsel %vm1042_vm8, %v1080_v49, %v1961_v50  ;;  %1950 = vst [vmem:[%s2737_s2 + $0x8] sm:$0xff] %v1029_v58  ;;  %1955 = vst [vmem:[%s2775_s0 + $0x8] sm:$0xff] %v1054_v51  ;;  %s1272_s2 = sadd.s32 (%p505_p11), 1, %s2295_s30   ;;  %vm467_vm8 = vcmp.eq.s32.totalorder (%p505_p11), %v455_v9, %v452_v12 }
 0x303   : >>> { %1090 = vst [vmem:[%s2779_s1] sm:$0xff] %v1087_v52  ;;  %v1058_v60 = vld [vmem:[%s2784_s14] ss:$0 sm:$0xff]  ;;  %v1957_v61 = vld [vmem:[%s2784_s14 + $0x9] sm:$0x7f]  ;;  %v1958_v62 = vld [vmem:[%s2784_s14 + $0x8] ss:$0 sm:$0xff]  ;;  %s3020_s30 = smov (%p505_p11), %s1272_s2 }
 0x304   : >>> { %1956 = vst [vmem:[%s2775_s0 + $0x1] sm:$0x1] %v1058_v60  ;;  %v1067_v63 = vsel %vm1066_vm9, %v1954_v59, %v1957_v61  ;;  %v1960_v0 = vld [vmem:[%s2784_s14 + $0x1] sm:$0x7f]  ;;  %p501_p12 = scmp.ge.s32.totalorder (%p505_p11), %s1272_s2, 15 }
 0x305   : >>> { %1959 = vst [vmem:[%s2784_s14 + $0x8] sm:$0xff] %v1067_v63  ;;  %v1075_v1 = vsel %vm1066_vm9, %v1958_v62, %v1960_v0 }
 0x306   : >>> { %1077 = vst [vmem:[%s2784_s14] sm:$0xff] %v1075_v1 }
 0x308   : >> { %507 = sbr.rel (!%p505_p11) target bundleno = 304 (0x130), region = 369 }
 0x309   : >>> { %v1102_v2 = vld [vmem:[%s1079_s18] ss:$0 sm:$0xff]  ;;  %v1967_v3 = vld [vmem:[%s1079_s18 + $0x9] sm:$0x7f]  ;;  %v1968_v4 = vld [vmem:[%s1079_s18 + $0x8] ss:$0 sm:$0xff] }
 0x30a   : >>> { %1966 = vst [vmem:[%s2779_s1 + $0x1] sm:$0x1] %v1102_v2  ;;  %v1111_v5 = vsel %vm1066_vm9, %v1964_v55, %v1967_v3  ;;  %v1970_v6 = vld [vmem:[%s1079_s18 + $0x1] sm:$0x7f] }
 0x30b   : >>> { %1969 = vst [vmem:[%s1079_s18 + $0x8] sm:$0xff] %v1111_v5  ;;  %v1119_v7 = vsel %vm1066_vm9, %v1968_v4, %v1970_v6  ;;  %v387_v8 = vld [vmem:[%s381_s25] sm:$0xff] (%p505_p11)  ;;  %v2001_v10 = vld [vmem:[%s381_s25 + $0x8] sm:$0xff] (%p505_p11)  ;;  %vm477_vm9 = vcmp.eq.s32.totalorder (%p505_p11), %v476_v40, %v452_v12 }
 0x30c   : >>> { %1121 = vst [vmem:[%s1079_s18] sm:$0xff] %v1119_v7  ;;  %v388_v14 = vsel (%p505_p11), %vm1711_vm4, %v387_v8, 0.0  ;;  %v396_v15 = vsel (%p505_p11), %vm1711_vm4, %v2001_v10, 0.0 }
 0x30d   : >> { %v439_v18 = vld [vmem:[%s433_s28] sm:$0xff] (%p505_p11)  ;;  %v389_v19 = vmul.f32 (%p505_p11), %v388_v14, %v388_v14  ;;  %v397_v20 = vmul.f32 (%p505_p11), %v396_v15, %v396_v15  ;;  %v2003_v23 = vld [vmem:[%s433_s28 + $0x8] sm:$0xff] (%p505_p11) }
 0x30e   : >> { %v440_v24 = vsel (%p505_p11), %vm1711_vm4, %v439_v18, 0.0  ;;  %v446_v28 = vsel (%p505_p11), %vm1711_vm4, %v2003_v23, 0.0 }
 0x30f   : >> { %v403_v25 = vadd.f32 %v397_v20, %v389_v19  ;;  %v393_v29 = vsel %vm392_vm6, 0.0, %v389_v19  ;;  %v441_v31 = vmul.f32 %v440_v24, %v440_v24  ;;  %v401_v33 = vsel %vm400_vm7, 0.0, %v397_v20 }
 0x310   : >> { %v402_v35 = vadd.f32 %v401_v33, %v393_v29  ;;  %v447_v37 = vmul.f32 %v446_v28, %v446_v28 }
 0x311   : >> { %v416_v11 = vld [vmem:[%s410_s16] sm:$0xff]  ;;  %v2002_v17 = vld [vmem:[%s410_s16 + $0x8] sm:$0xff] }
 0x312   : >> { %v417_v16 = vsel %vm1711_vm4, %v416_v11, 0.0  ;;  %v423_v22 = vsel %vm1711_vm4, %v2002_v17, 0.0 }
 0x313   : >> { %v418_v21 = vmul.f32 %v417_v16, %v417_v16  ;;  %v424_v26 = vmul.f32 %v423_v22, %v423_v22  ;;  %v462_v27 = vld [vmem:[%s456_s26] sm:$0xff]  ;;  %v2004_v32 = vld [vmem:[%s456_s26 + $0x8] sm:$0xff] }
 0x314   : >> { %v463_v34 = vsel %vm1711_vm4, %v462_v27, 0.0  ;;  %v473_v38 = vsel %vm1711_vm4, %v2004_v32, 0.0 }
 0x315   : >> { %v420_v30 = vadd.f32 %v418_v21, %v403_v25  ;;  %v419_v39 = vadd.f32 %v418_v21, %v402_v35  ;;  %v464_v42 = vmul.f32 %v463_v34, %v463_v34  ;;  %v474_v45 = vmul.f32 %v473_v38, %v473_v38 }
 0x317   : >> { %v426_v36 = vadd.f32 %v424_v26, %v420_v30  ;;  %v425_v43 = vadd.f32 %v424_v26, %v419_v39  ;;  %v468_v48 = vsel %vm467_vm8, 0.0, %v464_v42  ;;  %v478_v51 = vsel %vm477_vm9, 0.0, %v474_v45 }
 0x319   : >> { %v443_v41 = vadd.f32 %v441_v31, %v426_v36  ;;  %v442_v46 = vadd.f32 %v441_v31, %v425_v43 }
 0x31b   : >> { %v449_v44 = vadd.f32 %v447_v37, %v443_v41  ;;  %v448_v49 = vadd.f32 %v447_v37, %v442_v46 }
 0x31d   : >> { %v470_v47 = vadd.f32 %v464_v42, %v449_v44  ;;  %v469_v52 = vadd.f32 %v468_v48, %v448_v49 }
 0x31f   : >> { %v480_v50 = vadd.f32 %v474_v45, %v470_v47  ;;  %v479_v53 = vadd.f32 %v478_v51, %v469_v52 }
 0x321   : >> { %481 = vadd.xlane.f32.xlu0 %v480_v50 }
 0x325   : >> { %489 = vadd.xlane.f32.xlu0 %v479_v53 }
 0x3ae   : >> { %v482_v54 = vpop.xlane.xlu0 %481 }
 0x3af   : >> { %v483_v55 = vrot.slane %v482_v54, 4 }
 0x3b1   : >> { %v484_v56 = vadd.f32 %v483_v55, %v482_v54 }
 0x3b2   : >> { %v490_v57 = vpop.xlane.xlu0 %489 }
 0x3b3   : >> { %v485_v58 = vrot.slane %v484_v56, 2  ;;  %v491_v59 = vrot.slane %v490_v57, 4 }
 0x3b5   : >> { %v492_v60 = vadd.f32 %v491_v59, %v490_v57  ;;  %v486_v61 = vadd.f32 %v485_v58, %v484_v56 }
 0x3b7   : >> { %v493_v62 = vrot.slane %v492_v60, 2  ;;  %v487_v0 = vrot.slane %v486_v61, 1 }
 0x3b9   : >> { %v494_v63 = vadd.f32 %v493_v62, %v492_v60  ;;  %v488_v3 = vadd.f32 %v487_v0, %v486_v61 }
 0x3bb   : >> { %v495_v1 = vrot.slane %v494_v63, 1 }
 0x3bd   : >> { %v496_v2 = vadd.f32 %v495_v1, %v494_v63 }
 0x3bf   : >> { %2029 = vpush %v496_v2 }
 0x3c0   : >> { %2031 = vpush %v488_v3 }
 0x3f0   : >> { %s2030_s19 = spop %2029 }
 0x3f1   : >> { %s2032_s24 = spop %2031 }
 0x3f2   : >> { %s499_s0 = smul.f32 1e-10, %s2032_s24 }
 0x3f4   : >> { %p500_p13 = scmp.le.f32.partialorder %s2030_s19, %s499_s0 }
 0x3f6   : >> { %p502_p0 = por %p501_p12, %p500_p13 }
 0x3f8   : > { %1274 = sbr.rel (!%p502_p0) target bundleno = 303 (0x12f), region = 380 }
 0x3ff PF: > { %s1279_s1 = smov [#allocation15]  ;;  %v1283_v12 = vmov %v2449_v12  ;;  %v1286_v9 = vmov %v2446_v9  ;;  %s1305_s30 = smov [#allocation18] }
 0x400   : > { %v1309_v12 = vmov %v2449_v12  ;;  %v1312_v9 = vmov %v2446_v9  ;;  %v1287_v4 = vld [vmem:[%s1279_s1] sm:$0xff]  ;;  %vm1290_vm10 = vcmp.eq.s32.totalorder %v1286_v9, %v1283_v12  ;;  %v2005_v5 = vld [vmem:[%s1279_s1 + $0x8] sm:$0xff]  ;;  %v1295_v6 = vadd.s32 8, %v1286_v9  ;;  %s1275_s14 = sand.u32 7, %s2275_s11   ;;  %s3021_s25 = scalar_lea.vmem [#allocation5], %s2444_s20 }
 0x401   : > { %vm1316_vm11 = vcmp.eq.s32.totalorder %v1312_v9, %v1309_v12  ;;  %v1321_v7 = vadd.s32 8, %v1312_v9  ;;  %v1291_v8 = vsel %vm1290_vm10, %v1287_v4, 0.0  ;;  %v1313_v10 = vld [vmem:[%s1305_s30] sm:$0xff]  ;;  %v2006_v11 = vld [vmem:[%s1305_s30 + $0x8] sm:$0xff]  ;;  %s1276_s18 = scalar_lea.vmem [#allocation4], %s1275_s14  ;;  %s1278_s2 = scalar_lea.vmem [#allocation6], %s1275_s14 }
 0x402   : > { %vm1296_vm12 = vcmp.eq.s32.totalorder %v1295_v6, %v1283_v12  ;;  %v1317_v14 = vsel %vm1316_vm11, %v1313_v10, 0.0  ;;  %s1280_s18 = smov %s1276_s18  ;;  %s1306_s2 = smov %s1278_s2 }
 0x403   : > { %vm1322_vm4 = vcmp.eq.s32.totalorder %v1321_v7, %v1309_v12  ;;  %v1297_v13 = vsel %vm1296_vm12, %v2005_v5, %v1291_v8  ;;  %s3022_s16 = scalar_lea.vmem [#allocation7], %s2444_s20  ;;  %s1357_s26 = scalar_lea.sflag [#allocation11], %s2438_s27 }
 0x404   : > { %v1298_v15 = vrot.slane %v1297_v13, 4  ;;  %v1323_v16 = vsel %vm1322_vm4, %v2006_v11, %v1317_v14  ;;  %s1374_s24 = sshrl.u32 (%p2406_p4), %s2275_s11, 3  ;;  %s3023_s1 = scalar_lea.vmem (%p2406_p4), [#allocation5], %s2444_s20 }
 0x405   : > { %v1324_v17 = vrot.slane %v1323_v16, 4  ;;  %s1375_s0 = sadd.s32 (%p2406_p4), %s2279_s12, %s1374_s24 }
 0x406   : > { %v1299_v18 = vadd.f32 %v1298_v15, %v1297_v13  ;;  %s2013_s30 = sshll.u32 (%p2406_p4), %s1375_s0, 1 }
 0x407   : > { %v1325_v19 = vadd.f32 %v1324_v17, %v1323_v16 }
 0x408   : > { %v1300_v20 = vrot.slane %v1299_v18, 2 }
 0x409   : > { %v1326_v21 = vrot.slane %v1325_v19, 2 }
 0x40a   : > { %v1301_v22 = vadd.f32 %v1300_v20, %v1299_v18 }
 0x40b   : > { %v1327_v9 = vadd.f32 %v1326_v21, %v1325_v19 }
 0x40c   : > { %v1302_v23 = vrot.slane %v1301_v22, 1 }
 0x40d   : > { %v1328_v12 = vrot.slane %v1327_v9, 1 }
 0x40e   : > { %v1303_v24 = vadd.f32 %v1302_v23, %v1301_v22 }
 0x40f   : > { %v1329_v25 = vadd.f32 %v1328_v12, %v1327_v9 }
 0x410   : > { %1304 = vst [vmem:[%s1280_s18] sm:$0x1] %v1303_v24 }
 0x411   : > { %1330 = vst [vmem:[%s1306_s2] sm:$0x1] %v1329_v25  ;;  %s1377_s2 = scalar_lea.vmem (%p2406_p4), %s2998_s4, %s2013_s30 }
 0x413   : > { %1373 = sbr.rel (!%p2406_p4) target bundleno = 1057 (0x421), region = 114 }
 0x417   : > { %v1334_v26 = vld [vmem:[#allocation4] sm:$0x3] }
 0x418   : > { %1336 = vst [vmem:[%s3021_s25] sm:$0x3] %v1334_v26  ;;  %v1340_v27 = vld [vmem:[#allocation6] sm:$0x3] }
 0x419   : > { %1342 = vst [vmem:[%s3022_s16] sm:$0x3] %v1340_v27 }
 0x41f   : > { %v1393_v28 = vld [vmem:[%s3023_s1] sm:$0x3] }
 0x420   : > { %1394 = vst [vmem:[%s1377_s2] sm:$0x3] %v1393_v28 }
 0x421 PF: > { %1411 = sbr.rel (!%p2406_p4) target bundleno = 1065 (0x429), region = 148  ;;  %s1412_s25 = sshrl.u32 (%p2406_p4), %s2275_s11, 3 }
 0x422   : > { %s1413_s16 = sadd.s32 (%p2406_p4), %s2279_s12, %s1412_s25  ;;  %s3024_s19 = scalar_lea.vmem (%p2406_p4), [#allocation7], %s2444_s20 }
 0x423   : > { %s2014_s24 = sshll.u32 (%p2406_p4), %s1413_s16, 1 }
 0x424   : > { %s1415_s0 = scalar_lea.vmem (%p2406_p4), %s2999_s5, %s2014_s24 }
 0x427   : > { %v1431_v29 = vld [vmem:[%s3024_s19] sm:$0x3] (%p2406_p4) }
 0x428   : > { %1432 = vst [vmem:[%s1415_s0] sm:$0x3] %v1431_v29 }
 0x429 PF: > { %s2015_s23 = sshll.u32 %s2279_s12, 1  ;;  %s1467_s30 = sshll.u32 %s2462_s17, 4  ;;  %s1468_s30 = int_to_ptr.vmem [resolvable:$true] %s1467_s30 }
 0x42a   : > { %s1451_s14 = sadd.s32 %s2275_s11, %s2015_s23  ;;  %s1455_s20 = sshll.u32 %s2457_s29, 4  ;;  %s1456_s20 = int_to_ptr.vmem [resolvable:$true] %s1455_s20 }
 0x42b   : > { %s2896_s18 = sshll.u32 %s1451_s14, 8  ;;  %s2121_s1 = scalar_lea.vmem %s1468_s30, 256 }
 0x42c   : > { %s1465_s28 = scalar_lea.hbm %s3001_s7, %s2896_s18  ;;  %s2907_s24 = scalar_lea.hbm %s3000_s6, %s2896_s18 }
 0x42d   : > { %p2122_p1 = scmp.ne.s32.totalorder %s1468_s30, %s2121_s1  ;;  %s2304_s12 = smov [#allocation10]  }
 0x42e   : > { %s2123_s17 = sshll.u32 %s2304_s12, 4  ;;  %s2124_s17 = int_to_ptr.vmem [resolvable:$false] %s2123_s17 }
 0x42f   : > { %s2125_s11 = scalar_lea.vmem %s2124_s17, 512  ;;  %p2126_p2 = scmp.lt.s32.totalorder %s1468_s30, %s2124_s17 }
 0x430   : > { %p2127_p3 = scmp.lt.s32.totalorder %s2125_s11, %s2121_s1 }
 0x432   : > { %p2128_p4 = por %p2127_p3, %p2126_p2 }
 0x434   : > { %p2129_p5 = pnand %p2128_p4, %p2122_p1 }
 0x436   : > { %2132 = shalt.err (!%p2129_p5)
}
 0x437   : > { %s2133_s29 = scalar_lea.hbm %s1465_s28, 256  ;;  %s2135_s14 = scalar_lea.hbm %s3001_s7, 1024 }
 0x438   : > { %p2134_p6 = scmp.ne.s32.totalorder %s1465_s28, %s2133_s29  ;;  %p2136_p7 = scmp.lt.u32.totalorder %s1465_s28, %s3001_s7 }
 0x439   : > { %p2137_p8 = scmp.lt.u32.totalorder %s2135_s14, %s2133_s29  ;;  %p2139_p10 = scmp.lt.u32.totalorder %s2133_s29, %s1465_s28 }
 0x43b   : > { %p2138_p9 = por %p2137_p8, %p2136_p7 }
 0x43d   : > { %p2140_p11 = por %p2139_p10, %p2138_p9 }
 0x43f   : > { %p2141_p12 = pnand %p2140_p11, %p2134_p6 }
 0x441   : > { %2144 = shalt.err (!%p2141_p12)
}
 0x442   : > { %1470 = dma.vmem_to_hbm [thread:$0]  %s1468_s30, 256, %s1465_s28, %s1357_s26  }
 0x443   : > { %s2921_s1 = scalar_lea.hbm %s3002_s8, %s2896_s18  ;;  %s2145_s12 = scalar_lea.vmem %s1456_s20, 256 }
 0x444   : > { %p2146_p13 = scmp.ne.s32.totalorder %s1456_s20, %s2145_s12  ;;  %s2305_s17 = smov [#allocation8]  }
 0x445   : > { %s2147_s11 = sshll.u32 %s2305_s17, 4  ;;  %s2148_s11 = int_to_ptr.vmem [resolvable:$false] %s2147_s11 }
 0x446   : > { %s2149_s0 = scalar_lea.vmem %s2148_s11, 512  ;;  %p2150_p0 = scmp.lt.s32.totalorder %s1456_s20, %s2148_s11 }
 0x447   : > { %p2151_p1 = scmp.lt.s32.totalorder %s2149_s0, %s2145_s12 }
 0x449   : > { %p2152_p2 = por %p2151_p1, %p2150_p0 }
 0x44b   : > { %p2153_p3 = pnand %p2152_p2, %p2146_p13 }
 0x44d   : > { %2156 = shalt.err (!%p2153_p3)
}
 0x44e   : > { %s2157_s30 = scalar_lea.hbm %s2907_s24, 256  ;;  %s2159_s23 = scalar_lea.hbm %s3000_s6, 1024 }
 0x44f   : > { %p2158_p4 = scmp.ne.s32.totalorder %s2907_s24, %s2157_s30  ;;  %p2160_p5 = scmp.lt.u32.totalorder %s2907_s24, %s3000_s6 }
 0x450   : > { %p2161_p6 = scmp.lt.u32.totalorder %s2159_s23, %s2157_s30  ;;  %p2163_p8 = scmp.lt.u32.totalorder %s2157_s30, %s2907_s24 }
 0x452   : > { %p2162_p7 = por %p2161_p6, %p2160_p5 }
 0x454   : > { %p2164_p9 = por %p2163_p8, %p2162_p7 }
 0x456   : > { %p2165_p10 = pnand %p2164_p9, %p2158_p4 }
 0x458   : > { %2168 = shalt.err (!%p2165_p10)
}
 0x459   : > { %s3025_s2 = scalar_lea.sflag [#allocation9], %s2438_s27  ;;  %s1479_s25 = sshll.u32 %s2467_s21, 4  ;;  %s1480_s25 = int_to_ptr.vmem [resolvable:$true] %s1479_s25 }
 0x45a   : > { %1458 = dma.vmem_to_hbm [thread:$0]  %s1456_s20, 256, %s2907_s24, %s3025_s2  }
 0x45b   : > { %s2941_s17 = scalar_lea.hbm %s3003_s9, %s2896_s18  ;;  %s1491_s11 = sshll.u32 %s2472_s22, 4  ;;  %s1492_s11 = int_to_ptr.vmem [resolvable:$true] %s1491_s11 }
 0x45c   : > { %s2169_s0 = scalar_lea.vmem %s1480_s25, 256  ;;  %s2306_s30 = smov [#allocation12]  }
 0x45d   : > { %p2170_p11 = scmp.ne.s32.totalorder %s1480_s25, %s2169_s0  ;;  %s2171_s28 = sshll.u32 %s2306_s30, 4  ;;  %s2172_s28 = int_to_ptr.vmem [resolvable:$false] %s2171_s28 }
 0x45e   : > { %s2173_s29 = scalar_lea.vmem %s2172_s28, 512  ;;  %p2174_p12 = scmp.lt.s32.totalorder %s1480_s25, %s2172_s28 }
 0x45f   : > { %p2175_p13 = scmp.lt.s32.totalorder %s2173_s29, %s2169_s0 }
 0x461   : > { %p2176_p0 = por %p2175_p13, %p2174_p12 }
 0x463   : > { %p2177_p1 = pnand %p2176_p0, %p2170_p11 }
 0x465   : > { %2180 = shalt.err (!%p2177_p1)
}
 0x466   : > { %s2181_s21 = scalar_lea.hbm %s2921_s1, 256  ;;  %s2183_s22 = scalar_lea.hbm %s3002_s8, 1024 }
 0x467   : > { %p2182_p2 = scmp.ne.s32.totalorder %s2921_s1, %s2181_s21  ;;  %p2184_p3 = scmp.lt.u32.totalorder %s2921_s1, %s3002_s8 }
 0x468   : > { %p2185_p4 = scmp.lt.u32.totalorder %s2183_s22, %s2181_s21  ;;  %p2187_p6 = scmp.lt.u32.totalorder %s2181_s21, %s2921_s1 }
 0x46a   : > { %p2186_p5 = por %p2185_p4, %p2184_p3 }
 0x46c   : > { %p2188_p7 = por %p2187_p6, %p2186_p5 }
 0x46e   : > { %p2189_p8 = pnand %p2188_p7, %p2182_p2 }
 0x470   : > { %2192 = shalt.err (!%p2189_p8)
}
 0x471   : > { %1482 = dma.vmem_to_hbm [thread:$0]  %s1480_s25, 256, %s2921_s1, %s1357_s26  }
 0x472   : > { %s2193_s14 = scalar_lea.vmem %s1492_s11, 256  ;;  %s2307_s19 = smov [#allocation13]  }
 0x473   : > { %p2194_p9 = scmp.ne.s32.totalorder %s1492_s11, %s2193_s14  ;;  %s2195_s2 = sshll.u32 %s2307_s19, 4  ;;  %s2196_s2 = int_to_ptr.vmem [resolvable:$false] %s2195_s2 }
 0x474   : > { %s2197_s16 = scalar_lea.vmem %s2196_s2, 512  ;;  %p2198_p10 = scmp.lt.s32.totalorder %s1492_s11, %s2196_s2 }
 0x475   : > { %p2199_p11 = scmp.lt.s32.totalorder %s2197_s16, %s2193_s14 }
 0x477   : > { %p2200_p12 = por %p2199_p11, %p2198_p10 }
 0x479   : > { %p2201_p13 = pnand %p2200_p12, %p2194_p9 }
 0x47b   : > { %2204 = shalt.err (!%p2201_p13)
}
 0x47c   : > { %s2205_s12 = scalar_lea.hbm %s2941_s17, 256  ;;  %s2207_s1 = scalar_lea.hbm %s3003_s9, 1024 }
 0x47d   : > { %p2206_p0 = scmp.ne.s32.totalorder %s2941_s17, %s2205_s12  ;;  %p2208_p1 = scmp.lt.u32.totalorder %s2941_s17, %s3003_s9 }
 0x47e   : > { %p2209_p2 = scmp.lt.u32.totalorder %s2207_s1, %s2205_s12  ;;  %p2211_p4 = scmp.lt.u32.totalorder %s2205_s12, %s2941_s17 }
 0x480   : > { %p2210_p3 = por %p2209_p2, %p2208_p1 }
 0x482   : > { %p2212_p5 = por %p2211_p4, %p2210_p3 }
 0x484   : > { %p2213_p6 = pnand %p2212_p5, %p2206_p0 }
 0x486   : > { %2216 = shalt.err (!%p2213_p6)
}
 0x487   : > { %s3026_s28 = scalar_lea.sflag [#allocation14], %s2438_s27 }
 0x488   : > { %1494 = dma.vmem_to_hbm [thread:$0]  %s1492_s11, 256, %s2941_s17, %s3026_s28  }
 0x489 PF: > { %p2037_p7 = scmp.ge.s32.totalorder %s2291_s15, 2  ;;  %s3027_s29 = sadd.s32 4294967294, %s2291_s15  }
 0x48a   : > { %s1514_s21 = sand.u32 1, %s3027_s29  }
 0x48b   : > { %s1515_s18 = scalar_lea.sflag [#allocation9], %s1514_s21 }
 0x48c   : > { %2254 = dma.done.wait (%p2037_p7), %s1515_s18, 256  }
 0x48d   : > { %2256 = vsyncadd (%p2037_p7), %s1515_s18, 4294967040  ;;  %s1521_s20 = scalar_lea.sflag [#allocation11], %s1514_s21 }
 0x48e   : > { %2258 = dma.done.wait (%p2037_p7), %s1521_s20, 512  }
 0x48f   : > { %2260 = vsyncadd (%p2037_p7), %s1521_s20, 4294966784  ;;  %s1533_s22 = scalar_lea.sflag [#allocation14], %s1514_s21 }
 0x490   : > { %2262 = dma.done.wait (%p2037_p7), %s1533_s22, 256  }
 0x491   : > { %2264 = vsyncadd (%p2037_p7), %s1533_s22, 4294967040  ;;  %s25_s15 = sadd.s32 1, %s2291_s15   ;;  %s3028_s27 = sld [smem:[#allocation34_spill]] }
 0x492   : > { %p22_p8 = scmp.ge.s32.totalorder %s25_s15, 6   ;;  %s3029_s12 = sld [smem:[#allocation31_spill]] }
 0x493   : > { %s3030_s17 = sld [smem:[#allocation32_spill]]  ;;  %s3031_s14 = sld [smem:[#allocation33_spill]] }
 0x494   : > { %s3032_s30 = smov %s2271_s10  ;;  %s3034_s11 = smov %s2283_s13 }
 0x495   :  { %24 = sbr.rel (!%p22_p8) target bundleno = 13 (0xd), region = 391 }
 0x497   : > { %s3033_s10 = smov %s3028_s27 }
 0x499   : > { %s3035_s13 = smov %s3030_s17 }
 0x49c   :  { %1538 = vsyncpa [#allocation9], 1 }
 0x49d   :  { %1540 = vsyncpa [#allocation9 + $0x1], 1 }
 0x49e   :  { %1541 = vsyncpa [#allocation11], 1 }
 0x49f   :  { %1543 = vsyncpa [#allocation11 + $0x1], 1 }
 0x4a0   :  { %1544 = vsyncpa [#allocation14], 1 }
 0x4a1   :  { %1546 = vsyncpa [#allocation14 + $0x1], 1 }

// kernel: reverse
= control target key start
LH: loop header
LB: loop body
LE: loop exit
PB: predicated region body
PF: predicated region fallthrough
CT: control target
= control target key end

     0   :  { %v2_v0 = vlaneseq  ;;  %s131_s0 = inlined_call_operand.vmem [shape: f32[2,2,32], index: 0, kind: input, shape index: {}]   ;;  %s132_s1 = inlined_call_operand.vmem [shape: f32[2,2,32], index: 1, kind: output, shape index: {}]  }
   0x2   :  { %v3_v1 = vsub.s32 31, %v2_v0 }
   0x4   :  { %4 = vset.pattern.permute.xlu0 %v3_v1 }
   0x5   :  { %v20_v2 = vld [vmem:[%s131_s0] sm:$0xf]  }
   0x6   :  { %21 = vst [vmem:[#allocation1] sm:$0xf] %v20_v2  }
   0xd   :  { %v46_v3 = vld [vmem:[#allocation1] sm:$0x3]  ;;  %v43_v4 = vld [vmem:[#allocation1 + $0x2] sm:$0x3] }
   0xe   :  { %47 = vst [vmem:[#allocation0] sm:$0x3] %v46_v3  ;;  %45 = vst [vmem:[#allocation0 + $0x8] sm:$0x3] %v43_v4 }
  0x15   :  { %v48_v5 = vld [vmem:[#allocation0] sm:$0xff]  ;;  %v54_v6 = vld [vmem:[#allocation0 + $0x8] sm:$0xff] }
  0x16   :  { %49 = vperm.xlu0 %4, %v48_v5  }
  0x1a   :  { %55 = vperm.xlu0 %4, %v54_v6  }
  0x95   :  { %v50_v7 = vpop.permute.xlu0 %49 }
  0x96   :  { %51 = vst [vmem:[#allocation2] sm:$0xff] %v50_v7 }
  0x99   :  { %v56_v8 = vpop.permute.xlu0 %55 }
  0x9a   :  { %57 = vst [vmem:[#allocation2 + $0x8] sm:$0xff] %v56_v8 }
  0x9d   :  { %v61_v9 = vld [vmem:[#allocation2] sm:$0x3] }
  0x9e   :  { %63 = vst [vmem:[#allocation3] sm:$0x3] %v61_v9 }
  0xa1   :  { %v65_v10 = vld [vmem:[#allocation2 + $0x8] sm:$0x3] }
  0xa2   :  { %68 = vst [vmem:[#allocation3 + $0x2] sm:$0x3] %v65_v10 }
  0xa5   :  { %v84_v11 = vld [vmem:[#allocation3] sm:$0x3] }
  0xa6   :  { %85 = vst [vmem:[%s132_s1] sm:$0x3] %v84_v11 }
  0xa9   :  { %v86_v12 = vld [vmem:[#allocation3 + $0x2] sm:$0x3] }
  0xaa   :  { %87 = vst [vmem:[%s132_s1 + $0x2] sm:$0x3] %v86_v12 }

// kernel: forward.1
= control target key start
LH: loop header
LB: loop body
LE: loop exit
PB: predicated region body
PF: predicated region fallthrough
CT: control target
= control target key end

     0   :  { %v2575_v7 = vmov 0.0|0.0   ;;  %vm2576_vm0 = vmmov 0   ;;  %v2577_v8 = vmov 0.0   ;;  %s3524_s0 = inlined_call_operand.vmem [shape: f32[48,384], index: 0, kind: input, shape index: {}]   ;;  %s3525_s1 = inlined_call_operand.vmem [shape: f32[3,384,128], index: 1, kind: input, shape index: {}]   ;;  %s3526_s2 = inlined_call_operand.vmem [shape: f32[3,1,128], index: 2, kind: input, shape index: {}]   ;;  %s3527_s3 = inlined_call_operand.vmem [shape: f32[3,128,128], index: 3, kind: input, shape index: {}]   ;;  %s3528_s4 = inlined_call_operand.vmem [shape: f32[3,1,128], index: 4, kind: input, shape index: {}]   ;;  %s3529_s5 = inlined_call_operand.vmem [shape: f32[3,128,128], index: 5, kind: input, shape index: {}]   ;;  %s3530_s6 = inlined_call_operand.vmem [shape: f32[3,1,128], index: 6, kind: input, shape index: {}]   ;;  %s3531_s7 = inlined_call_operand.vmem [shape: f32[8,48], index: 7, kind: input, shape index: {}]   ;;  %s3532_s8 = inlined_call_operand.hbm [shape: f32[8,128], index: 8, kind: output, shape index: {}]  }
   0x1   :  { %v52_v0 = vld [vmem:[%s3525_s1 + $0x80] sm:$0xff]  ;;  %v53_v1 = vld [vmem:[%s3525_s1 + $0x88] sm:$0xff]  ;;  %v54_v5 = vld [vmem:[%s3525_s1 + $0x90] sm:$0xff]  ;;  %2234 = vmatprep.subr.bf16.mxu1 %v2575_v7  ;;  %1886 = vmatprep.mubr.msk.f32.mxu1 %vm2576_vm0, %v2577_v8 }
   0x2   :  { %v36_v2 = vld [vmem:[%s3525_s1] sm:$0xff]  ;;  %v2202_v3 = vpack.c.bf16 %v53_v1, %v52_v0  ;;  %v37_v4 = vld [vmem:[%s3525_s1 + $0x8] sm:$0xff]  ;;  %v55_v6 = vld [vmem:[%s3525_s1 + $0x98] sm:$0xff] }
   0x3   :  { %v2204_v9 = vpack.c.bf16 %v37_v4, %v36_v2  ;;  %v2206_v10 = vpack.c.bf16 %v55_v6, %v54_v5  ;;  %v38_v11 = vld [vmem:[%s3525_s1 + $0x10] sm:$0xff]  ;;  %v39_v12 = vld [vmem:[%s3525_s1 + $0x18] sm:$0xff]  ;;  %v68_v13 = vld [vmem:[%s3525_s1 + $0x100] sm:$0xff] }
   0x4   :  { %2203 = vmatprep.subr.bf16.mxu0 %v2202_v3  ;;  %v69_v14 = vld [vmem:[%s3525_s1 + $0x108] sm:$0xff]  ;;  %v56_v15 = vld [vmem:[%s3525_s1 + $0xa0] sm:$0xff]  ;;  %v2208_v17 = vpack.c.bf16 %v39_v12, %v38_v11  ;;  %v70_v19 = vld [vmem:[%s3525_s1 + $0x110] sm:$0xff] }
   0x5   :  { %v57_v16 = vld [vmem:[%s3525_s1 + $0xa8] sm:$0xff]  ;;  %2205 = vmatpush3.bf16.msra.mxu0 %v2204_v9  ;;  %v2235_v18 = vpack.c.bf16 %v69_v14, %v68_v13  ;;  %v40_v21 = vld [vmem:[%s3525_s1 + $0x20] sm:$0xff]  ;;  %v71_v23 = vld [vmem:[%s3525_s1 + $0x118] sm:$0xff] }
   0x6   :  { %2207 = vmatprep.subr.bf16.mxu0 %v2206_v10  ;;  %v2210_v20 = vpack.c.bf16 %v57_v16, %v56_v15  ;;  %v41_v22 = vld [vmem:[%s3525_s1 + $0x28] sm:$0xff]  ;;  %v2238_v24 = vpack.c.bf16 %v71_v23, %v70_v19  ;;  %v58_v25 = vld [vmem:[%s3525_s1 + $0xb0] sm:$0xff]  ;;  %v59_v26 = vld [vmem:[%s3525_s1 + $0xb8] sm:$0xff] }
   0x7   :  { %2236 = vmatpush3.bf16.msra.mxu1 %v2235_v18  ;;  %v72_v27 = vld [vmem:[%s3525_s1 + $0x120] sm:$0xff]  ;;  %v73_v28 = vld [vmem:[%s3525_s1 + $0x128] sm:$0xff]  ;;  %v2212_v29 = vpack.c.bf16 %v41_v22, %v40_v21  ;;  %v2214_v30 = vpack.c.bf16 %v59_v26, %v58_v25  ;;  %v42_v31 = vld [vmem:[%s3525_s1 + $0x30] sm:$0xff] }
   0x8   :  { %2237 = vmatprep.subr.bf16.mxu1 %v2575_v7  ;;  %v43_v32 = vld [vmem:[%s3525_s1 + $0x38] sm:$0xff]  ;;  %v2241_v33 = vpack.c.bf16 %v73_v28, %v72_v27  ;;  %v60_v34 = vld [vmem:[%s3525_s1 + $0xc0] sm:$0xff]  ;;  %v61_v35 = vld [vmem:[%s3525_s1 + $0xc8] sm:$0xff] }
   0x9   :  { %2209 = vmatpush3.bf16.msra.mxu0 %v2208_v17  ;;  %v74_v36 = vld [vmem:[%s3525_s1 + $0x130] sm:$0xff]  ;;  %v75_v37 = vld [vmem:[%s3525_s1 + $0x138] sm:$0xff]  ;;  %v2216_v38 = vpack.c.bf16 %v43_v32, %v42_v31  ;;  %v2218_v39 = vpack.c.bf16 %v61_v35, %v60_v34  ;;  %v44_v40 = vld [vmem:[%s3525_s1 + $0x40] sm:$0xff] }
   0xa   :  { %2211 = vmatprep.subr.bf16.mxu0 %v2210_v20  ;;  %v45_v41 = vld [vmem:[%s3525_s1 + $0x48] sm:$0xff]  ;;  %v2244_v42 = vpack.c.bf16 %v75_v37, %v74_v36  ;;  %v62_v43 = vld [vmem:[%s3525_s1 + $0xd0] sm:$0xff]  ;;  %v63_v44 = vld [vmem:[%s3525_s1 + $0xd8] sm:$0xff] }
   0xb   :  { %2239 = vmatpush3.bf16.msra.mxu1 %v2238_v24  ;;  %v76_v45 = vld [vmem:[%s3525_s1 + $0x140] sm:$0xff]  ;;  %v77_v46 = vld [vmem:[%s3525_s1 + $0x148] sm:$0xff]  ;;  %v2220_v48 = vpack.c.bf16 %v45_v41, %v44_v40  ;;  %v2222_v50 = vpack.c.bf16 %v63_v44, %v62_v43  ;;  %v46_v51 = vld [vmem:[%s3525_s1 + $0x50] sm:$0xff] }
   0xc   :  { %2240 = vmatprep.subr.bf16.mxu1 %v2575_v7  ;;  %v31_v47 = vld [vmem:[%s3524_s0 + $0x8] sm:$0xff]  ;;  %v47_v52 = vld [vmem:[%s3525_s1 + $0x58] sm:$0xff]  ;;  %v2247_v53 = vpack.c.bf16 %v77_v46, %v76_v45  ;;  %v64_v54 = vld [vmem:[%s3525_s1 + $0xe0] sm:$0xff] }
   0xd   :  { %2213 = vmatpush3.bf16.msra.mxu0 %v2212_v29  ;;  %v34_v49 = vmax.f32 %v31_v47, 0.0  ;;  %v65_v55 = vld [vmem:[%s3525_s1 + $0xe8] sm:$0xff]  ;;  %v78_v56 = vld [vmem:[%s3525_s1 + $0x150] sm:$0xff]  ;;  %v79_v57 = vld [vmem:[%s3525_s1 + $0x158] sm:$0xff]  ;;  %v2224_v58 = vpack.c.bf16 %v47_v52, %v46_v51 }
   0xe   :  { %2215 = vmatprep.subr.bf16.mxu0 %v2214_v30  ;;  %v2226_v59 = vpack.c.bf16 %v65_v55, %v64_v54  ;;  %v48_v60 = vld [vmem:[%s3525_s1 + $0x60] sm:$0xff]  ;;  %v49_v61 = vld [vmem:[%s3525_s1 + $0x68] sm:$0xff] }
   0xf   :  { %2242 = vmatpush3.bf16.msra.mxu1 %v2241_v33  ;;  %155 = vmatprep.mubr.f32.mxu0 %v34_v49 }
  0x10   :  { %2243 = vmatprep.subr.bf16.mxu1 %v2575_v7 }
  0x11   :  { %2217 = vmatpush3.bf16.msra.mxu0 %v2216_v38 }
  0x12   :  { %2219 = vmatprep.subr.bf16.mxu0 %v2218_v39 }
  0x13   :  { %2245 = vmatpush3.bf16.msra.mxu1 %v2244_v42 }
  0x14   :  { %2246 = vmatprep.subr.bf16.mxu1 %v2575_v7 }
  0x15   :  { %2221 = vmatpush3.bf16.msra.mxu0 %v2220_v48 }
  0x16   :  { %2223 = vmatprep.subr.bf16.mxu0 %v2222_v50 }
  0x17   :  { %13 = vsyncpa [#allocation4], 0  ;;  %2248 = vmatpush3.bf16.msra.mxu1 %v2247_v53  ;;  %v2250_v62 = vpack.c.bf16 %v79_v57, %v78_v56  ;;  %v66_v63 = vld [vmem:[%s3525_s1 + $0xf0] sm:$0xff]  ;;  %v67_v0 = vld [vmem:[%s3525_s1 + $0xf8] sm:$0xff]  ;;  %v2228_v3 = vpack.c.bf16 %v49_v61, %v48_v60  ;;  %vm1306_vm1 = vcmask 392192  }
  0x18   :  { %2249 = vmatprep.subr.bf16.mxu1 %v2575_v7  ;;  %v80_v1 = vld [vmem:[%s3525_s1 + $0x160] sm:$0xff]  ;;  %v81_v2 = vld [vmem:[%s3525_s1 + $0x168] sm:$0xff]  ;;  %v2230_v4 = vpack.c.bf16 %v67_v0, %v66_v63  ;;  %v50_v5 = vld [vmem:[%s3525_s1 + $0x70] sm:$0xff] }
  0x19   :  { %2225 = vmatpush3.bf16.msra.mxu0 %v2224_v58  ;;  %v51_v6 = vld [vmem:[%s3525_s1 + $0x78] sm:$0xff]  ;;  %v2253_v9 = vpack.c.bf16 %v81_v2, %v80_v1  ;;  %v82_v10 = vld [vmem:[%s3525_s1 + $0x170] sm:$0xff]  ;;  %v30_v13 = vld [vmem:[%s3524_s0] sm:$0xff] }
  0x1a   :  { %2227 = vmatprep.subr.bf16.mxu0 %v2226_v59  ;;  %v83_v11 = vld [vmem:[%s3525_s1 + $0x178] sm:$0xff]  ;;  %v2232_v12 = vpack.c.bf16 %v51_v6, %v50_v5  ;;  %v232_v14 = vld [vmem:[%s3527_s3] sm:$0xff]  ;;  %v233_v15 = vld [vmem:[%s3527_s3 + $0x8] sm:$0xff]  ;;  %v33_v18 = vmax.f32 %v30_v13, 0.0 }
  0x1b   :  { %2251 = vmatpush3.bf16.msra.mxu1 %v2250_v62  ;;  %v2256_v16 = vpack.c.bf16 %v83_v11, %v82_v10  ;;  %v32_v17 = vld [vmem:[%s3524_s0 + $0x10] sm:$0xff]  ;;  %v2259_v19 = vpack.c.bf16 %v233_v15, %v232_v14  ;;  %v235_v22 = vld [vmem:[%s3527_s3 + $0x18] sm:$0xff]  ;;  %v236_v24 = vld [vmem:[%s3527_s3 + $0x20] sm:$0xff] }
  0x1c   :  { %2252 = vmatprep.subr.bf16.mxu1 %v2575_v7  ;;  %v35_v20 = vmax.f32 %v32_v17, 0.0  ;;  %v234_v21 = vld [vmem:[%s3527_s3 + $0x10] sm:$0xff]  ;;  %v237_v25 = vld [vmem:[%s3527_s3 + $0x28] sm:$0xff]  ;;  %v239_v28 = vld [vmem:[%s3527_s3 + $0x38] sm:$0xff] }
  0x1d   :  { %2229 = vmatpush3.bf16.msra.mxu0 %v2228_v3  ;;  %v2262_v23 = vpack.c.bf16 %v235_v22, %v234_v21  ;;  %v2265_v26 = vpack.c.bf16 %v237_v25, %v236_v24  ;;  %v238_v27 = vld [vmem:[%s3527_s3 + $0x30] sm:$0xff]  ;;  %v240_v30 = vld [vmem:[%s3527_s3 + $0x40] sm:$0xff]  ;;  %v241_v31 = vld [vmem:[%s3527_s3 + $0x48] sm:$0xff] }
  0x1e   :  { %2231 = vmatprep.subr.bf16.mxu0 %v2230_v4  ;;  %v2268_v29 = vpack.c.bf16 %v239_v28, %v238_v27  ;;  %v2271_v32 = vpack.c.bf16 %v241_v31, %v240_v30  ;;  %v242_v33 = vld [vmem:[%s3527_s3 + $0x50] sm:$0xff]  ;;  %v243_v34 = vld [vmem:[%s3527_s3 + $0x58] sm:$0xff]  ;;  %v244_v36 = vld [vmem:[%s3527_s3 + $0x60] sm:$0xff] }
  0x1f   :  { %2254 = vmatpush3.bf16.msra.mxu1 %v2253_v9  ;;  %v2274_v35 = vpack.c.bf16 %v243_v34, %v242_v33  ;;  %v245_v37 = vld [vmem:[%s3527_s3 + $0x68] sm:$0xff]  ;;  %v246_v39 = vld [vmem:[%s3527_s3 + $0x70] sm:$0xff]  ;;  %v247_v40 = vld [vmem:[%s3527_s3 + $0x78] sm:$0xff] }
  0x20   :  { %2255 = vmatprep.subr.bf16.mxu1 %v2575_v7  ;;  %v2277_v38 = vpack.c.bf16 %v245_v37, %v244_v36  ;;  %v2280_v41 = vpack.c.bf16 %v247_v40, %v246_v39  ;;  %v326_v42 = vld [vmem:[%s3529_s5] sm:$0xff]  ;;  %v327_v43 = vld [vmem:[%s3529_s5 + $0x8] sm:$0xff]  ;;  %v328_v44 = vld [vmem:[%s3529_s5 + $0x10] sm:$0xff] }
  0x21   :  { %2233 = vmatpush3.bf16.msra.mxu0 %v2232_v12  ;;  %v2283_v45 = vpack.c.bf16 %v327_v43, %v326_v42  ;;  %v329_v46 = vld [vmem:[%s3529_s5 + $0x18] sm:$0xff]  ;;  %v330_v48 = vld [vmem:[%s3529_s5 + $0x20] sm:$0xff]  ;;  %v331_v49 = vld [vmem:[%s3529_s5 + $0x28] sm:$0xff] }
  0x22   :  { %2258 = vmatprep.subr.bf16.mxu0 %v2575_v7  ;;  %v2286_v47 = vpack.c.bf16 %v329_v46, %v328_v44  ;;  %v1414_v50 = vld [vmem:[%s3525_s1 + $0x200] sm:$0xff]  ;;  %v1415_v51 = vld [vmem:[%s3525_s1 + $0x208] sm:$0xff]  ;;  %v2289_v53 = vpack.c.bf16 %v331_v49, %v330_v48  ;;  %v332_v54 = vld [vmem:[%s3529_s5 + $0x30] sm:$0xff] }
  0x23   :  { %2257 = vmatpush3.bf16.msra.mxu1 %v2256_v16  ;;  %v2306_v52 = vpack.c.bf16 %v1415_v51, %v1414_v50  ;;  %v333_v55 = vld [vmem:[%s3529_s5 + $0x38] sm:$0xff]  ;;  %v334_v57 = vld [vmem:[%s3529_s5 + $0x40] sm:$0xff]  ;;  %v335_v58 = vld [vmem:[%s3529_s5 + $0x48] sm:$0xff] }
  0x24   :  { %156 = vmatmul.mubr.f32.vlgmr.msra.gmra.mrb[0].mxu0 %v33_v18  ;;  %2282 = vmatprep.subr.bf16.mxu1 %v2575_v7  ;;  %v2292_v56 = vpack.c.bf16 %v333_v55, %v332_v54  ;;  %v2295_v59 = vpack.c.bf16 %v335_v58, %v334_v57  ;;  %v336_v60 = vld [vmem:[%s3529_s5 + $0x50] sm:$0xff]  ;;  %v337_v61 = vld [vmem:[%s3529_s5 + $0x58] sm:$0xff]  ;;  %v338_v63 = vld [vmem:[%s3529_s5 + $0x60] sm:$0xff] }
  0x25   :  { %2260 = vmatpush3.bf16.msra.mxu0 %v2259_v19  ;;  %1921 = vmatprep.mubr.msk.f32.mxu0 %vm2576_vm0, %v2577_v8  ;;  %v2298_v62 = vpack.c.bf16 %v337_v61, %v336_v60  ;;  %v339_v0 = vld [vmem:[%s3529_s5 + $0x68] sm:$0xff]  ;;  %v1395_v4 = vld [vmem:[%s3526_s2] ss:$0 sm:$0xff]  ;;  %v1416_v13 = vld [vmem:[%s3525_s1 + $0x210] sm:$0xff] }
  0x26   :  { %1887 = vmatmul.mubr.f32.vlgmr.msra.gmra.mrb[0].mxu1 %v35_v20  ;;  %2261 = vmatprep.subr.bf16.mxu0 %v2575_v7  ;;  %v2301_v1 = vpack.c.bf16 %v339_v0, %v338_v63  ;;  %v1398_v11 = vld [vmem:[%s3525_s1 + $0x180] sm:$0xff]  ;;  %v1399_v12 = vld [vmem:[%s3525_s1 + $0x188] sm:$0xff]  ;;  %v1417_v14 = vld [vmem:[%s3525_s1 + $0x218] sm:$0xff] }
  0x27   :  { %1956 = vmatprep.mubr.msk.f32.mxu1 %vm2576_vm0, %v2577_v8  ;;  %2284 = vmatpush3.bf16.msra.mxu1 %v2283_v45  ;;  %v2308_v16 = vpack.c.bf16 %v1399_v12, %v1398_v11  ;;  %v2310_v18 = vpack.c.bf16 %v1417_v14, %v1416_v13  ;;  %v1400_v19 = vld [vmem:[%s3525_s1 + $0x190] sm:$0xff]  ;;  %v1401_v20 = vld [vmem:[%s3525_s1 + $0x198] sm:$0xff]  ;;  %v1418_v25 = vld [vmem:[%s3525_s1 + $0x220] sm:$0xff] }
  0x28   :  { %2285 = vmatprep.subr.bf16.mxu1 %v2575_v7  ;;  %v2312_v21 = vpack.c.bf16 %v1401_v20, %v1400_v19  ;;  %v340_v22 = vld [vmem:[%s3529_s5 + $0x70] sm:$0xff]  ;;  %v1402_v28 = vld [vmem:[%s3525_s1 + $0x1a0] sm:$0xff]  ;;  %v1407_v44 = vld [vmem:[%s3525_s1 + $0x1c8] sm:$0xff] }
  0x29   :  { %2263 = vmatpush3.bf16.msra.mxu0 %v2262_v23  ;;  %v341_v23 = vld [vmem:[%s3529_s5 + $0x78] sm:$0xff]  ;;  %v1430_v30 = vld [vmem:[%s3525_s1 + $0x280] sm:$0xff]  ;;  %v1420_v34 = vld [vmem:[%s3525_s1 + $0x230] sm:$0xff] }
  0x2a   :  { %2264 = vmatprep.subr.bf16.mxu0 %v2575_v7  ;;  %v2304_v24 = vpack.c.bf16 %v341_v23, %v340_v22  ;;  %v1404_v37 = vld [vmem:[%s3525_s1 + $0x1b0] sm:$0xff]  ;;  %v1422_v40 = vld [vmem:[%s3525_s1 + $0x240] sm:$0xff]  ;;  %v1409_v50 = vld [vmem:[%s3525_s1 + $0x1d8] sm:$0xff] }
  0x2b   :  { %2287 = vmatpush3.bf16.msra.mxu1 %v2286_v47  ;;  %v1406_v43 = vld [vmem:[%s3525_s1 + $0x1c0] sm:$0xff]  ;;  %v1424_v46 = vld [vmem:[%s3525_s1 + $0x250] sm:$0xff]  ;;  %v1425_v47 = vld [vmem:[%s3525_s1 + $0x258] sm:$0xff] }
  0x2c   :  { %2288 = vmatprep.subr.bf16.mxu1 %v2575_v7  ;;  %v2324_v45 = vpack.c.bf16 %v1407_v44, %v1406_v43  ;;  %v2326_v48 = vpack.c.bf16 %v1425_v47, %v1424_v46  ;;  %v1408_v49 = vld [vmem:[%s3525_s1 + $0x1d0] sm:$0xff]  ;;  %v1410_v55 = vld [vmem:[%s3525_s1 + $0x1e0] sm:$0xff]  ;;  %v422_v11 = vld [vmem:[%s3524_s0 + $0x28] sm:$0xff] }
  0x2d   :  { %2266 = vmatpush3.bf16.msra.mxu0 %v2265_v26  ;;  %v1419_v26 = vld [vmem:[%s3525_s1 + $0x228] sm:$0xff]  ;;  %v2328_v51 = vpack.c.bf16 %v1409_v50, %v1408_v49  ;;  %v1428_v58 = vld [vmem:[%s3525_s1 + $0x270] sm:$0xff]  ;;  %v421_v0 = vld [vmem:[%s3524_s0 + $0x20] sm:$0xff] }
  0x2e   :  { %2267 = vmatprep.subr.bf16.mxu0 %v2575_v7  ;;  %v2314_v27 = vpack.c.bf16 %v1419_v26, %v1418_v25  ;;  %v1412_v61 = vld [vmem:[%s3525_s1 + $0x1f0] sm:$0xff]  ;;  %v1433_v14 = vld [vmem:[%s3525_s1 + $0x298] sm:$0xff]  ;;  %v1434_v20 = vld [vmem:[%s3525_s1 + $0x2a0] sm:$0xff] }
  0x2f   :  { %2290 = vmatpush3.bf16.msra.mxu1 %v2289_v53  ;;  %v1427_v53 = vld [vmem:[%s3525_s1 + $0x268] sm:$0xff]  ;;  %v1432_v13 = vld [vmem:[%s3525_s1 + $0x290] sm:$0xff]  ;;  %v1438_v26 = vld [vmem:[%s3525_s1 + $0x2c0] sm:$0xff] }
  0x30   :  { %2291 = vmatprep.subr.bf16.mxu1 %v2575_v7  ;;  %v2342_v19 = vpack.c.bf16 %v1433_v14, %v1432_v13  ;;  %v1436_v23 = vld [vmem:[%s3525_s1 + $0x2b0] sm:$0xff]  ;;  %v1451_v44 = vld [vmem:[%s3527_s3 + $0x98] sm:$0xff]  ;;  %v1452_v46 = vld [vmem:[%s3527_s3 + $0xa0] sm:$0xff] }
  0x31   :  { %2269 = vmatpush3.bf16.msra.mxu0 %v2268_v29  ;;  %v1403_v29 = vld [vmem:[%s3525_s1 + $0x1a8] sm:$0xff]  ;;  %v1454_v49 = vld [vmem:[%s3527_s3 + $0xb0] sm:$0xff]  ;;  %v1455_v50 = vld [vmem:[%s3527_s3 + $0xb8] sm:$0xff] }
  0x32   :  { %2270 = vmatprep.subr.bf16.mxu0 %v2575_v7  ;;  %v2316_v31 = vpack.c.bf16 %v1403_v29, %v1402_v28  ;;  %v1440_v29 = vld [vmem:[%s3525_s1 + $0x2d0] sm:$0xff]  ;;  %v1453_v47 = vld [vmem:[%s3527_s3 + $0xa8] sm:$0xff]  ;;  %v1470_v14 = vld [vmem:[%s3529_s5 + $0xa0] sm:$0xff] }
  0x33   :  { %2293 = vmatpush3.bf16.msra.mxu1 %v2292_v56  ;;  %v1411_v56 = vld [vmem:[%s3525_s1 + $0x1e8] sm:$0xff] }
  0x34   :  { %2294 = vmatprep.subr.bf16.mxu1 %v2575_v7  ;;  %v2332_v57 = vpack.c.bf16 %v1411_v56, %v1410_v55  ;;  %v1458_v55 = vld [vmem:[%s3527_s3 + $0xd0] sm:$0xff]  ;;  %v1459_v56 = vld [vmem:[%s3527_s3 + $0xd8] sm:$0xff] }
  0x35   :  { %2272 = vmatpush3.bf16.msra.mxu0 %v2271_v32  ;;  %v1431_v32 = vld [vmem:[%s3525_s1 + $0x288] sm:$0xff] }
  0x36   :  { %2273 = vmatprep.subr.bf16.mxu0 %v2575_v7  ;;  %v2948_v33 = vpack.c.bf16 %v1431_v32, %v1430_v30  ;;  %v1441_v30 = vld [vmem:[%s3525_s1 + $0x2d8] sm:$0xff]  ;;  %v1442_v32 = vld [vmem:[%s3525_s1 + $0x2e0] sm:$0xff] }
  0x37   :  { %2296 = vmatpush3.bf16.msra.mxu1 %v2295_v59  ;;  %v1429_v59 = vld [vmem:[%s3525_s1 + $0x278] sm:$0xff] }
  0x38   :  { %2297 = vmatprep.subr.bf16.mxu1 %v2575_v7  ;;  %v2334_v60 = vpack.c.bf16 %v1429_v59, %v1428_v58  ;;  %v1460_v58 = vld [vmem:[%s3527_s3 + $0xe0] sm:$0xff]  ;;  %v1461_v59 = vld [vmem:[%s3527_s3 + $0xe8] sm:$0xff] }
  0x39   :  { %2275 = vmatpush3.bf16.msra.mxu0 %v2274_v35  ;;  %v1421_v35 = vld [vmem:[%s3525_s1 + $0x238] sm:$0xff] }
  0x3a   :  { %2276 = vmatprep.subr.bf16.mxu0 %v2575_v7  ;;  %v2318_v36 = vpack.c.bf16 %v1421_v35, %v1420_v34  ;;  %v1444_v35 = vld [vmem:[%s3525_s1 + $0x2f0] sm:$0xff] }
  0x3b   :  { %2299 = vmatpush3.bf16.msra.mxu1 %v2298_v62  ;;  %v1413_v62 = vld [vmem:[%s3525_s1 + $0x1f8] sm:$0xff] }
  0x3c   :  { %2300 = vmatprep.subr.bf16.mxu1 %v2575_v7  ;;  %v2336_v63 = vpack.c.bf16 %v1413_v62, %v1412_v61 }
  0x3d   :  { %2278 = vmatpush3.bf16.msra.mxu0 %v2277_v38  ;;  %v1405_v38 = vld [vmem:[%s3525_s1 + $0x1b8] sm:$0xff] }
  0x3e   :  { %2279 = vmatprep.subr.bf16.mxu0 %v2575_v7  ;;  %v2320_v39 = vpack.c.bf16 %v1405_v38, %v1404_v37  ;;  %v425_v38 = vld [vmem:[%s3524_s0 + $0x40] sm:$0xff] }
  0x3f   :  { %2302 = vmatpush3.bf16.msra.mxu1 %v2301_v1  ;;  %v427_v1 = vmax.f32 %v421_v0, 0.0 }
  0x40   :  { %2303 = vmatprep.subr.bf16.mxu1 %v2575_v7 }
  0x41   :  { %2281 = vmatpush3.bf16.msra.mxu0 %v2280_v41  ;;  %v1423_v41 = vld [vmem:[%s3525_s1 + $0x248] sm:$0xff] }
  0x42   :  { %2307 = vmatprep.subr.bf16.mxu0 %v2306_v52  ;;  %v2322_v42 = vpack.c.bf16 %v1423_v41, %v1422_v40  ;;  %v1426_v52 = vld [vmem:[%s3525_s1 + $0x260] sm:$0xff]  ;;  %v1449_v41 = vld [vmem:[%s3527_s3 + $0x88] sm:$0xff] }
  0x43   :  { %2305 = vmatpush3.bf16.msra.mxu1 %v2304_v24  ;;  %v2330_v54 = vpack.c.bf16 %v1427_v53, %v1426_v52  ;;  %v1437_v24 = vld [vmem:[%s3525_s1 + $0x2b8] sm:$0xff]  ;;  %v1448_v40 = vld [vmem:[%s3527_s3 + $0x80] sm:$0xff]  ;;  %v1457_v53 = vld [vmem:[%s3527_s3 + $0xc8] sm:$0xff] }
  0x44   :  { %2339 = vmatprep.subr.bf16.mxu1 %v2948_v33  ;;  %v2350_v25 = vpack.c.bf16 %v1437_v24, %v1436_v23  ;;  %v2370_v43 = vpack.c.bf16 %v1449_v41, %v1448_v40  ;;  %v1456_v52 = vld [vmem:[%s3527_s3 + $0xc0] sm:$0xff]  ;;  %v1476_v23 = vld [vmem:[%s3529_s5 + $0xd0] sm:$0xff]  ;;  %v1477_v24 = vld [vmem:[%s3529_s5 + $0xd8] sm:$0xff] }
  0x45   :  { %v1500_v40 = vld [vmem:[%s3525_s1 + $0x380] sm:$0xff]  ;;  %v1501_v41 = vld [vmem:[%s3525_s1 + $0x388] sm:$0xff] }
  0xf7   :  { %v1603_v2 = vpop.f32.mrb[0].mxu0 }
  0xf8   :  { %v1604_v3 = vpop.f32.mrb[1].mxu0 }
  0xf9   :  { %v1605_v5 = vadd.f32 %v1604_v3, %v1603_v2  ;;  %v227_v6 = vpop.f32.mrb[0].mxu1  ;;  %v420_v2 = vld [vmem:[%s3524_s0 + $0x18] sm:$0xff] }
  0xfa   :  { %v1888_v9 = vpop.f32.mrb[1].mxu1  ;;  %v426_v3 = vmax.f32 %v420_v2, 0.0 }
  0xfb   :  { %v158_v10 = vadd.f32 %v1605_v5, %v1395_v4  ;;  %v424_v4 = vld [vmem:[%s3524_s0 + $0x38] sm:$0xff] }
  0xfc   :  { %v430_v5 = vmax.f32 %v424_v4, 0.0  ;;  %v1463_v4 = vld [vmem:[%s3527_s3 + $0xf8] sm:$0xff] }
  0xfd   :  { %v228_v15 = vadd.f32 %v227_v6, %v158_v10  ;;  %v423_v6 = vld [vmem:[%s3524_s0 + $0x30] sm:$0xff]  ;;  %v1396_v10 = vld [vmem:[%s3528_s4] ss:$0 sm:$0xff] }
  0xfe   :  { %v429_v9 = vmax.f32 %v423_v6, 0.0  ;;  %v1466_v6 = vld [vmem:[%s3529_s5 + $0x80] sm:$0xff] }
  0xff   :  { %v231_v17 = vmax.f32 %v228_v15, 0.0 }
 0x101   :  { %1922 = vmatmul.mubr.f32.vlgmr.msra.gmra.mrb[2].mxu0 %v231_v17  ;;  %v428_v17 = vmax.f32 %v422_v11, 0.0 }
 0x102   :  { %2309 = vmatpush3.bf16.msra.mxu0 %v2308_v16  ;;  %553 = vmatprep.mubr.f32.mxu0 %v427_v1 }
 0x103   :  { %2311 = vmatprep.subr.bf16.mxu0 %v2310_v18 }
 0x106   :  { %2313 = vmatpush3.bf16.msra.mxu0 %v2312_v21  ;;  %v1435_v21 = vld [vmem:[%s3525_s1 + $0x2a8] sm:$0xff] }
 0x107   :  { %2315 = vmatprep.subr.bf16.mxu0 %v2314_v27  ;;  %v2346_v22 = vpack.c.bf16 %v1435_v21, %v1434_v20  ;;  %v1439_v27 = vld [vmem:[%s3525_s1 + $0x2c8] sm:$0xff]  ;;  %v1474_v20 = vld [vmem:[%s3529_s5 + $0xc0] sm:$0xff] }
 0x108   :  { %v2354_v28 = vpack.c.bf16 %v1439_v27, %v1438_v26  ;;  %v1475_v21 = vld [vmem:[%s3529_s5 + $0xc8] sm:$0xff]  ;;  %v1478_v26 = vld [vmem:[%s3529_s5 + $0xe0] sm:$0xff] }
 0x109   :  { %v1479_v27 = vld [vmem:[%s3529_s5 + $0xe8] sm:$0xff] }
 0x10a   :  { %2317 = vmatpush3.bf16.msra.mxu0 %v2316_v31  ;;  %v2358_v31 = vpack.c.bf16 %v1441_v30, %v1440_v29 }
 0x10b   :  { %2319 = vmatprep.subr.bf16.mxu0 %v2318_v36  ;;  %v1445_v36 = vld [vmem:[%s3525_s1 + $0x2f8] sm:$0xff] }
 0x10c   :  { %v2366_v37 = vpack.c.bf16 %v1445_v36, %v1444_v35 }
 0x10e   :  { %2321 = vmatpush3.bf16.msra.mxu0 %v2320_v39  ;;  %v431_v39 = vmax.f32 %v425_v38, 0.0 }
 0x10f   :  { %2323 = vmatprep.subr.bf16.mxu0 %v2322_v42  ;;  %v1450_v42 = vld [vmem:[%s3527_s3 + $0x90] sm:$0xff] }
 0x112   :  { %2325 = vmatpush3.bf16.msra.mxu0 %v2324_v45  ;;  %v2374_v45 = vpack.c.bf16 %v1451_v44, %v1450_v42  ;;  %v2434_v42 = vpack.c.bf16 %v1501_v41, %v1500_v40  ;;  %v1485_v44 = vld [vmem:[%s3525_s1 + $0x308] sm:$0xff]  ;;  %v851_v40 = vld [vmem:[%s3524_s0 + $0x78] sm:$0xff] }
 0x113   :  { %2327 = vmatprep.subr.bf16.mxu0 %v2326_v48  ;;  %v2378_v48 = vpack.c.bf16 %v1453_v47, %v1452_v46  ;;  %v1480_v46 = vld [vmem:[%s3529_s5 + $0xf0] sm:$0xff]  ;;  %v1481_v47 = vld [vmem:[%s3529_s5 + $0xf8] sm:$0xff]  ;;  %v860_v41 = vmax.f32 %v851_v40, 0.0 }
 0x116   :  { %2329 = vmatpush3.bf16.msra.mxu0 %v2328_v51  ;;  %v2382_v51 = vpack.c.bf16 %v1455_v50, %v1454_v49  ;;  %v1502_v49 = vld [vmem:[%s3525_s1 + $0x390] sm:$0xff]  ;;  %v1503_v50 = vld [vmem:[%s3525_s1 + $0x398] sm:$0xff] }
 0x117   :  { %2331 = vmatprep.subr.bf16.mxu0 %v2330_v54  ;;  %v2386_v54 = vpack.c.bf16 %v1457_v53, %v1456_v52  ;;  %v1486_v52 = vld [vmem:[%s3525_s1 + $0x310] sm:$0xff]  ;;  %v1487_v53 = vld [vmem:[%s3525_s1 + $0x318] sm:$0xff] }
 0x11a   :  { %2333 = vmatpush3.bf16.msra.mxu0 %v2332_v57  ;;  %v2390_v57 = vpack.c.bf16 %v1459_v56, %v1458_v55  ;;  %v1504_v55 = vld [vmem:[%s3525_s1 + $0x3a0] sm:$0xff]  ;;  %v1505_v56 = vld [vmem:[%s3525_s1 + $0x3a8] sm:$0xff] }
 0x11b   :  { %2335 = vmatprep.subr.bf16.mxu0 %v2334_v60  ;;  %v2394_v60 = vpack.c.bf16 %v1461_v59, %v1460_v58  ;;  %v1488_v58 = vld [vmem:[%s3525_s1 + $0x320] sm:$0xff]  ;;  %v1489_v59 = vld [vmem:[%s3525_s1 + $0x328] sm:$0xff] }
 0x11e   :  { %2337 = vmatpush3.bf16.msra.mxu0 %v2336_v63 }
 0x11f   :  { %2371 = vmatprep.subr.bf16.mxu0 %v2370_v43 }
 0x121   :  { %554 = vmatmul.mubr.f32.vlgmr.msra.gmra.mrb[4].mxu0 %v426_v3  ;;  %v1462_v3 = vld [vmem:[%s3527_s3 + $0xf0] sm:$0xff] }
 0x122   :  { %558 = vmatprep.mubr.f32.mxu0 %v430_v5  ;;  %2373 = vmatpush3.bf16.msra.mxu0 %v2370_v43  ;;  %v2398_v5 = vpack.c.bf16 %v1463_v4, %v1462_v3  ;;  %v1484_v43 = vld [vmem:[%s3525_s1 + $0x300] sm:$0xff]  ;;  %v1509_v4 = vld [vmem:[%s3525_s1 + $0x3c8] sm:$0xff] }
 0x123   :  { %2375 = vmatprep.subr.bf16.mxu0 %v2374_v45  ;;  %v1508_v3 = vld [vmem:[%s3525_s1 + $0x3c0] sm:$0xff] }
 0x125   :  { %559 = vmatmul.mubr.f32.gmra.mrb[6].mxu0 %v429_v9  ;;  %v1467_v9 = vld [vmem:[%s3529_s5 + $0x88] sm:$0xff] }
 0x126   :  { %2377 = vmatpush3.bf16.msra.mxu0 %v2374_v45  ;;  %v2402_v11 = vpack.c.bf16 %v1467_v9, %v1466_v6  ;;  %v2436_v45 = vpack.c.bf16 %v1485_v44, %v1484_v43  ;;  %v1492_v6 = vld [vmem:[%s3525_s1 + $0x340] sm:$0xff]  ;;  %v1493_v9 = vld [vmem:[%s3525_s1 + $0x348] sm:$0xff] }
 0x127   :  { %2379 = vmatprep.subr.bf16.mxu0 %v2378_v48 }
 0x12a   :  { %2381 = vmatpush3.bf16.msra.mxu0 %v2378_v48  ;;  %v2430_v48 = vpack.c.bf16 %v1481_v47, %v1480_v46  ;;  %v1516_v46 = vld [vmem:[%s3525_s1 + $0x400] sm:$0xff]  ;;  %v1517_v47 = vld [vmem:[%s3525_s1 + $0x408] sm:$0xff] }
 0x12b   :  { %2383 = vmatprep.subr.bf16.mxu0 %v2382_v51 }
 0x12e   :  { %2385 = vmatpush3.bf16.msra.mxu0 %v2382_v51  ;;  %v2438_v51 = vpack.c.bf16 %v1503_v50, %v1502_v49  ;;  %v2467_v50 = vpack.c.bf16 %v1517_v47, %v1516_v46 }
 0x12f   :  { %2387 = vmatprep.subr.bf16.mxu0 %v2386_v54 }
 0x132   :  { %2389 = vmatpush3.bf16.msra.mxu0 %v2386_v54  ;;  %v2440_v54 = vpack.c.bf16 %v1487_v53, %v1486_v52  ;;  %v1518_v52 = vld [vmem:[%s3525_s1 + $0x410] sm:$0xff]  ;;  %v1519_v53 = vld [vmem:[%s3525_s1 + $0x418] sm:$0xff] }
 0x133   :  { %2391 = vmatprep.subr.bf16.mxu0 %v2390_v57 }
 0x136   :  { %2393 = vmatpush3.bf16.msra.mxu0 %v2390_v57  ;;  %v2442_v57 = vpack.c.bf16 %v1505_v56, %v1504_v55  ;;  %v1520_v55 = vld [vmem:[%s3525_s1 + $0x420] sm:$0xff]  ;;  %v1521_v56 = vld [vmem:[%s3525_s1 + $0x428] sm:$0xff] }
 0x137   :  { %2395 = vmatprep.subr.bf16.mxu0 %v2394_v60 }
 0x13a   :  { %2397 = vmatpush3.bf16.msra.mxu0 %v2394_v60  ;;  %v2444_v60 = vpack.c.bf16 %v1489_v59, %v1488_v58  ;;  %v1522_v58 = vld [vmem:[%s3525_s1 + $0x430] sm:$0xff]  ;;  %v1523_v59 = vld [vmem:[%s3525_s1 + $0x438] sm:$0xff] }
 0x13b   :  { %2399 = vmatprep.subr.bf16.mxu0 %v2398_v5 }
 0x13e   :  { %2401 = vmatpush3.bf16.msra.mxu0 %v2398_v5  ;;  %v2450_v5 = vpack.c.bf16 %v1509_v4, %v1508_v3  ;;  %v1528_v3 = vld [vmem:[%s3525_s1 + $0x460] sm:$0xff]  ;;  %v1529_v4 = vld [vmem:[%s3525_s1 + $0x468] sm:$0xff] }
 0x13f   :  { %2435 = vmatprep.subr.bf16.mxu0 %v2434_v42  ;;  %v1465_v42 = vld [vmem:[%s3528_s4 + $0x1] ss:$0 sm:$0xff] }
 0x1d4   :  { %v321_v12 = vpop.f32.mrb[2].mxu0 }
 0x1d5   :  { %v322_v15 = vadd.f32 %v1396_v10, %v321_v12  ;;  %v1923_v16 = vpop.f32.mrb[3].mxu0  ;;  %v1468_v10 = vld [vmem:[%s3529_s5 + $0x90] sm:$0xff]  ;;  %v1469_v12 = vld [vmem:[%s3529_s5 + $0x98] sm:$0xff] }
 0x1d6   :  { %v2406_v13 = vpack.c.bf16 %v1469_v12, %v1468_v10  ;;  %v2452_v10 = vpack.c.bf16 %v1493_v9, %v1492_v6  ;;  %v1511_v12 = vld [vmem:[%s3525_s1 + $0x3d8] sm:$0xff]  ;;  %v1530_v6 = vld [vmem:[%s3525_s1 + $0x470] sm:$0xff] }
 0x1d7   :  { %v325_v18 = vmax.f32 %v322_v15, 0.0  ;;  %v1471_v15 = vld [vmem:[%s3529_s5 + $0xa8] sm:$0xff]  ;;  %v1531_v9 = vld [vmem:[%s3525_s1 + $0x478] sm:$0xff] }
 0x1d8   :  { %v2410_v16 = vpack.c.bf16 %v1471_v15, %v1470_v14  ;;  %v1494_v14 = vld [vmem:[%s3525_s1 + $0x350] sm:$0xff]  ;;  %v1495_v15 = vld [vmem:[%s3525_s1 + $0x358] sm:$0xff] }
 0x1d9   :  { %1957 = vmatmul.mubr.f32.vlgmr.msra.gmra.mrb[2].mxu1 %v325_v18  ;;  %v1473_v18 = vld [vmem:[%s3529_s5 + $0xb8] sm:$0xff] }
 0x1da   :  { %2341 = vmatpush3.bf16.msra.mxu1 %v2948_v33  ;;  %1991 = vmatprep.mubr.f32.mxu1 %v428_v17  ;;  %v1443_v33 = vld [vmem:[%s3525_s1 + $0x2e8] sm:$0xff]  ;;  %v1472_v17 = vld [vmem:[%s3529_s5 + $0xb0] sm:$0xff] }
 0x1db   :  { %2343 = vmatprep.subr.bf16.mxu1 %v2342_v19  ;;  %v2362_v34 = vpack.c.bf16 %v1443_v33, %v1442_v32 }
 0x1de   :  { %2345 = vmatpush3.bf16.msra.mxu1 %v2342_v19  ;;  %v2414_v19 = vpack.c.bf16 %v1473_v18, %v1472_v17  ;;  %v1512_v17 = vld [vmem:[%s3525_s1 + $0x3e0] sm:$0xff]  ;;  %v1513_v18 = vld [vmem:[%s3525_s1 + $0x3e8] sm:$0xff] }
 0x1df   :  { %2347 = vmatprep.subr.bf16.mxu1 %v2346_v22 }
 0x1e2   :  { %2349 = vmatpush3.bf16.msra.mxu1 %v2346_v22  ;;  %v2418_v22 = vpack.c.bf16 %v1475_v21, %v1474_v20  ;;  %v1496_v20 = vld [vmem:[%s3525_s1 + $0x360] sm:$0xff]  ;;  %v1497_v21 = vld [vmem:[%s3525_s1 + $0x368] sm:$0xff] }
 0x1e3   :  { %2351 = vmatprep.subr.bf16.mxu1 %v2350_v25 }
 0x1e6   :  { %2353 = vmatpush3.bf16.msra.mxu1 %v2350_v25  ;;  %v2422_v25 = vpack.c.bf16 %v1477_v24, %v1476_v23  ;;  %v1514_v23 = vld [vmem:[%s3525_s1 + $0x3f0] sm:$0xff]  ;;  %v1515_v24 = vld [vmem:[%s3525_s1 + $0x3f8] sm:$0xff] }
 0x1e7   :  { %2355 = vmatprep.subr.bf16.mxu1 %v2354_v28 }
 0x1ea   :  { %2357 = vmatpush3.bf16.msra.mxu1 %v2354_v28  ;;  %v2426_v28 = vpack.c.bf16 %v1479_v27, %v1478_v26  ;;  %v1498_v26 = vld [vmem:[%s3525_s1 + $0x370] sm:$0xff]  ;;  %v1499_v27 = vld [vmem:[%s3525_s1 + $0x378] sm:$0xff] }
 0x1eb   :  { %2359 = vmatprep.subr.bf16.mxu1 %v2358_v31 }
 0x1ee   :  { %2361 = vmatpush3.bf16.msra.mxu1 %v2358_v31  ;;  %v1447_v31 = vld [vmem:[%s3526_s2 + $0x1] ss:$0 sm:$0xff] }
 0x1ef   :  { %2363 = vmatprep.subr.bf16.mxu1 %v2362_v34 }
 0x1f2   :  { %2365 = vmatpush3.bf16.msra.mxu1 %v2362_v34 }
 0x1f3   :  { %2367 = vmatprep.subr.bf16.mxu1 %v2366_v37 }
 0x1f4   :  { %v1689_v61 = vpop.f32.mrb[4].mxu0 }
 0x1f5   :  { %v1690_v62 = vpop.f32.mrb[5].mxu0 }
 0x1f6   :  { %2369 = vmatpush3.bf16.msra.mxu1 %v2366_v37  ;;  %v1691_v63 = vadd.f32 %v1690_v62, %v1689_v61  ;;  %v1506_v61 = vld [vmem:[%s3525_s1 + $0x3b0] sm:$0xff]  ;;  %v1507_v62 = vld [vmem:[%s3525_s1 + $0x3b8] sm:$0xff] }
 0x1f7   :  { %2403 = vmatprep.subr.bf16.mxu1 %v2402_v11 }
 0x1f8   :  { %v1692_v0 = vpop.f32.mrb[6].mxu0  ;;  %v556_v34 = vadd.f32 %v1691_v63, %v1447_v31  ;;  %v2446_v63 = vpack.c.bf16 %v1507_v62, %v1506_v61  ;;  %v1524_v61 = vld [vmem:[%s3525_s1 + $0x440] sm:$0xff]  ;;  %v1525_v62 = vld [vmem:[%s3525_s1 + $0x448] sm:$0xff] }
 0x1f9   :  { %1992 = vmatmul.mubr.f32.vlgmr.msra.gmra.mrb[4].mxu1 %v431_v39  ;;  %v1693_v1 = vpop.f32.mrb[7].mxu0 }
 0x1fa   :  { %v1694_v2 = vadd.f32 %v1693_v1, %v1692_v0  ;;  %2405 = vmatpush3.bf16.msra.mxu1 %v2402_v11  ;;  %v1490_v0 = vld [vmem:[%s3525_s1 + $0x330] sm:$0xff]  ;;  %v1491_v1 = vld [vmem:[%s3525_s1 + $0x338] sm:$0xff] }
 0x1fb   :  { %2407 = vmatprep.subr.bf16.mxu1 %v2406_v13  ;;  %v1510_v11 = vld [vmem:[%s3525_s1 + $0x3d0] sm:$0xff] }
 0x1fc   :  { %v561_v32 = vadd.f32 %v1694_v2, %v1447_v31  ;;  %v2448_v2 = vpack.c.bf16 %v1491_v1, %v1490_v0  ;;  %v1526_v0 = vld [vmem:[%s3525_s1 + $0x450] sm:$0xff]  ;;  %v1527_v1 = vld [vmem:[%s3525_s1 + $0x458] sm:$0xff] }
 0x1fe   :  { %2409 = vmatpush3.bf16.msra.mxu1 %v2406_v13  ;;  %v2454_v13 = vpack.c.bf16 %v1511_v12, %v1510_v11  ;;  %v847_v11 = vld [vmem:[%s3524_s0 + $0x58] sm:$0xff] }
 0x1ff   :  { %2411 = vmatprep.subr.bf16.mxu1 %v2410_v16  ;;  %v856_v12 = vmax.f32 %v847_v11, 0.0  ;;  %v1397_v11 = vld [vmem:[%s3530_s6] ss:$0 sm:$0xff] }
 0x202   :  { %2413 = vmatpush3.bf16.msra.mxu1 %v2410_v16  ;;  %v2456_v16 = vpack.c.bf16 %v1495_v15, %v1494_v14  ;;  %v853_v15 = vld [vmem:[%s3524_s0 + $0x88] sm:$0xff] }
 0x203   :  { %2415 = vmatprep.subr.bf16.mxu1 %v2414_v19 }
 0x206   :  { %2417 = vmatpush3.bf16.msra.mxu1 %v2414_v19  ;;  %v2458_v19 = vpack.c.bf16 %v1513_v18, %v1512_v17  ;;  %v1534_v17 = vld [vmem:[%s3527_s3 + $0x100] sm:$0xff]  ;;  %v1535_v18 = vld [vmem:[%s3527_s3 + $0x108] sm:$0xff] }
 0x207   :  { %2419 = vmatprep.subr.bf16.mxu1 %v2418_v22 }
 0x20a   :  { %2421 = vmatpush3.bf16.msra.mxu1 %v2418_v22  ;;  %v2460_v22 = vpack.c.bf16 %v1497_v21, %v1496_v20  ;;  %v1536_v20 = vld [vmem:[%s3527_s3 + $0x110] sm:$0xff]  ;;  %v1537_v21 = vld [vmem:[%s3527_s3 + $0x118] sm:$0xff] }
 0x20b   :  { %2423 = vmatprep.subr.bf16.mxu1 %v2422_v25 }
 0x20e   :  { %2425 = vmatpush3.bf16.msra.mxu1 %v2422_v25  ;;  %v2462_v25 = vpack.c.bf16 %v1515_v24, %v1514_v23  ;;  %v1538_v23 = vld [vmem:[%s3527_s3 + $0x120] sm:$0xff]  ;;  %v1539_v24 = vld [vmem:[%s3527_s3 + $0x128] sm:$0xff] }
 0x20f   :  { %2427 = vmatprep.subr.bf16.mxu1 %v2426_v28 }
 0x212   :  { %2429 = vmatpush3.bf16.msra.mxu1 %v2426_v28  ;;  %v2464_v28 = vpack.c.bf16 %v1499_v27, %v1498_v26  ;;  %v1540_v26 = vld [vmem:[%s3527_s3 + $0x130] sm:$0xff]  ;;  %v1541_v27 = vld [vmem:[%s3527_s3 + $0x138] sm:$0xff] }
 0x213   :  { %2431 = vmatprep.subr.bf16.mxu1 %v2430_v48 }
 0x216   :  { %2433 = vmatpush3.bf16.msra.mxu1 %v2430_v48 }
 0x217   :  { %2466 = vmatprep.subr.bf16.mxu1 %v2575_v7 }
 0x2ac   :  { %v3165_v29 = vpop.f32.mrb[2].mxu1 }
 0x2ad   :  { %v1958_v30 = vpop.f32.mrb[3].mxu1 }
 0x2ae   :  { %v846_v30 = vld [vmem:[%s3524_s0 + $0x50] sm:$0xff] }
 0x2af   :  { %v855_v31 = vmax.f32 %v846_v30, 0.0  ;;  %v1542_v30 = vld [vmem:[%s3527_s3 + $0x140] sm:$0xff] }
 0x2cc   :  { %v1993_v33 = vpop.f32.mrb[4].mxu1 }
 0x2cd   :  { %v636_v35 = vadd.f32 %v1993_v33, %v561_v32  ;;  %v630_v36 = vpop.f32.mrb[5].mxu1  ;;  %v845_v32 = vld [vmem:[%s3524_s0 + $0x48] sm:$0xff] }
 0x2ce   :  { %v631_v37 = vadd.f32 %v630_v36, %v556_v34  ;;  %v854_v33 = vmax.f32 %v845_v32, 0.0  ;;  %v849_v34 = vld [vmem:[%s3524_s0 + $0x68] sm:$0xff]  ;;  %v848_v36 = vld [vmem:[%s3524_s0 + $0x60] sm:$0xff] }
 0x2cf   :  { %v640_v39 = vmax.f32 %v636_v35, 0.0  ;;  %v858_v35 = vmax.f32 %v849_v34, 0.0  ;;  %v1545_v34 = vld [vmem:[%s3527_s3 + $0x158] sm:$0xff] }
 0x2d0   :  { %v639_v38 = vmax.f32 %v631_v37, 0.0  ;;  %v857_v37 = vmax.f32 %v848_v36, 0.0  ;;  %v1546_v36 = vld [vmem:[%s3527_s3 + $0x160] sm:$0xff] }
 0x2d2   :  { %2026 = vmatprep.mubr.f32.mxu0 %v639_v38  ;;  %v852_v38 = vld [vmem:[%s3524_s0 + $0x80] sm:$0xff] }
 0x2d3   :  { %2027 = vmatmul.mubr.f32.vlgmr.msra.gmra.mrb[8].mxu0 %v640_v39  ;;  %v861_v39 = vmax.f32 %v852_v38, 0.0 }
 0x2d4   :  { %2437 = vmatpush3.bf16.msra.mxu0 %v2436_v45  ;;  %984 = vmatprep.mubr.f32.mxu0 %v855_v31  ;;  %v1543_v31 = vld [vmem:[%s3527_s3 + $0x148] sm:$0xff] }
 0x2d5   :  { %2439 = vmatprep.subr.bf16.mxu0 %v2438_v51  ;;  %v2503_v32 = vpack.c.bf16 %v1543_v31, %v1542_v30 }
 0x2d8   :  { %2441 = vmatpush3.bf16.msra.mxu0 %v2440_v54  ;;  %v2470_v54 = vpack.c.bf16 %v1519_v53, %v1518_v52  ;;  %v1553_v52 = vld [vmem:[%s3529_s5 + $0x108] sm:$0xff]  ;;  %v1554_v53 = vld [vmem:[%s3529_s5 + $0x110] sm:$0xff] }
 0x2d9   :  { %2443 = vmatprep.subr.bf16.mxu0 %v2442_v57  ;;  %v2473_v57 = vpack.c.bf16 %v1521_v56, %v1520_v55  ;;  %v1555_v55 = vld [vmem:[%s3529_s5 + $0x118] sm:$0xff] }
 0x2da   :  { %v2518_v56 = vpack.c.bf16 %v1555_v55, %v1554_v53 }
 0x2dc   :  { %2445 = vmatpush3.bf16.msra.mxu0 %v2444_v60  ;;  %v2476_v60 = vpack.c.bf16 %v1523_v59, %v1522_v58  ;;  %v1557_v58 = vld [vmem:[%s3529_s5 + $0x128] sm:$0xff] }
 0x2dd   :  { %2447 = vmatprep.subr.bf16.mxu0 %v2446_v63  ;;  %v2479_v63 = vpack.c.bf16 %v1525_v62, %v1524_v61  ;;  %v1559_v61 = vld [vmem:[%s3529_s5 + $0x138] sm:$0xff] }
 0x2e0   :  { %2449 = vmatpush3.bf16.msra.mxu0 %v2448_v2  ;;  %v2482_v2 = vpack.c.bf16 %v1527_v1, %v1526_v0  ;;  %v1561_v0 = vld [vmem:[%s3529_s5 + $0x148] sm:$0xff] }
 0x2e1   :  { %2451 = vmatprep.subr.bf16.mxu0 %v2450_v5  ;;  %v2485_v5 = vpack.c.bf16 %v1529_v4, %v1528_v3  ;;  %v1563_v3 = vld [vmem:[%s3529_s5 + $0x158] sm:$0xff] }
 0x2e4   :  { %2453 = vmatpush3.bf16.msra.mxu0 %v2452_v10  ;;  %v2488_v10 = vpack.c.bf16 %v1531_v9, %v1530_v6  ;;  %v1565_v6 = vld [vmem:[%s3529_s5 + $0x168] sm:$0xff] }
 0x2e5   :  { %2455 = vmatprep.subr.bf16.mxu0 %v2454_v13  ;;  %v850_v13 = vld [vmem:[%s3524_s0 + $0x70] sm:$0xff] }
 0x2e6   :  { %v859_v14 = vmax.f32 %v850_v13, 0.0 }
 0x2e8   :  { %2457 = vmatpush3.bf16.msra.mxu0 %v2456_v16  ;;  %v862_v16 = vmax.f32 %v853_v15, 0.0  ;;  %v416_v15 = vadd.f32 %v1397_v11, %v3165_v29 }
 0x2e9   :  { %2459 = vmatprep.subr.bf16.mxu0 %v2458_v19  ;;  %v2491_v19 = vpack.c.bf16 %v1535_v18, %v1534_v17  ;;  %v1533_v18 = vld [vmem:[%s3526_s2 + $0x2] ss:$0 sm:$0xff] }
 0x2ec   :  { %2461 = vmatpush3.bf16.msra.mxu0 %v2460_v22  ;;  %v2494_v22 = vpack.c.bf16 %v1537_v21, %v1536_v20 }
 0x2ed   :  { %2463 = vmatprep.subr.bf16.mxu0 %v2462_v25  ;;  %v2497_v25 = vpack.c.bf16 %v1539_v24, %v1538_v23 }
 0x2f0   :  { %2465 = vmatpush3.bf16.msra.mxu0 %v2464_v28  ;;  %v2500_v28 = vpack.c.bf16 %v1541_v27, %v1540_v26 }
 0x2f1   :  { %2490 = vmatprep.subr.bf16.mxu0 %v2575_v7 }
 0x2f3   :  { %985 = vmatmul.mubr.f32.vlgmr.msra.gmra.mrb[10].mxu0 %v854_v33  ;;  %v1544_v33 = vld [vmem:[%s3527_s3 + $0x150] sm:$0xff] }
 0x2f4   :  { %989 = vmatprep.mubr.f32.mxu0 %v858_v35  ;;  %2492 = vmatpush3.bf16.msra.mxu0 %v2491_v19  ;;  %v2506_v35 = vpack.c.bf16 %v1545_v34, %v1544_v33  ;;  %v1566_v34 = vld [vmem:[%s3529_s5 + $0x170] sm:$0xff] }
 0x2f5   :  { %2493 = vmatprep.subr.bf16.mxu0 %v2575_v7 }
 0x2f7   :  { %990 = vmatmul.mubr.f32.gmra.mrb[12].mxu0 %v857_v37  ;;  %v1547_v37 = vld [vmem:[%s3527_s3 + $0x168] sm:$0xff] }
 0x2f8   :  { %994 = vmatprep.mubr.f32.mxu0 %v861_v39  ;;  %2495 = vmatpush3.bf16.msra.mxu0 %v2494_v22  ;;  %v2509_v38 = vpack.c.bf16 %v1547_v37, %v1546_v36  ;;  %v1551_v37 = vld [vmem:[%s3528_s4 + $0x2] ss:$0 sm:$0xff] }
 0x2f9   :  { %2496 = vmatprep.subr.bf16.mxu0 %v2575_v7 }
 0x2fb   :  { %995 = vmatmul.mubr.f32.gmra.mrb[14].mxu0 %v860_v41 }
 0x2fc   :  { %2137 = vmatprep.mubr.msk.f32.mxu0 %vm2576_vm0, %v2577_v8  ;;  %2498 = vmatpush3.bf16.msra.mxu0 %v2497_v25 }
 0x2fd   :  { %2499 = vmatprep.subr.bf16.mxu0 %v2575_v7 }
 0x300   :  { %2501 = vmatpush3.bf16.msra.mxu0 %v2500_v28 }
 0x301   :  { %2502 = vmatprep.subr.bf16.mxu0 %v2575_v7 }
 0x304   :  { %2504 = vmatpush3.bf16.msra.mxu0 %v2503_v32 }
 0x305   :  { %2505 = vmatprep.subr.bf16.mxu0 %v2575_v7 }
 0x308   :  { %2507 = vmatpush3.bf16.msra.mxu0 %v2506_v35  ;;  %v1567_v35 = vld [vmem:[%s3529_s5 + $0x178] sm:$0xff] }
 0x309   :  { %2508 = vmatprep.subr.bf16.mxu0 %v2575_v7  ;;  %v2536_v36 = vpack.c.bf16 %v1567_v35, %v1566_v34 }
 0x30c   :  { %2510 = vmatpush3.bf16.msra.mxu0 %v2509_v38 }
 0x30d   :  { %2511 = vmatprep.subr.bf16.mxu0 %v2575_v7 }
 0x3a6   :  { %v2028_v43 = vpop.f32.mrb[8].mxu0 }
 0x3a7   :  { %v738_v44 = vadd.f32 %v2028_v43, %v1465_v42  ;;  %v732_v45 = vpop.f32.mrb[9].mxu0  ;;  %v1548_v43 = vld [vmem:[%s3527_s3 + $0x170] sm:$0xff] }
 0x3a8   :  { %v733_v48 = vadd.f32 %v1465_v42, %v732_v45 }
 0x3a9   :  { %v742_v51 = vmax.f32 %v738_v44, 0.0  ;;  %v1549_v44 = vld [vmem:[%s3527_s3 + $0x178] sm:$0xff] }
 0x3aa   :  { %v741_v49 = vmax.f32 %v733_v48, 0.0  ;;  %v2512_v46 = vpack.c.bf16 %v1549_v44, %v1548_v43 }
 0x3ac   :  { %2061 = vmatprep.mubr.f32.mxu1 %v741_v49  ;;  %2513 = vmatpush3.bf16.msra.mxu0 %v2512_v46 }
 0x3ad   :  { %2062 = vmatmul.mubr.f32.vlgmr.msra.gmra.mrb[6].mxu1 %v742_v51  ;;  %2538 = vmatprep.subr.bf16.mxu0 %v2575_v7  ;;  %v1552_v51 = vld [vmem:[%s3529_s5 + $0x100] sm:$0xff] }
 0x3ae   :  { %2468 = vmatpush3.bf16.msra.mxu1 %v2467_v50  ;;  %2096 = vmatprep.mubr.msk.f32.mxu1 %vm2576_vm0, %v2577_v8 }
 0x3af   :  { %2469 = vmatprep.subr.bf16.mxu1 %v2575_v7 }
 0x3b2   :  { %2471 = vmatpush3.bf16.msra.mxu1 %v2470_v54  ;;  %v2515_v54 = vpack.c.bf16 %v1553_v52, %v1552_v51 }
 0x3b3   :  { %2472 = vmatprep.subr.bf16.mxu1 %v2575_v7 }
 0x3b6   :  { %2474 = vmatpush3.bf16.msra.mxu1 %v2473_v57  ;;  %v1556_v57 = vld [vmem:[%s3529_s5 + $0x120] sm:$0xff] }
 0x3b7   :  { %2475 = vmatprep.subr.bf16.mxu1 %v2575_v7  ;;  %v2521_v59 = vpack.c.bf16 %v1557_v58, %v1556_v57 }
 0x3ba   :  { %2477 = vmatpush3.bf16.msra.mxu1 %v2476_v60  ;;  %v1558_v60 = vld [vmem:[%s3529_s5 + $0x130] sm:$0xff] }
 0x3bb   :  { %2478 = vmatprep.subr.bf16.mxu1 %v2575_v7  ;;  %v2524_v62 = vpack.c.bf16 %v1559_v61, %v1558_v60  ;;  %v1299_v61 = vld [vmem:[%s3531_s7] sm:$0xff] }
 0x3be   :  { %2480 = vmatpush3.bf16.msra.mxu1 %v2479_v63  ;;  %v1560_v63 = vld [vmem:[%s3529_s5 + $0x140] sm:$0xff] }
 0x3bf   :  { %2481 = vmatprep.subr.bf16.mxu1 %v2575_v7  ;;  %v2527_v1 = vpack.c.bf16 %v1561_v0, %v1560_v63 }
 0x3c2   :  { %2483 = vmatpush3.bf16.msra.mxu1 %v2482_v2  ;;  %v1562_v2 = vld [vmem:[%s3529_s5 + $0x150] sm:$0xff] }
 0x3c3   :  { %2484 = vmatprep.subr.bf16.mxu1 %v2575_v7  ;;  %v2530_v4 = vpack.c.bf16 %v1563_v3, %v1562_v2 }
 0x3c6   :  { %2486 = vmatpush3.bf16.msra.mxu1 %v2485_v5  ;;  %v1781_v39 = vpop.f32.mrb[10].mxu0  ;;  %v1564_v5 = vld [vmem:[%s3529_s5 + $0x160] sm:$0xff] }
 0x3c7   :  { %2487 = vmatprep.subr.bf16.mxu1 %v2575_v7  ;;  %v1782_v40 = vpop.f32.mrb[11].mxu0  ;;  %v2533_v9 = vpack.c.bf16 %v1565_v6, %v1564_v5 }
 0x3c8   :  { %v1783_v41 = vadd.f32 %v1782_v40, %v1781_v39 }
 0x3ca   :  { %2489 = vmatpush3.bf16.msra.mxu1 %v2488_v10  ;;  %v1784_v42 = vpop.f32.mrb[12].mxu0  ;;  %v1483_v10 = vld [vmem:[%s3530_s6 + $0x1] ss:$0 sm:$0xff]  ;;  %v987_v19 = vadd.f32 %v1783_v41, %v1533_v18 }
 0x3cb   :  { %2514 = vmatprep.subr.bf16.mxu1 %v2575_v7  ;;  %v1785_v45 = vpop.f32.mrb[13].mxu0 }
 0x3cc   :  { %v1786_v47 = vadd.f32 %v1785_v45, %v1784_v42 }
 0x3cd   :  { %2097 = vmatmul.mubr.f32.vlgmr.msra.gmra.mrb[8].mxu1 %v856_v12 }
 0x3ce   :  { %2099 = vmatprep.mubr.msk.f32.mxu1 %vm2576_vm0, %v2577_v8  ;;  %v1787_v48 = vpop.f32.mrb[14].mxu0  ;;  %2516 = vmatpush3.bf16.msra.mxu1 %v2515_v54  ;;  %v992_v23 = vadd.f32 %v1786_v47, %v1533_v18 }
 0x3cf   :  { %v1788_v49 = vpop.f32.mrb[15].mxu0  ;;  %2517 = vmatprep.subr.bf16.mxu1 %v2575_v7 }
 0x3d0   :  { %v1789_v50 = vadd.f32 %v1788_v49, %v1787_v48 }
 0x3d1   :  { %2100 = vmatmul.mubr.f32.gmra.mrb[10].mxu1 %v859_v14 }
 0x3d2   :  { %2102 = vmatprep.mubr.msk.f32.mxu1 %vm2576_vm0, %v2577_v8  ;;  %2519 = vmatpush3.bf16.msra.mxu1 %v2518_v56  ;;  %v997_v28 = vadd.f32 %v1789_v50, %v1533_v18  ;;  %v1569_v50 = vld [vmem:[%s3530_s6 + $0x2] ss:$0 sm:$0xff]  ;;  %s2578_s6 = smov [#allocation3]  }
 0x3d3   :  { %2520 = vmatprep.subr.bf16.mxu1 %v2575_v7  ;;  %s1387_s23 = sshll.u32 %s2578_s6, 4  ;;  %s1388_s23 = int_to_ptr.vmem [resolvable:$true] %s1387_s23 }
 0x3d4   :  { %s2551_s24 = scalar_lea.vmem %s1388_s23, 128  ;;  %p2556_p1 = scmp.lt.s32.totalorder %s1388_s23, %s1388_s23 }
 0x3d5   :  { %2103 = vmatmul.mubr.f32.gmra.mrb[12].mxu1 %v862_v16  ;;  %p2552_p0 = scmp.ne.s32.totalorder %s1388_s23, %s2551_s24  ;;  %p2557_p2 = scmp.lt.s32.totalorder %s2551_s24, %s2551_s24 }
 0x3d6   :  { %2178 = vmatprep.mubr.msk.f32.mxu1 %vm2576_vm0, %v2577_v8  ;;  %2522 = vmatpush3.bf16.msra.mxu1 %v2521_v59 }
 0x3d7   :  { %2523 = vmatprep.subr.bf16.mxu1 %v2575_v7  ;;  %p2558_p3 = por %p2557_p2, %p2556_p1 }
 0x3d9   :  { %p2559_p4 = pnand %p2558_p3, %p2552_p0 }
 0x3da   :  { %2525 = vmatpush3.bf16.msra.mxu1 %v2524_v62 }
 0x3db   :  { %2526 = vmatprep.subr.bf16.mxu1 %v2575_v7 }
 0x3de   :  { %2528 = vmatpush3.bf16.msra.mxu1 %v2527_v1 }
 0x3df   :  { %2529 = vmatprep.subr.bf16.mxu1 %v2575_v7 }
 0x3e2   :  { %2531 = vmatpush3.bf16.msra.mxu1 %v2530_v4 }
 0x3e3   :  { %2532 = vmatprep.subr.bf16.mxu1 %v2575_v7 }
 0x3e6   :  { %2534 = vmatpush3.bf16.msra.mxu1 %v2533_v9 }
 0x3e7   :  { %2535 = vmatprep.subr.bf16.mxu1 %v2575_v7 }
 0x3ea   :  { %2537 = vmatpush3.bf16.msra.mxu1 %v2536_v36 }
 0x480   :  { %v2063_v12 = vpop.f32.mrb[6].mxu1 }
 0x481   :  { %v840_v13 = vadd.f32 %v2063_v12, %v1483_v10  ;;  %v834_v14 = vpop.f32.mrb[7].mxu1 }
 0x482   :  { %v835_v16 = vadd.f32 %v1483_v10, %v834_v14 }
 0x484   :  { %v2539_v17 = vpack.c.bf16 %v835_v16, %v416_v15 }
 0x4a0   :  { %v1066_v20 = vpop.f32.mrb[8].mxu1 }
 0x4a1   :  { %v1067_v21 = vadd.f32 %v1066_v20, %v987_v19  ;;  %v2098_v22 = vpop.f32.mrb[9].mxu1 }
 0x4a3   :  { %v1080_v24 = vmax.f32 %v1067_v21, 0.0 }
 0x4a4   :  { %v1071_v25 = vpop.f32.mrb[10].mxu1 }
 0x4a5   :  { %v1072_v26 = vadd.f32 %v1071_v25, %v992_v23  ;;  %v2101_v27 = vpop.f32.mrb[11].mxu1  ;;  %2138 = vmatmul.mubr.f32.vlgmr.msra.gmra.mrb[16].mxu0 %v1080_v24 }
 0x4a6   :  { %2540 = vmatpush3.bf16.msra.mxu0 %v2539_v17  ;;  %2140 = vmatprep.mubr.msk.f32.mxu0 %vm2576_vm0, %v2577_v8 }
 0x4a7   :  { %v1081_v29 = vmax.f32 %v1072_v26, 0.0  ;;  %2541 = vmatprep.subr.bf16.mxu0 %v2575_v7 }
 0x4a8   :  { %v1076_v30 = vpop.f32.mrb[12].mxu1 }
 0x4a9   :  { %v1077_v31 = vadd.f32 %v1076_v30, %v997_v28  ;;  %v2104_v32 = vpop.f32.mrb[13].mxu1  ;;  %2141 = vmatmul.mubr.f32.gmra.mrb[18].mxu0 %v1081_v29 }
 0x4aa   :  { %2143 = vmatprep.mubr.msk.f32.mxu0 %vm2576_vm0, %v2577_v8 }
 0x4ab   :  { %v1082_v33 = vmax.f32 %v1077_v31, 0.0 }
 0x4ad   :  { %2144 = vmatmul.mubr.f32.gmra.mrb[20].mxu0 %v1082_v33 }
 0x4ae   :  { %2199 = vmatprep.mubr.msk.f32.mxu0 %vm2576_vm0, %v2577_v8 }
 0x578   :  { %v1174_v38 = vpop.f32.mrb[16].mxu0 }
 0x579   :  { %v1175_v39 = vadd.f32 %v1551_v37, %v1174_v38  ;;  %v2139_v40 = vpop.f32.mrb[17].mxu0 }
 0x57b   :  { %v1188_v41 = vmax.f32 %v1175_v39, 0.0 }
 0x57c   :  { %v1179_v42 = vpop.f32.mrb[18].mxu0 }
 0x57d   :  { %v1180_v43 = vadd.f32 %v1551_v37, %v1179_v42  ;;  %v2142_v44 = vpop.f32.mrb[19].mxu0  ;;  %2179 = vmatmul.mubr.f32.vlgmr.msra.gmra.mrb[14].mxu1 %v1188_v41 }
 0x57e   :  { %2181 = vmatprep.mubr.msk.f32.mxu1 %vm2576_vm0, %v2577_v8 }
 0x57f   :  { %v1189_v45 = vmax.f32 %v1180_v43, 0.0 }
 0x580   :  { %v1184_v46 = vpop.f32.mrb[20].mxu0 }
 0x581   :  { %v1185_v47 = vadd.f32 %v1551_v37, %v1184_v46  ;;  %v2145_v48 = vpop.f32.mrb[21].mxu0  ;;  %2182 = vmatmul.mubr.f32.gmra.mrb[16].mxu1 %v1189_v45 }
 0x582   :  { %2184 = vmatprep.mubr.msk.f32.mxu1 %vm2576_vm0, %v2577_v8 }
 0x583   :  { %v1190_v49 = vmax.f32 %v1185_v47, 0.0 }
 0x585   :  { %2185 = vmatmul.mubr.f32.gmra.mrb[18].mxu1 %v1190_v49 }
 0x650   :  { %v1282_v51 = vpop.f32.mrb[14].mxu1 }
 0x651   :  { %v1283_v52 = vadd.f32 %v1569_v50, %v1282_v51  ;;  %v2180_v53 = vpop.f32.mrb[15].mxu1 }
 0x653   :  { %v2542_v54 = vpack.c.bf16 %v1283_v52, %v840_v13 }
 0x654   :  { %v1287_v55 = vpop.f32.mrb[16].mxu1 }
 0x655   :  { %v2183_v56 = vpop.f32.mrb[17].mxu1  ;;  %2543 = vmatpush3.bf16.msra.mxu0 %v2542_v54  ;;  %v1288_v58 = vadd.f32 %v1569_v50, %v1287_v55 }
 0x656   :  { %2544 = vmatprep.subr.bf16.mxu0 %v2575_v7 }
 0x658   :  { %v1292_v57 = vpop.f32.mrb[18].mxu1 }
 0x659   :  { %v1293_v59 = vadd.f32 %v1569_v50, %v1292_v57  ;;  %v2186_v60 = vpop.f32.mrb[19].mxu1 }
 0x65b   :  { %v2545_v8 = vpack.c.bf16 %v1293_v59, %v1288_v58 }
 0x65d   :  { %2546 = vmatpush3.bf16.msra.mxu0 %v2545_v8 }
 0x660   :  { %2200 = vmatmul.mubr.msk.f32.vlgmr.msra.gmra.mrb[22].mxu0 %vm1306_vm1, %v1299_v61 }
 0x733   :  { %v1376_v62 = vpop.f32.mrb[22].mxu0 }
 0x734   :  { %1380 = vst [vmem:[#allocation3] sm:$0xff] %v1376_v62  ;;  %v2201_v63 = vpop.f32.mrb[23].mxu0 }
 0x735   :  { %2562 = shalt.err (!%p2559_p4)
}
 0x736   :  { %s2563_s27 = scalar_lea.hbm %s3532_s8, 128 }
 0x737   :  { %p2564_p5 = scmp.ne.s32.totalorder %s3532_s8, %s2563_s27  ;;  %p2567_p6 = scmp.lt.u32.totalorder %s2563_s27, %s3532_s8 }
 0x739   :  { %p2569_p7 = pnand %p2567_p6, %p2564_p5 }
 0x73b   :  { %2572 = shalt.err (!%p2569_p7)
}
 0x73c   :  { %1390 = dma.vmem_to_hbm [thread:$0]  %s1388_s23, 128, %s3532_s8, [#allocation4]  }
 0x73d   :  { %2573 = dma.done.wait [#allocation4], 128  }
 0x73e   :  { %2574 = vsyncadd [#allocation4], 4294967168 }
 0x73f   :  { %1394 = vsyncpa [#allocation4], 1 }

</bundles_post_ra>
